<compile_context>
chip_gen: v5e
topology: v5e:2x2
jax: 0.10.0
libtpu: 0.0.40
codegen_flags: <defaults>
</compile_context>

<pallas_src>
import math
import functools
import numpy as np

import jax
import jax.numpy as jnp
from jax import lax
from jax.experimental import pallas as pl
from jax.experimental.pallas import tpu as pltpu

# ----------------------------- small config ---------------------------------
IMAGE = 16          # image_size
PATCH = 4           # patch_size
CHANNELS = 3        # num_channels
D = 48              # hidden_size / emb_dim
HEADS = 3           # encoder heads
ENC_LAYERS = 2      # encoder layers
INTER = 96          # intermediate_size
D_DEC = 48          # decoder_hidden_size
DEC_HEADS = 3
DEC_LAYERS = 1
DEC_INTER = 96
MASK_RATIO = 0.75
LN_EPS = 1e-12      # ViTMAEConfig.layer_norm_eps default
BATCH = 2

GRID = IMAGE // PATCH
NUM_PATCHES = GRID * GRID
PATCH_DIM = CHANNELS * PATCH * PATCH


# -------------------- in-kernel helpers (run on VMEM-resident values) -------
def _layernorm(x, g, b):
    mean = jnp.mean(x, axis=-1, keepdims=True)
    xc = x - mean
    var = jnp.mean(xc * xc, axis=-1, keepdims=True)
    return xc * lax.rsqrt(var + LN_EPS) * g + b


_SQRT1_2 = 1.0 / math.sqrt(2.0)


def _erf(x):
    # TODO(synk): lax.erf is avoided inside the kernel (Mosaic lowering not assumed);
    # Abramowitz&Stegun 7.1.26 polynomial, |abs err| < 1.5e-7 (exact to f32 for GELU).
    a1, a2, a3, a4, a5 = 0.254829592, -0.284496736, 1.421413741, -1.453152027, 1.061405429
    p = 0.3275911
    sgn = jnp.where(x >= 0.0, 1.0, -1.0)
    ax = jnp.abs(x)
    t = 1.0 / (1.0 + p * ax)
    poly = ((((a5 * t + a4) * t + a3) * t + a2) * t + a1) * t
    return sgn * (1.0 - poly * jnp.exp(-ax * ax))


def _gelu(x):
    # exact (erf-based) GELU, matching torch nn.GELU() used by HF ViT
    return 0.5 * x * (1.0 + _erf(x * _SQRT1_2))


def _full_spec(shape):
    # whole-array VMEM block for grid=(1,)
    return pl.BlockSpec(shape, lambda i: (0,) * len(shape))


def _vit_layer_body(xb, l, qkv_scr, num_heads, layer_refs):
    """One fused pre-LN ViT layer on a VMEM-resident value xb:(S, D).

    layer_refs holds per-layer-stacked weight refs (leading axis = layer index):
      ln1_g/ln1_b : (L, 1, D)     qkv_w : (L, D, 3D)    qkv_b : (L, 1, 3D)
      o_w         : (L*H, dh, D)  o_b   : (L, 1, D)
      ln2_g/ln2_b : (L, 1, D)     fc1_w : (L, D, I)     fc1_b : (L, 1, I)
      fc2_w       : (L, I, D)     fc2_b : (L, 1, D)
    """
    (ln1g, ln1b, qkvw, qkvb, owh, ob, ln2g, ln2b, f1w, f1b, f2w, f2b) = layer_refs
    S, Dm = xb.shape
    dh = Dm // num_heads
    scale = 1.0 / math.sqrt(dh)

    # ---- attention block -----------------------------------------------------
    qkv_scr[...] = (jnp.dot(_layernorm(xb, ln1g[l], ln1b[l]), qkvw[l],
                            preferred_element_type=jnp.float32) + qkvb[l])   # (S, 3D)
    attn = None
    for h in range(num_heads):
        q = qkv_scr[:, pl.ds(h * dh, dh)]                 # (S, dh)
        k = qkv_scr[:, pl.ds(Dm + h * dh, dh)]
        v = qkv_scr[:, pl.ds(2 * Dm + h * dh, dh)]
        s = jnp.dot(q, k.T, preferred_element_type=jnp.float32) * scale      # (S, S)
        s = s - jnp.max(s, axis=-1, keepdims=True)
        e = jnp.exp(s)
        p = e / jnp.sum(e, axis=-1, keepdims=True)
        ctx = jnp.dot(p, v, preferred_element_type=jnp.float32)              # (S, dh)
        # per-head slice of the output projection (o_w flat: (L*H, dh, D)) avoids a
        # lane-concat; summing the per-head GEMMs == ctx_concat @ W_o.
        part = jnp.dot(ctx, owh[l * num_heads + h], preferred_element_type=jnp.float32)
        attn = part if attn is None else attn + part
    x1 = xb + attn + ob[l]

    # ---- MLP block -----------------------------------------------------------
    hmid = jnp.dot(_layernorm(x1, ln2g[l], ln2b[l]), f1w[l],
                   preferred_element_type=jnp.float32) + f1b[l]
    hmid = _gelu(hmid)
    return x1 + jnp.dot(hmid, f2w[l], preferred_element_type=jnp.float32) + f2b[l]


# ----------------------------- Pallas kernels -------------------------------
def _patch_embed_kernel(p_ref, w_ref, b_ref, pos_ref, o_ref):
    # p:(B,L,PD)  w:(PD,D)  b:(1,D)  pos:(L,D)  o:(B,L,D)
    B = p_ref.shape[0]
    w = w_ref[...]
    b = b_ref[...]
    pos = pos_ref[...]
    for bi in range(B):
        o_ref[bi] = jnp.dot(p_ref[bi], w, preferred_element_type=jnp.float32) + b + pos


def pallas_patch_embed(patches, w, b, pos):
    B, L, PD = patches.shape
    Dm = w.shape[1]
    return pl.pallas_call(
        _patch_embed_kernel,
        out_shape=jax.ShapeDtypeStruct((B, L, Dm), jnp.float32),
        grid=(1,),
        in_specs=[_full_spec((B, L, PD)), _full_spec((PD, Dm)),
                  _full_spec((1, Dm)), _full_spec((L, Dm))],
        out_specs=_full_spec((B, L, Dm)),
    )(patches, w, b.reshape(1, Dm), pos)


def _encoder_kernel(x_ref, ln1g, ln1b, qkvw, qkvb, owh, ob, ln2g, ln2b,
                    f1w, f1b, f2w, f2b, eng, enb, dew, deb,
                    feat_ref, y_ref, qkv_scr, *, num_layers, num_heads):
    # ALL encoder layers + final encoder LayerNorm + decoder_embed GEMM.
    B = x_ref.shape[0]
    layer_refs = (ln1g, ln1b, qkvw, qkvb, owh, ob, ln2g, ln2b, f1w, f1b, f2w, f2b)
    eg = eng[...]; eb = enb[...]
    dw = dew[...]; db = deb[...]
    for bi in range(B):                 # B tiny & static -> fully unrolled
        xb = x_ref[bi]                  # (S, D)
        for l in range(num_layers):
            xb = _vit_layer_body(xb, l, qkv_scr, num_heads, layer_refs)
        feat_ref[bi] = xb               # hidden_states[-1] (pre final LayerNorm)
        y_ref[bi] = jnp.dot(_layernorm(xb, eg, eb), dw,
                            preferred_element_type=jnp.float32) + db


def pallas_encoder(x, enc, enc_g, enc_b, dec_w, dec_b, num_layers, num_heads):
    B, S, Dm = x.shape
    inter = enc["fc1_w"].shape[2]
    Ddec = dec_w.shape[1]
    dh = Dm // num_heads
    kern = functools.partial(_encoder_kernel, num_layers=num_layers, num_heads=num_heads)
    feat, y = pl.pallas_call(
        kern,
        out_shape=(jax.ShapeDtypeStruct((B, S, Dm), jnp.float32),
                   jax.ShapeDtypeStruct((B, S, Ddec), jnp.float32)),
        grid=(1,),
        in_specs=[
            _full_spec((B, S, Dm)),
            _full_spec((num_layers, 1, Dm)), _full_spec((num_layers, 1, Dm)),          # ln1
            _full_spec((num_layers, Dm, 3 * Dm)), _full_spec((num_layers, 1, 3 * Dm)),  # qkv
            _full_spec((num_layers * num_heads, dh, Dm)), _full_spec((num_layers, 1, Dm)),  # out-proj
            _full_spec((num_layers, 1, Dm)), _full_spec((num_layers, 1, Dm)),          # ln2
            _full_spec((num_layers, Dm, inter)), _full_spec((num_layers, 1, inter)),   # fc1
            _full_spec((num_layers, inter, Dm)), _full_spec((num_layers, 1, Dm)),      # fc2
            _full_spec((1, Dm)), _full_spec((1, Dm)),                                  # enc final LN
            _full_spec((Dm, Ddec)), _full_spec((1, Ddec)),                             # decoder_embed
        ],
        out_specs=[_full_spec((B, S, Dm)), _full_spec((B, S, Ddec))],
        scratch_shapes=[pltpu.VMEM((S, 3 * Dm), jnp.float32)],
    )(
        x,
        enc["ln1_g"], enc["ln1_b"], enc["qkv_w"], enc["qkv_b"], enc["o_w"], enc["o_b"],
        enc["ln2_g"], enc["ln2_b"], enc["fc1_w"], enc["fc1_b"], enc["fc2_w"], enc["fc2_b"],
        enc_g.reshape(1, Dm), enc_b.reshape(1, Dm), dec_w, dec_b.reshape(1, Ddec),
    )
    return feat, y


def _decoder_kernel(y_ref, ln1g, ln1b, qkvw, qkvb, owh, ob, ln2g, ln2b,
                    f1w, f1b, f2w, f2b, dng, dnb, dpw, dpb, tgt_ref, m_ref,
                    o_ref, qkv_scr, *, num_layers, num_heads):
    # ALL decoder layers + decoder_norm + decoder_pred + masked MSE.
    # tgt has a zero CLS row prepended and mask has 0 at the CLS slot, so the CLS
    # prediction contributes nothing and the denominator is unchanged.
    B = y_ref.shape[0]
    P = dpw.shape[1]
    layer_refs = (ln1g, ln1b, qkvw, qkvb, owh, ob, ln2g, ln2b, f1w, f1b, f2w, f2b)
    g = dng[...]; bb = dnb[...]
    w = dpw[...]; wb = dpb[...]
    num = jnp.zeros((), jnp.float32)
    den = jnp.zeros((), jnp.float32)
    for bi in range(B):
        yb = y_ref[bi]                   # (Sd, Ddec)
        for l in range(num_layers):
            yb = _vit_layer_body(yb, l, qkv_scr, num_heads, layer_refs)
        pred = jnp.dot(_layernorm(yb, g, bb), w,
                       preferred_element_type=jnp.float32) + wb              # (Sd, P)
        d = pred - tgt_ref[bi]
        per = jnp.sum(d * d, axis=-1, keepdims=True) * (1.0 / P)             # (Sd, 1)
        m = m_ref[bi]                                                        # (Sd, 1)
        num = num + jnp.sum(per * m)
        den = den + jnp.sum(m)
    o_ref[...] = (num / den) * jnp.ones((1, 1), jnp.float32)


def pallas_decoder(y, dec, dn_g, dn_b, dp_w, dp_b, target_full, mask_full,
                   num_layers, num_heads):
    B, Sd, Dd = y.shape
    inter = dec["fc1_w"].shape[2]
    P = dp_w.shape[1]
    dh = Dd // num_heads
    kern = functools.partial(_decoder_kernel, num_layers=num_layers, num_heads=num_heads)
    out = pl.pallas_call(
        kern,
        out_shape=jax.ShapeDtypeStruct((1, 1), jnp.float32),
        grid=(1,),
        in_specs=[
            _full_spec((B, Sd, Dd)),
            _full_spec((num_layers, 1, Dd)), _full_spec((num_layers, 1, Dd)),          # ln1
            _full_spec((num_layers, Dd, 3 * Dd)), _full_spec((num_layers, 1, 3 * Dd)),  # qkv
            _full_spec((num_layers * num_heads, dh, Dd)), _full_spec((num_layers, 1, Dd)),  # out-proj
            _full_spec((num_layers, 1, Dd)), _full_spec((num_layers, 1, Dd)),          # ln2
            _full_spec((num_layers, Dd, inter)), _full_spec((num_layers, 1, inter)),   # fc1
            _full_spec((num_layers, inter, Dd)), _full_spec((num_layers, 1, Dd)),      # fc2
            _full_spec((1, Dd)), _full_spec((1, Dd)),                                  # decoder_norm
            _full_spec((Dd, P)), _full_spec((1, P)),                                   # decoder_pred
            _full_spec((B, Sd, P)), _full_spec((B, Sd, 1)),                            # target, mask
        ],
        out_specs=_full_spec((1, 1)),
        scratch_shapes=[pltpu.VMEM((Sd, 3 * Dd), jnp.float32)],
    )(
        y,
        dec["ln1_g"], dec["ln1_b"], dec["qkv_w"], dec["qkv_b"], dec["o_w"], dec["o_b"],
        dec["ln2_g"], dec["ln2_b"], dec["fc1_w"], dec["fc1_b"], dec["fc2_w"], dec["fc2_b"],
        dn_g.reshape(1, Dd), dn_b.reshape(1, Dd), dp_w, dp_b.reshape(1, P),
        target_full, mask_full,
    )
    return out[0, 0]


# -------------------- fixed 2-D sin/cos position embeddings -----------------
def _get_1d_sincos(embed_dim, pos):
    omega = np.arange(embed_dim // 2, dtype=np.float64)
    omega /= embed_dim / 2.0
    omega = 1.0 / 10000 ** omega
    out = np.einsum("m,d->md", pos.reshape(-1).astype(np.float64), omega)
    return np.concatenate([np.sin(out), np.cos(out)], axis=1)


def get_2d_sincos_pos_embed(embed_dim, grid_size, add_cls_token=True):
    grid_h = np.arange(grid_size, dtype=np.float32)
    grid_w = np.arange(grid_size, dtype=np.float32)
    grid = np.meshgrid(grid_w, grid_h)
    grid = np.stack(grid, axis=0).reshape([2, 1, grid_size, grid_size])
    emb_h = _get_1d_sincos(embed_dim // 2, grid[0])
    emb_w = _get_1d_sincos(embed_dim // 2, grid[1])
    pos = np.concatenate([emb_h, emb_w], axis=1)
    if add_cls_token:
        pos = np.concatenate([np.zeros([1, embed_dim]), pos], axis=0)
    return jnp.asarray(pos[None, ...], dtype=jnp.float32)


# ----------------------------- parameters -----------------------------------
def init_params(key):
    keys = iter(jax.random.split(key, 128))

    def nrm(shape):
        return 0.02 * jax.random.normal(next(keys), shape, jnp.float32)

    def vit_stack(num_layers, dim, inter, heads):
        # per-layer weights stacked along a leading layer axis (fused kernels)
        dh = dim // heads
        return {
            "ln1_g": jnp.ones((num_layers, 1, dim), jnp.float32),
            "ln1_b": jnp.zeros((num_layers, 1, dim), jnp.float32),
            # fused [Wq | Wk | Wv] : (L, dim, 3*dim)
            "qkv_w": nrm((num_layers, dim, 3 * dim)),
            "qkv_b": jnp.zeros((num_layers, 1, 3 * dim), jnp.float32),
            # output projection stored per head, flattened: (L*H, dh, dim)
            "o_w": nrm((num_layers * heads, dh, dim)),
            "o_b": jnp.zeros((num_layers, 1, dim), jnp.float32),
            "ln2_g": jnp.ones((num_layers, 1, dim), jnp.float32),
            "ln2_b": jnp.zeros((num_layers, 1, dim), jnp.float32),
            "fc1_w": nrm((num_layers, dim, inter)),
            "fc1_b": jnp.zeros((num_layers, 1, inter), jnp.float32),
            "fc2_w": nrm((num_layers, inter, dim)),
            "fc2_b": jnp.zeros((num_layers, 1, dim), jnp.float32),
        }

    params = {
        "patch_w": nrm((PATCH_DIM, D)),                 # flattened Conv2d(p,p,stride=p) weight
        "patch_b": jnp.zeros((D,), jnp.float32),
        "cls_token": nrm((1, 1, D)),
        "pos_embed": get_2d_sincos_pos_embed(D, GRID, True),
        "enc": vit_stack(ENC_LAYERS, D, INTER, HEADS),
        "enc_norm_g": jnp.ones((D,), jnp.float32),
        "enc_norm_b": jnp.zeros((D,), jnp.float32),
        "dec_embed_w": nrm((D, D_DEC)),
        "dec_embed_b": jnp.zeros((D_DEC,), jnp.float32),
        "mask_token": nrm((1, 1, D_DEC)),
        "dec_pos_embed": get_2d_sincos_pos_embed(D_DEC, GRID, True),
        "dec": vit_stack(DEC_LAYERS, D_DEC, DEC_INTER, DEC_HEADS),
        "dec_norm_g": jnp.ones((D_DEC,), jnp.float32),
        "dec_norm_b": jnp.zeros((D_DEC,), jnp.float32),
        "dec_pred_w": nrm((D_DEC, PATCH * PATCH * CHANNELS)),
        "dec_pred_b": jnp.zeros((PATCH * PATCH * CHANNELS,), jnp.float32),
    }
    return params


# ----------------------------- model forward --------------------------------
def mae_vit_forward(params, img, noise):
    B, C, H, W = img.shape
    h = H // PATCH
    w = W // PATCH
    L = h * w

    # --- patch embedding (fused GEMM + bias + pos-emb in one Pallas call) ----
    patches = (img.reshape(B, C, h, PATCH, w, PATCH)
                  .transpose(0, 2, 4, 1, 3, 5)          # conv (C,p,p) flatten order
                  .reshape(B, L, PATCH_DIM))
    emb = pallas_patch_embed(patches, params["patch_w"], params["patch_b"],
                             params["pos_embed"][0, 1:, :])           # (B, L, D)

    # --- random masking (argsort/gather stay in XLA) --------------------------
    # TODO(synk): argsort-based shuffling / gathers have no clean Pallas equivalent;
    # they run as tiny XLA ops between the fused kernels.
    len_keep = int(L * (1 - MASK_RATIO))
    ids_shuffle = jnp.argsort(noise, axis=1)
    ids_restore = jnp.argsort(ids_shuffle, axis=1)
    ids_keep = ids_shuffle[:, :len_keep]
    x = jnp.take_along_axis(emb, ids_keep[:, :, None], axis=1)
    mask = jnp.ones((B, L), jnp.float32).at[:, :len_keep].set(0.0)
    mask = jnp.take_along_axis(mask, ids_restore, axis=1)

    cls = params["cls_token"] + params["pos_embed"][:, :1, :]
    x = jnp.concatenate([jnp.broadcast_to(cls, (B, 1, D)), x], axis=1)

    # --- encoder: all layers + final LN + decoder_embed in ONE Pallas call ----
    features, y = pallas_encoder(x, params["enc"], params["enc_norm_g"],
                                 params["enc_norm_b"], params["dec_embed_w"],
                                 params["dec_embed_b"], ENC_LAYERS, HEADS)
    special_features = features[:, 0, :]  # CLS token of hidden_states[-1]

    # --- mask tokens + unshuffle + decoder pos-emb (cheap XLA glue) ------------
    S = x.shape[1]
    n_mask = L + 1 - S
    mask_tokens = jnp.broadcast_to(params["mask_token"], (B, n_mask, D_DEC))
    y_ = jnp.concatenate([y[:, 1:, :], mask_tokens], axis=1)
    y_ = jnp.take_along_axis(y_, ids_restore[:, :, None], axis=1)
    y = jnp.concatenate([y[:, :1, :], y_], axis=1)
    y = y + params["dec_pos_embed"]

    # --- decoder: all layers + norm + pred + masked MSE in ONE Pallas call -----
    target = (img.reshape(B, C, h, PATCH, w, PATCH)
                 .transpose(0, 2, 4, 3, 5, 1)            # nchpwq -> nhwpqc (HF patchify)
                 .reshape(B, L, PATCH * PATCH * C))
    target_full = jnp.pad(target, ((0, 0), (1, 0), (0, 0)))      # zero CLS row
    mask_full = jnp.pad(mask, ((0, 0), (1, 0)))[:, :, None]      # (B, L+1, 1), 0 at CLS
    recon_loss = pallas_decoder(y, params["dec"], params["dec_norm_g"],
                                params["dec_norm_b"], params["dec_pred_w"],
                                params["dec_pred_b"], target_full, mask_full,
                                DEC_LAYERS, DEC_HEADS)

    proj_emb = None  # no aux_task (simclr/simsiam/barlowtwin) configured
    return recon_loss, proj_emb, special_features, features


# ----------------------------- main ------------------------------------------
if __name__ == "__main__":
    root = jax.random.PRNGKey(0)
    k_params, k_img, k_noise = jax.random.split(root, 3)

    params = init_params(k_params)
    img = jax.random.normal(k_img, (BATCH, CHANNELS, IMAGE, IMAGE), jnp.float32)
    noise = jax.random.uniform(k_noise, (BATCH, NUM_PATCHES), jnp.float32)

    fwd = jax.jit(mae_vit_forward)
    recon_loss, proj_emb, special_features, features = fwd(params, img, noise)

    jax.block_until_ready((recon_loss, special_features, features))
    assert recon_loss.shape == ()
    assert special_features.shape == (BATCH, D)
    assert features.shape == (BATCH, 1 + int(NUM_PATCHES * (1 - MASK_RATIO)), D)
    assert proj_emb is None
    print("KERNEL_OK")
</pallas_src>

<mosaic_0001>
module attributes {stable_mosaic.version = 11 : i64} {
  func.func @_patch_embed_kernel(%arg0: i32, %arg1: memref<2x16x48xf32, #tpu.memory_space<vmem>>, %arg2: memref<48x48xf32, #tpu.memory_space<vmem>>, %arg3: memref<1x48xf32, #tpu.memory_space<vmem>>, %arg4: memref<16x48xf32, #tpu.memory_space<vmem>>, %arg5: memref<2x16x48xf32, #tpu.memory_space<vmem>>) attributes {dimension_semantics = [#tpu.dimension_semantics<arbitrary>], iteration_bounds = array<i64: 1>, scalar_prefetch = 0 : i64, scratch_operands = 0 : i64, tpu.core_type = #tpu.core_type<tc>, window_params = [{pipeline_mode = #tpu.pipeline_mode<synchronous>, transform_indices = @transform_0, window_bounds = array<i64: 2, 16, 48>}, {pipeline_mode = #tpu.pipeline_mode<synchronous>, transform_indices = @transform_1, window_bounds = array<i64: 48, 48>}, {pipeline_mode = #tpu.pipeline_mode<synchronous>, transform_indices = @transform_2, window_bounds = array<i64: 1, 48>}, {pipeline_mode = #tpu.pipeline_mode<synchronous>, transform_indices = @transform_3, window_bounds = array<i64: 16, 48>}, {pipeline_mode = #tpu.pipeline_mode<synchronous>, transform_indices = @transform_4, window_bounds = array<i64: 2, 16, 48>}]} {
    %c0 = arith.constant 0 : index
    %c0_0 = arith.constant 0 : index
    %0 = vector.load %arg2[%c0, %c0_0] : memref<48x48xf32, #tpu.memory_space<vmem>>, vector<48x48xf32>
    %c0_1 = arith.constant 0 : index
    %c0_2 = arith.constant 0 : index
    %1 = vector.load %arg3[%c0_1, %c0_2] : memref<1x48xf32, #tpu.memory_space<vmem>>, vector<1x48xf32>
    %c0_3 = arith.constant 0 : index
    %c0_4 = arith.constant 0 : index
    %2 = vector.load %arg4[%c0_3, %c0_4] : memref<16x48xf32, #tpu.memory_space<vmem>>, vector<16x48xf32>
    %c0_5 = arith.constant 0 : index
    %c0_6 = arith.constant 0 : index
    %c0_7 = arith.constant 0 : index
    %3 = vector.load %arg1[%c0_5, %c0_6, %c0_7] : memref<2x16x48xf32, #tpu.memory_space<vmem>>, vector<1x16x48xf32>
    %4 = vector.shape_cast %3 : vector<1x16x48xf32> to vector<16x48xf32>
    %cst = arith.constant dense<0.000000e+00> : vector<16x48xf32>
    %5 = tpu.matmul %4, %0, %cst {dimension_numbers = #tpu.dot_dimension_numbers<[1], [0], [0], [1], [0, 0, 1, 1], [], []>} : vector<16x48xf32>, vector<48x48xf32>, vector<16x48xf32> -> vector<16x48xf32>
    %6 = vector.broadcast %1 : vector<1x48xf32> to vector<16x48xf32>
    %7 = arith.addf %5, %6 : vector<16x48xf32>
    %8 = arith.addf %7, %2 : vector<16x48xf32>
    %c0_8 = arith.constant 0 : index
    %c0_9 = arith.constant 0 : index
    %c0_10 = arith.constant 0 : index
    %9 = vector.load %arg5[%c0_8, %c0_9, %c0_10] : memref<2x16x48xf32, #tpu.memory_space<vmem>>, vector<1x16x48xf32>
    %10 = vector.shape_cast %9 : vector<1x16x48xf32> to vector<16x48xf32>
    %11 = vector.shape_cast %8 : vector<16x48xf32> to vector<1x16x48xf32>
    tpu.vector_store %arg5[%c0_8, %c0_9, %c0_10], %11 {strides = array<i32>} : memref<2x16x48xf32, #tpu.memory_space<vmem>>, vector<1x16x48xf32>,
    %c1 = arith.constant 1 : index
    %c0_11 = arith.constant 0 : index
    %c0_12 = arith.constant 0 : index
    %12 = vector.load %arg1[%c1, %c0_11, %c0_12] : memref<2x16x48xf32, #tpu.memory_space<vmem>>, vector<1x16x48xf32>
    %13 = vector.shape_cast %12 : vector<1x16x48xf32> to vector<16x48xf32>
    %cst_13 = arith.constant dense<0.000000e+00> : vector<16x48xf32>
    %14 = tpu.matmul %13, %0, %cst_13 {dimension_numbers = #tpu.dot_dimension_numbers<[1], [0], [0], [1], [0, 0, 1, 1], [], []>} : vector<16x48xf32>, vector<48x48xf32>, vector<16x48xf32> -> vector<16x48xf32>
    %15 = vector.broadcast %1 : vector<1x48xf32> to vector<16x48xf32>
    %16 = arith.addf %14, %15 : vector<16x48xf32>
    %17 = arith.addf %16, %2 : vector<16x48xf32>
    %c1_14 = arith.constant 1 : index
    %c0_15 = arith.constant 0 : index
    %c0_16 = arith.constant 0 : index
    %18 = vector.load %arg5[%c1_14, %c0_15, %c0_16] : memref<2x16x48xf32, #tpu.memory_space<vmem>>, vector<1x16x48xf32>
    %19 = vector.shape_cast %18 : vector<1x16x48xf32> to vector<16x48xf32>
    %20 = vector.shape_cast %17 : vector<16x48xf32> to vector<1x16x48xf32>
    tpu.vector_store %arg5[%c1_14, %c0_15, %c0_16], %20 {strides = array<i32>} : memref<2x16x48xf32, #tpu.memory_space<vmem>>, vector<1x16x48xf32>,
    return
  }
  func.func @transform_0(%arg0: i32) -> (i32, i32, i32) {
    %c0_i32 = arith.constant 0 : i32
    %c0_i32_0 = arith.constant 0 : i32
    %c0_i32_1 = arith.constant 0 : i32
    %c0_i32_2 = arith.constant 0 : i32
    return %c0_i32, %c0_i32_0, %c0_i32_1 : i32, i32, i32
  }
  func.func @transform_1(%arg0: i32) -> (i32, i32) {
    %c0_i32 = arith.constant 0 : i32
    %c0_i32_0 = arith.constant 0 : i32
    %c0_i32_1 = arith.constant 0 : i32
    return %c0_i32, %c0_i32_0 : i32, i32
  }
  func.func @transform_2(%arg0: i32) -> (i32, i32) {
    %c0_i32 = arith.constant 0 : i32
    %c0_i32_0 = arith.constant 0 : i32
    %c0_i32_1 = arith.constant 0 : i32
    return %c0_i32, %c0_i32_0 : i32, i32
  }
  func.func @transform_3(%arg0: i32) -> (i32, i32) {
    %c0_i32 = arith.constant 0 : i32
    %c0_i32_0 = arith.constant 0 : i32
    %c0_i32_1 = arith.constant 0 : i32
    return %c0_i32, %c0_i32_0 : i32, i32
  }
  func.func @transform_4(%arg0: i32) -> (i32, i32, i32) {
    %c0_i32 = arith.constant 0 : i32
    %c0_i32_0 = arith.constant 0 : i32
    %c0_i32_1 = arith.constant 0 : i32
    %c0_i32_2 = arith.constant 0 : i32
    return %c0_i32, %c0_i32_0, %c0_i32_1 : i32, i32, i32
  }
}

module attributes {stable_mosaic.version = 11 : i64} {
  func.func @_encoder_kernel(%arg0: i32, %arg1: memref<2x5x48xf32, #tpu.memory_space<vmem>>, %arg2: memref<2x1x48xf32, #tpu.memory_space<vmem>>, %arg3: memref<2x1x48xf32, #tpu.memory_space<vmem>>, %arg4: memref<2x48x144xf32, #tpu.memory_space<vmem>>, %arg5: memref<2x1x144xf32, #tpu.memory_space<vmem>>, %arg6: memref<6x16x48xf32, #tpu.memory_space<vmem>>, %arg7: memref<2x1x48xf32, #tpu.memory_space<vmem>>, %arg8: memref<2x1x48xf32, #tpu.memory_space<vmem>>, %arg9: memref<2x1x48xf32, #tpu.memory_space<vmem>>, %arg10: memref<2x48x96xf32, #tpu.memory_space<vmem>>, %arg11: memref<2x1x96xf32, #tpu.memory_space<vmem>>, %arg12: memref<2x96x48xf32, #tpu.memory_space<vmem>>, %arg13: memref<2x1x48xf32, #tpu.memory_space<vmem>>, %arg14: memref<1x48xf32, #tpu.memory_space<vmem>>, %arg15: memref<1x48xf32, #tpu.memory_space<vmem>>, %arg16: memref<48x48xf32, #tpu.memory_space<vmem>>, %arg17: memref<1x48xf32, #tpu.memory_space<vmem>>, %arg18: memref<2x5x48xf32, #tpu.memory_space<vmem>>, %arg19: memref<2x5x48xf32, #tpu.memory_space<vmem>>, %arg20: memref<5x144xf32, #tpu.memory_space<vmem>>) attributes {dimension_semantics = [#tpu.dimension_semantics<arbitrary>], iteration_bounds = array<i64: 1>, scalar_prefetch = 0 : i64, scratch_operands = 1 : i64, tpu.core_type = #tpu.core_type<tc>, window_params = [{pipeline_mode = #tpu.pipeline_mode<synchronous>, transform_indices = @transform_0, window_bounds = array<i64: 2, 5, 48>}, {pipeline_mode = #tpu.pipeline_mode<synchronous>, transform_indices = @transform_1, window_bounds = array<i64: 2, 1, 48>}, {pipeline_mode = #tpu.pipeline_mode<synchronous>, transform_indices = @transform_2, window_bounds = array<i64: 2, 1, 48>}, {pipeline_mode = #tpu.pipeline_mode<synchronous>, transform_indices = @transform_3, window_bounds = array<i64: 2, 48, 144>}, {pipeline_mode = #tpu.pipeline_mode<synchronous>, transform_indices = @transform_4, window_bounds = array<i64: 2, 1, 144>}, {pipeline_mode = #tpu.pipeline_mode<synchronous>, transform_indices = @transform_5, window_bounds = array<i64: 6, 16, 48>}, {pipeline_mode = #tpu.pipeline_mode<synchronous>, transform_indices = @transform_6, window_bounds = array<i64: 2, 1, 48>}, {pipeline_mode = #tpu.pipeline_mode<synchronous>, transform_indices = @transform_7, window_bounds = array<i64: 2, 1, 48>}, {pipeline_mode = #tpu.pipeline_mode<synchronous>, transform_indices = @transform_8, window_bounds = array<i64: 2, 1, 48>}, {pipeline_mode = #tpu.pipeline_mode<synchronous>, transform_indices = @transform_9, window_bounds = array<i64: 2, 48, 96>}, {pipeline_mode = #tpu.pipeline_mode<synchronous>, transform_indices = @transform_10, window_bounds = array<i64: 2, 1, 96>}, {pipeline_mode = #tpu.pipeline_mode<synchronous>, transform_indices = @transform_11, window_bounds = array<i64: 2, 96, 48>}, {pipeline_mode = #tpu.pipeline_mode<synchronous>, transform_indices = @transform_12, window_bounds = array<i64: 2, 1, 48>}, {pipeline_mode = #tpu.pipeline_mode<synchronous>, transform_indices = @transform_13, window_bounds = array<i64: 1, 48>}, {pipeline_mode = #tpu.pipeline_mode<synchronous>, transform_indices = @transform_14, window_bounds = array<i64: 1, 48>}, {pipeline_mode = #tpu.pipeline_mode<synchronous>, transform_indices = @transform_15, window_bounds = array<i64: 48, 48>}, {pipeline_mode = #tpu.pipeline_mode<synchronous>, transform_indices = @transform_16, window_bounds = array<i64: 1, 48>}, {pipeline_mode = #tpu.pipeline_mode<synchronous>, transform_indices = @transform_17, window_bounds = array<i64: 2, 5, 48>}, {pipeline_mode = #tpu.pipeline_mode<synchronous>, transform_indices = @transform_18, window_bounds = array<i64: 2, 5, 48>}]} {
    %c0 = arith.constant 0 : index
    %c0_0 = arith.constant 0 : index
    %0 = vector.load %arg14[%c0, %c0_0] : memref<1x48xf32, #tpu.memory_space<vmem>>, vector<1x48xf32>
    %c0_1 = arith.constant 0 : index
    %c0_2 = arith.constant 0 : index
    %1 = vector.load %arg15[%c0_1, %c0_2] : memref<1x48xf32, #tpu.memory_space<vmem>>, vector<1x48xf32>
    %c0_3 = arith.constant 0 : index
    %c0_4 = arith.constant 0 : index
    %2 = vector.load %arg16[%c0_3, %c0_4] : memref<48x48xf32, #tpu.memory_space<vmem>>, vector<48x48xf32>
    %c0_5 = arith.constant 0 : index
    %c0_6 = arith.constant 0 : index
    %3 = vector.load %arg17[%c0_5, %c0_6] : memref<1x48xf32, #tpu.memory_space<vmem>>, vector<1x48xf32>
    %c0_7 = arith.constant 0 : index
    %c0_8 = arith.constant 0 : index
    %c0_9 = arith.constant 0 : index
    %4 = vector.load %arg1[%c0_7, %c0_8, %c0_9] : memref<2x5x48xf32, #tpu.memory_space<vmem>>, vector<1x5x48xf32>
    %5 = vector.shape_cast %4 : vector<1x5x48xf32> to vector<5x48xf32>
    %c0_10 = arith.constant 0 : index
    %c0_11 = arith.constant 0 : index
    %c0_12 = arith.constant 0 : index
    %6 = vector.load %arg2[%c0_10, %c0_11, %c0_12] : memref<2x1x48xf32, #tpu.memory_space<vmem>>, vector<1x1x48xf32>
    %7 = vector.shape_cast %6 : vector<1x1x48xf32> to vector<1x48xf32>
    %c0_13 = arith.constant 0 : index
    %c0_14 = arith.constant 0 : index
    %c0_15 = arith.constant 0 : index
    %8 = vector.load %arg3[%c0_13, %c0_14, %c0_15] : memref<2x1x48xf32, #tpu.memory_space<vmem>>, vector<1x1x48xf32>
    %9 = vector.shape_cast %8 : vector<1x1x48xf32> to vector<1x48xf32>
    %cst = arith.constant dense<0.000000e+00> : vector<5xf32>
    %10 = vector.multi_reduction <add>, %5, %cst [1] : vector<5x48xf32> to vector<5xf32>
    %11 = vector.shape_cast %10 : vector<5xf32> to vector<5x1xf32>
    %cst_16 = arith.constant 4.800000e+01 : f32
    %12 = vector.broadcast %cst_16 : f32 to vector<5x1xf32>
    %13 = arith.divf %11, %12 : vector<5x1xf32>
    %14 = vector.broadcast %13 : vector<5x1xf32> to vector<5x48xf32>
    %15 = arith.subf %5, %14 : vector<5x48xf32>
    %16 = arith.mulf %15, %15 : vector<5x48xf32>
    %cst_17 = arith.constant dense<0.000000e+00> : vector<5xf32>
    %17 = vector.multi_reduction <add>, %16, %cst_17 [1] : vector<5x48xf32> to vector<5xf32>
    %18 = vector.shape_cast %17 : vector<5xf32> to vector<5x1xf32>
    %cst_18 = arith.constant 4.800000e+01 : f32
    %19 = vector.broadcast %cst_18 : f32 to vector<5x1xf32>
    %20 = arith.divf %18, %19 : vector<5x1xf32>
    %cst_19 = arith.constant 9.99999996E-13 : f32
    %21 = vector.broadcast %cst_19 : f32 to vector<5x1xf32>
    %22 = arith.addf %20, %21 : vector<5x1xf32>
    %23 = math.rsqrt %22 : vector<5x1xf32>
    %24 = vector.broadcast %23 : vector<5x1xf32> to vector<5x48xf32>
    %25 = arith.mulf %15, %24 : vector<5x48xf32>
    %26 = vector.broadcast %7 : vector<1x48xf32> to vector<5x48xf32>
    %27 = arith.mulf %25, %26 : vector<5x48xf32>
    %28 = vector.broadcast %9 : vector<1x48xf32> to vector<5x48xf32>
    %29 = arith.addf %27, %28 : vector<5x48xf32>
    %c0_20 = arith.constant 0 : index
    %c0_21 = arith.constant 0 : index
    %c0_22 = arith.constant 0 : index
    %30 = vector.load %arg4[%c0_20, %c0_21, %c0_22] : memref<2x48x144xf32, #tpu.memory_space<vmem>>, vector<1x48x144xf32>
    %31 = vector.shape_cast %30 : vector<1x48x144xf32> to vector<48x144xf32>
    %cst_23 = arith.constant dense<0.000000e+00> : vector<5x144xf32>
    %32 = tpu.matmul %29, %31, %cst_23 {dimension_numbers = #tpu.dot_dimension_numbers<[1], [0], [0], [1], [0, 0, 1, 1], [], []>} : vector<5x48xf32>, vector<48x144xf32>, vector<5x144xf32> -> vector<5x144xf32>
    %c0_24 = arith.constant 0 : index
    %c0_25 = arith.constant 0 : index
    %c0_26 = arith.constant 0 : index
    %33 = vector.load %arg5[%c0_24, %c0_25, %c0_26] : memref<2x1x144xf32, #tpu.memory_space<vmem>>, vector<1x1x144xf32>
    %34 = vector.shape_cast %33 : vector<1x1x144xf32> to vector<1x144xf32>
    %35 = vector.broadcast %34 : vector<1x144xf32> to vector<5x144xf32>
    %36 = arith.addf %32, %35 : vector<5x144xf32>
    %c0_27 = arith.constant 0 : index
    %c0_28 = arith.constant 0 : index
    %37 = vector.load %arg20[%c0_27, %c0_28] : memref<5x144xf32, #tpu.memory_space<vmem>>, vector<5x144xf32>
    tpu.vector_store %arg20[%c0_27, %c0_28], %36 {strides = array<i32>} : memref<5x144xf32, #tpu.memory_space<vmem>>, vector<5x144xf32>,
    %c0_29 = arith.constant 0 : index
    %c0_30 = arith.constant 0 : index
    %38 = vector.load %arg20[%c0_29, %c0_30] : memref<5x144xf32, #tpu.memory_space<vmem>>, vector<5x16xf32>
    %c0_31 = arith.constant 0 : index
    %c48 = arith.constant 48 : index
    %39 = vector.load %arg20[%c0_31, %c48] : memref<5x144xf32, #tpu.memory_space<vmem>>, vector<5x16xf32>
    %c0_32 = arith.constant 0 : index
    %c96 = arith.constant 96 : index
    %40 = vector.load %arg20[%c0_32, %c96] : memref<5x144xf32, #tpu.memory_space<vmem>>, vector<5x16xf32>
    %41 = tpu.transpose %39, [1, 0] : vector<5x16xf32> -> vector<16x5xf32>
    %cst_33 = arith.constant dense<0.000000e+00> : vector<5x5xf32>
    %42 = tpu.matmul %38, %41, %cst_33 {dimension_numbers = #tpu.dot_dimension_numbers<[1], [0], [0], [1], [0, 0, 1, 1], [], []>} : vector<5x16xf32>, vector<16x5xf32>, vector<5x5xf32> -> vector<5x5xf32>
    %cst_34 = arith.constant 2.500000e-01 : f32
    %43 = vector.broadcast %cst_34 : f32 to vector<5x5xf32>
    %44 = arith.mulf %42, %43 : vector<5x5xf32>
    %cst_35 = arith.constant dense<0xFF800000> : vector<5xf32>
    %45 = vector.multi_reduction <maximumf>, %44, %cst_35 [1] : vector<5x5xf32> to vector<5xf32>
    %46 = vector.shape_cast %45 : vector<5xf32> to vector<5x1xf32>
    %47 = vector.broadcast %46 : vector<5x1xf32> to vector<5x5xf32>
    %48 = arith.subf %44, %47 : vector<5x5xf32>
    %49 = math.exp %48 : vector<5x5xf32>
    %cst_36 = arith.constant dense<0.000000e+00> : vector<5xf32>
    %50 = vector.multi_reduction <add>, %49, %cst_36 [1] : vector<5x5xf32> to vector<5xf32>
    %51 = vector.shape_cast %50 : vector<5xf32> to vector<5x1xf32>
    %52 = vector.broadcast %51 : vector<5x1xf32> to vector<5x5xf32>
    %53 = arith.divf %49, %52 : vector<5x5xf32>
    %cst_37 = arith.constant dense<0.000000e+00> : vector<5x16xf32>
    %54 = tpu.matmul %53, %40, %cst_37 {dimension_numbers = #tpu.dot_dimension_numbers<[1], [0], [0], [1], [0, 0, 1, 1], [], []>} : vector<5x5xf32>, vector<5x16xf32>, vector<5x16xf32> -> vector<5x16xf32>
    %c0_38 = arith.constant 0 : index
    %c0_39 = arith.constant 0 : index
    %c0_40 = arith.constant 0 : index
    %55 = vector.load %arg6[%c0_38, %c0_39, %c0_40] : memref<6x16x48xf32, #tpu.memory_space<vmem>>, vector<1x16x48xf32>
    %56 = vector.shape_cast %55 : vector<1x16x48xf32> to vector<16x48xf32>
    %cst_41 = arith.constant dense<0.000000e+00> : vector<5x48xf32>
    %57 = tpu.matmul %54, %56, %cst_41 {dimension_numbers = #tpu.dot_dimension_numbers<[1], [0], [0], [1], [0, 0, 1, 1], [], []>} : vector<5x16xf32>, vector<16x48xf32>, vector<5x48xf32> -> vector<5x48xf32>
    %c0_42 = arith.constant 0 : index
    %c16 = arith.constant 16 : index
    %58 = vector.load %arg20[%c0_42, %c16] : memref<5x144xf32, #tpu.memory_space<vmem>>, vector<5x16xf32>
    %c0_43 = arith.constant 0 : index
    %c64 = arith.constant 64 : index
    %59 = vector.load %arg20[%c0_43, %c64] : memref<5x144xf32, #tpu.memory_space<vmem>>, vector<5x16xf32>
    %c0_44 = arith.constant 0 : index
    %c112 = arith.constant 112 : index
    %60 = vector.load %arg20[%c0_44, %c112] : memref<5x144xf32, #tpu.memory_space<vmem>>, vector<5x16xf32>
    %61 = tpu.transpose %59, [1, 0] : vector<5x16xf32> -> vector<16x5xf32>
    %cst_45 = arith.constant dense<0.000000e+00> : vector<5x5xf32>
    %62 = tpu.matmul %58, %61, %cst_45 {dimension_numbers = #tpu.dot_dimension_numbers<[1], [0], [0], [1], [0, 0, 1, 1], [], []>} : vector<5x16xf32>, vector<16x5xf32>, vector<5x5xf32> -> vector<5x5xf32>
    %cst_46 = arith.constant 2.500000e-01 : f32
    %63 = vector.broadcast %cst_46 : f32 to vector<5x5xf32>
    %64 = arith.mulf %62, %63 : vector<5x5xf32>
    %cst_47 = arith.constant dense<0xFF800000> : vector<5xf32>
    %65 = vector.multi_reduction <maximumf>, %64, %cst_47 [1] : vector<5x5xf32> to vector<5xf32>
    %66 = vector.shape_cast %65 : vector<5xf32> to vector<5x1xf32>
    %67 = vector.broadcast %66 : vector<5x1xf32> to vector<5x5xf32>
    %68 = arith.subf %64, %67 : vector<5x5xf32>
    %69 = math.exp %68 : vector<5x5xf32>
    %cst_48 = arith.constant dense<0.000000e+00> : vector<5xf32>
    %70 = vector.multi_reduction <add>, %69, %cst_48 [1] : vector<5x5xf32> to vector<5xf32>
    %71 = vector.shape_cast %70 : vector<5xf32> to vector<5x1xf32>
    %72 = vector.broadcast %71 : vector<5x1xf32> to vector<5x5xf32>
    %73 = arith.divf %69, %72 : vector<5x5xf32>
    %cst_49 = arith.constant dense<0.000000e+00> : vector<5x16xf32>
    %74 = tpu.matmul %73, %60, %cst_49 {dimension_numbers = #tpu.dot_dimension_numbers<[1], [0], [0], [1], [0, 0, 1, 1], [], []>} : vector<5x5xf32>, vector<5x16xf32>, vector<5x16xf32> -> vector<5x16xf32>
    %c1 = arith.constant 1 : index
    %c0_50 = arith.constant 0 : index
    %c0_51 = arith.constant 0 : index
    %75 = vector.load %arg6[%c1, %c0_50, %c0_51] : memref<6x16x48xf32, #tpu.memory_space<vmem>>, vector<1x16x48xf32>
    %76 = vector.shape_cast %75 : vector<1x16x48xf32> to vector<16x48xf32>
    %cst_52 = arith.constant dense<0.000000e+00> : vector<5x48xf32>
    %77 = tpu.matmul %74, %76, %cst_52 {dimension_numbers = #tpu.dot_dimension_numbers<[1], [0], [0], [1], [0, 0, 1, 1], [], []>} : vector<5x16xf32>, vector<16x48xf32>, vector<5x48xf32> -> vector<5x48xf32>
    %78 = arith.addf %57, %77 : vector<5x48xf32>
    %c0_53 = arith.constant 0 : index
    %c32 = arith.constant 32 : index
    %79 = vector.load %arg20[%c0_53, %c32] : memref<5x144xf32, #tpu.memory_space<vmem>>, vector<5x16xf32>
    %c0_54 = arith.constant 0 : index
    %c80 = arith.constant 80 : index
    %80 = vector.load %arg20[%c0_54, %c80] : memref<5x144xf32, #tpu.memory_space<vmem>>, vector<5x16xf32>
    %c0_55 = arith.constant 0 : index
    %c128 = arith.constant 128 : index
    %81 = vector.load %arg20[%c0_55, %c128] : memref<5x144xf32, #tpu.memory_space<vmem>>, vector<5x16xf32>
    %82 = tpu.transpose %80, [1, 0] : vector<5x16xf32> -> vector<16x5xf32>
    %cst_56 = arith.constant dense<0.000000e+00> : vector<5x5xf32>
    %83 = tpu.matmul %79, %82, %cst_56 {dimension_numbers = #tpu.dot_dimension_numbers<[1], [0], [0], [1], [0, 0, 1, 1], [], []>} : vector<5x16xf32>, vector<16x5xf32>, vector<5x5xf32> -> vector<5x5xf32>
    %cst_57 = arith.constant 2.500000e-01 : f32
    %84 = vector.broadcast %cst_57 : f32 to vector<5x5xf32>
    %85 = arith.mulf %83, %84 : vector<5x5xf32>
    %cst_58 = arith.constant dense<0xFF800000> : vector<5xf32>
    %86 = vector.multi_reduction <maximumf>, %85, %cst_58 [1] : vector<5x5xf32> to vector<5xf32>
    %87 = vector.shape_cast %86 : vector<5xf32> to vector<5x1xf32>
    %88 = vector.broadcast %87 : vector<5x1xf32> to vector<5x5xf32>
    %89 = arith.subf %85, %88 : vector<5x5xf32>
    %90 = math.exp %89 : vector<5x5xf32>
    %cst_59 = arith.constant dense<0.000000e+00> : vector<5xf32>
    %91 = vector.multi_reduction <add>, %90, %cst_59 [1] : vector<5x5xf32> to vector<5xf32>
    %92 = vector.shape_cast %91 : vector<5xf32> to vector<5x1xf32>
    %93 = vector.broadcast %92 : vector<5x1xf32> to vector<5x5xf32>
    %94 = arith.divf %90, %93 : vector<5x5xf32>
    %cst_60 = arith.constant dense<0.000000e+00> : vector<5x16xf32>
    %95 = tpu.matmul %94, %81, %cst_60 {dimension_numbers = #tpu.dot_dimension_numbers<[1], [0], [0], [1], [0, 0, 1, 1], [], []>} : vector<5x5xf32>, vector<5x16xf32>, vector<5x16xf32> -> vector<5x16xf32>
    %c2 = arith.constant 2 : index
    %c0_61 = arith.constant 0 : index
    %c0_62 = arith.constant 0 : index
    %96 = vector.load %arg6[%c2, %c0_61, %c0_62] : memref<6x16x48xf32, #tpu.memory_space<vmem>>, vector<1x16x48xf32>
    %97 = vector.shape_cast %96 : vector<1x16x48xf32> to vector<16x48xf32>
    %cst_63 = arith.constant dense<0.000000e+00> : vector<5x48xf32>
    %98 = tpu.matmul %95, %97, %cst_63 {dimension_numbers = #tpu.dot_dimension_numbers<[1], [0], [0], [1], [0, 0, 1, 1], [], []>} : vector<5x16xf32>, vector<16x48xf32>, vector<5x48xf32> -> vector<5x48xf32>
    %99 = arith.addf %78, %98 : vector<5x48xf32>
    %100 = arith.addf %5, %99 : vector<5x48xf32>
    %c0_64 = arith.constant 0 : index
    %c0_65 = arith.constant 0 : index
    %c0_66 = arith.constant 0 : index
    %101 = vector.load %arg7[%c0_64, %c0_65, %c0_66] : memref<2x1x48xf32, #tpu.memory_space<vmem>>, vector<1x1x48xf32>
    %102 = vector.shape_cast %101 : vector<1x1x48xf32> to vector<1x48xf32>
    %103 = vector.broadcast %102 : vector<1x48xf32> to vector<5x48xf32>
    %104 = arith.addf %100, %103 : vector<5x48xf32>
    %c0_67 = arith.constant 0 : index
    %c0_68 = arith.constant 0 : index
    %c0_69 = arith.constant 0 : index
    %105 = vector.load %arg8[%c0_67, %c0_68, %c0_69] : memref<2x1x48xf32, #tpu.memory_space<vmem>>, vector<1x1x48xf32>
    %106 = vector.shape_cast %105 : vector<1x1x48xf32> to vector<1x48xf32>
    %c0_70 = arith.constant 0 : index
    %c0_71 = arith.constant 0 : index
    %c0_72 = arith.constant 0 : index
    %107 = vector.load %arg9[%c0_70, %c0_71, %c0_72] : memref<2x1x48xf32, #tpu.memory_space<vmem>>, vector<1x1x48xf32>
    %108 = vector.shape_cast %107 : vector<1x1x48xf32> to vector<1x48xf32>
    %cst_73 = arith.constant dense<0.000000e+00> : vector<5xf32>
    %109 = vector.multi_reduction <add>, %104, %cst_73 [1] : vector<5x48xf32> to vector<5xf32>
    %110 = vector.shape_cast %109 : vector<5xf32> to vector<5x1xf32>
    %cst_74 = arith.constant 4.800000e+01 : f32
    %111 = vector.broadcast %cst_74 : f32 to vector<5x1xf32>
    %112 = arith.divf %110, %111 : vector<5x1xf32>
    %113 = vector.broadcast %112 : vector<5x1xf32> to vector<5x48xf32>
    %114 = arith.subf %104, %113 : vector<5x48xf32>
    %115 = arith.mulf %114, %114 : vector<5x48xf32>
    %cst_75 = arith.constant dense<0.000000e+00> : vector<5xf32>
    %116 = vector.multi_reduction <add>, %115, %cst_75 [1] : vector<5x48xf32> to vector<5xf32>
    %117 = vector.shape_cast %116 : vector<5xf32> to vector<5x1xf32>
    %cst_76 = arith.constant 4.800000e+01 : f32
    %118 = vector.broadcast %cst_76 : f32 to vector<5x1xf32>
    %119 = arith.divf %117, %118 : vector<5x1xf32>
    %cst_77 = arith.constant 9.99999996E-13 : f32
    %120 = vector.broadcast %cst_77 : f32 to vector<5x1xf32>
    %121 = arith.addf %119, %120 : vector<5x1xf32>
    %122 = math.rsqrt %121 : vector<5x1xf32>
    %123 = vector.broadcast %122 : vector<5x1xf32> to vector<5x48xf32>
    %124 = arith.mulf %114, %123 : vector<5x48xf32>
    %125 = vector.broadcast %106 : vector<1x48xf32> to vector<5x48xf32>
    %126 = arith.mulf %124, %125 : vector<5x48xf32>
    %127 = vector.broadcast %108 : vector<1x48xf32> to vector<5x48xf32>
    %128 = arith.addf %126, %127 : vector<5x48xf32>
    %c0_78 = arith.constant 0 : index
    %c0_79 = arith.constant 0 : index
    %c0_80 = arith.constant 0 : index
    %129 = vector.load %arg10[%c0_78, %c0_79, %c0_80] : memref<2x48x96xf32, #tpu.memory_space<vmem>>, vector<1x48x96xf32>
    %130 = vector.shape_cast %129 : vector<1x48x96xf32> to vector<48x96xf32>
    %cst_81 = arith.constant dense<0.000000e+00> : vector<5x96xf32>
    %131 = tpu.matmul %128, %130, %cst_81 {dimension_numbers = #tpu.dot_dimension_numbers<[1], [0], [0], [1], [0, 0, 1, 1], [], []>} : vector<5x48xf32>, vector<48x96xf32>, vector<5x96xf32> -> vector<5x96xf32>
    %c0_82 = arith.constant 0 : index
    %c0_83 = arith.constant 0 : index
    %c0_84 = arith.constant 0 : index
    %132 = vector.load %arg11[%c0_82, %c0_83, %c0_84] : memref<2x1x96xf32, #tpu.memory_space<vmem>>, vector<1x1x96xf32>
    %133 = vector.shape_cast %132 : vector<1x1x96xf32> to vector<1x96xf32>
    %134 = vector.broadcast %133 : vector<1x96xf32> to vector<5x96xf32>
    %135 = arith.addf %131, %134 : vector<5x96xf32>
    %cst_85 = arith.constant 5.000000e-01 : f32
    %136 = vector.broadcast %cst_85 : f32 to vector<5x96xf32>
    %137 = arith.mulf %136, %135 : vector<5x96xf32>
    %cst_86 = arith.constant 0.707106769 : f32
    %138 = vector.broadcast %cst_86 : f32 to vector<5x96xf32>
    %139 = arith.mulf %135, %138 : vector<5x96xf32>
    %cst_87 = arith.constant 0.000000e+00 : f32
    %140 = vector.broadcast %cst_87 : f32 to vector<5x96xf32>
    %141 = arith.cmpf oge, %139, %140 : vector<5x96xf32>
    %cst_88 = arith.constant 1.000000e+00 : f32
    %cst_89 = arith.constant -1.000000e+00 : f32
    %142 = vector.broadcast %cst_88 : f32 to vector<5x96xf32>
    %143 = vector.broadcast %cst_89 : f32 to vector<5x96xf32>
    %144 = arith.select %141, %142, %143 : vector<5x96xi1>, vector<5x96xf32>
    %145 = math.absf %139 : vector<5x96xf32>
    %cst_90 = arith.constant 0.327591091 : f32
    %146 = vector.broadcast %cst_90 : f32 to vector<5x96xf32>
    %147 = arith.mulf %146, %145 : vector<5x96xf32>
    %cst_91 = arith.constant 1.000000e+00 : f32
    %148 = vector.broadcast %cst_91 : f32 to vector<5x96xf32>
    %149 = arith.addf %148, %147 : vector<5x96xf32>
    %cst_92 = arith.constant 1.000000e+00 : f32
    %150 = vector.broadcast %cst_92 : f32 to vector<5x96xf32>
    %151 = arith.divf %150, %149 : vector<5x96xf32>
    %cst_93 = arith.constant 1.06140542 : f32
    %152 = vector.broadcast %cst_93 : f32 to vector<5x96xf32>
    %153 = arith.mulf %152, %151 : vector<5x96xf32>
    %cst_94 = arith.constant -1.45315206 : f32
    %154 = vector.broadcast %cst_94 : f32 to vector<5x96xf32>
    %155 = arith.addf %153, %154 : vector<5x96xf32>
    %156 = arith.mulf %155, %151 : vector<5x96xf32>
    %cst_95 = arith.constant 1.42141378 : f32
    %157 = vector.broadcast %cst_95 : f32 to vector<5x96xf32>
    %158 = arith.addf %156, %157 : vector<5x96xf32>
    %159 = arith.mulf %158, %151 : vector<5x96xf32>
    %cst_96 = arith.constant -0.284496725 : f32
    %160 = vector.broadcast %cst_96 : f32 to vector<5x96xf32>
    %161 = arith.addf %159, %160 : vector<5x96xf32>
    %162 = arith.mulf %161, %151 : vector<5x96xf32>
    %cst_97 = arith.constant 0.254829586 : f32
    %163 = vector.broadcast %cst_97 : f32 to vector<5x96xf32>
    %164 = arith.addf %162, %163 : vector<5x96xf32>
    %165 = arith.mulf %164, %151 : vector<5x96xf32>
    %cst_98 = arith.constant 0.000000e+00 : f32
    %166 = vector.broadcast %cst_98 : f32 to vector<5x96xf32>
    %167 = arith.subf %166, %145 : vector<5x96xf32>
    %168 = arith.mulf %167, %145 : vector<5x96xf32>
    %169 = math.exp %168 : vector<5x96xf32>
    %170 = arith.mulf %165, %169 : vector<5x96xf32>
    %cst_99 = arith.constant 1.000000e+00 : f32
    %171 = vector.broadcast %cst_99 : f32 to vector<5x96xf32>
    %172 = arith.subf %171, %170 : vector<5x96xf32>
    %173 = arith.mulf %144, %172 : vector<5x96xf32>
    %cst_100 = arith.constant 1.000000e+00 : f32
    %174 = vector.broadcast %cst_100 : f32 to vector<5x96xf32>
    %175 = arith.addf %174, %173 : vector<5x96xf32>
    %176 = arith.mulf %137, %175 : vector<5x96xf32>
    %c0_101 = arith.constant 0 : index
    %c0_102 = arith.constant 0 : index
    %c0_103 = arith.constant 0 : index
    %177 = vector.load %arg12[%c0_101, %c0_102, %c0_103] : memref<2x96x48xf32, #tpu.memory_space<vmem>>, vector<1x96x48xf32>
    %178 = vector.shape_cast %177 : vector<1x96x48xf32> to vector<96x48xf32>
    %cst_104 = arith.constant dense<0.000000e+00> : vector<5x48xf32>
    %179 = tpu.matmul %176, %178, %cst_104 {dimension_numbers = #tpu.dot_dimension_numbers<[1], [0], [0], [1], [0, 0, 1, 1], [], []>} : vector<5x96xf32>, vector<96x48xf32>, vector<5x48xf32> -> vector<5x48xf32>
    %180 = arith.addf %104, %179 : vector<5x48xf32>
    %c0_105 = arith.constant 0 : index
    %c0_106 = arith.constant 0 : index
    %c0_107 = arith.constant 0 : index
    %181 = vector.load %arg13[%c0_105, %c0_106, %c0_107] : memref<2x1x48xf32, #tpu.memory_space<vmem>>, vector<1x1x48xf32>
    %182 = vector.shape_cast %181 : vector<1x1x48xf32> to vector<1x48xf32>
    %183 = vector.broadcast %182 : vector<1x48xf32> to vector<5x48xf32>
    %184 = arith.addf %180, %183 : vector<5x48xf32>
    %c1_108 = arith.constant 1 : index
    %c0_109 = arith.constant 0 : index
    %c0_110 = arith.constant 0 : index
    %185 = vector.load %arg2[%c1_108, %c0_109, %c0_110] : memref<2x1x48xf32, #tpu.memory_space<vmem>>, vector<1x1x48xf32>
    %186 = vector.shape_cast %185 : vector<1x1x48xf32> to vector<1x48xf32>
    %c1_111 = arith.constant 1 : index
    %c0_112 = arith.constant 0 : index
    %c0_113 = arith.constant 0 : index
    %187 = vector.load %arg3[%c1_111, %c0_112, %c0_113] : memref<2x1x48xf32, #tpu.memory_space<vmem>>, vector<1x1x48xf32>
    %188 = vector.shape_cast %187 : vector<1x1x48xf32> to vector<1x48xf32>
    %cst_114 = arith.constant dense<0.000000e+00> : vector<5xf32>
    %189 = vector.multi_reduction <add>, %184, %cst_114 [1] : vector<5x48xf32> to vector<5xf32>
    %190 = vector.shape_cast %189 : vector<5xf32> to vector<5x1xf32>
    %cst_115 = arith.constant 4.800000e+01 : f32
    %191 = vector.broadcast %cst_115 : f32 to vector<5x1xf32>
    %192 = arith.divf %190, %191 : vector<5x1xf32>
    %193 = vector.broadcast %192 : vector<5x1xf32> to vector<5x48xf32>
    %194 = arith.subf %184, %193 : vector<5x48xf32>
    %195 = arith.mulf %194, %194 : vector<5x48xf32>
    %cst_116 = arith.constant dense<0.000000e+00> : vector<5xf32>
    %196 = vector.multi_reduction <add>, %195, %cst_116 [1] : vector<5x48xf32> to vector<5xf32>
    %197 = vector.shape_cast %196 : vector<5xf32> to vector<5x1xf32>
    %cst_117 = arith.constant 4.800000e+01 : f32
    %198 = vector.broadcast %cst_117 : f32 to vector<5x1xf32>
    %199 = arith.divf %197, %198 : vector<5x1xf32>
    %cst_118 = arith.constant 9.99999996E-13 : f32
    %200 = vector.broadcast %cst_118 : f32 to vector<5x1xf32>
    %201 = arith.addf %199, %200 : vector<5x1xf32>
    %202 = math.rsqrt %201 : vector<5x1xf32>
    %203 = vector.broadcast %202 : vector<5x1xf32> to vector<5x48xf32>
    %204 = arith.mulf %194, %203 : vector<5x48xf32>
    %205 = vector.broadcast %186 : vector<1x48xf32> to vector<5x48xf32>
    %206 = arith.mulf %204, %205 : vector<5x48xf32>
    %207 = vector.broadcast %188 : vector<1x48xf32> to vector<5x48xf32>
    %208 = arith.addf %206, %207 : vector<5x48xf32>
    %c1_119 = arith.constant 1 : index
    %c0_120 = arith.constant 0 : index
    %c0_121 = arith.constant 0 : index
    %209 = vector.load %arg4[%c1_119, %c0_120, %c0_121] : memref<2x48x144xf32, #tpu.memory_space<vmem>>, vector<1x48x144xf32>
    %210 = vector.shape_cast %209 : vector<1x48x144xf32> to vector<48x144xf32>
    %cst_122 = arith.constant dense<0.000000e+00> : vector<5x144xf32>
    %211 = tpu.matmul %208, %210, %cst_122 {dimension_numbers = #tpu.dot_dimension_numbers<[1], [0], [0], [1], [0, 0, 1, 1], [], []>} : vector<5x48xf32>, vector<48x144xf32>, vector<5x144xf32> -> vector<5x144xf32>
    %c1_123 = arith.constant 1 : index
    %c0_124 = arith.constant 0 : index
    %c0_125 = arith.constant 0 : index
    %212 = vector.load %arg5[%c1_123, %c0_124, %c0_125] : memref<2x1x144xf32, #tpu.memory_space<vmem>>, vector<1x1x144xf32>
    %213 = vector.shape_cast %212 : vector<1x1x144xf32> to vector<1x144xf32>
    %214 = vector.broadcast %213 : vector<1x144xf32> to vector<5x144xf32>
    %215 = arith.addf %211, %214 : vector<5x144xf32>
    %c0_126 = arith.constant 0 : index
    %c0_127 = arith.constant 0 : index
    %216 = vector.load %arg20[%c0_126, %c0_127] : memref<5x144xf32, #tpu.memory_space<vmem>>, vector<5x144xf32>
    tpu.vector_store %arg20[%c0_126, %c0_127], %215 {strides = array<i32>} : memref<5x144xf32, #tpu.memory_space<vmem>>, vector<5x144xf32>,
    %c0_128 = arith.constant 0 : index
    %c0_129 = arith.constant 0 : index
    %217 = vector.load %arg20[%c0_128, %c0_129] : memref<5x144xf32, #tpu.memory_space<vmem>>, vector<5x16xf32>
    %c0_130 = arith.constant 0 : index
    %c48_131 = arith.constant 48 : index
    %218 = vector.load %arg20[%c0_130, %c48_131] : memref<5x144xf32, #tpu.memory_space<vmem>>, vector<5x16xf32>
    %c0_132 = arith.constant 0 : index
    %c96_133 = arith.constant 96 : index
    %219 = vector.load %arg20[%c0_132, %c96_133] : memref<5x144xf32, #tpu.memory_space<vmem>>, vector<5x16xf32>
    %220 = tpu.transpose %218, [1, 0] : vector<5x16xf32> -> vector<16x5xf32>
    %cst_134 = arith.constant dense<0.000000e+00> : vector<5x5xf32>
    %221 = tpu.matmul %217, %220, %cst_134 {dimension_numbers = #tpu.dot_dimension_numbers<[1], [0], [0], [1], [0, 0, 1, 1], [], []>} : vector<5x16xf32>, vector<16x5xf32>, vector<5x5xf32> -> vector<5x5xf32>
    %cst_135 = arith.constant 2.500000e-01 : f32
    %222 = vector.broadcast %cst_135 : f32 to vector<5x5xf32>
    %223 = arith.mulf %221, %222 : vector<5x5xf32>
    %cst_136 = arith.constant dense<0xFF800000> : vector<5xf32>
    %224 = vector.multi_reduction <maximumf>, %223, %cst_136 [1] : vector<5x5xf32> to vector<5xf32>
    %225 = vector.shape_cast %224 : vector<5xf32> to vector<5x1xf32>
    %226 = vector.broadcast %225 : vector<5x1xf32> to vector<5x5xf32>
    %227 = arith.subf %223, %226 : vector<5x5xf32>
    %228 = math.exp %227 : vector<5x5xf32>
    %cst_137 = arith.constant dense<0.000000e+00> : vector<5xf32>
    %229 = vector.multi_reduction <add>, %228, %cst_137 [1] : vector<5x5xf32> to vector<5xf32>
    %230 = vector.shape_cast %229 : vector<5xf32> to vector<5x1xf32>
    %231 = vector.broadcast %230 : vector<5x1xf32> to vector<5x5xf32>
    %232 = arith.divf %228, %231 : vector<5x5xf32>
    %cst_138 = arith.constant dense<0.000000e+00> : vector<5x16xf32>
    %233 = tpu.matmul %232, %219, %cst_138 {dimension_numbers = #tpu.dot_dimension_numbers<[1], [0], [0], [1], [0, 0, 1, 1], [], []>} : vector<5x5xf32>, vector<5x16xf32>, vector<5x16xf32> -> vector<5x16xf32>
    %c3 = arith.constant 3 : index
    %c0_139 = arith.constant 0 : index
    %c0_140 = arith.constant 0 : index
    %234 = vector.load %arg6[%c3, %c0_139, %c0_140] : memref<6x16x48xf32, #tpu.memory_space<vmem>>, vector<1x16x48xf32>
    %235 = vector.shape_cast %234 : vector<1x16x48xf32> to vector<16x48xf32>
    %cst_141 = arith.constant dense<0.000000e+00> : vector<5x48xf32>
    %236 = tpu.matmul %233, %235, %cst_141 {dimension_numbers = #tpu.dot_dimension_numbers<[1], [0], [0], [1], [0, 0, 1, 1], [], []>} : vector<5x16xf32>, vector<16x48xf32>, vector<5x48xf32> -> vector<5x48xf32>
    %c0_142 = arith.constant 0 : index
    %c16_143 = arith.constant 16 : index
    %237 = vector.load %arg20[%c0_142, %c16_143] : memref<5x144xf32, #tpu.memory_space<vmem>>, vector<5x16xf32>
    %c0_144 = arith.constant 0 : index
    %c64_145 = arith.constant 64 : index
    %238 = vector.load %arg20[%c0_144, %c64_145] : memref<5x144xf32, #tpu.memory_space<vmem>>, vector<5x16xf32>
    %c0_146 = arith.constant 0 : index
    %c112_147 = arith.constant 112 : index
    %239 = vector.load %arg20[%c0_146, %c112_147] : memref<5x144xf32, #tpu.memory_space<vmem>>, vector<5x16xf32>
    %240 = tpu.transpose %238, [1, 0] : vector<5x16xf32> -> vector<16x5xf32>
    %cst_148 = arith.constant dense<0.000000e+00> : vector<5x5xf32>
    %241 = tpu.matmul %237, %240, %cst_148 {dimension_numbers = #tpu.dot_dimension_numbers<[1], [0], [0], [1], [0, 0, 1, 1], [], []>} : vector<5x16xf32>, vector<16x5xf32>, vector<5x5xf32> -> vector<5x5xf32>
    %cst_149 = arith.constant 2.500000e-01 : f32
    %242 = vector.broadcast %cst_149 : f32 to vector<5x5xf32>
    %243 = arith.mulf %241, %242 : vector<5x5xf32>
    %cst_150 = arith.constant dense<0xFF800000> : vector<5xf32>
    %244 = vector.multi_reduction <maximumf>, %243, %cst_150 [1] : vector<5x5xf32> to vector<5xf32>
    %245 = vector.shape_cast %244 : vector<5xf32> to vector<5x1xf32>
    %246 = vector.broadcast %245 : vector<5x1xf32> to vector<5x5xf32>
    %247 = arith.subf %243, %246 : vector<5x5xf32>
    %248 = math.exp %247 : vector<5x5xf32>
    %cst_151 = arith.constant dense<0.000000e+00> : vector<5xf32>
    %249 = vector.multi_reduction <add>, %248, %cst_151 [1] : vector<5x5xf32> to vector<5xf32>
    %250 = vector.shape_cast %249 : vector<5xf32> to vector<5x1xf32>
    %251 = vector.broadcast %250 : vector<5x1xf32> to vector<5x5xf32>
    %252 = arith.divf %248, %251 : vector<5x5xf32>
    %cst_152 = arith.constant dense<0.000000e+00> : vector<5x16xf32>
    %253 = tpu.matmul %252, %239, %cst_152 {dimension_numbers = #tpu.dot_dimension_numbers<[1], [0], [0], [1], [0, 0, 1, 1], [], []>} : vector<5x5xf32>, vector<5x16xf32>, vector<5x16xf32> -> vector<5x16xf32>
    %c4 = arith.constant 4 : index
    %c0_153 = arith.constant 0 : index
    %c0_154 = arith.constant 0 : index
    %254 = vector.load %arg6[%c4, %c0_153, %c0_154] : memref<6x16x48xf32, #tpu.memory_space<vmem>>, vector<1x16x48xf32>
    %255 = vector.shape_cast %254 : vector<1x16x48xf32> to vector<16x48xf32>
    %cst_155 = arith.constant dense<0.000000e+00> : vector<5x48xf32>
    %256 = tpu.matmul %253, %255, %cst_155 {dimension_numbers = #tpu.dot_dimension_numbers<[1], [0], [0], [1], [0, 0, 1, 1], [], []>} : vector<5x16xf32>, vector<16x48xf32>, vector<5x48xf32> -> vector<5x48xf32>
    %257 = arith.addf %236, %256 : vector<5x48xf32>
    %c0_156 = arith.constant 0 : index
    %c32_157 = arith.constant 32 : index
    %258 = vector.load %arg20[%c0_156, %c32_157] : memref<5x144xf32, #tpu.memory_space<vmem>>, vector<5x16xf32>
    %c0_158 = arith.constant 0 : index
    %c80_159 = arith.constant 80 : index
    %259 = vector.load %arg20[%c0_158, %c80_159] : memref<5x144xf32, #tpu.memory_space<vmem>>, vector<5x16xf32>
    %c0_160 = arith.constant 0 : index
    %c128_161 = arith.constant 128 : index
    %260 = vector.load %arg20[%c0_160, %c128_161] : memref<5x144xf32, #tpu.memory_space<vmem>>, vector<5x16xf32>
    %261 = tpu.transpose %259, [1, 0] : vector<5x16xf32> -> vector<16x5xf32>
    %cst_162 = arith.constant dense<0.000000e+00> : vector<5x5xf32>
    %262 = tpu.matmul %258, %261, %cst_162 {dimension_numbers = #tpu.dot_dimension_numbers<[1], [0], [0], [1], [0, 0, 1, 1], [], []>} : vector<5x16xf32>, vector<16x5xf32>, vector<5x5xf32> -> vector<5x5xf32>
    %cst_163 = arith.constant 2.500000e-01 : f32
    %263 = vector.broadcast %cst_163 : f32 to vector<5x5xf32>
    %264 = arith.mulf %262, %263 : vector<5x5xf32>
    %cst_164 = arith.constant dense<0xFF800000> : vector<5xf32>
    %265 = vector.multi_reduction <maximumf>, %264, %cst_164 [1] : vector<5x5xf32> to vector<5xf32>
    %266 = vector.shape_cast %265 : vector<5xf32> to vector<5x1xf32>
    %267 = vector.broadcast %266 : vector<5x1xf32> to vector<5x5xf32>
    %268 = arith.subf %264, %267 : vector<5x5xf32>
    %269 = math.exp %268 : vector<5x5xf32>
    %cst_165 = arith.constant dense<0.000000e+00> : vector<5xf32>
    %270 = vector.multi_reduction <add>, %269, %cst_165 [1] : vector<5x5xf32> to vector<5xf32>
    %271 = vector.shape_cast %270 : vector<5xf32> to vector<5x1xf32>
    %272 = vector.broadcast %271 : vector<5x1xf32> to vector<5x5xf32>
    %273 = arith.divf %269, %272 : vector<5x5xf32>
    %cst_166 = arith.constant dense<0.000000e+00> : vector<5x16xf32>
    %274 = tpu.matmul %273, %260, %cst_166 {dimension_numbers = #tpu.dot_dimension_numbers<[1], [0], [0], [1], [0, 0, 1, 1], [], []>} : vector<5x5xf32>, vector<5x16xf32>, vector<5x16xf32> -> vector<5x16xf32>
    %c5 = arith.constant 5 : index
    %c0_167 = arith.constant 0 : index
    %c0_168 = arith.constant 0 : index
    %275 = vector.load %arg6[%c5, %c0_167, %c0_168] : memref<6x16x48xf32, #tpu.memory_space<vmem>>, vector<1x16x48xf32>
    %276 = vector.shape_cast %275 : vector<1x16x48xf32> to vector<16x48xf32>
    %cst_169 = arith.constant dense<0.000000e+00> : vector<5x48xf32>
    %277 = tpu.matmul %274, %276, %cst_169 {dimension_numbers = #tpu.dot_dimension_numbers<[1], [0], [0], [1], [0, 0, 1, 1], [], []>} : vector<5x16xf32>, vector<16x48xf32>, vector<5x48xf32> -> vector<5x48xf32>
    %278 = arith.addf %257, %277 : vector<5x48xf32>
    %279 = arith.addf %184, %278 : vector<5x48xf32>
    %c1_170 = arith.constant 1 : index
    %c0_171 = arith.constant 0 : index
    %c0_172 = arith.constant 0 : index
    %280 = vector.load %arg7[%c1_170, %c0_171, %c0_172] : memref<2x1x48xf32, #tpu.memory_space<vmem>>, vector<1x1x48xf32>
    %281 = vector.shape_cast %280 : vector<1x1x48xf32> to vector<1x48xf32>
    %282 = vector.broadcast %281 : vector<1x48xf32> to vector<5x48xf32>
    %283 = arith.addf %279, %282 : vector<5x48xf32>
    %c1_173 = arith.constant 1 : index
    %c0_174 = arith.constant 0 : index
    %c0_175 = arith.constant 0 : index
    %284 = vector.load %arg8[%c1_173, %c0_174, %c0_175] : memref<2x1x48xf32, #tpu.memory_space<vmem>>, vector<1x1x48xf32>
    %285 = vector.shape_cast %284 : vector<1x1x48xf32> to vector<1x48xf32>
    %c1_176 = arith.constant 1 : index
    %c0_177 = arith.constant 0 : index
    %c0_178 = arith.constant 0 : index
    %286 = vector.load %arg9[%c1_176, %c0_177, %c0_178] : memref<2x1x48xf32, #tpu.memory_space<vmem>>, vector<1x1x48xf32>
    %287 = vector.shape_cast %286 : vector<1x1x48xf32> to vector<1x48xf32>
    %cst_179 = arith.constant dense<0.000000e+00> : vector<5xf32>
    %288 = vector.multi_reduction <add>, %283, %cst_179 [1] : vector<5x48xf32> to vector<5xf32>
    %289 = vector.shape_cast %288 : vector<5xf32> to vector<5x1xf32>
    %cst_180 = arith.constant 4.800000e+01 : f32
    %290 = vector.broadcast %cst_180 : f32 to vector<5x1xf32>
    %291 = arith.divf %289, %290 : vector<5x1xf32>
    %292 = vector.broadcast %291 : vector<5x1xf32> to vector<5x48xf32>
    %293 = arith.subf %283, %292 : vector<5x48xf32>
    %294 = arith.mulf %293, %293 : vector<5x48xf32>
    %cst_181 = arith.constant dense<0.000000e+00> : vector<5xf32>
    %295 = vector.multi_reduction <add>, %294, %cst_181 [1] : vector<5x48xf32> to vector<5xf32>
    %296 = vector.shape_cast %295 : vector<5xf32> to vector<5x1xf32>
    %cst_182 = arith.constant 4.800000e+01 : f32
    %297 = vector.broadcast %cst_182 : f32 to vector<5x1xf32>
    %298 = arith.divf %296, %297 : vector<5x1xf32>
    %cst_183 = arith.constant 9.99999996E-13 : f32
    %299 = vector.broadcast %cst_183 : f32 to vector<5x1xf32>
    %300 = arith.addf %298, %299 : vector<5x1xf32>
    %301 = math.rsqrt %300 : vector<5x1xf32>
    %302 = vector.broadcast %301 : vector<5x1xf32> to vector<5x48xf32>
    %303 = arith.mulf %293, %302 : vector<5x48xf32>
    %304 = vector.broadcast %285 : vector<1x48xf32> to vector<5x48xf32>
    %305 = arith.mulf %303, %304 : vector<5x48xf32>
    %306 = vector.broadcast %287 : vector<1x48xf32> to vector<5x48xf32>
    %307 = arith.addf %305, %306 : vector<5x48xf32>
    %c1_184 = arith.constant 1 : index
    %c0_185 = arith.constant 0 : index
    %c0_186 = arith.constant 0 : index
    %308 = vector.load %arg10[%c1_184, %c0_185, %c0_186] : memref<2x48x96xf32, #tpu.memory_space<vmem>>, vector<1x48x96xf32>
    %309 = vector.shape_cast %308 : vector<1x48x96xf32> to vector<48x96xf32>
    %cst_187 = arith.constant dense<0.000000e+00> : vector<5x96xf32>
    %310 = tpu.matmul %307, %309, %cst_187 {dimension_numbers = #tpu.dot_dimension_numbers<[1], [0], [0], [1], [0, 0, 1, 1], [], []>} : vector<5x48xf32>, vector<48x96xf32>, vector<5x96xf32> -> vector<5x96xf32>
    %c1_188 = arith.constant 1 : index
    %c0_189 = arith.constant 0 : index
    %c0_190 = arith.constant 0 : index
    %311 = vector.load %arg11[%c1_188, %c0_189, %c0_190] : memref<2x1x96xf32, #tpu.memory_space<vmem>>, vector<1x1x96xf32>
    %312 = vector.shape_cast %311 : vector<1x1x96xf32> to vector<1x96xf32>
    %313 = vector.broadcast %312 : vector<1x96xf32> to vector<5x96xf32>
    %314 = arith.addf %310, %313 : vector<5x96xf32>
    %cst_191 = arith.constant 5.000000e-01 : f32
    %315 = vector.broadcast %cst_191 : f32 to vector<5x96xf32>
    %316 = arith.mulf %315, %314 : vector<5x96xf32>
    %cst_192 = arith.constant 0.707106769 : f32
    %317 = vector.broadcast %cst_192 : f32 to vector<5x96xf32>
    %318 = arith.mulf %314, %317 : vector<5x96xf32>
    %cst_193 = arith.constant 0.000000e+00 : f32
    %319 = vector.broadcast %cst_193 : f32 to vector<5x96xf32>
    %320 = arith.cmpf oge, %318, %319 : vector<5x96xf32>
    %cst_194 = arith.constant 1.000000e+00 : f32
    %cst_195 = arith.constant -1.000000e+00 : f32
    %321 = vector.broadcast %cst_194 : f32 to vector<5x96xf32>
    %322 = vector.broadcast %cst_195 : f32 to vector<5x96xf32>
    %323 = arith.select %320, %321, %322 : vector<5x96xi1>, vector<5x96xf32>
    %324 = math.absf %318 : vector<5x96xf32>
    %cst_196 = arith.constant 0.327591091 : f32
    %325 = vector.broadcast %cst_196 : f32 to vector<5x96xf32>
    %326 = arith.mulf %325, %324 : vector<5x96xf32>
    %cst_197 = arith.constant 1.000000e+00 : f32
    %327 = vector.broadcast %cst_197 : f32 to vector<5x96xf32>
    %328 = arith.addf %327, %326 : vector<5x96xf32>
    %cst_198 = arith.constant 1.000000e+00 : f32
    %329 = vector.broadcast %cst_198 : f32 to vector<5x96xf32>
    %330 = arith.divf %329, %328 : vector<5x96xf32>
    %cst_199 = arith.constant 1.06140542 : f32
    %331 = vector.broadcast %cst_199 : f32 to vector<5x96xf32>
    %332 = arith.mulf %331, %330 : vector<5x96xf32>
    %cst_200 = arith.constant -1.45315206 : f32
    %333 = vector.broadcast %cst_200 : f32 to vector<5x96xf32>
    %334 = arith.addf %332, %333 : vector<5x96xf32>
    %335 = arith.mulf %334, %330 : vector<5x96xf32>
    %cst_201 = arith.constant 1.42141378 : f32
    %336 = vector.broadcast %cst_201 : f32 to vector<5x96xf32>
    %337 = arith.addf %335, %336 : vector<5x96xf32>
    %338 = arith.mulf %337, %330 : vector<5x96xf32>
    %cst_202 = arith.constant -0.284496725 : f32
    %339 = vector.broadcast %cst_202 : f32 to vector<5x96xf32>
    %340 = arith.addf %338, %339 : vector<5x96xf32>
    %341 = arith.mulf %340, %330 : vector<5x96xf32>
    %cst_203 = arith.constant 0.254829586 : f32
    %342 = vector.broadcast %cst_203 : f32 to vector<5x96xf32>
    %343 = arith.addf %341, %342 : vector<5x96xf32>
    %344 = arith.mulf %343, %330 : vector<5x96xf32>
    %cst_204 = arith.constant 0.000000e+00 : f32
    %345 = vector.broadcast %cst_204 : f32 to vector<5x96xf32>
    %346 = arith.subf %345, %324 : vector<5x96xf32>
    %347 = arith.mulf %346, %324 : vector<5x96xf32>
    %348 = math.exp %347 : vector<5x96xf32>
    %349 = arith.mulf %344, %348 : vector<5x96xf32>
    %cst_205 = arith.constant 1.000000e+00 : f32
    %350 = vector.broadcast %cst_205 : f32 to vector<5x96xf32>
    %351 = arith.subf %350, %349 : vector<5x96xf32>
    %352 = arith.mulf %323, %351 : vector<5x96xf32>
    %cst_206 = arith.constant 1.000000e+00 : f32
    %353 = vector.broadcast %cst_206 : f32 to vector<5x96xf32>
    %354 = arith.addf %353, %352 : vector<5x96xf32>
    %355 = arith.mulf %316, %354 : vector<5x96xf32>
    %c1_207 = arith.constant 1 : index
    %c0_208 = arith.constant 0 : index
    %c0_209 = arith.constant 0 : index
    %356 = vector.load %arg12[%c1_207, %c0_208, %c0_209] : memref<2x96x48xf32, #tpu.memory_space<vmem>>, vector<1x96x48xf32>
    %357 = vector.shape_cast %356 : vector<1x96x48xf32> to vector<96x48xf32>
    %cst_210 = arith.constant dense<0.000000e+00> : vector<5x48xf32>
    %358 = tpu.matmul %355, %357, %cst_210 {dimension_numbers = #tpu.dot_dimension_numbers<[1], [0], [0], [1], [0, 0, 1, 1], [], []>} : vector<5x96xf32>, vector<96x48xf32>, vector<5x48xf32> -> vector<5x48xf32>
    %359 = arith.addf %283, %358 : vector<5x48xf32>
    %c1_211 = arith.constant 1 : index
    %c0_212 = arith.constant 0 : index
    %c0_213 = arith.constant 0 : index
    %360 = vector.load %arg13[%c1_211, %c0_212, %c0_213] : memref<2x1x48xf32, #tpu.memory_space<vmem>>, vector<1x1x48xf32>
    %361 = vector.shape_cast %360 : vector<1x1x48xf32> to vector<1x48xf32>
    %362 = vector.broadcast %361 : vector<1x48xf32> to vector<5x48xf32>
    %363 = arith.addf %359, %362 : vector<5x48xf32>
    %c0_214 = arith.constant 0 : index
    %c0_215 = arith.constant 0 : index
    %c0_216 = arith.constant 0 : index
    %364 = vector.load %arg18[%c0_214, %c0_215, %c0_216] : memref<2x5x48xf32, #tpu.memory_space<vmem>>, vector<1x5x48xf32>
    %365 = vector.shape_cast %364 : vector<1x5x48xf32> to vector<5x48xf32>
    %366 = vector.shape_cast %363 : vector<5x48xf32> to vector<1x5x48xf32>
    tpu.vector_store %arg18[%c0_214, %c0_215, %c0_216], %366 {strides = array<i32>} : memref<2x5x48xf32, #tpu.memory_space<vmem>>, vector<1x5x48xf32>,
    %cst_217 = arith.constant dense<0.000000e+00> : vector<5xf32>
    %367 = vector.multi_reduction <add>, %363, %cst_217 [1] : vector<5x48xf32> to vector<5xf32>
    %368 = vector.shape_cast %367 : vector<5xf32> to vector<5x1xf32>
    %cst_218 = arith.constant 4.800000e+01 : f32
    %369 = vector.broadcast %cst_218 : f32 to vector<5x1xf32>
    %370 = arith.divf %368, %369 : vector<5x1xf32>
    %371 = vector.broadcast %370 : vector<5x1xf32> to vector<5x48xf32>
    %372 = arith.subf %363, %371 : vector<5x48xf32>
    %373 = arith.mulf %372, %372 : vector<5x48xf32>
    %cst_219 = arith.constant dense<0.000000e+00> : vector<5xf32>
    %374 = vector.multi_reduction <add>, %373, %cst_219 [1] : vector<5x48xf32> to vector<5xf32>
    %375 = vector.shape_cast %374 : vector<5xf32> to vector<5x1xf32>
    %cst_220 = arith.constant 4.800000e+01 : f32
    %376 = vector.broadcast %cst_220 : f32 to vector<5x1xf32>
    %377 = arith.divf %375, %376 : vector<5x1xf32>
    %cst_221 = arith.constant 9.99999996E-13 : f32
    %378 = vector.broadcast %cst_221 : f32 to vector<5x1xf32>
    %379 = arith.addf %377, %378 : vector<5x1xf32>
    %380 = math.rsqrt %379 : vector<5x1xf32>
    %381 = vector.broadcast %380 : vector<5x1xf32> to vector<5x48xf32>
    %382 = arith.mulf %372, %381 : vector<5x48xf32>
    %383 = vector.broadcast %0 : vector<1x48xf32> to vector<5x48xf32>
    %384 = arith.mulf %382, %383 : vector<5x48xf32>
    %385 = vector.broadcast %1 : vector<1x48xf32> to vector<5x48xf32>
    %386 = arith.addf %384, %385 : vector<5x48xf32>
    %cst_222 = arith.constant dense<0.000000e+00> : vector<5x48xf32>
    %387 = tpu.matmul %386, %2, %cst_222 {dimension_numbers = #tpu.dot_dimension_numbers<[1], [0], [0], [1], [0, 0, 1, 1], [], []>} : vector<5x48xf32>, vector<48x48xf32>, vector<5x48xf32> -> vector<5x48xf32>
    %388 = vector.broadcast %3 : vector<1x48xf32> to vector<5x48xf32>
    %389 = arith.addf %387, %388 : vector<5x48xf32>
    %c0_223 = arith.constant 0 : index
    %c0_224 = arith.constant 0 : index
    %c0_225 = arith.constant 0 : index
    %390 = vector.load %arg19[%c0_223, %c0_224, %c0_225] : memref<2x5x48xf32, #tpu.memory_space<vmem>>, vector<1x5x48xf32>
    %391 = vector.shape_cast %390 : vector<1x5x48xf32> to vector<5x48xf32>
    %392 = vector.shape_cast %389 : vector<5x48xf32> to vector<1x5x48xf32>
    tpu.vector_store %arg19[%c0_223, %c0_224, %c0_225], %392 {strides = array<i32>} : memref<2x5x48xf32, #tpu.memory_space<vmem>>, vector<1x5x48xf32>,
    %c1_226 = arith.constant 1 : index
    %c0_227 = arith.constant 0 : index
    %c0_228 = arith.constant 0 : index
    %393 = vector.load %arg1[%c1_226, %c0_227, %c0_228] : memref<2x5x48xf32, #tpu.memory_space<vmem>>, vector<1x5x48xf32>
    %394 = vector.shape_cast %393 : vector<1x5x48xf32> to vector<5x48xf32>
    %c0_229 = arith.constant 0 : index
    %c0_230 = arith.constant 0 : index
    %c0_231 = arith.constant 0 : index
    %395 = vector.load %arg2[%c0_229, %c0_230, %c0_231] : memref<2x1x48xf32, #tpu.memory_space<vmem>>, vector<1x1x48xf32>
    %396 = vector.shape_cast %395 : vector<1x1x48xf32> to vector<1x48xf32>
    %c0_232 = arith.constant 0 : index
    %c0_233 = arith.constant 0 : index
    %c0_234 = arith.constant 0 : index
    %397 = vector.load %arg3[%c0_232, %c0_233, %c0_234] : memref<2x1x48xf32, #tpu.memory_space<vmem>>, vector<1x1x48xf32>
    %398 = vector.shape_cast %397 : vector<1x1x48xf32> to vector<1x48xf32>
    %cst_235 = arith.constant dense<0.000000e+00> : vector<5xf32>
    %399 = vector.multi_reduction <add>, %394, %cst_235 [1] : vector<5x48xf32> to vector<5xf32>
    %400 = vector.shape_cast %399 : vector<5xf32> to vector<5x1xf32>
    %cst_236 = arith.constant 4.800000e+01 : f32
    %401 = vector.broadcast %cst_236 : f32 to vector<5x1xf32>
    %402 = arith.divf %400, %401 : vector<5x1xf32>
    %403 = vector.broadcast %402 : vector<5x1xf32> to vector<5x48xf32>
    %404 = arith.subf %394, %403 : vector<5x48xf32>
    %405 = arith.mulf %404, %404 : vector<5x48xf32>
    %cst_237 = arith.constant dense<0.000000e+00> : vector<5xf32>
    %406 = vector.multi_reduction <add>, %405, %cst_237 [1] : vector<5x48xf32> to vector<5xf32>
    %407 = vector.shape_cast %406 : vector<5xf32> to vector<5x1xf32>
    %cst_238 = arith.constant 4.800000e+01 : f32
    %408 = vector.broadcast %cst_238 : f32 to vector<5x1xf32>
    %409 = arith.divf %407, %408 : vector<5x1xf32>
    %cst_239 = arith.constant 9.99999996E-13 : f32
    %410 = vector.broadcast %cst_239 : f32 to vector<5x1xf32>
    %411 = arith.addf %409, %410 : vector<5x1xf32>
    %412 = math.rsqrt %411 : vector<5x1xf32>
    %413 = vector.broadcast %412 : vector<5x1xf32> to vector<5x48xf32>
    %414 = arith.mulf %404, %413 : vector<5x48xf32>
    %415 = vector.broadcast %396 : vector<1x48xf32> to vector<5x48xf32>
    %416 = arith.mulf %414, %415 : vector<5x48xf32>
    %417 = vector.broadcast %398 : vector<1x48xf32> to vector<5x48xf32>
    %418 = arith.addf %416, %417 : vector<5x48xf32>
    %c0_240 = arith.constant 0 : index
    %c0_241 = arith.constant 0 : index
    %c0_242 = arith.constant 0 : index
    %419 = vector.load %arg4[%c0_240, %c0_241, %c0_242] : memref<2x48x144xf32, #tpu.memory_space<vmem>>, vector<1x48x144xf32>
    %420 = vector.shape_cast %419 : vector<1x48x144xf32> to vector<48x144xf32>
    %cst_243 = arith.constant dense<0.000000e+00> : vector<5x144xf32>
    %421 = tpu.matmul %418, %420, %cst_243 {dimension_numbers = #tpu.dot_dimension_numbers<[1], [0], [0], [1], [0, 0, 1, 1], [], []>} : vector<5x48xf32>, vector<48x144xf32>, vector<5x144xf32> -> vector<5x144xf32>
    %c0_244 = arith.constant 0 : index
    %c0_245 = arith.constant 0 : index
    %c0_246 = arith.constant 0 : index
    %422 = vector.load %arg5[%c0_244, %c0_245, %c0_246] : memref<2x1x144xf32, #tpu.memory_space<vmem>>, vector<1x1x144xf32>
    %423 = vector.shape_cast %422 : vector<1x1x144xf32> to vector<1x144xf32>
    %424 = vector.broadcast %423 : vector<1x144xf32> to vector<5x144xf32>
    %425 = arith.addf %421, %424 : vector<5x144xf32>
    %c0_247 = arith.constant 0 : index
    %c0_248 = arith.constant 0 : index
    %426 = vector.load %arg20[%c0_247, %c0_248] : memref<5x144xf32, #tpu.memory_space<vmem>>, vector<5x144xf32>
    tpu.vector_store %arg20[%c0_247, %c0_248], %425 {strides = array<i32>} : memref<5x144xf32, #tpu.memory_space<vmem>>, vector<5x144xf32>,
    %c0_249 = arith.constant 0 : index
    %c0_250 = arith.constant 0 : index
    %427 = vector.load %arg20[%c0_249, %c0_250] : memref<5x144xf32, #tpu.memory_space<vmem>>, vector<5x16xf32>
    %c0_251 = arith.constant 0 : index
    %c48_252 = arith.constant 48 : index
    %428 = vector.load %arg20[%c0_251, %c48_252] : memref<5x144xf32, #tpu.memory_space<vmem>>, vector<5x16xf32>
    %c0_253 = arith.constant 0 : index
    %c96_254 = arith.constant 96 : index
    %429 = vector.load %arg20[%c0_253, %c96_254] : memref<5x144xf32, #tpu.memory_space<vmem>>, vector<5x16xf32>
    %430 = tpu.transpose %428, [1, 0] : vector<5x16xf32> -> vector<16x5xf32>
    %cst_255 = arith.constant dense<0.000000e+00> : vector<5x5xf32>
    %431 = tpu.matmul %427, %430, %cst_255 {dimension_numbers = #tpu.dot_dimension_numbers<[1], [0], [0], [1], [0, 0, 1, 1], [], []>} : vector<5x16xf32>, vector<16x5xf32>, vector<5x5xf32> -> vector<5x5xf32>
    %cst_256 = arith.constant 2.500000e-01 : f32
    %432 = vector.broadcast %cst_256 : f32 to vector<5x5xf32>
    %433 = arith.mulf %431, %432 : vector<5x5xf32>
    %cst_257 = arith.constant dense<0xFF800000> : vector<5xf32>
    %434 = vector.multi_reduction <maximumf>, %433, %cst_257 [1] : vector<5x5xf32> to vector<5xf32>
    %435 = vector.shape_cast %434 : vector<5xf32> to vector<5x1xf32>
    %436 = vector.broadcast %435 : vector<5x1xf32> to vector<5x5xf32>
    %437 = arith.subf %433, %436 : vector<5x5xf32>
    %438 = math.exp %437 : vector<5x5xf32>
    %cst_258 = arith.constant dense<0.000000e+00> : vector<5xf32>
    %439 = vector.multi_reduction <add>, %438, %cst_258 [1] : vector<5x5xf32> to vector<5xf32>
    %440 = vector.shape_cast %439 : vector<5xf32> to vector<5x1xf32>
    %441 = vector.broadcast %440 : vector<5x1xf32> to vector<5x5xf32>
    %442 = arith.divf %438, %441 : vector<5x5xf32>
    %cst_259 = arith.constant dense<0.000000e+00> : vector<5x16xf32>
    %443 = tpu.matmul %442, %429, %cst_259 {dimension_numbers = #tpu.dot_dimension_numbers<[1], [0], [0], [1], [0, 0, 1, 1], [], []>} : vector<5x5xf32>, vector<5x16xf32>, vector<5x16xf32> -> vector<5x16xf32>
    %c0_260 = arith.constant 0 : index
    %c0_261 = arith.constant 0 : index
    %c0_262 = arith.constant 0 : index
    %444 = vector.load %arg6[%c0_260, %c0_261, %c0_262] : memref<6x16x48xf32, #tpu.memory_space<vmem>>, vector<1x16x48xf32>
    %445 = vector.shape_cast %444 : vector<1x16x48xf32> to vector<16x48xf32>
    %cst_263 = arith.constant dense<0.000000e+00> : vector<5x48xf32>
    %446 = tpu.matmul %443, %445, %cst_263 {dimension_numbers = #tpu.dot_dimension_numbers<[1], [0], [0], [1], [0, 0, 1, 1], [], []>} : vector<5x16xf32>, vector<16x48xf32>, vector<5x48xf32> -> vector<5x48xf32>
    %c0_264 = arith.constant 0 : index
    %c16_265 = arith.constant 16 : index
    %447 = vector.load %arg20[%c0_264, %c16_265] : memref<5x144xf32, #tpu.memory_space<vmem>>, vector<5x16xf32>
    %c0_266 = arith.constant 0 : index
    %c64_267 = arith.constant 64 : index
    %448 = vector.load %arg20[%c0_266, %c64_267] : memref<5x144xf32, #tpu.memory_space<vmem>>, vector<5x16xf32>
    %c0_268 = arith.constant 0 : index
    %c112_269 = arith.constant 112 : index
    %449 = vector.load %arg20[%c0_268, %c112_269] : memref<5x144xf32, #tpu.memory_space<vmem>>, vector<5x16xf32>
    %450 = tpu.transpose %448, [1, 0] : vector<5x16xf32> -> vector<16x5xf32>
    %cst_270 = arith.constant dense<0.000000e+00> : vector<5x5xf32>
    %451 = tpu.matmul %447, %450, %cst_270 {dimension_numbers = #tpu.dot_dimension_numbers<[1], [0], [0], [1], [0, 0, 1, 1], [], []>} : vector<5x16xf32>, vector<16x5xf32>, vector<5x5xf32> -> vector<5x5xf32>
    %cst_271 = arith.constant 2.500000e-01 : f32
    %452 = vector.broadcast %cst_271 : f32 to vector<5x5xf32>
    %453 = arith.mulf %451, %452 : vector<5x5xf32>
    %cst_272 = arith.constant dense<0xFF800000> : vector<5xf32>
    %454 = vector.multi_reduction <maximumf>, %453, %cst_272 [1] : vector<5x5xf32> to vector<5xf32>
    %455 = vector.shape_cast %454 : vector<5xf32> to vector<5x1xf32>
    %456 = vector.broadcast %455 : vector<5x1xf32> to vector<5x5xf32>
    %457 = arith.subf %453, %456 : vector<5x5xf32>
    %458 = math.exp %457 : vector<5x5xf32>
    %cst_273 = arith.constant dense<0.000000e+00> : vector<5xf32>
    %459 = vector.multi_reduction <add>, %458, %cst_273 [1] : vector<5x5xf32> to vector<5xf32>
    %460 = vector.shape_cast %459 : vector<5xf32> to vector<5x1xf32>
    %461 = vector.broadcast %460 : vector<5x1xf32> to vector<5x5xf32>
    %462 = arith.divf %458, %461 : vector<5x5xf32>
    %cst_274 = arith.constant dense<0.000000e+00> : vector<5x16xf32>
    %463 = tpu.matmul %462, %449, %cst_274 {dimension_numbers = #tpu.dot_dimension_numbers<[1], [0], [0], [1], [0, 0, 1, 1], [], []>} : vector<5x5xf32>, vector<5x16xf32>, vector<5x16xf32> -> vector<5x16xf32>
    %c1_275 = arith.constant 1 : index
    %c0_276 = arith.constant 0 : index
    %c0_277 = arith.constant 0 : index
    %464 = vector.load %arg6[%c1_275, %c0_276, %c0_277] : memref<6x16x48xf32, #tpu.memory_space<vmem>>, vector<1x16x48xf32>
    %465 = vector.shape_cast %464 : vector<1x16x48xf32> to vector<16x48xf32>
    %cst_278 = arith.constant dense<0.000000e+00> : vector<5x48xf32>
    %466 = tpu.matmul %463, %465, %cst_278 {dimension_numbers = #tpu.dot_dimension_numbers<[1], [0], [0], [1], [0, 0, 1, 1], [], []>} : vector<5x16xf32>, vector<16x48xf32>, vector<5x48xf32> -> vector<5x48xf32>
    %467 = arith.addf %446, %466 : vector<5x48xf32>
    %c0_279 = arith.constant 0 : index
    %c32_280 = arith.constant 32 : index
    %468 = vector.load %arg20[%c0_279, %c32_280] : memref<5x144xf32, #tpu.memory_space<vmem>>, vector<5x16xf32>
    %c0_281 = arith.constant 0 : index
    %c80_282 = arith.constant 80 : index
    %469 = vector.load %arg20[%c0_281, %c80_282] : memref<5x144xf32, #tpu.memory_space<vmem>>, vector<5x16xf32>
    %c0_283 = arith.constant 0 : index
    %c128_284 = arith.constant 128 : index
    %470 = vector.load %arg20[%c0_283, %c128_284] : memref<5x144xf32, #tpu.memory_space<vmem>>, vector<5x16xf32>
    %471 = tpu.transpose %469, [1, 0] : vector<5x16xf32> -> vector<16x5xf32>
    %cst_285 = arith.constant dense<0.000000e+00> : vector<5x5xf32>
    %472 = tpu.matmul %468, %471, %cst_285 {dimension_numbers = #tpu.dot_dimension_numbers<[1], [0], [0], [1], [0, 0, 1, 1], [], []>} : vector<5x16xf32>, vector<16x5xf32>, vector<5x5xf32> -> vector<5x5xf32>
    %cst_286 = arith.constant 2.500000e-01 : f32
    %473 = vector.broadcast %cst_286 : f32 to vector<5x5xf32>
    %474 = arith.mulf %472, %473 : vector<5x5xf32>
    %cst_287 = arith.constant dense<0xFF800000> : vector<5xf32>
    %475 = vector.multi_reduction <maximumf>, %474, %cst_287 [1] : vector<5x5xf32> to vector<5xf32>
    %476 = vector.shape_cast %475 : vector<5xf32> to vector<5x1xf32>
    %477 = vector.broadcast %476 : vector<5x1xf32> to vector<5x5xf32>
    %478 = arith.subf %474, %477 : vector<5x5xf32>
    %479 = math.exp %478 : vector<5x5xf32>
    %cst_288 = arith.constant dense<0.000000e+00> : vector<5xf32>
    %480 = vector.multi_reduction <add>, %479, %cst_288 [1] : vector<5x5xf32> to vector<5xf32>
    %481 = vector.shape_cast %480 : vector<5xf32> to vector<5x1xf32>
    %482 = vector.broadcast %481 : vector<5x1xf32> to vector<5x5xf32>
    %483 = arith.divf %479, %482 : vector<5x5xf32>
    %cst_289 = arith.constant dense<0.000000e+00> : vector<5x16xf32>
    %484 = tpu.matmul %483, %470, %cst_289 {dimension_numbers = #tpu.dot_dimension_numbers<[1], [0], [0], [1], [0, 0, 1, 1], [], []>} : vector<5x5xf32>, vector<5x16xf32>, vector<5x16xf32> -> vector<5x16xf32>
    %c2_290 = arith.constant 2 : index
    %c0_291 = arith.constant 0 : index
    %c0_292 = arith.constant 0 : index
    %485 = vector.load %arg6[%c2_290, %c0_291, %c0_292] : memref<6x16x48xf32, #tpu.memory_space<vmem>>, vector<1x16x48xf32>
    %486 = vector.shape_cast %485 : vector<1x16x48xf32> to vector<16x48xf32>
    %cst_293 = arith.constant dense<0.000000e+00> : vector<5x48xf32>
    %487 = tpu.matmul %484, %486, %cst_293 {dimension_numbers = #tpu.dot_dimension_numbers<[1], [0], [0], [1], [0, 0, 1, 1], [], []>} : vector<5x16xf32>, vector<16x48xf32>, vector<5x48xf32> -> vector<5x48xf32>
    %488 = arith.addf %467, %487 : vector<5x48xf32>
    %489 = arith.addf %394, %488 : vector<5x48xf32>
    %c0_294 = arith.constant 0 : index
    %c0_295 = arith.constant 0 : index
    %c0_296 = arith.constant 0 : index
    %490 = vector.load %arg7[%c0_294, %c0_295, %c0_296] : memref<2x1x48xf32, #tpu.memory_space<vmem>>, vector<1x1x48xf32>
    %491 = vector.shape_cast %490 : vector<1x1x48xf32> to vector<1x48xf32>
    %492 = vector.broadcast %491 : vector<1x48xf32> to vector<5x48xf32>
    %493 = arith.addf %489, %492 : vector<5x48xf32>
    %c0_297 = arith.constant 0 : index
    %c0_298 = arith.constant 0 : index
    %c0_299 = arith.constant 0 : index
    %494 = vector.load %arg8[%c0_297, %c0_298, %c0_299] : memref<2x1x48xf32, #tpu.memory_space<vmem>>, vector<1x1x48xf32>
    %495 = vector.shape_cast %494 : vector<1x1x48xf32> to vector<1x48xf32>
    %c0_300 = arith.constant 0 : index
    %c0_301 = arith.constant 0 : index
    %c0_302 = arith.constant 0 : index
    %496 = vector.load %arg9[%c0_300, %c0_301, %c0_302] : memref<2x1x48xf32, #tpu.memory_space<vmem>>, vector<1x1x48xf32>
    %497 = vector.shape_cast %496 : vector<1x1x48xf32> to vector<1x48xf32>
    %cst_303 = arith.constant dense<0.000000e+00> : vector<5xf32>
    %498 = vector.multi_reduction <add>, %493, %cst_303 [1] : vector<5x48xf32> to vector<5xf32>
    %499 = vector.shape_cast %498 : vector<5xf32> to vector<5x1xf32>
    %cst_304 = arith.constant 4.800000e+01 : f32
    %500 = vector.broadcast %cst_304 : f32 to vector<5x1xf32>
    %501 = arith.divf %499, %500 : vector<5x1xf32>
    %502 = vector.broadcast %501 : vector<5x1xf32> to vector<5x48xf32>
    %503 = arith.subf %493, %502 : vector<5x48xf32>
    %504 = arith.mulf %503, %503 : vector<5x48xf32>
    %cst_305 = arith.constant dense<0.000000e+00> : vector<5xf32>
    %505 = vector.multi_reduction <add>, %504, %cst_305 [1] : vector<5x48xf32> to vector<5xf32>
    %506 = vector.shape_cast %505 : vector<5xf32> to vector<5x1xf32>
    %cst_306 = arith.constant 4.800000e+01 : f32
    %507 = vector.broadcast %cst_306 : f32 to vector<5x1xf32>
    %508 = arith.divf %506, %507 : vector<5x1xf32>
    %cst_307 = arith.constant 9.99999996E-13 : f32
    %509 = vector.broadcast %cst_307 : f32 to vector<5x1xf32>
    %510 = arith.addf %508, %509 : vector<5x1xf32>
    %511 = math.rsqrt %510 : vector<5x1xf32>
    %512 = vector.broadcast %511 : vector<5x1xf32> to vector<5x48xf32>
    %513 = arith.mulf %503, %512 : vector<5x48xf32>
    %514 = vector.broadcast %495 : vector<1x48xf32> to vector<5x48xf32>
    %515 = arith.mulf %513, %514 : vector<5x48xf32>
    %516 = vector.broadcast %497 : vector<1x48xf32> to vector<5x48xf32>
    %517 = arith.addf %515, %516 : vector<5x48xf32>
    %c0_308 = arith.constant 0 : index
    %c0_309 = arith.constant 0 : index
    %c0_310 = arith.constant 0 : index
    %518 = vector.load %arg10[%c0_308, %c0_309, %c0_310] : memref<2x48x96xf32, #tpu.memory_space<vmem>>, vector<1x48x96xf32>
    %519 = vector.shape_cast %518 : vector<1x48x96xf32> to vector<48x96xf32>
    %cst_311 = arith.constant dense<0.000000e+00> : vector<5x96xf32>
    %520 = tpu.matmul %517, %519, %cst_311 {dimension_numbers = #tpu.dot_dimension_numbers<[1], [0], [0], [1], [0, 0, 1, 1], [], []>} : vector<5x48xf32>, vector<48x96xf32>, vector<5x96xf32> -> vector<5x96xf32>
    %c0_312 = arith.constant 0 : index
    %c0_313 = arith.constant 0 : index
    %c0_314 = arith.constant 0 : index
    %521 = vector.load %arg11[%c0_312, %c0_313, %c0_314] : memref<2x1x96xf32, #tpu.memory_space<vmem>>, vector<1x1x96xf32>
    %522 = vector.shape_cast %521 : vector<1x1x96xf32> to vector<1x96xf32>
    %523 = vector.broadcast %522 : vector<1x96xf32> to vector<5x96xf32>
    %524 = arith.addf %520, %523 : vector<5x96xf32>
    %cst_315 = arith.constant 5.000000e-01 : f32
    %525 = vector.broadcast %cst_315 : f32 to vector<5x96xf32>
    %526 = arith.mulf %525, %524 : vector<5x96xf32>
    %cst_316 = arith.constant 0.707106769 : f32
    %527 = vector.broadcast %cst_316 : f32 to vector<5x96xf32>
    %528 = arith.mulf %524, %527 : vector<5x96xf32>
    %cst_317 = arith.constant 0.000000e+00 : f32
    %529 = vector.broadcast %cst_317 : f32 to vector<5x96xf32>
    %530 = arith.cmpf oge, %528, %529 : vector<5x96xf32>
    %cst_318 = arith.constant 1.000000e+00 : f32
    %cst_319 = arith.constant -1.000000e+00 : f32
    %531 = vector.broadcast %cst_318 : f32 to vector<5x96xf32>
    %532 = vector.broadcast %cst_319 : f32 to vector<5x96xf32>
    %533 = arith.select %530, %531, %532 : vector<5x96xi1>, vector<5x96xf32>
    %534 = math.absf %528 : vector<5x96xf32>
    %cst_320 = arith.constant 0.327591091 : f32
    %535 = vector.broadcast %cst_320 : f32 to vector<5x96xf32>
    %536 = arith.mulf %535, %534 : vector<5x96xf32>
    %cst_321 = arith.constant 1.000000e+00 : f32
    %537 = vector.broadcast %cst_321 : f32 to vector<5x96xf32>
    %538 = arith.addf %537, %536 : vector<5x96xf32>
    %cst_322 = arith.constant 1.000000e+00 : f32
    %539 = vector.broadcast %cst_322 : f32 to vector<5x96xf32>
    %540 = arith.divf %539, %538 : vector<5x96xf32>
    %cst_323 = arith.constant 1.06140542 : f32
    %541 = vector.broadcast %cst_323 : f32 to vector<5x96xf32>
    %542 = arith.mulf %541, %540 : vector<5x96xf32>
    %cst_324 = arith.constant -1.45315206 : f32
    %543 = vector.broadcast %cst_324 : f32 to vector<5x96xf32>
    %544 = arith.addf %542, %543 : vector<5x96xf32>
    %545 = arith.mulf %544, %540 : vector<5x96xf32>
    %cst_325 = arith.constant 1.42141378 : f32
    %546 = vector.broadcast %cst_325 : f32 to vector<5x96xf32>
    %547 = arith.addf %545, %546 : vector<5x96xf32>
    %548 = arith.mulf %547, %540 : vector<5x96xf32>
    %cst_326 = arith.constant -0.284496725 : f32
    %549 = vector.broadcast %cst_326 : f32 to vector<5x96xf32>
    %550 = arith.addf %548, %549 : vector<5x96xf32>
    %551 = arith.mulf %550, %540 : vector<5x96xf32>
    %cst_327 = arith.constant 0.254829586 : f32
    %552 = vector.broadcast %cst_327 : f32 to vector<5x96xf32>
    %553 = arith.addf %551, %552 : vector<5x96xf32>
    %554 = arith.mulf %553, %540 : vector<5x96xf32>
    %cst_328 = arith.constant 0.000000e+00 : f32
    %555 = vector.broadcast %cst_328 : f32 to vector<5x96xf32>
    %556 = arith.subf %555, %534 : vector<5x96xf32>
    %557 = arith.mulf %556, %534 : vector<5x96xf32>
    %558 = math.exp %557 : vector<5x96xf32>
    %559 = arith.mulf %554, %558 : vector<5x96xf32>
    %cst_329 = arith.constant 1.000000e+00 : f32
    %560 = vector.broadcast %cst_329 : f32 to vector<5x96xf32>
    %561 = arith.subf %560, %559 : vector<5x96xf32>
    %562 = arith.mulf %533, %561 : vector<5x96xf32>
    %cst_330 = arith.constant 1.000000e+00 : f32
    %563 = vector.broadcast %cst_330 : f32 to vector<5x96xf32>
    %564 = arith.addf %563, %562 : vector<5x96xf32>
    %565 = arith.mulf %526, %564 : vector<5x96xf32>
    %c0_331 = arith.constant 0 : index
    %c0_332 = arith.constant 0 : index
    %c0_333 = arith.constant 0 : index
    %566 = vector.load %arg12[%c0_331, %c0_332, %c0_333] : memref<2x96x48xf32, #tpu.memory_space<vmem>>, vector<1x96x48xf32>
    %567 = vector.shape_cast %566 : vector<1x96x48xf32> to vector<96x48xf32>
    %cst_334 = arith.constant dense<0.000000e+00> : vector<5x48xf32>
    %568 = tpu.matmul %565, %567, %cst_334 {dimension_numbers = #tpu.dot_dimension_numbers<[1], [0], [0], [1], [0, 0, 1, 1], [], []>} : vector<5x96xf32>, vector<96x48xf32>, vector<5x48xf32> -> vector<5x48xf32>
    %569 = arith.addf %493, %568 : vector<5x48xf32>
    %c0_335 = arith.constant 0 : index
    %c0_336 = arith.constant 0 : index
    %c0_337 = arith.constant 0 : index
    %570 = vector.load %arg13[%c0_335, %c0_336, %c0_337] : memref<2x1x48xf32, #tpu.memory_space<vmem>>, vector<1x1x48xf32>
    %571 = vector.shape_cast %570 : vector<1x1x48xf32> to vector<1x48xf32>
    %572 = vector.broadcast %571 : vector<1x48xf32> to vector<5x48xf32>
    %573 = arith.addf %569, %572 : vector<5x48xf32>
    %c1_338 = arith.constant 1 : index
    %c0_339 = arith.constant 0 : index
    %c0_340 = arith.constant 0 : index
    %574 = vector.load %arg2[%c1_338, %c0_339, %c0_340] : memref<2x1x48xf32, #tpu.memory_space<vmem>>, vector<1x1x48xf32>
    %575 = vector.shape_cast %574 : vector<1x1x48xf32> to vector<1x48xf32>
    %c1_341 = arith.constant 1 : index
    %c0_342 = arith.constant 0 : index
    %c0_343 = arith.constant 0 : index
    %576 = vector.load %arg3[%c1_341, %c0_342, %c0_343] : memref<2x1x48xf32, #tpu.memory_space<vmem>>, vector<1x1x48xf32>
    %577 = vector.shape_cast %576 : vector<1x1x48xf32> to vector<1x48xf32>
    %cst_344 = arith.constant dense<0.000000e+00> : vector<5xf32>
    %578 = vector.multi_reduction <add>, %573, %cst_344 [1] : vector<5x48xf32> to vector<5xf32>
    %579 = vector.shape_cast %578 : vector<5xf32> to vector<5x1xf32>
    %cst_345 = arith.constant 4.800000e+01 : f32
    %580 = vector.broadcast %cst_345 : f32 to vector<5x1xf32>
    %581 = arith.divf %579, %580 : vector<5x1xf32>
    %582 = vector.broadcast %581 : vector<5x1xf32> to vector<5x48xf32>
    %583 = arith.subf %573, %582 : vector<5x48xf32>
    %584 = arith.mulf %583, %583 : vector<5x48xf32>
    %cst_346 = arith.constant dense<0.000000e+00> : vector<5xf32>
    %585 = vector.multi_reduction <add>, %584, %cst_346 [1] : vector<5x48xf32> to vector<5xf32>
    %586 = vector.shape_cast %585 : vector<5xf32> to vector<5x1xf32>
    %cst_347 = arith.constant 4.800000e+01 : f32
    %587 = vector.broadcast %cst_347 : f32 to vector<5x1xf32>
    %588 = arith.divf %586, %587 : vector<5x1xf32>
    %cst_348 = arith.constant 9.99999996E-13 : f32
    %589 = vector.broadcast %cst_348 : f32 to vector<5x1xf32>
    %590 = arith.addf %588, %589 : vector<5x1xf32>
    %591 = math.rsqrt %590 : vector<5x1xf32>
    %592 = vector.broadcast %591 : vector<5x1xf32> to vector<5x48xf32>
    %593 = arith.mulf %583, %592 : vector<5x48xf32>
    %594 = vector.broadcast %575 : vector<1x48xf32> to vector<5x48xf32>
    %595 = arith.mulf %593, %594 : vector<5x48xf32>
    %596 = vector.broadcast %577 : vector<1x48xf32> to vector<5x48xf32>
    %597 = arith.addf %595, %596 : vector<5x48xf32>
    %c1_349 = arith.constant 1 : index
    %c0_350 = arith.constant 0 : index
    %c0_351 = arith.constant 0 : index
    %598 = vector.load %arg4[%c1_349, %c0_350, %c0_351] : memref<2x48x144xf32, #tpu.memory_space<vmem>>, vector<1x48x144xf32>
    %599 = vector.shape_cast %598 : vector<1x48x144xf32> to vector<48x144xf32>
    %cst_352 = arith.constant dense<0.000000e+00> : vector<5x144xf32>
    %600 = tpu.matmul %597, %599, %cst_352 {dimension_numbers = #tpu.dot_dimension_numbers<[1], [0], [0], [1], [0, 0, 1, 1], [], []>} : vector<5x48xf32>, vector<48x144xf32>, vector<5x144xf32> -> vector<5x144xf32>
    %c1_353 = arith.constant 1 : index
    %c0_354 = arith.constant 0 : index
    %c0_355 = arith.constant 0 : index
    %601 = vector.load %arg5[%c1_353, %c0_354, %c0_355] : memref<2x1x144xf32, #tpu.memory_space<vmem>>, vector<1x1x144xf32>
    %602 = vector.shape_cast %601 : vector<1x1x144xf32> to vector<1x144xf32>
    %603 = vector.broadcast %602 : vector<1x144xf32> to vector<5x144xf32>
    %604 = arith.addf %600, %603 : vector<5x144xf32>
    %c0_356 = arith.constant 0 : index
    %c0_357 = arith.constant 0 : index
    %605 = vector.load %arg20[%c0_356, %c0_357] : memref<5x144xf32, #tpu.memory_space<vmem>>, vector<5x144xf32>
    tpu.vector_store %arg20[%c0_356, %c0_357], %604 {strides = array<i32>} : memref<5x144xf32, #tpu.memory_space<vmem>>, vector<5x144xf32>,
    %c0_358 = arith.constant 0 : index
    %c0_359 = arith.constant 0 : index
    %606 = vector.load %arg20[%c0_358, %c0_359] : memref<5x144xf32, #tpu.memory_space<vmem>>, vector<5x16xf32>
    %c0_360 = arith.constant 0 : index
    %c48_361 = arith.constant 48 : index
    %607 = vector.load %arg20[%c0_360, %c48_361] : memref<5x144xf32, #tpu.memory_space<vmem>>, vector<5x16xf32>
    %c0_362 = arith.constant 0 : index
    %c96_363 = arith.constant 96 : index
    %608 = vector.load %arg20[%c0_362, %c96_363] : memref<5x144xf32, #tpu.memory_space<vmem>>, vector<5x16xf32>
    %609 = tpu.transpose %607, [1, 0] : vector<5x16xf32> -> vector<16x5xf32>
    %cst_364 = arith.constant dense<0.000000e+00> : vector<5x5xf32>
    %610 = tpu.matmul %606, %609, %cst_364 {dimension_numbers = #tpu.dot_dimension_numbers<[1], [0], [0], [1], [0, 0, 1, 1], [], []>} : vector<5x16xf32>, vector<16x5xf32>, vector<5x5xf32> -> vector<5x5xf32>
    %cst_365 = arith.constant 2.500000e-01 : f32
    %611 = vector.broadcast %cst_365 : f32 to vector<5x5xf32>
    %612 = arith.mulf %610, %611 : vector<5x5xf32>
    %cst_366 = arith.constant dense<0xFF800000> : vector<5xf32>
    %613 = vector.multi_reduction <maximumf>, %612, %cst_366 [1] : vector<5x5xf32> to vector<5xf32>
    %614 = vector.shape_cast %613 : vector<5xf32> to vector<5x1xf32>
    %615 = vector.broadcast %614 : vector<5x1xf32> to vector<5x5xf32>
    %616 = arith.subf %612, %615 : vector<5x5xf32>
    %617 = math.exp %616 : vector<5x5xf32>
    %cst_367 = arith.constant dense<0.000000e+00> : vector<5xf32>
    %618 = vector.multi_reduction <add>, %617, %cst_367 [1] : vector<5x5xf32> to vector<5xf32>
    %619 = vector.shape_cast %618 : vector<5xf32> to vector<5x1xf32>
    %620 = vector.broadcast %619 : vector<5x1xf32> to vector<5x5xf32>
    %621 = arith.divf %617, %620 : vector<5x5xf32>
    %cst_368 = arith.constant dense<0.000000e+00> : vector<5x16xf32>
    %622 = tpu.matmul %621, %608, %cst_368 {dimension_numbers = #tpu.dot_dimension_numbers<[1], [0], [0], [1], [0, 0, 1, 1], [], []>} : vector<5x5xf32>, vector<5x16xf32>, vector<5x16xf32> -> vector<5x16xf32>
    %c3_369 = arith.constant 3 : index
    %c0_370 = arith.constant 0 : index
    %c0_371 = arith.constant 0 : index
    %623 = vector.load %arg6[%c3_369, %c0_370, %c0_371] : memref<6x16x48xf32, #tpu.memory_space<vmem>>, vector<1x16x48xf32>
    %624 = vector.shape_cast %623 : vector<1x16x48xf32> to vector<16x48xf32>
    %cst_372 = arith.constant dense<0.000000e+00> : vector<5x48xf32>
    %625 = tpu.matmul %622, %624, %cst_372 {dimension_numbers = #tpu.dot_dimension_numbers<[1], [0], [0], [1], [0, 0, 1, 1], [], []>} : vector<5x16xf32>, vector<16x48xf32>, vector<5x48xf32> -> vector<5x48xf32>
    %c0_373 = arith.constant 0 : index
    %c16_374 = arith.constant 16 : index
    %626 = vector.load %arg20[%c0_373, %c16_374] : memref<5x144xf32, #tpu.memory_space<vmem>>, vector<5x16xf32>
    %c0_375 = arith.constant 0 : index
    %c64_376 = arith.constant 64 : index
    %627 = vector.load %arg20[%c0_375, %c64_376] : memref<5x144xf32, #tpu.memory_space<vmem>>, vector<5x16xf32>
    %c0_377 = arith.constant 0 : index
    %c112_378 = arith.constant 112 : index
    %628 = vector.load %arg20[%c0_377, %c112_378] : memref<5x144xf32, #tpu.memory_space<vmem>>, vector<5x16xf32>
    %629 = tpu.transpose %627, [1, 0] : vector<5x16xf32> -> vector<16x5xf32>
    %cst_379 = arith.constant dense<0.000000e+00> : vector<5x5xf32>
    %630 = tpu.matmul %626, %629, %cst_379 {dimension_numbers = #tpu.dot_dimension_numbers<[1], [0], [0], [1], [0, 0, 1, 1], [], []>} : vector<5x16xf32>, vector<16x5xf32>, vector<5x5xf32> -> vector<5x5xf32>
    %cst_380 = arith.constant 2.500000e-01 : f32
    %631 = vector.broadcast %cst_380 : f32 to vector<5x5xf32>
    %632 = arith.mulf %630, %631 : vector<5x5xf32>
    %cst_381 = arith.constant dense<0xFF800000> : vector<5xf32>
    %633 = vector.multi_reduction <maximumf>, %632, %cst_381 [1] : vector<5x5xf32> to vector<5xf32>
    %634 = vector.shape_cast %633 : vector<5xf32> to vector<5x1xf32>
    %635 = vector.broadcast %634 : vector<5x1xf32> to vector<5x5xf32>
    %636 = arith.subf %632, %635 : vector<5x5xf32>
    %637 = math.exp %636 : vector<5x5xf32>
    %cst_382 = arith.constant dense<0.000000e+00> : vector<5xf32>
    %638 = vector.multi_reduction <add>, %637, %cst_382 [1] : vector<5x5xf32> to vector<5xf32>
    %639 = vector.shape_cast %638 : vector<5xf32> to vector<5x1xf32>
    %640 = vector.broadcast %639 : vector<5x1xf32> to vector<5x5xf32>
    %641 = arith.divf %637, %640 : vector<5x5xf32>
    %cst_383 = arith.constant dense<0.000000e+00> : vector<5x16xf32>
    %642 = tpu.matmul %641, %628, %cst_383 {dimension_numbers = #tpu.dot_dimension_numbers<[1], [0], [0], [1], [0, 0, 1, 1], [], []>} : vector<5x5xf32>, vector<5x16xf32>, vector<5x16xf32> -> vector<5x16xf32>
    %c4_384 = arith.constant 4 : index
    %c0_385 = arith.constant 0 : index
    %c0_386 = arith.constant 0 : index
    %643 = vector.load %arg6[%c4_384, %c0_385, %c0_386] : memref<6x16x48xf32, #tpu.memory_space<vmem>>, vector<1x16x48xf32>
    %644 = vector.shape_cast %643 : vector<1x16x48xf32> to vector<16x48xf32>
    %cst_387 = arith.constant dense<0.000000e+00> : vector<5x48xf32>
    %645 = tpu.matmul %642, %644, %cst_387 {dimension_numbers = #tpu.dot_dimension_numbers<[1], [0], [0], [1], [0, 0, 1, 1], [], []>} : vector<5x16xf32>, vector<16x48xf32>, vector<5x48xf32> -> vector<5x48xf32>
    %646 = arith.addf %625, %645 : vector<5x48xf32>
    %c0_388 = arith.constant 0 : index
    %c32_389 = arith.constant 32 : index
    %647 = vector.load %arg20[%c0_388, %c32_389] : memref<5x144xf32, #tpu.memory_space<vmem>>, vector<5x16xf32>
    %c0_390 = arith.constant 0 : index
    %c80_391 = arith.constant 80 : index
    %648 = vector.load %arg20[%c0_390, %c80_391] : memref<5x144xf32, #tpu.memory_space<vmem>>, vector<5x16xf32>
    %c0_392 = arith.constant 0 : index
    %c128_393 = arith.constant 128 : index
    %649 = vector.load %arg20[%c0_392, %c128_393] : memref<5x144xf32, #tpu.memory_space<vmem>>, vector<5x16xf32>
    %650 = tpu.transpose %648, [1, 0] : vector<5x16xf32> -> vector<16x5xf32>
    %cst_394 = arith.constant dense<0.000000e+00> : vector<5x5xf32>
    %651 = tpu.matmul %647, %650, %cst_394 {dimension_numbers = #tpu.dot_dimension_numbers<[1], [0], [0], [1], [0, 0, 1, 1], [], []>} : vector<5x16xf32>, vector<16x5xf32>, vector<5x5xf32> -> vector<5x5xf32>
    %cst_395 = arith.constant 2.500000e-01 : f32
    %652 = vector.broadcast %cst_395 : f32 to vector<5x5xf32>
    %653 = arith.mulf %651, %652 : vector<5x5xf32>
    %cst_396 = arith.constant dense<0xFF800000> : vector<5xf32>
    %654 = vector.multi_reduction <maximumf>, %653, %cst_396 [1] : vector<5x5xf32> to vector<5xf32>
    %655 = vector.shape_cast %654 : vector<5xf32> to vector<5x1xf32>
    %656 = vector.broadcast %655 : vector<5x1xf32> to vector<5x5xf32>
    %657 = arith.subf %653, %656 : vector<5x5xf32>
    %658 = math.exp %657 : vector<5x5xf32>
    %cst_397 = arith.constant dense<0.000000e+00> : vector<5xf32>
    %659 = vector.multi_reduction <add>, %658, %cst_397 [1] : vector<5x5xf32> to vector<5xf32>
    %660 = vector.shape_cast %659 : vector<5xf32> to vector<5x1xf32>
    %661 = vector.broadcast %660 : vector<5x1xf32> to vector<5x5xf32>
    %662 = arith.divf %658, %661 : vector<5x5xf32>
    %cst_398 = arith.constant dense<0.000000e+00> : vector<5x16xf32>
    %663 = tpu.matmul %662, %649, %cst_398 {dimension_numbers = #tpu.dot_dimension_numbers<[1], [0], [0], [1], [0, 0, 1, 1], [], []>} : vector<5x5xf32>, vector<5x16xf32>, vector<5x16xf32> -> vector<5x16xf32>
    %c5_399 = arith.constant 5 : index
    %c0_400 = arith.constant 0 : index
    %c0_401 = arith.constant 0 : index
    %664 = vector.load %arg6[%c5_399, %c0_400, %c0_401] : memref<6x16x48xf32, #tpu.memory_space<vmem>>, vector<1x16x48xf32>
    %665 = vector.shape_cast %664 : vector<1x16x48xf32> to vector<16x48xf32>
    %cst_402 = arith.constant dense<0.000000e+00> : vector<5x48xf32>
    %666 = tpu.matmul %663, %665, %cst_402 {dimension_numbers = #tpu.dot_dimension_numbers<[1], [0], [0], [1], [0, 0, 1, 1], [], []>} : vector<5x16xf32>, vector<16x48xf32>, vector<5x48xf32> -> vector<5x48xf32>
    %667 = arith.addf %646, %666 : vector<5x48xf32>
    %668 = arith.addf %573, %667 : vector<5x48xf32>
    %c1_403 = arith.constant 1 : index
    %c0_404 = arith.constant 0 : index
    %c0_405 = arith.constant 0 : index
    %669 = vector.load %arg7[%c1_403, %c0_404, %c0_405] : memref<2x1x48xf32, #tpu.memory_space<vmem>>, vector<1x1x48xf32>
    %670 = vector.shape_cast %669 : vector<1x1x48xf32> to vector<1x48xf32>
    %671 = vector.broadcast %670 : vector<1x48xf32> to vector<5x48xf32>
    %672 = arith.addf %668, %671 : vector<5x48xf32>
    %c1_406 = arith.constant 1 : index
    %c0_407 = arith.constant 0 : index
    %c0_408 = arith.constant 0 : index
    %673 = vector.load %arg8[%c1_406, %c0_407, %c0_408] : memref<2x1x48xf32, #tpu.memory_space<vmem>>, vector<1x1x48xf32>
    %674 = vector.shape_cast %673 : vector<1x1x48xf32> to vector<1x48xf32>
    %c1_409 = arith.constant 1 : index
    %c0_410 = arith.constant 0 : index
    %c0_411 = arith.constant 0 : index
    %675 = vector.load %arg9[%c1_409, %c0_410, %c0_411] : memref<2x1x48xf32, #tpu.memory_space<vmem>>, vector<1x1x48xf32>
    %676 = vector.shape_cast %675 : vector<1x1x48xf32> to vector<1x48xf32>
    %cst_412 = arith.constant dense<0.000000e+00> : vector<5xf32>
    %677 = vector.multi_reduction <add>, %672, %cst_412 [1] : vector<5x48xf32> to vector<5xf32>
    %678 = vector.shape_cast %677 : vector<5xf32> to vector<5x1xf32>
    %cst_413 = arith.constant 4.800000e+01 : f32
    %679 = vector.broadcast %cst_413 : f32 to vector<5x1xf32>
    %680 = arith.divf %678, %679 : vector<5x1xf32>
    %681 = vector.broadcast %680 : vector<5x1xf32> to vector<5x48xf32>
    %682 = arith.subf %672, %681 : vector<5x48xf32>
    %683 = arith.mulf %682, %682 : vector<5x48xf32>
    %cst_414 = arith.constant dense<0.000000e+00> : vector<5xf32>
    %684 = vector.multi_reduction <add>, %683, %cst_414 [1] : vector<5x48xf32> to vector<5xf32>
    %685 = vector.shape_cast %684 : vector<5xf32> to vector<5x1xf32>
    %cst_415 = arith.constant 4.800000e+01 : f32
    %686 = vector.broadcast %cst_415 : f32 to vector<5x1xf32>
    %687 = arith.divf %685, %686 : vector<5x1xf32>
    %cst_416 = arith.constant 9.99999996E-13 : f32
    %688 = vector.broadcast %cst_416 : f32 to vector<5x1xf32>
    %689 = arith.addf %687, %688 : vector<5x1xf32>
    %690 = math.rsqrt %689 : vector<5x1xf32>
    %691 = vector.broadcast %690 : vector<5x1xf32> to vector<5x48xf32>
    %692 = arith.mulf %682, %691 : vector<5x48xf32>
    %693 = vector.broadcast %674 : vector<1x48xf32> to vector<5x48xf32>
    %694 = arith.mulf %692, %693 : vector<5x48xf32>
    %695 = vector.broadcast %676 : vector<1x48xf32> to vector<5x48xf32>
    %696 = arith.addf %694, %695 : vector<5x48xf32>
    %c1_417 = arith.constant 1 : index
    %c0_418 = arith.constant 0 : index
    %c0_419 = arith.constant 0 : index
    %697 = vector.load %arg10[%c1_417, %c0_418, %c0_419] : memref<2x48x96xf32, #tpu.memory_space<vmem>>, vector<1x48x96xf32>
    %698 = vector.shape_cast %697 : vector<1x48x96xf32> to vector<48x96xf32>
    %cst_420 = arith.constant dense<0.000000e+00> : vector<5x96xf32>
    %699 = tpu.matmul %696, %698, %cst_420 {dimension_numbers = #tpu.dot_dimension_numbers<[1], [0], [0], [1], [0, 0, 1, 1], [], []>} : vector<5x48xf32>, vector<48x96xf32>, vector<5x96xf32> -> vector<5x96xf32>
    %c1_421 = arith.constant 1 : index
    %c0_422 = arith.constant 0 : index
    %c0_423 = arith.constant 0 : index
    %700 = vector.load %arg11[%c1_421, %c0_422, %c0_423] : memref<2x1x96xf32, #tpu.memory_space<vmem>>, vector<1x1x96xf32>
    %701 = vector.shape_cast %700 : vector<1x1x96xf32> to vector<1x96xf32>
    %702 = vector.broadcast %701 : vector<1x96xf32> to vector<5x96xf32>
    %703 = arith.addf %699, %702 : vector<5x96xf32>
    %cst_424 = arith.constant 5.000000e-01 : f32
    %704 = vector.broadcast %cst_424 : f32 to vector<5x96xf32>
    %705 = arith.mulf %704, %703 : vector<5x96xf32>
    %cst_425 = arith.constant 0.707106769 : f32
    %706 = vector.broadcast %cst_425 : f32 to vector<5x96xf32>
    %707 = arith.mulf %703, %706 : vector<5x96xf32>
    %cst_426 = arith.constant 0.000000e+00 : f32
    %708 = vector.broadcast %cst_426 : f32 to vector<5x96xf32>
    %709 = arith.cmpf oge, %707, %708 : vector<5x96xf32>
    %cst_427 = arith.constant 1.000000e+00 : f32
    %cst_428 = arith.constant -1.000000e+00 : f32
    %710 = vector.broadcast %cst_427 : f32 to vector<5x96xf32>
    %711 = vector.broadcast %cst_428 : f32 to vector<5x96xf32>
    %712 = arith.select %709, %710, %711 : vector<5x96xi1>, vector<5x96xf32>
    %713 = math.absf %707 : vector<5x96xf32>
    %cst_429 = arith.constant 0.327591091 : f32
    %714 = vector.broadcast %cst_429 : f32 to vector<5x96xf32>
    %715 = arith.mulf %714, %713 : vector<5x96xf32>
    %cst_430 = arith.constant 1.000000e+00 : f32
    %716 = vector.broadcast %cst_430 : f32 to vector<5x96xf32>
    %717 = arith.addf %716, %715 : vector<5x96xf32>
    %cst_431 = arith.constant 1.000000e+00 : f32
    %718 = vector.broadcast %cst_431 : f32 to vector<5x96xf32>
    %719 = arith.divf %718, %717 : vector<5x96xf32>
    %cst_432 = arith.constant 1.06140542 : f32
    %720 = vector.broadcast %cst_432 : f32 to vector<5x96xf32>
    %721 = arith.mulf %720, %719 : vector<5x96xf32>
    %cst_433 = arith.constant -1.45315206 : f32
    %722 = vector.broadcast %cst_433 : f32 to vector<5x96xf32>
    %723 = arith.addf %721, %722 : vector<5x96xf32>
    %724 = arith.mulf %723, %719 : vector<5x96xf32>
    %cst_434 = arith.constant 1.42141378 : f32
    %725 = vector.broadcast %cst_434 : f32 to vector<5x96xf32>
    %726 = arith.addf %724, %725 : vector<5x96xf32>
    %727 = arith.mulf %726, %719 : vector<5x96xf32>
    %cst_435 = arith.constant -0.284496725 : f32
    %728 = vector.broadcast %cst_435 : f32 to vector<5x96xf32>
    %729 = arith.addf %727, %728 : vector<5x96xf32>
    %730 = arith.mulf %729, %719 : vector<5x96xf32>
    %cst_436 = arith.constant 0.254829586 : f32
    %731 = vector.broadcast %cst_436 : f32 to vector<5x96xf32>
    %732 = arith.addf %730, %731 : vector<5x96xf32>
    %733 = arith.mulf %732, %719 : vector<5x96xf32>
    %cst_437 = arith.constant 0.000000e+00 : f32
    %734 = vector.broadcast %cst_437 : f32 to vector<5x96xf32>
    %735 = arith.subf %734, %713 : vector<5x96xf32>
    %736 = arith.mulf %735, %713 : vector<5x96xf32>
    %737 = math.exp %736 : vector<5x96xf32>
    %738 = arith.mulf %733, %737 : vector<5x96xf32>
    %cst_438 = arith.constant 1.000000e+00 : f32
    %739 = vector.broadcast %cst_438 : f32 to vector<5x96xf32>
    %740 = arith.subf %739, %738 : vector<5x96xf32>
    %741 = arith.mulf %712, %740 : vector<5x96xf32>
    %cst_439 = arith.constant 1.000000e+00 : f32
    %742 = vector.broadcast %cst_439 : f32 to vector<5x96xf32>
    %743 = arith.addf %742, %741 : vector<5x96xf32>
    %744 = arith.mulf %705, %743 : vector<5x96xf32>
    %c1_440 = arith.constant 1 : index
    %c0_441 = arith.constant 0 : index
    %c0_442 = arith.constant 0 : index
    %745 = vector.load %arg12[%c1_440, %c0_441, %c0_442] : memref<2x96x48xf32, #tpu.memory_space<vmem>>, vector<1x96x48xf32>
    %746 = vector.shape_cast %745 : vector<1x96x48xf32> to vector<96x48xf32>
    %cst_443 = arith.constant dense<0.000000e+00> : vector<5x48xf32>
    %747 = tpu.matmul %744, %746, %cst_443 {dimension_numbers = #tpu.dot_dimension_numbers<[1], [0], [0], [1], [0, 0, 1, 1], [], []>} : vector<5x96xf32>, vector<96x48xf32>, vector<5x48xf32> -> vector<5x48xf32>
    %748 = arith.addf %672, %747 : vector<5x48xf32>
    %c1_444 = arith.constant 1 : index
    %c0_445 = arith.constant 0 : index
    %c0_446 = arith.constant 0 : index
    %749 = vector.load %arg13[%c1_444, %c0_445, %c0_446] : memref<2x1x48xf32, #tpu.memory_space<vmem>>, vector<1x1x48xf32>
    %750 = vector.shape_cast %749 : vector<1x1x48xf32> to vector<1x48xf32>
    %751 = vector.broadcast %750 : vector<1x48xf32> to vector<5x48xf32>
    %752 = arith.addf %748, %751 : vector<5x48xf32>
    %c1_447 = arith.constant 1 : index
    %c0_448 = arith.constant 0 : index
    %c0_449 = arith.constant 0 : index
    %753 = vector.load %arg18[%c1_447, %c0_448, %c0_449] : memref<2x5x48xf32, #tpu.memory_space<vmem>>, vector<1x5x48xf32>
    %754 = vector.shape_cast %753 : vector<1x5x48xf32> to vector<5x48xf32>
    %755 = vector.shape_cast %752 : vector<5x48xf32> to vector<1x5x48xf32>
    tpu.vector_store %arg18[%c1_447, %c0_448, %c0_449], %755 {strides = array<i32>} : memref<2x5x48xf32, #tpu.memory_space<vmem>>, vector<1x5x48xf32>,
    %cst_450 = arith.constant dense<0.000000e+00> : vector<5xf32>
    %756 = vector.multi_reduction <add>, %752, %cst_450 [1] : vector<5x48xf32> to vector<5xf32>
    %757 = vector.shape_cast %756 : vector<5xf32> to vector<5x1xf32>
    %cst_451 = arith.constant 4.800000e+01 : f32
    %758 = vector.broadcast %cst_451 : f32 to vector<5x1xf32>
    %759 = arith.divf %757, %758 : vector<5x1xf32>
    %760 = vector.broadcast %759 : vector<5x1xf32> to vector<5x48xf32>
    %761 = arith.subf %752, %760 : vector<5x48xf32>
    %762 = arith.mulf %761, %761 : vector<5x48xf32>
    %cst_452 = arith.constant dense<0.000000e+00> : vector<5xf32>
    %763 = vector.multi_reduction <add>, %762, %cst_452 [1] : vector<5x48xf32> to vector<5xf32>
    %764 = vector.shape_cast %763 : vector<5xf32> to vector<5x1xf32>
    %cst_453 = arith.constant 4.800000e+01 : f32
    %765 = vector.broadcast %cst_453 : f32 to vector<5x1xf32>
    %766 = arith.divf %764, %765 : vector<5x1xf32>
    %cst_454 = arith.constant 9.99999996E-13 : f32
    %767 = vector.broadcast %cst_454 : f32 to vector<5x1xf32>
    %768 = arith.addf %766, %767 : vector<5x1xf32>
    %769 = math.rsqrt %768 : vector<5x1xf32>
    %770 = vector.broadcast %769 : vector<5x1xf32> to vector<5x48xf32>
    %771 = arith.mulf %761, %770 : vector<5x48xf32>
    %772 = vector.broadcast %0 : vector<1x48xf32> to vector<5x48xf32>
    %773 = arith.mulf %771, %772 : vector<5x48xf32>
    %774 = vector.broadcast %1 : vector<1x48xf32> to vector<5x48xf32>
    %775 = arith.addf %773, %774 : vector<5x48xf32>
    %cst_455 = arith.constant dense<0.000000e+00> : vector<5x48xf32>
    %776 = tpu.matmul %775, %2, %cst_455 {dimension_numbers = #tpu.dot_dimension_numbers<[1], [0], [0], [1], [0, 0, 1, 1], [], []>} : vector<5x48xf32>, vector<48x48xf32>, vector<5x48xf32> -> vector<5x48xf32>
    %777 = vector.broadcast %3 : vector<1x48xf32> to vector<5x48xf32>
    %778 = arith.addf %776, %777 : vector<5x48xf32>
    %c1_456 = arith.constant 1 : index
    %c0_457 = arith.constant 0 : index
    %c0_458 = arith.constant 0 : index
    %779 = vector.load %arg19[%c1_456, %c0_457, %c0_458] : memref<2x5x48xf32, #tpu.memory_space<vmem>>, vector<1x5x48xf32>
    %780 = vector.shape_cast %779 : vector<1x5x48xf32> to vector<5x48xf32>
    %781 = vector.shape_cast %778 : vector<5x48xf32> to vector<1x5x48xf32>
    tpu.vector_store %arg19[%c1_456, %c0_457, %c0_458], %781 {strides = array<i32>} : memref<2x5x48xf32, #tpu.memory_space<vmem>>, vector<1x5x48xf32>,
    return
  }
  func.func @transform_0(%arg0: i32) -> (i32, i32, i32) {
    %c0_i32 = arith.constant 0 : i32
    %c0_i32_0 = arith.constant 0 : i32
    %c0_i32_1 = arith.constant 0 : i32
    %c0_i32_2 = arith.constant 0 : i32
    return %c0_i32, %c0_i32_0, %c0_i32_1 : i32, i32, i32
  }
  func.func @transform_1(%arg0: i32) -> (i32, i32, i32) {
    %c0_i32 = arith.constant 0 : i32
    %c0_i32_0 = arith.constant 0 : i32
    %c0_i32_1 = arith.constant 0 : i32
    %c0_i32_2 = arith.constant 0 : i32
    return %c0_i32, %c0_i32_0, %c0_i32_1 : i32, i32, i32
  }
  func.func @transform_2(%arg0: i32) -> (i32, i32, i32) {
    %c0_i32 = arith.constant 0 : i32
    %c0_i32_0 = arith.constant 0 : i32
    %c0_i32_1 = arith.constant 0 : i32
    %c0_i32_2 = arith.constant 0 : i32
    return %c0_i32, %c0_i32_0, %c0_i32_1 : i32, i32, i32
  }
  func.func @transform_3(%arg0: i32) -> (i32, i32, i32) {
    %c0_i32 = arith.constant 0 : i32
    %c0_i32_0 = arith.constant 0 : i32
    %c0_i32_1 = arith.constant 0 : i32
    %c0_i32_2 = arith.constant 0 : i32
    return %c0_i32, %c0_i32_0, %c0_i32_1 : i32, i32, i32
  }
  func.func @transform_4(%arg0: i32) -> (i32, i32, i32) {
    %c0_i32 = arith.constant 0 : i32
    %c0_i32_0 = arith.constant 0 : i32
    %c0_i32_1 = arith.constant 0 : i32
    %c0_i32_2 = arith.constant 0 : i32
    return %c0_i32, %c0_i32_0, %c0_i32_1 : i32, i32, i32
  }
  func.func @transform_5(%arg0: i32) -> (i32, i32, i32) {
    %c0_i32 = arith.constant 0 : i32
    %c0_i32_0 = arith.constant 0 : i32
    %c0_i32_1 = arith.constant 0 : i32
    %c0_i32_2 = arith.constant 0 : i32
    return %c0_i32, %c0_i32_0, %c0_i32_1 : i32, i32, i32
  }
  func.func @transform_6(%arg0: i32) -> (i32, i32, i32) {
    %c0_i32 = arith.constant 0 : i32
    %c0_i32_0 = arith.constant 0 : i32
    %c0_i32_1 = arith.constant 0 : i32
    %c0_i32_2 = arith.constant 0 : i32
    return %c0_i32, %c0_i32_0, %c0_i32_1 : i32, i32, i32
  }
  func.func @transform_7(%arg0: i32) -> (i32, i32, i32) {
    %c0_i32 = arith.constant 0 : i32
    %c0_i32_0 = arith.constant 0 : i32
    %c0_i32_1 = arith.constant 0 : i32
    %c0_i32_2 = arith.constant 0 : i32
    return %c0_i32, %c0_i32_0, %c0_i32_1 : i32, i32, i32
  }
  func.func @transform_8(%arg0: i32) -> (i32, i32, i32) {
    %c0_i32 = arith.constant 0 : i32
    %c0_i32_0 = arith.constant 0 : i32
    %c0_i32_1 = arith.constant 0 : i32
    %c0_i32_2 = arith.constant 0 : i32
    return %c0_i32, %c0_i32_0, %c0_i32_1 : i32, i32, i32
  }
  func.func @transform_9(%arg0: i32) -> (i32, i32, i32) {
    %c0_i32 = arith.constant 0 : i32
    %c0_i32_0 = arith.constant 0 : i32
    %c0_i32_1 = arith.constant 0 : i32
    %c0_i32_2 = arith.constant 0 : i32
    return %c0_i32, %c0_i32_0, %c0_i32_1 : i32, i32, i32
  }
  func.func @transform_10(%arg0: i32) -> (i32, i32, i32) {
    %c0_i32 = arith.constant 0 : i32
    %c0_i32_0 = arith.constant 0 : i32
    %c0_i32_1 = arith.constant 0 : i32
    %c0_i32_2 = arith.constant 0 : i32
    return %c0_i32, %c0_i32_0, %c0_i32_1 : i32, i32, i32
  }
  func.func @transform_11(%arg0: i32) -> (i32, i32, i32) {
    %c0_i32 = arith.constant 0 : i32
    %c0_i32_0 = arith.constant 0 : i32
    %c0_i32_1 = arith.constant 0 : i32
    %c0_i32_2 = arith.constant 0 : i32
    return %c0_i32, %c0_i32_0, %c0_i32_1 : i32, i32, i32
  }
  func.func @transform_12(%arg0: i32) -> (i32, i32, i32) {
    %c0_i32 = arith.constant 0 : i32
    %c0_i32_0 = arith.constant 0 : i32
    %c0_i32_1 = arith.constant 0 : i32
    %c0_i32_2 = arith.constant 0 : i32
    return %c0_i32, %c0_i32_0, %c0_i32_1 : i32, i32, i32
  }
  func.func @transform_13(%arg0: i32) -> (i32, i32) {
    %c0_i32 = arith.constant 0 : i32
    %c0_i32_0 = arith.constant 0 : i32
    %c0_i32_1 = arith.constant 0 : i32
    return %c0_i32, %c0_i32_0 : i32, i32
  }
  func.func @transform_14(%arg0: i32) -> (i32, i32) {
    %c0_i32 = arith.constant 0 : i32
    %c0_i32_0 = arith.constant 0 : i32
    %c0_i32_1 = arith.constant 0 : i32
    return %c0_i32, %c0_i32_0 : i32, i32
  }
  func.func @transform_15(%arg0: i32) -> (i32, i32) {
    %c0_i32 = arith.constant 0 : i32
    %c0_i32_0 = arith.constant 0 : i32
    %c0_i32_1 = arith.constant 0 : i32
    return %c0_i32, %c0_i32_0 : i32, i32
  }
  func.func @transform_16(%arg0: i32) -> (i32, i32) {
    %c0_i32 = arith.constant 0 : i32
    %c0_i32_0 = arith.constant 0 : i32
    %c0_i32_1 = arith.constant 0 : i32
    return %c0_i32, %c0_i32_0 : i32, i32
  }
  func.func @transform_17(%arg0: i32) -> (i32, i32, i32) {
    %c0_i32 = arith.constant 0 : i32
    %c0_i32_0 = arith.constant 0 : i32
    %c0_i32_1 = arith.constant 0 : i32
    %c0_i32_2 = arith.constant 0 : i32
    return %c0_i32, %c0_i32_0, %c0_i32_1 : i32, i32, i32
  }
  func.func @transform_18(%arg0: i32) -> (i32, i32, i32) {
    %c0_i32 = arith.constant 0 : i32
    %c0_i32_0 = arith.constant 0 : i32
    %c0_i32_1 = arith.constant 0 : i32
    %c0_i32_2 = arith.constant 0 : i32
    return %c0_i32, %c0_i32_0, %c0_i32_1 : i32, i32, i32
  }
}

module attributes {stable_mosaic.version = 11 : i64} {
  func.func @_decoder_kernel(%arg0: i32, %arg1: memref<2x17x48xf32, #tpu.memory_space<vmem>>, %arg2: memref<1x1x48xf32, #tpu.memory_space<vmem>>, %arg3: memref<1x1x48xf32, #tpu.memory_space<vmem>>, %arg4: memref<1x48x144xf32, #tpu.memory_space<vmem>>, %arg5: memref<1x1x144xf32, #tpu.memory_space<vmem>>, %arg6: memref<3x16x48xf32, #tpu.memory_space<vmem>>, %arg7: memref<1x1x48xf32, #tpu.memory_space<vmem>>, %arg8: memref<1x1x48xf32, #tpu.memory_space<vmem>>, %arg9: memref<1x1x48xf32, #tpu.memory_space<vmem>>, %arg10: memref<1x48x96xf32, #tpu.memory_space<vmem>>, %arg11: memref<1x1x96xf32, #tpu.memory_space<vmem>>, %arg12: memref<1x96x48xf32, #tpu.memory_space<vmem>>, %arg13: memref<1x1x48xf32, #tpu.memory_space<vmem>>, %arg14: memref<1x48xf32, #tpu.memory_space<vmem>>, %arg15: memref<1x48xf32, #tpu.memory_space<vmem>>, %arg16: memref<48x48xf32, #tpu.memory_space<vmem>>, %arg17: memref<1x48xf32, #tpu.memory_space<vmem>>, %arg18: memref<2x17x48xf32, #tpu.memory_space<vmem>>, %arg19: memref<2x17x1xf32, #tpu.memory_space<vmem>>, %arg20: memref<1x1xf32, #tpu.memory_space<vmem>>, %arg21: memref<17x144xf32, #tpu.memory_space<vmem>>) attributes {dimension_semantics = [#tpu.dimension_semantics<arbitrary>], iteration_bounds = array<i64: 1>, scalar_prefetch = 0 : i64, scratch_operands = 1 : i64, tpu.core_type = #tpu.core_type<tc>, window_params = [{pipeline_mode = #tpu.pipeline_mode<synchronous>, transform_indices = @transform_0, window_bounds = array<i64: 2, 17, 48>}, {pipeline_mode = #tpu.pipeline_mode<synchronous>, transform_indices = @transform_1, window_bounds = array<i64: 1, 1, 48>}, {pipeline_mode = #tpu.pipeline_mode<synchronous>, transform_indices = @transform_2, window_bounds = array<i64: 1, 1, 48>}, {pipeline_mode = #tpu.pipeline_mode<synchronous>, transform_indices = @transform_3, window_bounds = array<i64: 1, 48, 144>}, {pipeline_mode = #tpu.pipeline_mode<synchronous>, transform_indices = @transform_4, window_bounds = array<i64: 1, 1, 144>}, {pipeline_mode = #tpu.pipeline_mode<synchronous>, transform_indices = @transform_5, window_bounds = array<i64: 3, 16, 48>}, {pipeline_mode = #tpu.pipeline_mode<synchronous>, transform_indices = @transform_6, window_bounds = array<i64: 1, 1, 48>}, {pipeline_mode = #tpu.pipeline_mode<synchronous>, transform_indices = @transform_7, window_bounds = array<i64: 1, 1, 48>}, {pipeline_mode = #tpu.pipeline_mode<synchronous>, transform_indices = @transform_8, window_bounds = array<i64: 1, 1, 48>}, {pipeline_mode = #tpu.pipeline_mode<synchronous>, transform_indices = @transform_9, window_bounds = array<i64: 1, 48, 96>}, {pipeline_mode = #tpu.pipeline_mode<synchronous>, transform_indices = @transform_10, window_bounds = array<i64: 1, 1, 96>}, {pipeline_mode = #tpu.pipeline_mode<synchronous>, transform_indices = @transform_11, window_bounds = array<i64: 1, 96, 48>}, {pipeline_mode = #tpu.pipeline_mode<synchronous>, transform_indices = @transform_12, window_bounds = array<i64: 1, 1, 48>}, {pipeline_mode = #tpu.pipeline_mode<synchronous>, transform_indices = @transform_13, window_bounds = array<i64: 1, 48>}, {pipeline_mode = #tpu.pipeline_mode<synchronous>, transform_indices = @transform_14, window_bounds = array<i64: 1, 48>}, {pipeline_mode = #tpu.pipeline_mode<synchronous>, transform_indices = @transform_15, window_bounds = array<i64: 48, 48>}, {pipeline_mode = #tpu.pipeline_mode<synchronous>, transform_indices = @transform_16, window_bounds = array<i64: 1, 48>}, {pipeline_mode = #tpu.pipeline_mode<synchronous>, transform_indices = @transform_17, window_bounds = array<i64: 2, 17, 48>}, {pipeline_mode = #tpu.pipeline_mode<synchronous>, transform_indices = @transform_18, window_bounds = array<i64: 2, 17, 1>}, {pipeline_mode = #tpu.pipeline_mode<synchronous>, transform_indices = @transform_19, window_bounds = array<i64: 1, 1>}]} {
    %c0 = arith.constant 0 : index
    %c0_0 = arith.constant 0 : index
    %0 = vector.load %arg14[%c0, %c0_0] : memref<1x48xf32, #tpu.memory_space<vmem>>, vector<1x48xf32>
    %c0_1 = arith.constant 0 : index
    %c0_2 = arith.constant 0 : index
    %1 = vector.load %arg15[%c0_1, %c0_2] : memref<1x48xf32, #tpu.memory_space<vmem>>, vector<1x48xf32>
    %c0_3 = arith.constant 0 : index
    %c0_4 = arith.constant 0 : index
    %2 = vector.load %arg16[%c0_3, %c0_4] : memref<48x48xf32, #tpu.memory_space<vmem>>, vector<48x48xf32>
    %c0_5 = arith.constant 0 : index
    %c0_6 = arith.constant 0 : index
    %3 = vector.load %arg17[%c0_5, %c0_6] : memref<1x48xf32, #tpu.memory_space<vmem>>, vector<1x48xf32>
    %c0_7 = arith.constant 0 : index
    %c0_8 = arith.constant 0 : index
    %c0_9 = arith.constant 0 : index
    %4 = vector.load %arg1[%c0_7, %c0_8, %c0_9] : memref<2x17x48xf32, #tpu.memory_space<vmem>>, vector<1x17x48xf32>
    %5 = vector.shape_cast %4 : vector<1x17x48xf32> to vector<17x48xf32>
    %c0_10 = arith.constant 0 : index
    %c0_11 = arith.constant 0 : index
    %c0_12 = arith.constant 0 : index
    %6 = vector.load %arg2[%c0_10, %c0_11, %c0_12] : memref<1x1x48xf32, #tpu.memory_space<vmem>>, vector<1x1x48xf32>
    %7 = vector.shape_cast %6 : vector<1x1x48xf32> to vector<1x48xf32>
    %c0_13 = arith.constant 0 : index
    %c0_14 = arith.constant 0 : index
    %c0_15 = arith.constant 0 : index
    %8 = vector.load %arg3[%c0_13, %c0_14, %c0_15] : memref<1x1x48xf32, #tpu.memory_space<vmem>>, vector<1x1x48xf32>
    %9 = vector.shape_cast %8 : vector<1x1x48xf32> to vector<1x48xf32>
    %cst = arith.constant dense<0.000000e+00> : vector<17xf32>
    %10 = vector.multi_reduction <add>, %5, %cst [1] : vector<17x48xf32> to vector<17xf32>
    %11 = vector.shape_cast %10 : vector<17xf32> to vector<17x1xf32>
    %cst_16 = arith.constant 4.800000e+01 : f32
    %12 = vector.broadcast %cst_16 : f32 to vector<17x1xf32>
    %13 = arith.divf %11, %12 : vector<17x1xf32>
    %14 = vector.broadcast %13 : vector<17x1xf32> to vector<17x48xf32>
    %15 = arith.subf %5, %14 : vector<17x48xf32>
    %16 = arith.mulf %15, %15 : vector<17x48xf32>
    %cst_17 = arith.constant dense<0.000000e+00> : vector<17xf32>
    %17 = vector.multi_reduction <add>, %16, %cst_17 [1] : vector<17x48xf32> to vector<17xf32>
    %18 = vector.shape_cast %17 : vector<17xf32> to vector<17x1xf32>
    %cst_18 = arith.constant 4.800000e+01 : f32
    %19 = vector.broadcast %cst_18 : f32 to vector<17x1xf32>
    %20 = arith.divf %18, %19 : vector<17x1xf32>
    %cst_19 = arith.constant 9.99999996E-13 : f32
    %21 = vector.broadcast %cst_19 : f32 to vector<17x1xf32>
    %22 = arith.addf %20, %21 : vector<17x1xf32>
    %23 = math.rsqrt %22 : vector<17x1xf32>
    %24 = vector.broadcast %23 : vector<17x1xf32> to vector<17x48xf32>
    %25 = arith.mulf %15, %24 : vector<17x48xf32>
    %26 = vector.broadcast %7 : vector<1x48xf32> to vector<17x48xf32>
    %27 = arith.mulf %25, %26 : vector<17x48xf32>
    %28 = vector.broadcast %9 : vector<1x48xf32> to vector<17x48xf32>
    %29 = arith.addf %27, %28 : vector<17x48xf32>
    %c0_20 = arith.constant 0 : index
    %c0_21 = arith.constant 0 : index
    %c0_22 = arith.constant 0 : index
    %30 = vector.load %arg4[%c0_20, %c0_21, %c0_22] : memref<1x48x144xf32, #tpu.memory_space<vmem>>, vector<1x48x144xf32>
    %31 = vector.shape_cast %30 : vector<1x48x144xf32> to vector<48x144xf32>
    %cst_23 = arith.constant dense<0.000000e+00> : vector<17x144xf32>
    %32 = tpu.matmul %29, %31, %cst_23 {dimension_numbers = #tpu.dot_dimension_numbers<[1], [0], [0], [1], [0, 0, 1, 1], [], []>} : vector<17x48xf32>, vector<48x144xf32>, vector<17x144xf32> -> vector<17x144xf32>
    %c0_24 = arith.constant 0 : index
    %c0_25 = arith.constant 0 : index
    %c0_26 = arith.constant 0 : index
    %33 = vector.load %arg5[%c0_24, %c0_25, %c0_26] : memref<1x1x144xf32, #tpu.memory_space<vmem>>, vector<1x1x144xf32>
    %34 = vector.shape_cast %33 : vector<1x1x144xf32> to vector<1x144xf32>
    %35 = vector.broadcast %34 : vector<1x144xf32> to vector<17x144xf32>
    %36 = arith.addf %32, %35 : vector<17x144xf32>
    %c0_27 = arith.constant 0 : index
    %c0_28 = arith.constant 0 : index
    %37 = vector.load %arg21[%c0_27, %c0_28] : memref<17x144xf32, #tpu.memory_space<vmem>>, vector<17x144xf32>
    tpu.vector_store %arg21[%c0_27, %c0_28], %36 {strides = array<i32>} : memref<17x144xf32, #tpu.memory_space<vmem>>, vector<17x144xf32>,
    %c0_29 = arith.constant 0 : index
    %c0_30 = arith.constant 0 : index
    %38 = vector.load %arg21[%c0_29, %c0_30] : memref<17x144xf32, #tpu.memory_space<vmem>>, vector<17x16xf32>
    %c0_31 = arith.constant 0 : index
    %c48 = arith.constant 48 : index
    %39 = vector.load %arg21[%c0_31, %c48] : memref<17x144xf32, #tpu.memory_space<vmem>>, vector<17x16xf32>
    %c0_32 = arith.constant 0 : index
    %c96 = arith.constant 96 : index
    %40 = vector.load %arg21[%c0_32, %c96] : memref<17x144xf32, #tpu.memory_space<vmem>>, vector<17x16xf32>
    %41 = tpu.transpose %39, [1, 0] : vector<17x16xf32> -> vector<16x17xf32>
    %cst_33 = arith.constant dense<0.000000e+00> : vector<17x17xf32>
    %42 = tpu.matmul %38, %41, %cst_33 {dimension_numbers = #tpu.dot_dimension_numbers<[1], [0], [0], [1], [0, 0, 1, 1], [], []>} : vector<17x16xf32>, vector<16x17xf32>, vector<17x17xf32> -> vector<17x17xf32>
    %cst_34 = arith.constant 2.500000e-01 : f32
    %43 = vector.broadcast %cst_34 : f32 to vector<17x17xf32>
    %44 = arith.mulf %42, %43 : vector<17x17xf32>
    %cst_35 = arith.constant dense<0xFF800000> : vector<17xf32>
    %45 = vector.multi_reduction <maximumf>, %44, %cst_35 [1] : vector<17x17xf32> to vector<17xf32>
    %46 = vector.shape_cast %45 : vector<17xf32> to vector<17x1xf32>
    %47 = vector.broadcast %46 : vector<17x1xf32> to vector<17x17xf32>
    %48 = arith.subf %44, %47 : vector<17x17xf32>
    %49 = math.exp %48 : vector<17x17xf32>
    %cst_36 = arith.constant dense<0.000000e+00> : vector<17xf32>
    %50 = vector.multi_reduction <add>, %49, %cst_36 [1] : vector<17x17xf32> to vector<17xf32>
    %51 = vector.shape_cast %50 : vector<17xf32> to vector<17x1xf32>
    %52 = vector.broadcast %51 : vector<17x1xf32> to vector<17x17xf32>
    %53 = arith.divf %49, %52 : vector<17x17xf32>
    %cst_37 = arith.constant dense<0.000000e+00> : vector<17x16xf32>
    %54 = tpu.matmul %53, %40, %cst_37 {dimension_numbers = #tpu.dot_dimension_numbers<[1], [0], [0], [1], [0, 0, 1, 1], [], []>} : vector<17x17xf32>, vector<17x16xf32>, vector<17x16xf32> -> vector<17x16xf32>
    %c0_38 = arith.constant 0 : index
    %c0_39 = arith.constant 0 : index
    %c0_40 = arith.constant 0 : index
    %55 = vector.load %arg6[%c0_38, %c0_39, %c0_40] : memref<3x16x48xf32, #tpu.memory_space<vmem>>, vector<1x16x48xf32>
    %56 = vector.shape_cast %55 : vector<1x16x48xf32> to vector<16x48xf32>
    %cst_41 = arith.constant dense<0.000000e+00> : vector<17x48xf32>
    %57 = tpu.matmul %54, %56, %cst_41 {dimension_numbers = #tpu.dot_dimension_numbers<[1], [0], [0], [1], [0, 0, 1, 1], [], []>} : vector<17x16xf32>, vector<16x48xf32>, vector<17x48xf32> -> vector<17x48xf32>
    %c0_42 = arith.constant 0 : index
    %c16 = arith.constant 16 : index
    %58 = vector.load %arg21[%c0_42, %c16] : memref<17x144xf32, #tpu.memory_space<vmem>>, vector<17x16xf32>
    %c0_43 = arith.constant 0 : index
    %c64 = arith.constant 64 : index
    %59 = vector.load %arg21[%c0_43, %c64] : memref<17x144xf32, #tpu.memory_space<vmem>>, vector<17x16xf32>
    %c0_44 = arith.constant 0 : index
    %c112 = arith.constant 112 : index
    %60 = vector.load %arg21[%c0_44, %c112] : memref<17x144xf32, #tpu.memory_space<vmem>>, vector<17x16xf32>
    %61 = tpu.transpose %59, [1, 0] : vector<17x16xf32> -> vector<16x17xf32>
    %cst_45 = arith.constant dense<0.000000e+00> : vector<17x17xf32>
    %62 = tpu.matmul %58, %61, %cst_45 {dimension_numbers = #tpu.dot_dimension_numbers<[1], [0], [0], [1], [0, 0, 1, 1], [], []>} : vector<17x16xf32>, vector<16x17xf32>, vector<17x17xf32> -> vector<17x17xf32>
    %cst_46 = arith.constant 2.500000e-01 : f32
    %63 = vector.broadcast %cst_46 : f32 to vector<17x17xf32>
    %64 = arith.mulf %62, %63 : vector<17x17xf32>
    %cst_47 = arith.constant dense<0xFF800000> : vector<17xf32>
    %65 = vector.multi_reduction <maximumf>, %64, %cst_47 [1] : vector<17x17xf32> to vector<17xf32>
    %66 = vector.shape_cast %65 : vector<17xf32> to vector<17x1xf32>
    %67 = vector.broadcast %66 : vector<17x1xf32> to vector<17x17xf32>
    %68 = arith.subf %64, %67 : vector<17x17xf32>
    %69 = math.exp %68 : vector<17x17xf32>
    %cst_48 = arith.constant dense<0.000000e+00> : vector<17xf32>
    %70 = vector.multi_reduction <add>, %69, %cst_48 [1] : vector<17x17xf32> to vector<17xf32>
    %71 = vector.shape_cast %70 : vector<17xf32> to vector<17x1xf32>
    %72 = vector.broadcast %71 : vector<17x1xf32> to vector<17x17xf32>
    %73 = arith.divf %69, %72 : vector<17x17xf32>
    %cst_49 = arith.constant dense<0.000000e+00> : vector<17x16xf32>
    %74 = tpu.matmul %73, %60, %cst_49 {dimension_numbers = #tpu.dot_dimension_numbers<[1], [0], [0], [1], [0, 0, 1, 1], [], []>} : vector<17x17xf32>, vector<17x16xf32>, vector<17x16xf32> -> vector<17x16xf32>
    %c1 = arith.constant 1 : index
    %c0_50 = arith.constant 0 : index
    %c0_51 = arith.constant 0 : index
    %75 = vector.load %arg6[%c1, %c0_50, %c0_51] : memref<3x16x48xf32, #tpu.memory_space<vmem>>, vector<1x16x48xf32>
    %76 = vector.shape_cast %75 : vector<1x16x48xf32> to vector<16x48xf32>
    %cst_52 = arith.constant dense<0.000000e+00> : vector<17x48xf32>
    %77 = tpu.matmul %74, %76, %cst_52 {dimension_numbers = #tpu.dot_dimension_numbers<[1], [0], [0], [1], [0, 0, 1, 1], [], []>} : vector<17x16xf32>, vector<16x48xf32>, vector<17x48xf32> -> vector<17x48xf32>
    %78 = arith.addf %57, %77 : vector<17x48xf32>
    %c0_53 = arith.constant 0 : index
    %c32 = arith.constant 32 : index
    %79 = vector.load %arg21[%c0_53, %c32] : memref<17x144xf32, #tpu.memory_space<vmem>>, vector<17x16xf32>
    %c0_54 = arith.constant 0 : index
    %c80 = arith.constant 80 : index
    %80 = vector.load %arg21[%c0_54, %c80] : memref<17x144xf32, #tpu.memory_space<vmem>>, vector<17x16xf32>
    %c0_55 = arith.constant 0 : index
    %c128 = arith.constant 128 : index
    %81 = vector.load %arg21[%c0_55, %c128] : memref<17x144xf32, #tpu.memory_space<vmem>>, vector<17x16xf32>
    %82 = tpu.transpose %80, [1, 0] : vector<17x16xf32> -> vector<16x17xf32>
    %cst_56 = arith.constant dense<0.000000e+00> : vector<17x17xf32>
    %83 = tpu.matmul %79, %82, %cst_56 {dimension_numbers = #tpu.dot_dimension_numbers<[1], [0], [0], [1], [0, 0, 1, 1], [], []>} : vector<17x16xf32>, vector<16x17xf32>, vector<17x17xf32> -> vector<17x17xf32>
    %cst_57 = arith.constant 2.500000e-01 : f32
    %84 = vector.broadcast %cst_57 : f32 to vector<17x17xf32>
    %85 = arith.mulf %83, %84 : vector<17x17xf32>
    %cst_58 = arith.constant dense<0xFF800000> : vector<17xf32>
    %86 = vector.multi_reduction <maximumf>, %85, %cst_58 [1] : vector<17x17xf32> to vector<17xf32>
    %87 = vector.shape_cast %86 : vector<17xf32> to vector<17x1xf32>
    %88 = vector.broadcast %87 : vector<17x1xf32> to vector<17x17xf32>
    %89 = arith.subf %85, %88 : vector<17x17xf32>
    %90 = math.exp %89 : vector<17x17xf32>
    %cst_59 = arith.constant dense<0.000000e+00> : vector<17xf32>
    %91 = vector.multi_reduction <add>, %90, %cst_59 [1] : vector<17x17xf32> to vector<17xf32>
    %92 = vector.shape_cast %91 : vector<17xf32> to vector<17x1xf32>
    %93 = vector.broadcast %92 : vector<17x1xf32> to vector<17x17xf32>
    %94 = arith.divf %90, %93 : vector<17x17xf32>
    %cst_60 = arith.constant dense<0.000000e+00> : vector<17x16xf32>
    %95 = tpu.matmul %94, %81, %cst_60 {dimension_numbers = #tpu.dot_dimension_numbers<[1], [0], [0], [1], [0, 0, 1, 1], [], []>} : vector<17x17xf32>, vector<17x16xf32>, vector<17x16xf32> -> vector<17x16xf32>
    %c2 = arith.constant 2 : index
    %c0_61 = arith.constant 0 : index
    %c0_62 = arith.constant 0 : index
    %96 = vector.load %arg6[%c2, %c0_61, %c0_62] : memref<3x16x48xf32, #tpu.memory_space<vmem>>, vector<1x16x48xf32>
    %97 = vector.shape_cast %96 : vector<1x16x48xf32> to vector<16x48xf32>
    %cst_63 = arith.constant dense<0.000000e+00> : vector<17x48xf32>
    %98 = tpu.matmul %95, %97, %cst_63 {dimension_numbers = #tpu.dot_dimension_numbers<[1], [0], [0], [1], [0, 0, 1, 1], [], []>} : vector<17x16xf32>, vector<16x48xf32>, vector<17x48xf32> -> vector<17x48xf32>
    %99 = arith.addf %78, %98 : vector<17x48xf32>
    %100 = arith.addf %5, %99 : vector<17x48xf32>
    %c0_64 = arith.constant 0 : index
    %c0_65 = arith.constant 0 : index
    %c0_66 = arith.constant 0 : index
    %101 = vector.load %arg7[%c0_64, %c0_65, %c0_66] : memref<1x1x48xf32, #tpu.memory_space<vmem>>, vector<1x1x48xf32>
    %102 = vector.shape_cast %101 : vector<1x1x48xf32> to vector<1x48xf32>
    %103 = vector.broadcast %102 : vector<1x48xf32> to vector<17x48xf32>
    %104 = arith.addf %100, %103 : vector<17x48xf32>
    %c0_67 = arith.constant 0 : index
    %c0_68 = arith.constant 0 : index
    %c0_69 = arith.constant 0 : index
    %105 = vector.load %arg8[%c0_67, %c0_68, %c0_69] : memref<1x1x48xf32, #tpu.memory_space<vmem>>, vector<1x1x48xf32>
    %106 = vector.shape_cast %105 : vector<1x1x48xf32> to vector<1x48xf32>
    %c0_70 = arith.constant 0 : index
    %c0_71 = arith.constant 0 : index
    %c0_72 = arith.constant 0 : index
    %107 = vector.load %arg9[%c0_70, %c0_71, %c0_72] : memref<1x1x48xf32, #tpu.memory_space<vmem>>, vector<1x1x48xf32>
    %108 = vector.shape_cast %107 : vector<1x1x48xf32> to vector<1x48xf32>
    %cst_73 = arith.constant dense<0.000000e+00> : vector<17xf32>
    %109 = vector.multi_reduction <add>, %104, %cst_73 [1] : vector<17x48xf32> to vector<17xf32>
    %110 = vector.shape_cast %109 : vector<17xf32> to vector<17x1xf32>
    %cst_74 = arith.constant 4.800000e+01 : f32
    %111 = vector.broadcast %cst_74 : f32 to vector<17x1xf32>
    %112 = arith.divf %110, %111 : vector<17x1xf32>
    %113 = vector.broadcast %112 : vector<17x1xf32> to vector<17x48xf32>
    %114 = arith.subf %104, %113 : vector<17x48xf32>
    %115 = arith.mulf %114, %114 : vector<17x48xf32>
    %cst_75 = arith.constant dense<0.000000e+00> : vector<17xf32>
    %116 = vector.multi_reduction <add>, %115, %cst_75 [1] : vector<17x48xf32> to vector<17xf32>
    %117 = vector.shape_cast %116 : vector<17xf32> to vector<17x1xf32>
    %cst_76 = arith.constant 4.800000e+01 : f32
    %118 = vector.broadcast %cst_76 : f32 to vector<17x1xf32>
    %119 = arith.divf %117, %118 : vector<17x1xf32>
    %cst_77 = arith.constant 9.99999996E-13 : f32
    %120 = vector.broadcast %cst_77 : f32 to vector<17x1xf32>
    %121 = arith.addf %119, %120 : vector<17x1xf32>
    %122 = math.rsqrt %121 : vector<17x1xf32>
    %123 = vector.broadcast %122 : vector<17x1xf32> to vector<17x48xf32>
    %124 = arith.mulf %114, %123 : vector<17x48xf32>
    %125 = vector.broadcast %106 : vector<1x48xf32> to vector<17x48xf32>
    %126 = arith.mulf %124, %125 : vector<17x48xf32>
    %127 = vector.broadcast %108 : vector<1x48xf32> to vector<17x48xf32>
    %128 = arith.addf %126, %127 : vector<17x48xf32>
    %c0_78 = arith.constant 0 : index
    %c0_79 = arith.constant 0 : index
    %c0_80 = arith.constant 0 : index
    %129 = vector.load %arg10[%c0_78, %c0_79, %c0_80] : memref<1x48x96xf32, #tpu.memory_space<vmem>>, vector<1x48x96xf32>
    %130 = vector.shape_cast %129 : vector<1x48x96xf32> to vector<48x96xf32>
    %cst_81 = arith.constant dense<0.000000e+00> : vector<17x96xf32>
    %131 = tpu.matmul %128, %130, %cst_81 {dimension_numbers = #tpu.dot_dimension_numbers<[1], [0], [0], [1], [0, 0, 1, 1], [], []>} : vector<17x48xf32>, vector<48x96xf32>, vector<17x96xf32> -> vector<17x96xf32>
    %c0_82 = arith.constant 0 : index
    %c0_83 = arith.constant 0 : index
    %c0_84 = arith.constant 0 : index
    %132 = vector.load %arg11[%c0_82, %c0_83, %c0_84] : memref<1x1x96xf32, #tpu.memory_space<vmem>>, vector<1x1x96xf32>
    %133 = vector.shape_cast %132 : vector<1x1x96xf32> to vector<1x96xf32>
    %134 = vector.broadcast %133 : vector<1x96xf32> to vector<17x96xf32>
    %135 = arith.addf %131, %134 : vector<17x96xf32>
    %cst_85 = arith.constant 5.000000e-01 : f32
    %136 = vector.broadcast %cst_85 : f32 to vector<17x96xf32>
    %137 = arith.mulf %136, %135 : vector<17x96xf32>
    %cst_86 = arith.constant 0.707106769 : f32
    %138 = vector.broadcast %cst_86 : f32 to vector<17x96xf32>
    %139 = arith.mulf %135, %138 : vector<17x96xf32>
    %cst_87 = arith.constant 0.000000e+00 : f32
    %140 = vector.broadcast %cst_87 : f32 to vector<17x96xf32>
    %141 = arith.cmpf oge, %139, %140 : vector<17x96xf32>
    %cst_88 = arith.constant 1.000000e+00 : f32
    %cst_89 = arith.constant -1.000000e+00 : f32
    %142 = vector.broadcast %cst_88 : f32 to vector<17x96xf32>
    %143 = vector.broadcast %cst_89 : f32 to vector<17x96xf32>
    %144 = arith.select %141, %142, %143 : vector<17x96xi1>, vector<17x96xf32>
    %145 = math.absf %139 : vector<17x96xf32>
    %cst_90 = arith.constant 0.327591091 : f32
    %146 = vector.broadcast %cst_90 : f32 to vector<17x96xf32>
    %147 = arith.mulf %146, %145 : vector<17x96xf32>
    %cst_91 = arith.constant 1.000000e+00 : f32
    %148 = vector.broadcast %cst_91 : f32 to vector<17x96xf32>
    %149 = arith.addf %148, %147 : vector<17x96xf32>
    %cst_92 = arith.constant 1.000000e+00 : f32
    %150 = vector.broadcast %cst_92 : f32 to vector<17x96xf32>
    %151 = arith.divf %150, %149 : vector<17x96xf32>
    %cst_93 = arith.constant 1.06140542 : f32
    %152 = vector.broadcast %cst_93 : f32 to vector<17x96xf32>
    %153 = arith.mulf %152, %151 : vector<17x96xf32>
    %cst_94 = arith.constant -1.45315206 : f32
    %154 = vector.broadcast %cst_94 : f32 to vector<17x96xf32>
    %155 = arith.addf %153, %154 : vector<17x96xf32>
    %156 = arith.mulf %155, %151 : vector<17x96xf32>
    %cst_95 = arith.constant 1.42141378 : f32
    %157 = vector.broadcast %cst_95 : f32 to vector<17x96xf32>
    %158 = arith.addf %156, %157 : vector<17x96xf32>
    %159 = arith.mulf %158, %151 : vector<17x96xf32>
    %cst_96 = arith.constant -0.284496725 : f32
    %160 = vector.broadcast %cst_96 : f32 to vector<17x96xf32>
    %161 = arith.addf %159, %160 : vector<17x96xf32>
    %162 = arith.mulf %161, %151 : vector<17x96xf32>
    %cst_97 = arith.constant 0.254829586 : f32
    %163 = vector.broadcast %cst_97 : f32 to vector<17x96xf32>
    %164 = arith.addf %162, %163 : vector<17x96xf32>
    %165 = arith.mulf %164, %151 : vector<17x96xf32>
    %cst_98 = arith.constant 0.000000e+00 : f32
    %166 = vector.broadcast %cst_98 : f32 to vector<17x96xf32>
    %167 = arith.subf %166, %145 : vector<17x96xf32>
    %168 = arith.mulf %167, %145 : vector<17x96xf32>
    %169 = math.exp %168 : vector<17x96xf32>
    %170 = arith.mulf %165, %169 : vector<17x96xf32>
    %cst_99 = arith.constant 1.000000e+00 : f32
    %171 = vector.broadcast %cst_99 : f32 to vector<17x96xf32>
    %172 = arith.subf %171, %170 : vector<17x96xf32>
    %173 = arith.mulf %144, %172 : vector<17x96xf32>
    %cst_100 = arith.constant 1.000000e+00 : f32
    %174 = vector.broadcast %cst_100 : f32 to vector<17x96xf32>
    %175 = arith.addf %174, %173 : vector<17x96xf32>
    %176 = arith.mulf %137, %175 : vector<17x96xf32>
    %c0_101 = arith.constant 0 : index
    %c0_102 = arith.constant 0 : index
    %c0_103 = arith.constant 0 : index
    %177 = vector.load %arg12[%c0_101, %c0_102, %c0_103] : memref<1x96x48xf32, #tpu.memory_space<vmem>>, vector<1x96x48xf32>
    %178 = vector.shape_cast %177 : vector<1x96x48xf32> to vector<96x48xf32>
    %cst_104 = arith.constant dense<0.000000e+00> : vector<17x48xf32>
    %179 = tpu.matmul %176, %178, %cst_104 {dimension_numbers = #tpu.dot_dimension_numbers<[1], [0], [0], [1], [0, 0, 1, 1], [], []>} : vector<17x96xf32>, vector<96x48xf32>, vector<17x48xf32> -> vector<17x48xf32>
    %180 = arith.addf %104, %179 : vector<17x48xf32>
    %c0_105 = arith.constant 0 : index
    %c0_106 = arith.constant 0 : index
    %c0_107 = arith.constant 0 : index
    %181 = vector.load %arg13[%c0_105, %c0_106, %c0_107] : memref<1x1x48xf32, #tpu.memory_space<vmem>>, vector<1x1x48xf32>
    %182 = vector.shape_cast %181 : vector<1x1x48xf32> to vector<1x48xf32>
    %183 = vector.broadcast %182 : vector<1x48xf32> to vector<17x48xf32>
    %184 = arith.addf %180, %183 : vector<17x48xf32>
    %cst_108 = arith.constant dense<0.000000e+00> : vector<17xf32>
    %185 = vector.multi_reduction <add>, %184, %cst_108 [1] : vector<17x48xf32> to vector<17xf32>
    %186 = vector.shape_cast %185 : vector<17xf32> to vector<17x1xf32>
    %cst_109 = arith.constant 4.800000e+01 : f32
    %187 = vector.broadcast %cst_109 : f32 to vector<17x1xf32>
    %188 = arith.divf %186, %187 : vector<17x1xf32>
    %189 = vector.broadcast %188 : vector<17x1xf32> to vector<17x48xf32>
    %190 = arith.subf %184, %189 : vector<17x48xf32>
    %191 = arith.mulf %190, %190 : vector<17x48xf32>
    %cst_110 = arith.constant dense<0.000000e+00> : vector<17xf32>
    %192 = vector.multi_reduction <add>, %191, %cst_110 [1] : vector<17x48xf32> to vector<17xf32>
    %193 = vector.shape_cast %192 : vector<17xf32> to vector<17x1xf32>
    %cst_111 = arith.constant 4.800000e+01 : f32
    %194 = vector.broadcast %cst_111 : f32 to vector<17x1xf32>
    %195 = arith.divf %193, %194 : vector<17x1xf32>
    %cst_112 = arith.constant 9.99999996E-13 : f32
    %196 = vector.broadcast %cst_112 : f32 to vector<17x1xf32>
    %197 = arith.addf %195, %196 : vector<17x1xf32>
    %198 = math.rsqrt %197 : vector<17x1xf32>
    %199 = vector.broadcast %198 : vector<17x1xf32> to vector<17x48xf32>
    %200 = arith.mulf %190, %199 : vector<17x48xf32>
    %201 = vector.broadcast %0 : vector<1x48xf32> to vector<17x48xf32>
    %202 = arith.mulf %200, %201 : vector<17x48xf32>
    %203 = vector.broadcast %1 : vector<1x48xf32> to vector<17x48xf32>
    %204 = arith.addf %202, %203 : vector<17x48xf32>
    %cst_113 = arith.constant dense<0.000000e+00> : vector<17x48xf32>
    %205 = tpu.matmul %204, %2, %cst_113 {dimension_numbers = #tpu.dot_dimension_numbers<[1], [0], [0], [1], [0, 0, 1, 1], [], []>} : vector<17x48xf32>, vector<48x48xf32>, vector<17x48xf32> -> vector<17x48xf32>
    %206 = vector.broadcast %3 : vector<1x48xf32> to vector<17x48xf32>
    %207 = arith.addf %205, %206 : vector<17x48xf32>
    %c0_114 = arith.constant 0 : index
    %c0_115 = arith.constant 0 : index
    %c0_116 = arith.constant 0 : index
    %208 = vector.load %arg18[%c0_114, %c0_115, %c0_116] : memref<2x17x48xf32, #tpu.memory_space<vmem>>, vector<1x17x48xf32>
    %209 = vector.shape_cast %208 : vector<1x17x48xf32> to vector<17x48xf32>
    %210 = arith.subf %207, %209 : vector<17x48xf32>
    %211 = arith.mulf %210, %210 : vector<17x48xf32>
    %cst_117 = arith.constant dense<0.000000e+00> : vector<17xf32>
    %212 = vector.multi_reduction <add>, %211, %cst_117 [1] : vector<17x48xf32> to vector<17xf32>
    %213 = vector.shape_cast %212 : vector<17xf32> to vector<17x1xf32>
    %cst_118 = arith.constant 0.020833334 : f32
    %214 = vector.broadcast %cst_118 : f32 to vector<17x1xf32>
    %215 = arith.mulf %213, %214 : vector<17x1xf32>
    %c0_119 = arith.constant 0 : index
    %c0_120 = arith.constant 0 : index
    %c0_121 = arith.constant 0 : index
    %216 = vector.load %arg19[%c0_119, %c0_120, %c0_121] : memref<2x17x1xf32, #tpu.memory_space<vmem>>, vector<1x17x1xf32>
    %217 = vector.shape_cast %216 : vector<1x17x1xf32> to vector<17x1xf32>
    %218 = arith.mulf %215, %217 : vector<17x1xf32>
    %219 = vector.shape_cast %218 : vector<17x1xf32> to vector<1x17x1xf32>
    %cst_122 = arith.constant dense<0.000000e+00> : vector<1xf32>
    %220 = vector.multi_reduction <add>, %219, %cst_122 [1, 2] : vector<1x17x1xf32> to vector<1xf32>
    %221 = vector.shape_cast %220 : vector<1xf32> to vector<1x1x1xf32>
    %222 = vector.extract %221[0, 0, 0] : f32 from vector<1x1x1xf32>
    %cst_123 = arith.constant 0.000000e+00 : f32
    %223 = arith.addf %cst_123, %222 : f32
    %224 = vector.shape_cast %217 : vector<17x1xf32> to vector<1x17x1xf32>
    %cst_124 = arith.constant dense<0.000000e+00> : vector<1xf32>
    %225 = vector.multi_reduction <add>, %224, %cst_124 [1, 2] : vector<1x17x1xf32> to vector<1xf32>
    %226 = vector.shape_cast %225 : vector<1xf32> to vector<1x1x1xf32>
    %227 = vector.extract %226[0, 0, 0] : f32 from vector<1x1x1xf32>
    %cst_125 = arith.constant 0.000000e+00 : f32
    %228 = arith.addf %cst_125, %227 : f32
    %c1_126 = arith.constant 1 : index
    %c0_127 = arith.constant 0 : index
    %c0_128 = arith.constant 0 : index
    %229 = vector.load %arg1[%c1_126, %c0_127, %c0_128] : memref<2x17x48xf32, #tpu.memory_space<vmem>>, vector<1x17x48xf32>
    %230 = vector.shape_cast %229 : vector<1x17x48xf32> to vector<17x48xf32>
    %c0_129 = arith.constant 0 : index
    %c0_130 = arith.constant 0 : index
    %c0_131 = arith.constant 0 : index
    %231 = vector.load %arg2[%c0_129, %c0_130, %c0_131] : memref<1x1x48xf32, #tpu.memory_space<vmem>>, vector<1x1x48xf32>
    %232 = vector.shape_cast %231 : vector<1x1x48xf32> to vector<1x48xf32>
    %c0_132 = arith.constant 0 : index
    %c0_133 = arith.constant 0 : index
    %c0_134 = arith.constant 0 : index
    %233 = vector.load %arg3[%c0_132, %c0_133, %c0_134] : memref<1x1x48xf32, #tpu.memory_space<vmem>>, vector<1x1x48xf32>
    %234 = vector.shape_cast %233 : vector<1x1x48xf32> to vector<1x48xf32>
    %cst_135 = arith.constant dense<0.000000e+00> : vector<17xf32>
    %235 = vector.multi_reduction <add>, %230, %cst_135 [1] : vector<17x48xf32> to vector<17xf32>
    %236 = vector.shape_cast %235 : vector<17xf32> to vector<17x1xf32>
    %cst_136 = arith.constant 4.800000e+01 : f32
    %237 = vector.broadcast %cst_136 : f32 to vector<17x1xf32>
    %238 = arith.divf %236, %237 : vector<17x1xf32>
    %239 = vector.broadcast %238 : vector<17x1xf32> to vector<17x48xf32>
    %240 = arith.subf %230, %239 : vector<17x48xf32>
    %241 = arith.mulf %240, %240 : vector<17x48xf32>
    %cst_137 = arith.constant dense<0.000000e+00> : vector<17xf32>
    %242 = vector.multi_reduction <add>, %241, %cst_137 [1] : vector<17x48xf32> to vector<17xf32>
    %243 = vector.shape_cast %242 : vector<17xf32> to vector<17x1xf32>
    %cst_138 = arith.constant 4.800000e+01 : f32
    %244 = vector.broadcast %cst_138 : f32 to vector<17x1xf32>
    %245 = arith.divf %243, %244 : vector<17x1xf32>
    %cst_139 = arith.constant 9.99999996E-13 : f32
    %246 = vector.broadcast %cst_139 : f32 to vector<17x1xf32>
    %247 = arith.addf %245, %246 : vector<17x1xf32>
    %248 = math.rsqrt %247 : vector<17x1xf32>
    %249 = vector.broadcast %248 : vector<17x1xf32> to vector<17x48xf32>
    %250 = arith.mulf %240, %249 : vector<17x48xf32>
    %251 = vector.broadcast %232 : vector<1x48xf32> to vector<17x48xf32>
    %252 = arith.mulf %250, %251 : vector<17x48xf32>
    %253 = vector.broadcast %234 : vector<1x48xf32> to vector<17x48xf32>
    %254 = arith.addf %252, %253 : vector<17x48xf32>
    %c0_140 = arith.constant 0 : index
    %c0_141 = arith.constant 0 : index
    %c0_142 = arith.constant 0 : index
    %255 = vector.load %arg4[%c0_140, %c0_141, %c0_142] : memref<1x48x144xf32, #tpu.memory_space<vmem>>, vector<1x48x144xf32>
    %256 = vector.shape_cast %255 : vector<1x48x144xf32> to vector<48x144xf32>
    %cst_143 = arith.constant dense<0.000000e+00> : vector<17x144xf32>
    %257 = tpu.matmul %254, %256, %cst_143 {dimension_numbers = #tpu.dot_dimension_numbers<[1], [0], [0], [1], [0, 0, 1, 1], [], []>} : vector<17x48xf32>, vector<48x144xf32>, vector<17x144xf32> -> vector<17x144xf32>
    %c0_144 = arith.constant 0 : index
    %c0_145 = arith.constant 0 : index
    %c0_146 = arith.constant 0 : index
    %258 = vector.load %arg5[%c0_144, %c0_145, %c0_146] : memref<1x1x144xf32, #tpu.memory_space<vmem>>, vector<1x1x144xf32>
    %259 = vector.shape_cast %258 : vector<1x1x144xf32> to vector<1x144xf32>
    %260 = vector.broadcast %259 : vector<1x144xf32> to vector<17x144xf32>
    %261 = arith.addf %257, %260 : vector<17x144xf32>
    %c0_147 = arith.constant 0 : index
    %c0_148 = arith.constant 0 : index
    %262 = vector.load %arg21[%c0_147, %c0_148] : memref<17x144xf32, #tpu.memory_space<vmem>>, vector<17x144xf32>
    tpu.vector_store %arg21[%c0_147, %c0_148], %261 {strides = array<i32>} : memref<17x144xf32, #tpu.memory_space<vmem>>, vector<17x144xf32>,
    %c0_149 = arith.constant 0 : index
    %c0_150 = arith.constant 0 : index
    %263 = vector.load %arg21[%c0_149, %c0_150] : memref<17x144xf32, #tpu.memory_space<vmem>>, vector<17x16xf32>
    %c0_151 = arith.constant 0 : index
    %c48_152 = arith.constant 48 : index
    %264 = vector.load %arg21[%c0_151, %c48_152] : memref<17x144xf32, #tpu.memory_space<vmem>>, vector<17x16xf32>
    %c0_153 = arith.constant 0 : index
    %c96_154 = arith.constant 96 : index
    %265 = vector.load %arg21[%c0_153, %c96_154] : memref<17x144xf32, #tpu.memory_space<vmem>>, vector<17x16xf32>
    %266 = tpu.transpose %264, [1, 0] : vector<17x16xf32> -> vector<16x17xf32>
    %cst_155 = arith.constant dense<0.000000e+00> : vector<17x17xf32>
    %267 = tpu.matmul %263, %266, %cst_155 {dimension_numbers = #tpu.dot_dimension_numbers<[1], [0], [0], [1], [0, 0, 1, 1], [], []>} : vector<17x16xf32>, vector<16x17xf32>, vector<17x17xf32> -> vector<17x17xf32>
    %cst_156 = arith.constant 2.500000e-01 : f32
    %268 = vector.broadcast %cst_156 : f32 to vector<17x17xf32>
    %269 = arith.mulf %267, %268 : vector<17x17xf32>
    %cst_157 = arith.constant dense<0xFF800000> : vector<17xf32>
    %270 = vector.multi_reduction <maximumf>, %269, %cst_157 [1] : vector<17x17xf32> to vector<17xf32>
    %271 = vector.shape_cast %270 : vector<17xf32> to vector<17x1xf32>
    %272 = vector.broadcast %271 : vector<17x1xf32> to vector<17x17xf32>
    %273 = arith.subf %269, %272 : vector<17x17xf32>
    %274 = math.exp %273 : vector<17x17xf32>
    %cst_158 = arith.constant dense<0.000000e+00> : vector<17xf32>
    %275 = vector.multi_reduction <add>, %274, %cst_158 [1] : vector<17x17xf32> to vector<17xf32>
    %276 = vector.shape_cast %275 : vector<17xf32> to vector<17x1xf32>
    %277 = vector.broadcast %276 : vector<17x1xf32> to vector<17x17xf32>
    %278 = arith.divf %274, %277 : vector<17x17xf32>
    %cst_159 = arith.constant dense<0.000000e+00> : vector<17x16xf32>
    %279 = tpu.matmul %278, %265, %cst_159 {dimension_numbers = #tpu.dot_dimension_numbers<[1], [0], [0], [1], [0, 0, 1, 1], [], []>} : vector<17x17xf32>, vector<17x16xf32>, vector<17x16xf32> -> vector<17x16xf32>
    %c0_160 = arith.constant 0 : index
    %c0_161 = arith.constant 0 : index
    %c0_162 = arith.constant 0 : index
    %280 = vector.load %arg6[%c0_160, %c0_161, %c0_162] : memref<3x16x48xf32, #tpu.memory_space<vmem>>, vector<1x16x48xf32>
    %281 = vector.shape_cast %280 : vector<1x16x48xf32> to vector<16x48xf32>
    %cst_163 = arith.constant dense<0.000000e+00> : vector<17x48xf32>
    %282 = tpu.matmul %279, %281, %cst_163 {dimension_numbers = #tpu.dot_dimension_numbers<[1], [0], [0], [1], [0, 0, 1, 1], [], []>} : vector<17x16xf32>, vector<16x48xf32>, vector<17x48xf32> -> vector<17x48xf32>
    %c0_164 = arith.constant 0 : index
    %c16_165 = arith.constant 16 : index
    %283 = vector.load %arg21[%c0_164, %c16_165] : memref<17x144xf32, #tpu.memory_space<vmem>>, vector<17x16xf32>
    %c0_166 = arith.constant 0 : index
    %c64_167 = arith.constant 64 : index
    %284 = vector.load %arg21[%c0_166, %c64_167] : memref<17x144xf32, #tpu.memory_space<vmem>>, vector<17x16xf32>
    %c0_168 = arith.constant 0 : index
    %c112_169 = arith.constant 112 : index
    %285 = vector.load %arg21[%c0_168, %c112_169] : memref<17x144xf32, #tpu.memory_space<vmem>>, vector<17x16xf32>
    %286 = tpu.transpose %284, [1, 0] : vector<17x16xf32> -> vector<16x17xf32>
    %cst_170 = arith.constant dense<0.000000e+00> : vector<17x17xf32>
    %287 = tpu.matmul %283, %286, %cst_170 {dimension_numbers = #tpu.dot_dimension_numbers<[1], [0], [0], [1], [0, 0, 1, 1], [], []>} : vector<17x16xf32>, vector<16x17xf32>, vector<17x17xf32> -> vector<17x17xf32>
    %cst_171 = arith.constant 2.500000e-01 : f32
    %288 = vector.broadcast %cst_171 : f32 to vector<17x17xf32>
    %289 = arith.mulf %287, %288 : vector<17x17xf32>
    %cst_172 = arith.constant dense<0xFF800000> : vector<17xf32>
    %290 = vector.multi_reduction <maximumf>, %289, %cst_172 [1] : vector<17x17xf32> to vector<17xf32>
    %291 = vector.shape_cast %290 : vector<17xf32> to vector<17x1xf32>
    %292 = vector.broadcast %291 : vector<17x1xf32> to vector<17x17xf32>
    %293 = arith.subf %289, %292 : vector<17x17xf32>
    %294 = math.exp %293 : vector<17x17xf32>
    %cst_173 = arith.constant dense<0.000000e+00> : vector<17xf32>
    %295 = vector.multi_reduction <add>, %294, %cst_173 [1] : vector<17x17xf32> to vector<17xf32>
    %296 = vector.shape_cast %295 : vector<17xf32> to vector<17x1xf32>
    %297 = vector.broadcast %296 : vector<17x1xf32> to vector<17x17xf32>
    %298 = arith.divf %294, %297 : vector<17x17xf32>
    %cst_174 = arith.constant dense<0.000000e+00> : vector<17x16xf32>
    %299 = tpu.matmul %298, %285, %cst_174 {dimension_numbers = #tpu.dot_dimension_numbers<[1], [0], [0], [1], [0, 0, 1, 1], [], []>} : vector<17x17xf32>, vector<17x16xf32>, vector<17x16xf32> -> vector<17x16xf32>
    %c1_175 = arith.constant 1 : index
    %c0_176 = arith.constant 0 : index
    %c0_177 = arith.constant 0 : index
    %300 = vector.load %arg6[%c1_175, %c0_176, %c0_177] : memref<3x16x48xf32, #tpu.memory_space<vmem>>, vector<1x16x48xf32>
    %301 = vector.shape_cast %300 : vector<1x16x48xf32> to vector<16x48xf32>
    %cst_178 = arith.constant dense<0.000000e+00> : vector<17x48xf32>
    %302 = tpu.matmul %299, %301, %cst_178 {dimension_numbers = #tpu.dot_dimension_numbers<[1], [0], [0], [1], [0, 0, 1, 1], [], []>} : vector<17x16xf32>, vector<16x48xf32>, vector<17x48xf32> -> vector<17x48xf32>
    %303 = arith.addf %282, %302 : vector<17x48xf32>
    %c0_179 = arith.constant 0 : index
    %c32_180 = arith.constant 32 : index
    %304 = vector.load %arg21[%c0_179, %c32_180] : memref<17x144xf32, #tpu.memory_space<vmem>>, vector<17x16xf32>
    %c0_181 = arith.constant 0 : index
    %c80_182 = arith.constant 80 : index
    %305 = vector.load %arg21[%c0_181, %c80_182] : memref<17x144xf32, #tpu.memory_space<vmem>>, vector<17x16xf32>
    %c0_183 = arith.constant 0 : index
    %c128_184 = arith.constant 128 : index
    %306 = vector.load %arg21[%c0_183, %c128_184] : memref<17x144xf32, #tpu.memory_space<vmem>>, vector<17x16xf32>
    %307 = tpu.transpose %305, [1, 0] : vector<17x16xf32> -> vector<16x17xf32>
    %cst_185 = arith.constant dense<0.000000e+00> : vector<17x17xf32>
    %308 = tpu.matmul %304, %307, %cst_185 {dimension_numbers = #tpu.dot_dimension_numbers<[1], [0], [0], [1], [0, 0, 1, 1], [], []>} : vector<17x16xf32>, vector<16x17xf32>, vector<17x17xf32> -> vector<17x17xf32>
    %cst_186 = arith.constant 2.500000e-01 : f32
    %309 = vector.broadcast %cst_186 : f32 to vector<17x17xf32>
    %310 = arith.mulf %308, %309 : vector<17x17xf32>
    %cst_187 = arith.constant dense<0xFF800000> : vector<17xf32>
    %311 = vector.multi_reduction <maximumf>, %310, %cst_187 [1] : vector<17x17xf32> to vector<17xf32>
    %312 = vector.shape_cast %311 : vector<17xf32> to vector<17x1xf32>
    %313 = vector.broadcast %312 : vector<17x1xf32> to vector<17x17xf32>
    %314 = arith.subf %310, %313 : vector<17x17xf32>
    %315 = math.exp %314 : vector<17x17xf32>
    %cst_188 = arith.constant dense<0.000000e+00> : vector<17xf32>
    %316 = vector.multi_reduction <add>, %315, %cst_188 [1] : vector<17x17xf32> to vector<17xf32>
    %317 = vector.shape_cast %316 : vector<17xf32> to vector<17x1xf32>
    %318 = vector.broadcast %317 : vector<17x1xf32> to vector<17x17xf32>
    %319 = arith.divf %315, %318 : vector<17x17xf32>
    %cst_189 = arith.constant dense<0.000000e+00> : vector<17x16xf32>
    %320 = tpu.matmul %319, %306, %cst_189 {dimension_numbers = #tpu.dot_dimension_numbers<[1], [0], [0], [1], [0, 0, 1, 1], [], []>} : vector<17x17xf32>, vector<17x16xf32>, vector<17x16xf32> -> vector<17x16xf32>
    %c2_190 = arith.constant 2 : index
    %c0_191 = arith.constant 0 : index
    %c0_192 = arith.constant 0 : index
    %321 = vector.load %arg6[%c2_190, %c0_191, %c0_192] : memref<3x16x48xf32, #tpu.memory_space<vmem>>, vector<1x16x48xf32>
    %322 = vector.shape_cast %321 : vector<1x16x48xf32> to vector<16x48xf32>
    %cst_193 = arith.constant dense<0.000000e+00> : vector<17x48xf32>
    %323 = tpu.matmul %320, %322, %cst_193 {dimension_numbers = #tpu.dot_dimension_numbers<[1], [0], [0], [1], [0, 0, 1, 1], [], []>} : vector<17x16xf32>, vector<16x48xf32>, vector<17x48xf32> -> vector<17x48xf32>
    %324 = arith.addf %303, %323 : vector<17x48xf32>
    %325 = arith.addf %230, %324 : vector<17x48xf32>
    %c0_194 = arith.constant 0 : index
    %c0_195 = arith.constant 0 : index
    %c0_196 = arith.constant 0 : index
    %326 = vector.load %arg7[%c0_194, %c0_195, %c0_196] : memref<1x1x48xf32, #tpu.memory_space<vmem>>, vector<1x1x48xf32>
    %327 = vector.shape_cast %326 : vector<1x1x48xf32> to vector<1x48xf32>
    %328 = vector.broadcast %327 : vector<1x48xf32> to vector<17x48xf32>
    %329 = arith.addf %325, %328 : vector<17x48xf32>
    %c0_197 = arith.constant 0 : index
    %c0_198 = arith.constant 0 : index
    %c0_199 = arith.constant 0 : index
    %330 = vector.load %arg8[%c0_197, %c0_198, %c0_199] : memref<1x1x48xf32, #tpu.memory_space<vmem>>, vector<1x1x48xf32>
    %331 = vector.shape_cast %330 : vector<1x1x48xf32> to vector<1x48xf32>
    %c0_200 = arith.constant 0 : index
    %c0_201 = arith.constant 0 : index
    %c0_202 = arith.constant 0 : index
    %332 = vector.load %arg9[%c0_200, %c0_201, %c0_202] : memref<1x1x48xf32, #tpu.memory_space<vmem>>, vector<1x1x48xf32>
    %333 = vector.shape_cast %332 : vector<1x1x48xf32> to vector<1x48xf32>
    %cst_203 = arith.constant dense<0.000000e+00> : vector<17xf32>
    %334 = vector.multi_reduction <add>, %329, %cst_203 [1] : vector<17x48xf32> to vector<17xf32>
    %335 = vector.shape_cast %334 : vector<17xf32> to vector<17x1xf32>
    %cst_204 = arith.constant 4.800000e+01 : f32
    %336 = vector.broadcast %cst_204 : f32 to vector<17x1xf32>
    %337 = arith.divf %335, %336 : vector<17x1xf32>
    %338 = vector.broadcast %337 : vector<17x1xf32> to vector<17x48xf32>
    %339 = arith.subf %329, %338 : vector<17x48xf32>
    %340 = arith.mulf %339, %339 : vector<17x48xf32>
    %cst_205 = arith.constant dense<0.000000e+00> : vector<17xf32>
    %341 = vector.multi_reduction <add>, %340, %cst_205 [1] : vector<17x48xf32> to vector<17xf32>
    %342 = vector.shape_cast %341 : vector<17xf32> to vector<17x1xf32>
    %cst_206 = arith.constant 4.800000e+01 : f32
    %343 = vector.broadcast %cst_206 : f32 to vector<17x1xf32>
    %344 = arith.divf %342, %343 : vector<17x1xf32>
    %cst_207 = arith.constant 9.99999996E-13 : f32
    %345 = vector.broadcast %cst_207 : f32 to vector<17x1xf32>
    %346 = arith.addf %344, %345 : vector<17x1xf32>
    %347 = math.rsqrt %346 : vector<17x1xf32>
    %348 = vector.broadcast %347 : vector<17x1xf32> to vector<17x48xf32>
    %349 = arith.mulf %339, %348 : vector<17x48xf32>
    %350 = vector.broadcast %331 : vector<1x48xf32> to vector<17x48xf32>
    %351 = arith.mulf %349, %350 : vector<17x48xf32>
    %352 = vector.broadcast %333 : vector<1x48xf32> to vector<17x48xf32>
    %353 = arith.addf %351, %352 : vector<17x48xf32>
    %c0_208 = arith.constant 0 : index
    %c0_209 = arith.constant 0 : index
    %c0_210 = arith.constant 0 : index
    %354 = vector.load %arg10[%c0_208, %c0_209, %c0_210] : memref<1x48x96xf32, #tpu.memory_space<vmem>>, vector<1x48x96xf32>
    %355 = vector.shape_cast %354 : vector<1x48x96xf32> to vector<48x96xf32>
    %cst_211 = arith.constant dense<0.000000e+00> : vector<17x96xf32>
    %356 = tpu.matmul %353, %355, %cst_211 {dimension_numbers = #tpu.dot_dimension_numbers<[1], [0], [0], [1], [0, 0, 1, 1], [], []>} : vector<17x48xf32>, vector<48x96xf32>, vector<17x96xf32> -> vector<17x96xf32>
    %c0_212 = arith.constant 0 : index
    %c0_213 = arith.constant 0 : index
    %c0_214 = arith.constant 0 : index
    %357 = vector.load %arg11[%c0_212, %c0_213, %c0_214] : memref<1x1x96xf32, #tpu.memory_space<vmem>>, vector<1x1x96xf32>
    %358 = vector.shape_cast %357 : vector<1x1x96xf32> to vector<1x96xf32>
    %359 = vector.broadcast %358 : vector<1x96xf32> to vector<17x96xf32>
    %360 = arith.addf %356, %359 : vector<17x96xf32>
    %cst_215 = arith.constant 5.000000e-01 : f32
    %361 = vector.broadcast %cst_215 : f32 to vector<17x96xf32>
    %362 = arith.mulf %361, %360 : vector<17x96xf32>
    %cst_216 = arith.constant 0.707106769 : f32
    %363 = vector.broadcast %cst_216 : f32 to vector<17x96xf32>
    %364 = arith.mulf %360, %363 : vector<17x96xf32>
    %cst_217 = arith.constant 0.000000e+00 : f32
    %365 = vector.broadcast %cst_217 : f32 to vector<17x96xf32>
    %366 = arith.cmpf oge, %364, %365 : vector<17x96xf32>
    %cst_218 = arith.constant 1.000000e+00 : f32
    %cst_219 = arith.constant -1.000000e+00 : f32
    %367 = vector.broadcast %cst_218 : f32 to vector<17x96xf32>
    %368 = vector.broadcast %cst_219 : f32 to vector<17x96xf32>
    %369 = arith.select %366, %367, %368 : vector<17x96xi1>, vector<17x96xf32>
    %370 = math.absf %364 : vector<17x96xf32>
    %cst_220 = arith.constant 0.327591091 : f32
    %371 = vector.broadcast %cst_220 : f32 to vector<17x96xf32>
    %372 = arith.mulf %371, %370 : vector<17x96xf32>
    %cst_221 = arith.constant 1.000000e+00 : f32
    %373 = vector.broadcast %cst_221 : f32 to vector<17x96xf32>
    %374 = arith.addf %373, %372 : vector<17x96xf32>
    %cst_222 = arith.constant 1.000000e+00 : f32
    %375 = vector.broadcast %cst_222 : f32 to vector<17x96xf32>
    %376 = arith.divf %375, %374 : vector<17x96xf32>
    %cst_223 = arith.constant 1.06140542 : f32
    %377 = vector.broadcast %cst_223 : f32 to vector<17x96xf32>
    %378 = arith.mulf %377, %376 : vector<17x96xf32>
    %cst_224 = arith.constant -1.45315206 : f32
    %379 = vector.broadcast %cst_224 : f32 to vector<17x96xf32>
    %380 = arith.addf %378, %379 : vector<17x96xf32>
    %381 = arith.mulf %380, %376 : vector<17x96xf32>
    %cst_225 = arith.constant 1.42141378 : f32
    %382 = vector.broadcast %cst_225 : f32 to vector<17x96xf32>
    %383 = arith.addf %381, %382 : vector<17x96xf32>
    %384 = arith.mulf %383, %376 : vector<17x96xf32>
    %cst_226 = arith.constant -0.284496725 : f32
    %385 = vector.broadcast %cst_226 : f32 to vector<17x96xf32>
    %386 = arith.addf %384, %385 : vector<17x96xf32>
    %387 = arith.mulf %386, %376 : vector<17x96xf32>
    %cst_227 = arith.constant 0.254829586 : f32
    %388 = vector.broadcast %cst_227 : f32 to vector<17x96xf32>
    %389 = arith.addf %387, %388 : vector<17x96xf32>
    %390 = arith.mulf %389, %376 : vector<17x96xf32>
    %cst_228 = arith.constant 0.000000e+00 : f32
    %391 = vector.broadcast %cst_228 : f32 to vector<17x96xf32>
    %392 = arith.subf %391, %370 : vector<17x96xf32>
    %393 = arith.mulf %392, %370 : vector<17x96xf32>
    %394 = math.exp %393 : vector<17x96xf32>
    %395 = arith.mulf %390, %394 : vector<17x96xf32>
    %cst_229 = arith.constant 1.000000e+00 : f32
    %396 = vector.broadcast %cst_229 : f32 to vector<17x96xf32>
    %397 = arith.subf %396, %395 : vector<17x96xf32>
    %398 = arith.mulf %369, %397 : vector<17x96xf32>
    %cst_230 = arith.constant 1.000000e+00 : f32
    %399 = vector.broadcast %cst_230 : f32 to vector<17x96xf32>
    %400 = arith.addf %399, %398 : vector<17x96xf32>
    %401 = arith.mulf %362, %400 : vector<17x96xf32>
    %c0_231 = arith.constant 0 : index
    %c0_232 = arith.constant 0 : index
    %c0_233 = arith.constant 0 : index
    %402 = vector.load %arg12[%c0_231, %c0_232, %c0_233] : memref<1x96x48xf32, #tpu.memory_space<vmem>>, vector<1x96x48xf32>
    %403 = vector.shape_cast %402 : vector<1x96x48xf32> to vector<96x48xf32>
    %cst_234 = arith.constant dense<0.000000e+00> : vector<17x48xf32>
    %404 = tpu.matmul %401, %403, %cst_234 {dimension_numbers = #tpu.dot_dimension_numbers<[1], [0], [0], [1], [0, 0, 1, 1], [], []>} : vector<17x96xf32>, vector<96x48xf32>, vector<17x48xf32> -> vector<17x48xf32>
    %405 = arith.addf %329, %404 : vector<17x48xf32>
    %c0_235 = arith.constant 0 : index
    %c0_236 = arith.constant 0 : index
    %c0_237 = arith.constant 0 : index
    %406 = vector.load %arg13[%c0_235, %c0_236, %c0_237] : memref<1x1x48xf32, #tpu.memory_space<vmem>>, vector<1x1x48xf32>
    %407 = vector.shape_cast %406 : vector<1x1x48xf32> to vector<1x48xf32>
    %408 = vector.broadcast %407 : vector<1x48xf32> to vector<17x48xf32>
    %409 = arith.addf %405, %408 : vector<17x48xf32>
    %cst_238 = arith.constant dense<0.000000e+00> : vector<17xf32>
    %410 = vector.multi_reduction <add>, %409, %cst_238 [1] : vector<17x48xf32> to vector<17xf32>
    %411 = vector.shape_cast %410 : vector<17xf32> to vector<17x1xf32>
    %cst_239 = arith.constant 4.800000e+01 : f32
    %412 = vector.broadcast %cst_239 : f32 to vector<17x1xf32>
    %413 = arith.divf %411, %412 : vector<17x1xf32>
    %414 = vector.broadcast %413 : vector<17x1xf32> to vector<17x48xf32>
    %415 = arith.subf %409, %414 : vector<17x48xf32>
    %416 = arith.mulf %415, %415 : vector<17x48xf32>
    %cst_240 = arith.constant dense<0.000000e+00> : vector<17xf32>
    %417 = vector.multi_reduction <add>, %416, %cst_240 [1] : vector<17x48xf32> to vector<17xf32>
    %418 = vector.shape_cast %417 : vector<17xf32> to vector<17x1xf32>
    %cst_241 = arith.constant 4.800000e+01 : f32
    %419 = vector.broadcast %cst_241 : f32 to vector<17x1xf32>
    %420 = arith.divf %418, %419 : vector<17x1xf32>
    %cst_242 = arith.constant 9.99999996E-13 : f32
    %421 = vector.broadcast %cst_242 : f32 to vector<17x1xf32>
    %422 = arith.addf %420, %421 : vector<17x1xf32>
    %423 = math.rsqrt %422 : vector<17x1xf32>
    %424 = vector.broadcast %423 : vector<17x1xf32> to vector<17x48xf32>
    %425 = arith.mulf %415, %424 : vector<17x48xf32>
    %426 = vector.broadcast %0 : vector<1x48xf32> to vector<17x48xf32>
    %427 = arith.mulf %425, %426 : vector<17x48xf32>
    %428 = vector.broadcast %1 : vector<1x48xf32> to vector<17x48xf32>
    %429 = arith.addf %427, %428 : vector<17x48xf32>
    %cst_243 = arith.constant dense<0.000000e+00> : vector<17x48xf32>
    %430 = tpu.matmul %429, %2, %cst_243 {dimension_numbers = #tpu.dot_dimension_numbers<[1], [0], [0], [1], [0, 0, 1, 1], [], []>} : vector<17x48xf32>, vector<48x48xf32>, vector<17x48xf32> -> vector<17x48xf32>
    %431 = vector.broadcast %3 : vector<1x48xf32> to vector<17x48xf32>
    %432 = arith.addf %430, %431 : vector<17x48xf32>
    %c1_244 = arith.constant 1 : index
    %c0_245 = arith.constant 0 : index
    %c0_246 = arith.constant 0 : index
    %433 = vector.load %arg18[%c1_244, %c0_245, %c0_246] : memref<2x17x48xf32, #tpu.memory_space<vmem>>, vector<1x17x48xf32>
    %434 = vector.shape_cast %433 : vector<1x17x48xf32> to vector<17x48xf32>
    %435 = arith.subf %432, %434 : vector<17x48xf32>
    %436 = arith.mulf %435, %435 : vector<17x48xf32>
    %cst_247 = arith.constant dense<0.000000e+00> : vector<17xf32>
    %437 = vector.multi_reduction <add>, %436, %cst_247 [1] : vector<17x48xf32> to vector<17xf32>
    %438 = vector.shape_cast %437 : vector<17xf32> to vector<17x1xf32>
    %cst_248 = arith.constant 0.020833334 : f32
    %439 = vector.broadcast %cst_248 : f32 to vector<17x1xf32>
    %440 = arith.mulf %438, %439 : vector<17x1xf32>
    %c1_249 = arith.constant 1 : index
    %c0_250 = arith.constant 0 : index
    %c0_251 = arith.constant 0 : index
    %441 = vector.load %arg19[%c1_249, %c0_250, %c0_251] : memref<2x17x1xf32, #tpu.memory_space<vmem>>, vector<1x17x1xf32>
    %442 = vector.shape_cast %441 : vector<1x17x1xf32> to vector<17x1xf32>
    %443 = arith.mulf %440, %442 : vector<17x1xf32>
    %444 = vector.shape_cast %443 : vector<17x1xf32> to vector<1x17x1xf32>
    %cst_252 = arith.constant dense<0.000000e+00> : vector<1xf32>
    %445 = vector.multi_reduction <add>, %444, %cst_252 [1, 2] : vector<1x17x1xf32> to vector<1xf32>
    %446 = vector.shape_cast %445 : vector<1xf32> to vector<1x1x1xf32>
    %447 = vector.extract %446[0, 0, 0] : f32 from vector<1x1x1xf32>
    %448 = arith.addf %223, %447 : f32
    %449 = vector.shape_cast %442 : vector<17x1xf32> to vector<1x17x1xf32>
    %cst_253 = arith.constant dense<0.000000e+00> : vector<1xf32>
    %450 = vector.multi_reduction <add>, %449, %cst_253 [1, 2] : vector<1x17x1xf32> to vector<1xf32>
    %451 = vector.shape_cast %450 : vector<1xf32> to vector<1x1x1xf32>
    %452 = vector.extract %451[0, 0, 0] : f32 from vector<1x1x1xf32>
    %453 = arith.addf %228, %452 : f32
    %454 = arith.divf %448, %453 : f32
    %cst_254 = arith.constant 1.000000e+00 : f32
    %455 = vector.broadcast %cst_254 : f32 to vector<1x1xf32>
    %456 = vector.broadcast %454 : f32 to vector<1x1xf32>
    %457 = arith.mulf %456, %455 : vector<1x1xf32>
    %c0_255 = arith.constant 0 : index
    %c0_256 = arith.constant 0 : index
    %458 = vector.load %arg20[%c0_255, %c0_256] : memref<1x1xf32, #tpu.memory_space<vmem>>, vector<1x1xf32>
    tpu.vector_store %arg20[%c0_255, %c0_256], %457 {strides = array<i32>} : memref<1x1xf32, #tpu.memory_space<vmem>>, vector<1x1xf32>,
    return
  }
  func.func @transform_0(%arg0: i32) -> (i32, i32, i32) {
    %c0_i32 = arith.constant 0 : i32
    %c0_i32_0 = arith.constant 0 : i32
    %c0_i32_1 = arith.constant 0 : i32
    %c0_i32_2 = arith.constant 0 : i32
    return %c0_i32, %c0_i32_0, %c0_i32_1 : i32, i32, i32
  }
  func.func @transform_1(%arg0: i32) -> (i32, i32, i32) {
    %c0_i32 = arith.constant 0 : i32
    %c0_i32_0 = arith.constant 0 : i32
    %c0_i32_1 = arith.constant 0 : i32
    %c0_i32_2 = arith.constant 0 : i32
    return %c0_i32, %c0_i32_0, %c0_i32_1 : i32, i32, i32
  }
  func.func @transform_2(%arg0: i32) -> (i32, i32, i32) {
    %c0_i32 = arith.constant 0 : i32
    %c0_i32_0 = arith.constant 0 : i32
    %c0_i32_1 = arith.constant 0 : i32
    %c0_i32_2 = arith.constant 0 : i32
    return %c0_i32, %c0_i32_0, %c0_i32_1 : i32, i32, i32
  }
  func.func @transform_3(%arg0: i32) -> (i32, i32, i32) {
    %c0_i32 = arith.constant 0 : i32
    %c0_i32_0 = arith.constant 0 : i32
    %c0_i32_1 = arith.constant 0 : i32
    %c0_i32_2 = arith.constant 0 : i32
    return %c0_i32, %c0_i32_0, %c0_i32_1 : i32, i32, i32
  }
  func.func @transform_4(%arg0: i32) -> (i32, i32, i32) {
    %c0_i32 = arith.constant 0 : i32
    %c0_i32_0 = arith.constant 0 : i32
    %c0_i32_1 = arith.constant 0 : i32
    %c0_i32_2 = arith.constant 0 : i32
    return %c0_i32, %c0_i32_0, %c0_i32_1 : i32, i32, i32
  }
  func.func @transform_5(%arg0: i32) -> (i32, i32, i32) {
    %c0_i32 = arith.constant 0 : i32
    %c0_i32_0 = arith.constant 0 : i32
    %c0_i32_1 = arith.constant 0 : i32
    %c0_i32_2 = arith.constant 0 : i32
    return %c0_i32, %c0_i32_0, %c0_i32_1 : i32, i32, i32
  }
  func.func @transform_6(%arg0: i32) -> (i32, i32, i32) {
    %c0_i32 = arith.constant 0 : i32
    %c0_i32_0 = arith.constant 0 : i32
    %c0_i32_1 = arith.constant 0 : i32
    %c0_i32_2 = arith.constant 0 : i32
    return %c0_i32, %c0_i32_0, %c0_i32_1 : i32, i32, i32
  }
  func.func @transform_7(%arg0: i32) -> (i32, i32, i32) {
    %c0_i32 = arith.constant 0 : i32
    %c0_i32_0 = arith.constant 0 : i32
    %c0_i32_1 = arith.constant 0 : i32
    %c0_i32_2 = arith.constant 0 : i32
    return %c0_i32, %c0_i32_0, %c0_i32_1 : i32, i32, i32
  }
  func.func @transform_8(%arg0: i32) -> (i32, i32, i32) {
    %c0_i32 = arith.constant 0 : i32
    %c0_i32_0 = arith.constant 0 : i32
    %c0_i32_1 = arith.constant 0 : i32
    %c0_i32_2 = arith.constant 0 : i32
    return %c0_i32, %c0_i32_0, %c0_i32_1 : i32, i32, i32
  }
  func.func @transform_9(%arg0: i32) -> (i32, i32, i32) {
    %c0_i32 = arith.constant 0 : i32
    %c0_i32_0 = arith.constant 0 : i32
    %c0_i32_1 = arith.constant 0 : i32
    %c0_i32_2 = arith.constant 0 : i32
    return %c0_i32, %c0_i32_0, %c0_i32_1 : i32, i32, i32
  }
  func.func @transform_10(%arg0: i32) -> (i32, i32, i32) {
    %c0_i32 = arith.constant 0 : i32
    %c0_i32_0 = arith.constant 0 : i32
    %c0_i32_1 = arith.constant 0 : i32
    %c0_i32_2 = arith.constant 0 : i32
    return %c0_i32, %c0_i32_0, %c0_i32_1 : i32, i32, i32
  }
  func.func @transform_11(%arg0: i32) -> (i32, i32, i32) {
    %c0_i32 = arith.constant 0 : i32
    %c0_i32_0 = arith.constant 0 : i32
    %c0_i32_1 = arith.constant 0 : i32
    %c0_i32_2 = arith.constant 0 : i32
    return %c0_i32, %c0_i32_0, %c0_i32_1 : i32, i32, i32
  }
  func.func @transform_12(%arg0: i32) -> (i32, i32, i32) {
    %c0_i32 = arith.constant 0 : i32
    %c0_i32_0 = arith.constant 0 : i32
    %c0_i32_1 = arith.constant 0 : i32
    %c0_i32_2 = arith.constant 0 : i32
    return %c0_i32, %c0_i32_0, %c0_i32_1 : i32, i32, i32
  }
  func.func @transform_13(%arg0: i32) -> (i32, i32) {
    %c0_i32 = arith.constant 0 : i32
    %c0_i32_0 = arith.constant 0 : i32
    %c0_i32_1 = arith.constant 0 : i32
    return %c0_i32, %c0_i32_0 : i32, i32
  }
  func.func @transform_14(%arg0: i32) -> (i32, i32) {
    %c0_i32 = arith.constant 0 : i32
    %c0_i32_0 = arith.constant 0 : i32
    %c0_i32_1 = arith.constant 0 : i32
    return %c0_i32, %c0_i32_0 : i32, i32
  }
  func.func @transform_15(%arg0: i32) -> (i32, i32) {
    %c0_i32 = arith.constant 0 : i32
    %c0_i32_0 = arith.constant 0 : i32
    %c0_i32_1 = arith.constant 0 : i32
    return %c0_i32, %c0_i32_0 : i32, i32
  }
  func.func @transform_16(%arg0: i32) -> (i32, i32) {
    %c0_i32 = arith.constant 0 : i32
    %c0_i32_0 = arith.constant 0 : i32
    %c0_i32_1 = arith.constant 0 : i32
    return %c0_i32, %c0_i32_0 : i32, i32
  }
  func.func @transform_17(%arg0: i32) -> (i32, i32, i32) {
    %c0_i32 = arith.constant 0 : i32
    %c0_i32_0 = arith.constant 0 : i32
    %c0_i32_1 = arith.constant 0 : i32
    %c0_i32_2 = arith.constant 0 : i32
    return %c0_i32, %c0_i32_0, %c0_i32_1 : i32, i32, i32
  }
  func.func @transform_18(%arg0: i32) -> (i32, i32, i32) {
    %c0_i32 = arith.constant 0 : i32
    %c0_i32_0 = arith.constant 0 : i32
    %c0_i32_1 = arith.constant 0 : i32
    %c0_i32_2 = arith.constant 0 : i32
    return %c0_i32, %c0_i32_0, %c0_i32_1 : i32, i32, i32
  }
  func.func @transform_19(%arg0: i32) -> (i32, i32) {
    %c0_i32 = arith.constant 0 : i32
    %c0_i32_0 = arith.constant 0 : i32
    %c0_i32_1 = arith.constant 0 : i32
    return %c0_i32, %c0_i32_0 : i32, i32
  }
}

</mosaic_0001>

<bundles_post_ra>
// kernel: mae_vit_forward.3
= control target key start
LH: loop header
LB: loop body
LE: loop exit
PB: predicated region body
PF: predicated region fallthrough
CT: control target
= control target key end

     0   :  { %vm31_vm0 = vcmask 392192   ;;  %s211_s1 = inlined_call_operand.vmem [shape: f32[48,48], index: 1, kind: input, shape index: {}]   ;;  %s212_s2 = inlined_call_operand.vmem [shape: f32[1,48], index: 2, kind: input, shape index: {}]   ;;  %s213_s0 = inlined_call_operand.vmem [shape: f32[2,16,48], index: 0, kind: input, shape index: {}]   ;;  %s214_s3 = inlined_call_operand.vmem [shape: f32[16,48], index: 3, kind: input, shape index: {}]   ;;  %s215_s4 = inlined_call_operand.vmem [shape: f32[2,16,48], index: 4, kind: output, shape index: {}]  }
   0x1   :  { %v22_v0 = vld [vmem:[%s211_s1 + $0x28] sm:$0xff]  ;;  %v21_v1 = vld [vmem:[%s211_s1 + $0x20] sm:$0xff]  ;;  %v20_v2 = vld [vmem:[%s211_s1 + $0x18] sm:$0xff] }
   0x2   :  { %114 = vmatpush.msra.mxu2 %v22_v0  ;;  %120 = vmatpush.msra.mxu3 %v22_v0  ;;  %v19_v3 = vld [vmem:[%s211_s1 + $0x10] sm:$0xff]  ;;  %v18_v4 = vld [vmem:[%s211_s1 + $0x8] sm:$0xff]  ;;  %v17_v5 = vld [vmem:[%s211_s1] sm:$0xff] }
   0x3   :  { %48 = vmatpush.msra.mxu0 %v22_v0  ;;  %84 = vmatpush.msra.mxu1 %v22_v0  ;;  %v27_v6 = vld [vmem:[%s213_s0 + $0x8] sm:$0xff]  ;;  %v109_v7 = vld [vmem:[%s213_s0 + $0x18] sm:$0xff]  ;;  %v26_v8 = vld [vmem:[%s213_s0] sm:$0xff] }
   0x4   :  { %115 = vmatpush.msra.mxu2 %v21_v1  ;;  %121 = vmatpush.msra.mxu3 %v21_v1  ;;  %v108_v9 = vld [vmem:[%s213_s0 + $0x10] sm:$0xff]  ;;  %v126_v10 = vld [vmem:[%s212_s2] ss:$0 sm:$0xff]  ;;  %v25_v18 = vld [vmem:[%s214_s3 + $0x8] sm:$0xff] }
   0x5   :  { %49 = vmatpush.msra.mxu0 %v21_v1  ;;  %85 = vmatpush.msra.mxu1 %v21_v1  ;;  %v24_v11 = vld [vmem:[%s214_s3] sm:$0xff] }
   0x6   :  { %116 = vmatpush.msra.mxu2 %v20_v2  ;;  %122 = vmatpush.msra.mxu3 %v20_v2 }
   0x7   :  { %50 = vmatpush.msra.mxu0 %v20_v2  ;;  %86 = vmatpush.msra.mxu1 %v20_v2 }
   0x8   :  { %117 = vmatpush.msra.mxu2 %v19_v3  ;;  %123 = vmatpush.msra.mxu3 %v19_v3 }
   0x9   :  { %51 = vmatpush.msra.mxu0 %v19_v3  ;;  %87 = vmatpush.msra.mxu1 %v19_v3 }
   0xa   :  { %118 = vmatpush.msra.mxu2 %v18_v4  ;;  %124 = vmatpush.msra.mxu3 %v18_v4 }
   0xb   :  { %52 = vmatpush.msra.mxu0 %v18_v4  ;;  %88 = vmatpush.msra.mxu1 %v18_v4 }
   0xc   :  { %119 = vmatpush.msra.mxu2 %v17_v5  ;;  %125 = vmatpush.msra.mxu3 %v17_v5 }
   0xd   :  { %107 = vmatmul.msk.f32.vlgmr.msra.gmra.mxu2 %vm31_vm0, %v27_v6  ;;  %111 = vmatmul.msk.f32.vlgmr.msra.gmra.mxu3 %vm31_vm0, %v109_v7 }
   0xe   :  { %53 = vmatpush.msra.mxu0 %v17_v5  ;;  %89 = vmatpush.msra.mxu1 %v17_v5 }
   0xf   :  { %106 = vmatmul.msk.f32.vlgmr.msra.gmra.mxu0 %vm31_vm0, %v26_v8  ;;  %110 = vmatmul.msk.f32.vlgmr.msra.gmra.mxu1 %vm31_vm0, %v108_v9 }
  0x8c   :  { %v55_v12 = vpop.f32.mrf.mxu0  ;;  %v91_v13 = vpop.f32.mrf.mxu1 }
  0x8d   :  { %v56_v14 = vadd.f32 %v126_v10, %v55_v12  ;;  %v92_v15 = vadd.f32 %v126_v10, %v91_v13 }
  0x8f   :  { %v61_v16 = vadd.f32 %v56_v14, %v24_v11  ;;  %v97_v17 = vadd.f32 %v92_v15, %v24_v11 }
  0x90   :  { %v58_v19 = vpop.f32.mrf.mxu2  ;;  %v94_v20 = vpop.f32.mrf.mxu3 }
  0x91   :  { %63 = vst.msk [vmem:[%s215_s4] sm:$0xff] %vm31_vm0, %v61_v16  ;;  %v59_v21 = vadd.f32 %v126_v10, %v58_v19  ;;  %v95_v22 = vadd.f32 %v126_v10, %v94_v20 }
  0x92   :  { %112 = vst.msk [vmem:[%s215_s4 + $0x10] sm:$0xff] %vm31_vm0, %v97_v17 }
  0x93   :  { %v62_v23 = vadd.f32 %v59_v21, %v25_v18  ;;  %v98_v24 = vadd.f32 %v95_v22, %v25_v18 }
  0x95   :  { %64 = vst.msk [vmem:[%s215_s4 + $0x8] sm:$0xff] %vm31_vm0, %v62_v23 }
  0x96   :  { %113 = vst.msk [vmem:[%s215_s4 + $0x18] sm:$0xff] %vm31_vm0, %v98_v24 }

// kernel: mae_vit_forward.4
= control target key start
LH: loop header
LB: loop body
LE: loop exit
PB: predicated region body
PF: predicated region fallthrough
CT: control target
= control target key end

     0   :  { %vm70_vm0 = vcmask 389120   ;;  %v2776_v2 = vmov 48.0   ;;  %vm126_vm5 = vcmask 392192   ;;  %vm171_vm6 = vcmask 126976   ;;  %s3805_s20 = smov 96   ;;  %s3803_s21 = smov 80   ;;  %s3776_s0 = inlined_call_operand.vmem [shape: f32[2,5,48], index: 0, kind: input, shape index: {}]   ;;  %s3777_s1 = inlined_call_operand.vmem [shape: f32[2,1,48], index: 1, kind: input, shape index: {}]   ;;  %s3778_s2 = inlined_call_operand.vmem [shape: f32[2,1,48], index: 2, kind: input, shape index: {}]   ;;  %s3779_s3 = inlined_call_operand.vmem [shape: f32[2,48,144], index: 3, kind: input, shape index: {}]   ;;  %s3780_s4 = inlined_call_operand.vmem [shape: f32[2,1,144], index: 4, kind: input, shape index: {}]   ;;  %s3781_s5 = inlined_call_operand.vmem [shape: f32[6,16,48], index: 5, kind: input, shape index: {}]   ;;  %s3782_s6 = inlined_call_operand.vmem [shape: f32[2,1,48], index: 6, kind: input, shape index: {}]   ;;  %s3783_s7 = inlined_call_operand.vmem [shape: f32[2,1,48], index: 7, kind: input, shape index: {}]   ;;  %s3784_s8 = inlined_call_operand.vmem [shape: f32[2,1,48], index: 8, kind: input, shape index: {}]   ;;  %s3785_s10 = inlined_call_operand.vmem [shape: f32[2,1,96], index: 10, kind: input, shape index: {}]   ;;  %s3786_s9 = inlined_call_operand.vmem [shape: f32[2,48,96], index: 9, kind: input, shape index: {}]   ;;  %s3787_s12 = inlined_call_operand.vmem [shape: f32[2,1,48], index: 12, kind: input, shape index: {}]   ;;  %s3788_s11 = inlined_call_operand.vmem [shape: f32[2,96,48], index: 11, kind: input, shape index: {}]   ;;  %s3789_s17 = inlined_call_operand.vmem [shape: f32[2,5,48], index: 17, kind: output, shape index: {0}]   ;;  %s3790_s13 = inlined_call_operand.vmem [shape: f32[1,48], index: 13, kind: input, shape index: {}]   ;;  %s3791_s15 = inlined_call_operand.vmem [shape: f32[48,48], index: 15, kind: input, shape index: {}]   ;;  %s3792_s14 = inlined_call_operand.vmem [shape: f32[1,48], index: 14, kind: input, shape index: {}]   ;;  %s3793_s16 = inlined_call_operand.vmem [shape: f32[1,48], index: 16, kind: input, shape index: {}]   ;;  %s3794_s18 = inlined_call_operand.vmem [shape: f32[2,5,48], index: 18, kind: output, shape index: {1}]  }
   0x1   :  { %3816 = sst [smem:[#allocation3_spill]] %s3776_s0  ;;  %2687 = vrcp.f32 %v2776_v2  ;;  %v118_v14 = vld [vmem:[%s3779_s3 + $0x50] sm:$0xff]  ;;  %v119_v15 = vld [vmem:[%s3779_s3 + $0x58] sm:$0xff]  ;;  %v116_v16 = vld [vmem:[%s3779_s3 + $0x40] sm:$0xff]  ;;  %s3811_s22 = smov 64   ;;  %vm177_vm7 = vcmask 130048  }
   0x2   :  { %3817 = sst [smem:[#allocation4_spill]] %s3777_s1  ;;  %140 = vmatpush.msra.mxu0 %v118_v14  ;;  %160 = vmatpush.msra.mxu1 %v119_v15  ;;  %v117_v17 = vld [vmem:[%s3779_s3 + $0x48] sm:$0xff]  ;;  %v114_v18 = vld [vmem:[%s3779_s3 + $0x30] sm:$0xff]  ;;  %v115_v19 = vld [vmem:[%s3779_s3 + $0x38] sm:$0xff]  ;;  %s3809_s23 = smov 112   ;;  %vm3798_vm8 = vcmask 36864  }
   0x3   :  { %3818 = sst [smem:[#allocation5_spill]] %s3778_s2  ;;  %v112_v20 = vld [vmem:[%s3779_s3 + $0x20] sm:$0xff]  ;;  %v113_v21 = vld [vmem:[%s3779_s3 + $0x28] sm:$0xff]  ;;  %v110_v22 = vld [vmem:[%s3779_s3 + $0x10] sm:$0xff]  ;;  %s3807_s2 = smov 48   ;;  %vm234_vm9 = vcmask 1044480  }
   0x4   :  { %3819 = sst [smem:[#allocation6_spill]] %s3792_s14  ;;  %141 = vmatpush.msra.mxu0 %v116_v16  ;;  %161 = vmatpush.msra.mxu1 %v117_v17  ;;  %v111_v23 = vld [vmem:[%s3779_s3 + $0x18] sm:$0xff]  ;;  %v108_v24 = vld [vmem:[%s3779_s3] sm:$0xff]  ;;  %v109_v25 = vld [vmem:[%s3779_s3 + $0x8] sm:$0xff]  ;;  %s3799_s24 = smov 32  }
   0x5   :  { %3820 = sst [smem:[#allocation7_spill]] %s3793_s16  ;;  %v120_v41 = vld [vmem:[%s3780_s4] sm:$0x3]  ;;  %s3801_s25 = smov 16  }
   0x6   :  { %3821 = sst [smem:[#allocation8_spill]] %s3794_s18  ;;  %142 = vmatpush.msra.mxu0 %v114_v18  ;;  %162 = vmatpush.msra.mxu1 %v115_v19  ;;  %v122_v42 = vperm.slane %v120_v41, 0  ;;  %v123_v43 = vperm.slane %v120_v41, 1  ;;  %s3825_s19 = smov 48  }
   0x7   :  { %s3822_s29 = sld [smem:[#allocation3_spill]]  ;;  %v2688_v3 = vpop.eup %2687  ;;  %s3826_s1 = smov 96  }
   0x8   :  { %v75_v4 = vmul.f32 48.0, %v2688_v3  ;;  %vm79_vm1 = vweird.f32 %v2688_v3  ;;  %143 = vmatpush.msra.mxu0 %v112_v20  ;;  %163 = vmatpush.msra.mxu1 %v113_v21  ;;  %s3823_s27 = sld [smem:[#allocation4_spill]]  ;;  %v258_v21 = vld [vmem:[%s3781_s5 + $0x8] sm:$0xff]  ;;  %s3827_s26 = smov 80  }
   0x9   :  { %s3824_s0 = sld [smem:[#allocation5_spill]]  ;;  %s3831_s28 = smov 16  }
   0xa   :  { %v76_v5 = vsub.f32 1.0, %v75_v4  ;;  %144 = vmatpush.msra.mxu0 %v110_v22  ;;  %164 = vmatpush.msra.mxu1 %v111_v23  ;;  %s3837_s30 = smov 112  }
   0xc   :  { %v77_v6 = vmul.f32 %v2688_v3, %v76_v5  ;;  %145 = vmatpush.msra.mxu0 %v108_v24  ;;  %165 = vmatpush.msra.mxu1 %v109_v25 }
   0xd   :  { %v2883_v0 = vld [vmem:[%s3822_s29] sm:$0x1f] }
   0xe   :  { %v71_v1 = vsel %vm70_vm0, %v2883_v0, 0.0  ;;  %v78_v7 = vadd.f32 %v2688_v3, %v77_v6  ;;  %v2656_v35 = vld [vmem:[%s3823_s27] ss:$0 sm:$0xff]  ;;  %382 = vmatpush.msrb.mxu0 %v258_v21 }
   0xf   :  { %72 = vadd.xlane.f32.xlu0 %v71_v1  ;;  %v2657_v38 = vld [vmem:[%s3824_s0] ss:$0 sm:$0xff] }
  0x10   :  { %v2887_v8 = vsel %vm79_vm1, %v2688_v3, %v78_v7 }
  0x82   :  { %v73_v9 = vpop.xlane.xlu0 %72 }
  0x83   :  { %v81_v10 = vmul.f32 %v2887_v8, %v73_v9 }
  0x85   :  { %v82_v11 = vsub.f32 %v2883_v0, %v81_v10 }
  0x87   :  { %v83_v12 = vmul.f32 %v82_v11, %v82_v11 }
  0x89   :  { %v84_v13 = vsel %vm70_vm0, %v83_v12, 0.0 }
  0x8a   :  { %85 = vadd.xlane.f32.xlu0 %v84_v13 }
  0xfd   :  { %v86_v26 = vpop.xlane.xlu0 %85 }
  0xfe   :  { %v87_v27 = vmul.f32 %v86_v26, %v2887_v8 }
 0x100   :  { %v88_v28 = vadd.f32 1e-12, %v87_v27 }
 0x102   :  { %2689 = vrsqrt.f32 %v88_v28  ;;  %vm95_vm3 = vweird.f32 %v88_v28 }
 0x108   :  { %v2690_v29 = vpop.eup %2689 }
 0x109   :  { %v90_v30 = vmul.f32 %v2690_v29, %v88_v28  ;;  %vm96_vm2 = vweird.f32 %v2690_v29 }
 0x10a   :  { %vm97_vm4 = vmor %vm95_vm3, %vm96_vm2  ;;  %vm230_vm2 = vcmask 39936  }
 0x10b   :  { %v91_v31 = vmul.f32 %v2690_v29, %v90_v30 }
 0x10d   :  { %v92_v32 = vmul.f32 0.5, %v91_v31 }
 0x10f   :  { %v93_v33 = vsub.f32 1.5, %v92_v32 }
 0x111   :  { %v94_v34 = vmul.f32 %v2690_v29, %v93_v33 }
 0x113   :  { %v98_v36 = vsel %vm97_vm4, %v2690_v29, %v94_v34 }
 0x114   :  { %v99_v37 = vmul.f32 %v98_v36, %v82_v11 }
 0x116   :  { %v103_v39 = vmul.f32 %v2656_v35, %v99_v37 }
 0x118   :  { %v107_v40 = vadd.f32 %v2657_v38, %v103_v39 }
 0x11a   :  { %2470 = vmatmul.msk.f32.vlgmr.msra.gmra.mxu0 %vm126_vm5, %v107_v40  ;;  %2471 = vmatmul.msk.f32.vlgmr.msra.gmra.mxu1 %vm126_vm5, %v107_v40 }
 0x197   :  { %v147_v44 = vpop.f32.mrf.mxu0  ;;  %v167_v45 = vpop.f32.mrf.mxu1 }
 0x198   :  { %v148_v46 = vadd.f32 %v147_v44, %v122_v42  ;;  %v168_v47 = vadd.f32 %v167_v45, %v123_v43 }
 0x19a   :  { %170 = vst [vmem:[#allocation2] sm:$0x1f] %v148_v46 }
 0x19b   :  { %172 = vst.msk [vmem:[#allocation2 + $0x8] sm:$0x1f] %vm171_vm6, %v168_v47 }
 0x1a1   :  { %v173_v48 = vld [vmem:[#allocation2] sm:$0x1f] }
 0x1a2   :  { %389 = vrot.lane.b32.xlu0 %v173_v48, %s3805_s20  ;;  %175 = vrot.lane.b32.xlu2 %v173_v48, %s3803_s21  ;;  %s3835_s21 = smov 32  }
 0x1a3   :  { %261 = vrot.lane.b32.xlu1 %v173_v48, %s3811_s22 }
 0x1aa   :  { %391 = vrot.lane.b32.xlu2 %v173_v48, %s3807_s2  ;;  %s3838_s2 = sld [smem:[#allocation8_spill]] }
 0x1ab   :  { %259 = vrot.lane.b32.xlu1 %v173_v48, %s3809_s23 }
 0x1fc   :  { %v176_v49 = vpop.permute.xlu2 %175 }
 0x1fd   :  { %2472 = vmatpush.xpose.msk.msra.mxu2 %vm177_vm7, %v176_v49 }
 0x200   :  { %2473 = vmatmul.msk.f32.vlgmr.msra.gmra.mxu2 %vm177_vm7, %v173_v48 }
 0x204   :  { %v392_v51 = vpop.permute.xlu2 %391 }
 0x214   :  { %v390_v53 = vpop.permute.xlu0 %389 }
 0x215   :  { %v262_v50 = vpop.permute.xlu1 %261 }
 0x216   :  { %2476 = vmatpush.xpose.msk.msrb.mxu1 %vm177_vm7, %v262_v50 }
 0x21a   :  { %2484 = vmatpush.xpose.msk.msra.mxu1 %vm177_vm7, %v392_v51 }
 0x21d   :  { %v260_v52 = vpop.permute.xlu1 %259 }
 0x21e   :  { %2477 = vmatmul.msk.f32.vlgmr.msrb.gmra.mxu1 %vm177_vm7, %v260_v52  ;;  %v388_v52 = vld [vmem:[#allocation2 + $0x8] sm:$0x1f] }
 0x226   :  { %2485 = vmatmul.msk.f32.vlgmr.msra.gmra.mxu1 %vm177_vm7, %v390_v53 }
 0x283   :  { %v199_v54 = vpop.f32.mrf.mxu2 }
 0x284   :  { %v202_v55 = vmul.f32 0.25, %v199_v54 }
 0x286   :  { %v204_v56 = vsel %vm3798_vm8, %v202_v55, -inf }
 0x287   :  { %205 = vmax.xlane.f32.xlu0 %v204_v56  ;;  %v257_v56 = vld [vmem:[%s3781_s5] sm:$0xff] }
 0x288   :  { %383 = vmatpush.msrb.mxu0 %v257_v56 }
 0x29b   :  { %v284_v57 = vpop.f32.mrf.mxu1 }
 0x29c   :  { %v287_v58 = vmul.f32 0.25, %v284_v57  ;;  %v2481_v57 = vld [vmem:[%s3781_s5 + $0x18] sm:$0xff] }
 0x29e   :  { %v288_v59 = vsel %vm3798_vm8, %v287_v58, -inf }
 0x29f   :  { %289 = vmax.xlane.f32.xlu1 %v288_v59  ;;  %v2489_v59 = vld [vmem:[%s3781_s5 + $0x28] sm:$0xff] }
 0x2a3   :  { %v414_v60 = vpop.f32.mrf.mxu1 }
 0x2a4   :  { %v417_v61 = vmul.f32 0.25, %v414_v60  ;;  %v2488_v60 = vld [vmem:[%s3781_s5 + $0x20] sm:$0xff] }
 0x2a6   :  { %v418_v62 = vsel %vm3798_vm8, %v417_v61, -inf }
 0x2a7   :  { %419 = vmax.xlane.f32.xlu2 %v418_v62 }
 0x2fa   :  { %v206_v63 = vpop.xlane.xlu0 %205 }
 0x2fb   :  { %v207_v3 = vsub.f32 %v202_v55, %v206_v63 }
 0x2fd   :  { %v208_v5 = vmul.f32 1.442695, %v207_v3 }
 0x312   :  { %v290_v1 = vpop.xlane.xlu1 %289 }
 0x313   :  { %v291_v2 = vsub.f32 %v287_v58, %v290_v1  ;;  %v2480_v58 = vld [vmem:[%s3781_s5 + $0x10] sm:$0xff] }
 0x315   :  { %v292_v4 = vmul.f32 1.442695, %v291_v2 }
 0x317   :  { %2691 = vpow2.f32 %v292_v4 }
 0x318   :  { %2693 = vpow2.f32 %v208_v5 }
 0x31a   :  { %v420_v6 = vpop.xlane.xlu2 %419 }
 0x31b   :  { %v421_v7 = vsub.f32 %v417_v61, %v420_v6  ;;  %v2658_v6 = vld [vmem:[%s3782_s6] ss:$0 sm:$0xff] }
 0x31d   :  { %v2955_v9 = vpop.eup %2691  ;;  %v422_v10 = vmul.f32 1.442695, %v421_v7 }
 0x31e   :  { %v294_v11 = vsel %vm3798_vm8, %v2955_v9, 0.0  ;;  %v2694_v12 = vpop.eup %2693 }
 0x31f   :  { %2695 = vpow2.f32 %v422_v10  ;;  %295 = vadd.xlane.f32.xlu2 %v294_v11  ;;  %v210_v15 = vsel %vm3798_vm8, %v2694_v12, 0.0 }
 0x325   :  { %v2959_v13 = vpop.eup %2695 }
 0x326   :  { %v424_v14 = vsel %vm3798_vm8, %v2959_v13, 0.0 }
 0x327   :  { %425 = vadd.xlane.f32.xlu1 %v424_v14  ;;  %211 = vadd.xlane.f32.xlu2 %v210_v15 }
 0x33f   :  { %228 = vrot.lane.b32.xlu2 %v173_v48, %s3799_s24 }
 0x340   :  { %312 = vrot.lane.b32.xlu1 %v173_v48, %s3801_s25  ;;  %s3855_s25 = sld [smem:[#allocation8_spill]] }
 0x392   :  { %v296_v16 = vpop.xlane.xlu2 %295 }
 0x393   :  { %2697 = vrcp.f32 %v296_v16  ;;  %v308_v36 = vand.u32 2147483648, %v296_v16  ;;  %vm302_vm14 = vweird.f32 %v296_v16  ;;  %v306_v38 = vand.u32 2147483647, %v296_v16 }
 0x395   :  { %v309_v44 = vor.u32 1.1754944e-38, %v308_v36  ;;  %vm307_vm3 = vcmp.eq.f32.partialorder %v306_v38, 8.507059e+37  ;;  %v2661_v36 = vld [vmem:[%s3785_s10] ss:$0 sm:$0xff] }
 0x399   :  { %v2698_v17 = vpop.eup %2697 }
 0x39a   :  { %v212_v18 = vpop.xlane.xlu2 %211  ;;  %v426_v19 = vpop.xlane.xlu1 %425  ;;  %v298_v20 = vmul.f32 %v2698_v17, %v296_v16  ;;  %vm303_vm11 = vweird.f32 %v2698_v17  ;;  %v538_v16 = vld [vmem:[%s3786_s9 + $0x28] sm:$0xff] }
 0x39b   :  { %2699 = vrcp.f32 %v212_v18  ;;  %v224_v30 = vand.u32 2147483648, %v212_v18  ;;  %v222_v32 = vand.u32 2147483647, %v212_v18  ;;  %vm218_vm12 = vweird.f32 %v212_v18  ;;  %vm304_vm1 = vmor %vm302_vm14, %vm303_vm11  ;;  %556 = vmatpush.msra.mxu0 %v538_v16 }
 0x39c   :  { %2701 = vrcp.f32 %v426_v19  ;;  %v299_v22 = vsub.f32 1.0, %v298_v20  ;;  %v438_v47 = vand.u32 2147483648, %v426_v19  ;;  %vm432_vm8 = vweird.f32 %v426_v19  ;;  %v533_v20 = vld [vmem:[%s3786_s9] sm:$0xff] }
 0x39d   :  { %v225_v37 = vor.u32 1.1754944e-38, %v224_v30  ;;  %vm223_vm15 = vcmp.eq.f32.partialorder %v222_v32, 8.507059e+37  ;;  %v436_v48 = vand.u32 2147483647, %v426_v19  ;;  %v2659_v30 = vld [vmem:[%s3783_s7] ss:$0 sm:$0xff] }
 0x39e   :  { %v300_v27 = vmul.f32 %v2698_v17, %v299_v22  ;;  %v439_v53 = vor.u32 1.1754944e-38, %v438_v47  ;;  %v613_v47 = vld [vmem:[%s3788_s11 + $0x38] sm:$0xff] }
 0x39f   :  { %vm437_vm11 = vcmp.eq.f32.partialorder %v436_v48, 8.507059e+37  ;;  %v612_v48 = vld [vmem:[%s3788_s11 + $0x30] sm:$0xff] }
 0x3a0   :  { %v301_v33 = vadd.f32 %v2698_v17, %v300_v27 }
 0x3a1   :  { %v2700_v23 = vpop.eup %2699 }
 0x3a2   :  { %v2702_v24 = vpop.eup %2701  ;;  %v214_v25 = vmul.f32 %v2700_v23, %v212_v18  ;;  %v229_v26 = vpop.permute.xlu2 %228  ;;  %vm219_vm10 = vweird.f32 %v2700_v23  ;;  %v305_v43 = vsel %vm304_vm1, %v2698_v17, %v301_v33  ;;  %v536_v17 = vld [vmem:[%s3786_s9 + $0x18] sm:$0xff]  ;;  %v535_v18 = vld [vmem:[%s3786_s9 + $0x10] sm:$0xff]  ;;  %v2660_v33 = vld [vmem:[%s3784_s8] ss:$0 sm:$0xff] }
 0x3a3   :  { %2474 = vmatpush.msk.msra.mxu3 %vm234_vm9, %v229_v26  ;;  %v428_v29 = vmul.f32 %v2702_v24, %v426_v19  ;;  %vm220_vm13 = vmor %vm218_vm12, %vm219_vm10  ;;  %v310_v45 = vsel %vm307_vm3, %v309_v44, %v305_v43  ;;  %vm433_vm4 = vweird.f32 %v2702_v24  ;;  %v534_v19 = vld [vmem:[%s3786_s9 + $0x8] sm:$0xff] }
 0x3a4   :  { %v215_v28 = vsub.f32 1.0, %v214_v25  ;;  %v311_v50 = vmul.f32 %v2955_v9, %v310_v45  ;;  %vm434_vm10 = vmor %vm432_vm8, %vm433_vm4  ;;  %v615_v43 = vld [vmem:[%s3788_s11 + $0x48] sm:$0xff]  ;;  %v614_v45 = vld [vmem:[%s3788_s11 + $0x40] sm:$0xff] }
 0x3a5   :  { %v429_v34 = vsub.f32 1.0, %v428_v29  ;;  %359 = vmatpush.msrb.mxu3 %v2481_v57 }
 0x3a6   :  { %v216_v31 = vmul.f32 %v2700_v23, %v215_v28 }
 0x3a7   :  { %v430_v41 = vmul.f32 %v2702_v24, %v429_v34  ;;  %360 = vmatpush.msrb.mxu3 %v2480_v58 }
 0x3a8   :  { %v217_v35 = vadd.f32 %v2700_v23, %v216_v31 }
 0x3a9   :  { %v431_v46 = vadd.f32 %v2702_v24, %v430_v41  ;;  %v616_v41 = vld [vmem:[%s3788_s11 + $0x50] sm:$0xff] }
 0x3aa   :  { %v221_v39 = vsel %vm220_vm13, %v2700_v23, %v217_v35 }
 0x3ab   :  { %v226_v40 = vsel %vm223_vm15, %v225_v37, %v221_v39  ;;  %v435_v51 = vsel %vm434_vm10, %v2702_v24, %v431_v46  ;;  %v617_v39 = vld [vmem:[%s3788_s11 + $0x58] sm:$0xff]  ;;  %vm618_vm10 = vcmask 785408  }
 0x3ac   :  { %v227_v42 = vmul.f32 %v2694_v12, %v226_v40  ;;  %v440_v54 = vsel %vm437_vm11, %v439_v53, %v435_v51  ;;  %626 = vmatpush.msrb.mxu1 %v617_v39  ;;  %v609_v53 = vld [vmem:[%s3788_s11 + $0x18] sm:$0xff]  ;;  %v2499_v39 = vld [vmem:[%s3779_s3 + $0x80] sm:$0xff] }
 0x3ad   :  { %v441_v55 = vmul.f32 %v2959_v13, %v440_v54 }
 0x3ae   :  { %2475 = vmatmul.msk.f32.vlgmr.msra.gmra.mxu3 %vm230_vm2, %v227_v42  ;;  %627 = vmatpush.msrb.mxu1 %v616_v41  ;;  %v2497_v41 = vld [vmem:[%s3779_s3 + $0x70] sm:$0xff] }
 0x3af   :  { %488 = vmatpush.msra.mxu3 %v2489_v59  ;;  %v607_v59 = vld [vmem:[%s3788_s11 + $0x8] sm:$0xff] }
 0x3b0   :  { %628 = vmatpush.msrb.mxu1 %v615_v43  ;;  %v2495_v43 = vld [vmem:[%s3779_s3 + $0x60] sm:$0xff] }
 0x3b1   :  { %489 = vmatpush.msra.mxu3 %v2488_v60  ;;  %v606_v60 = vld [vmem:[%s3788_s11] sm:$0xff] }
 0x3b2   :  { %v313_v49 = vpop.permute.xlu1 %312  ;;  %629 = vmatpush.msrb.mxu1 %v614_v45 }
 0x3b3   :  { %2478 = vmatpush.msk.msrb.mxu2 %vm234_vm9, %v313_v49  ;;  %v611_v49 = vld [vmem:[%s3788_s11 + $0x28] sm:$0xff] }
 0x3b4   :  { %2479 = vmatmul.msk.f32.vlgmr.msrb.gmra.mxu2 %vm230_vm2, %v311_v50  ;;  %630 = vmatpush.msrb.mxu1 %v613_v47  ;;  %v610_v50 = vld [vmem:[%s3788_s11 + $0x20] sm:$0xff] }
 0x3b5   :  { %2486 = vmatpush.msk.msra.mxu2 %vm234_vm9, %v388_v52 }
 0x3b6   :  { %631 = vmatpush.msrb.mxu1 %v612_v48 }
 0x3b8   :  { %632 = vmatpush.msrb.mxu1 %v611_v49 }
 0x3ba   :  { %633 = vmatpush.msrb.mxu1 %v610_v50 }
 0x3bc   :  { %2487 = vmatmul.msk.f32.vlgmr.msra.gmra.mxu2 %vm230_vm2, %v441_v55  ;;  %634 = vmatpush.msrb.mxu1 %v609_v53  ;;  %v608_v55 = vld [vmem:[%s3788_s11 + $0x10] sm:$0xff] }
 0x3be   :  { %635 = vmatpush.msrb.mxu1 %v608_v55 }
 0x3c0   :  { %636 = vmatpush.msrb.mxu1 %v607_v59 }
 0x3c2   :  { %637 = vmatpush.msrb.mxu1 %v606_v60  ;;  %v2507_v60 = vld [vmem:[%s3780_s4 + $0x2] sm:$0x3] }
 0x431   :  { %v254_v61 = vpop.f32.mrf.mxu3 }
 0x432   :  { %2483 = vmatmul.msk.f32.vlgmr.msrb.gmra.mxu0 %vm177_vm7, %v254_v61 }
 0x437   :  { %v336_v62 = vpop.f32.mrf.mxu2 }
 0x438   :  { %2482 = vmatmul.msk.f32.vlgmr.msrb.gmra.mxu3 %vm177_vm7, %v336_v62 }
 0x43f   :  { %v465_v63 = vpop.f32.mrf.mxu2 }
 0x440   :  { %2490 = vmatmul.msk.f32.vlgmr.msra.gmra.mxu3 %vm177_vm7, %v465_v63 }
 0x4af   :  { %v385_v2 = vpop.f32.mrf.mxu0 }
 0x4bb   :  { %v362_v1 = vpop.f32.mrf.mxu3 }
 0x4bc   :  { %v386_v3 = vadd.f32 %v385_v2, %v362_v1 }
 0x4c3   :  { %v491_v4 = vpop.f32.mrf.mxu3 }
 0x4c4   :  { %v494_v5 = vadd.f32 %v491_v4, %v386_v3 }
 0x4c6   :  { %v495_v7 = vadd.f32 %v494_v5, %v2883_v0  ;;  %v537_v0 = vld [vmem:[%s3786_s9 + $0x20] sm:$0xff] }
 0x4c7   :  { %557 = vmatpush.msra.mxu0 %v537_v0 }
 0x4c8   :  { %v2999_v9 = vadd.f32 %v2658_v6, %v495_v7 }
 0x4c9   :  { %558 = vmatpush.msra.mxu0 %v536_v17 }
 0x4ca   :  { %v503_v10 = vsel %vm70_vm0, %v2999_v9, 0.0 }
 0x4cb   :  { %504 = vadd.xlane.f32.xlu0 %v503_v10  ;;  %559 = vmatpush.msra.mxu0 %v535_v18  ;;  %v2784_v18 = vmov -1.0  }
 0x4cd   :  { %560 = vmatpush.msra.mxu0 %v534_v19 }
 0x4cf   :  { %561 = vmatpush.msra.mxu0 %v533_v20 }
 0x53e   :  { %v505_v11 = vpop.xlane.xlu0 %504 }
 0x53f   :  { %v506_v12 = vmul.f32 %v505_v11, %v2887_v8 }
 0x541   :  { %v507_v13 = vsub.f32 %v2999_v9, %v506_v12 }
 0x543   :  { %v508_v14 = vmul.f32 %v507_v13, %v507_v13 }
 0x545   :  { %v509_v15 = vsel %vm70_vm0, %v508_v14, 0.0 }
 0x546   :  { %510 = vadd.xlane.f32.xlu0 %v509_v15 }
 0x5b9   :  { %v511_v21 = vpop.xlane.xlu0 %510 }
 0x5ba   :  { %v512_v22 = vmul.f32 %v511_v21, %v2887_v8 }
 0x5bc   :  { %v513_v23 = vadd.f32 1e-12, %v512_v22 }
 0x5be   :  { %2703 = vrsqrt.f32 %v513_v23  ;;  %vm520_vm12 = vweird.f32 %v513_v23 }
 0x5c4   :  { %v2704_v24 = vpop.eup %2703 }
 0x5c5   :  { %v515_v25 = vmul.f32 %v2704_v24, %v513_v23  ;;  %vm521_vm8 = vweird.f32 %v2704_v24 }
 0x5c6   :  { %vm522_vm13 = vmor %vm520_vm12, %vm521_vm8 }
 0x5c7   :  { %v516_v26 = vmul.f32 %v2704_v24, %v515_v25 }
 0x5c9   :  { %v517_v27 = vmul.f32 0.5, %v516_v26 }
 0x5cb   :  { %v518_v28 = vsub.f32 1.5, %v517_v27 }
 0x5cd   :  { %v519_v29 = vmul.f32 %v2704_v24, %v518_v28 }
 0x5cf   :  { %v523_v31 = vsel %vm522_vm13, %v2704_v24, %v519_v29  ;;  %v2662_v24 = vld [vmem:[%s3787_s12] ss:$0 sm:$0xff]  ;;  %vm3828_vm13 = vcmask 36864  }
 0x5d0   :  { %v524_v32 = vmul.f32 %v523_v31, %v507_v13 }
 0x5d2   :  { %v528_v34 = vmul.f32 %v2659_v30, %v524_v32 }
 0x5d4   :  { %v532_v35 = vadd.f32 %v2660_v33, %v528_v34  ;;  %v2505_v34 = vld [vmem:[%s3779_s3 + $0xb0] sm:$0xff] }
 0x5d5   :  { %715 = vmatpush.msrb.mxu2 %v2505_v34 }
 0x5d6   :  { %2491 = vmatmul.msk.f32.vlgmr.msra.gmra.mxu0 %vm126_vm5, %v532_v35  ;;  %v2503_v35 = vld [vmem:[%s3779_s3 + $0xa0] sm:$0xff] }
 0x5d7   :  { %716 = vmatpush.msrb.mxu2 %v2503_v35 }
 0x653   :  { %v563_v37 = vpop.f32.mrf.mxu0 }
 0x654   :  { %v3035_v38 = vadd.f32 %v2661_v36, %v563_v37  ;;  %v2504_v36 = vld [vmem:[%s3779_s3 + $0xa8] sm:$0xff]  ;;  %v2501_v37 = vld [vmem:[%s3779_s3 + $0x90] sm:$0xff] }
 0x655   :  { %717 = vmatpush.msrb.mxu2 %v2501_v37 }
 0x656   :  { %v567_v40 = vmul.f32 0.70710677, %v3035_v38  ;;  %v566_v21 = vmul.f32 0.5, %v3035_v38  ;;  %v2502_v38 = vld [vmem:[%s3779_s3 + $0x98] sm:$0xff] }
 0x657   :  { %718 = vmatpush.msrb.mxu2 %v2499_v39 }
 0x658   :  { %v570_v42 = vand.u32 2147483647, %v567_v40  ;;  %vm568_vm4 = vcmp.ge.f32.partialorder %v567_v40, 0.0  ;;  %v2500_v40 = vld [vmem:[%s3779_s3 + $0x88] sm:$0xff] }
 0x659   :  { %v569_v19 = vsel %vm568_vm4, 1.0, %v2784_v18  ;;  %719 = vmatpush.msrb.mxu2 %v2497_v41 }
 0x65a   :  { %v571_v44 = vmul.f32 0.3275911, %v570_v42  ;;  %v597_v2 = vsub.f32 0.0, %v570_v42 }
 0x65b   :  { %720 = vmatpush.msrb.mxu2 %v2495_v43 }
 0x65c   :  { %v572_v46 = vadd.f32 1.0, %v571_v44  ;;  %v598_v5 = vmul.f32 %v597_v2, %v570_v42  ;;  %v2498_v42 = vld [vmem:[%s3779_s3 + $0x78] sm:$0xff]  ;;  %v2496_v44 = vld [vmem:[%s3779_s3 + $0x68] sm:$0xff] }
 0x65e   :  { %2705 = vrcp.f32 %v572_v46  ;;  %v584_v56 = vand.u32 2147483648, %v572_v46  ;;  %v582_v58 = vand.u32 2147483647, %v572_v46  ;;  %vm578_vm15 = vweird.f32 %v572_v46 }
 0x65f   :  { %v599_v10 = vmul.f32 1.442695, %v598_v5 }
 0x660   :  { %v585_v62 = vor.u32 1.1754944e-38, %v584_v56  ;;  %vm583_vm3 = vcmp.eq.f32.partialorder %v582_v58, 8.507059e+37 }
 0x661   :  { %2707 = vpow2.f32 %v599_v10 }
 0x664   :  { %v2706_v51 = vpop.eup %2705 }
 0x665   :  { %v574_v52 = vmul.f32 %v2706_v51, %v572_v46  ;;  %vm579_vm14 = vweird.f32 %v2706_v51 }
 0x666   :  { %vm580_vm1 = vmor %vm578_vm15, %vm579_vm14 }
 0x667   :  { %v575_v54 = vsub.f32 1.0, %v574_v52  ;;  %v2708_v16 = vpop.eup %2707  ;;  %vm3829_vm14 = vmmov %vm3828_vm13 }
 0x668   :  { %vm3830_vm15 = vmmov %vm3828_vm13 }
 0x669   :  { %v576_v57 = vmul.f32 %v2706_v51, %v575_v54  ;;  %v2663_v54 = vld [vmem:[%s3823_s27 + $0x1] ss:$0 sm:$0xff] }
 0x66b   :  { %v577_v61 = vadd.f32 %v2706_v51, %v576_v57  ;;  %v2664_v57 = vld [vmem:[%s3824_s0 + $0x1] ss:$0 sm:$0xff] }
 0x66d   :  { %v581_v63 = vsel %vm580_vm1, %v2706_v51, %v577_v61  ;;  %v698_v61 = vperm.slane %v2507_v60, 0  ;;  %vm3832_vm1 = vmmov %vm3828_vm13 }
 0x66e   :  { %v586_v1 = vsel %vm583_vm3, %v585_v62, %v581_v63  ;;  %v699_v62 = vperm.slane %v2507_v60, 1  ;;  %vm3833_vm3 = vmmov %vm3832_vm1 }
 0x66f   :  { %v588_v3 = vmul.f32 1.0614054, %v586_v1  ;;  %vm3834_vm4 = vmmov %vm3832_vm1 }
 0x671   :  { %v589_v4 = vadd.f32 -1.4531521, %v588_v3 }
 0x673   :  { %v590_v6 = vmul.f32 %v589_v4, %v586_v1 }
 0x675   :  { %v591_v7 = vadd.f32 1.4214138, %v590_v6 }
 0x677   :  { %v592_v11 = vmul.f32 %v591_v7, %v586_v1 }
 0x679   :  { %v593_v12 = vadd.f32 -0.28449672, %v592_v11 }
 0x67b   :  { %v594_v13 = vmul.f32 %v593_v12, %v586_v1 }
 0x67d   :  { %v595_v14 = vadd.f32 0.2548296, %v594_v13 }
 0x67f   :  { %v596_v15 = vmul.f32 %v595_v14, %v586_v1 }
 0x681   :  { %v601_v0 = vmul.f32 %v2708_v16, %v596_v15 }
 0x683   :  { %v602_v17 = vsub.f32 1.0, %v601_v0 }
 0x685   :  { %v603_v20 = vmul.f32 %v602_v17, %v569_v19 }
 0x687   :  { %v604_v22 = vadd.f32 1.0, %v603_v20 }
 0x689   :  { %v605_v23 = vmul.f32 %v604_v22, %v566_v21 }
 0x68b   :  { %2492 = vmatmul.msk.f32.vlgmr.msrb.gmra.mxu1 %vm618_vm10, %v605_v23 }
 0x708   :  { %v639_v25 = vpop.f32.mrf.mxu1 }
 0x709   :  { %v642_v26 = vadd.f32 %v639_v25, %v2999_v9  ;;  %v2506_v9 = vld [vmem:[%s3779_s3 + $0xb8] sm:$0xff] }
 0x70a   :  { %735 = vmatpush.msrb.mxu3 %v2506_v9 }
 0x70b   :  { %v3081_v27 = vadd.f32 %v2662_v24, %v642_v26 }
 0x70c   :  { %736 = vmatpush.msrb.mxu3 %v2504_v36 }
 0x70d   :  { %v652_v28 = vsel %vm70_vm0, %v3081_v27, 0.0 }
 0x70e   :  { %653 = vadd.xlane.f32.xlu1 %v652_v28  ;;  %737 = vmatpush.msrb.mxu3 %v2502_v38 }
 0x710   :  { %738 = vmatpush.msrb.mxu3 %v2500_v40 }
 0x712   :  { %739 = vmatpush.msrb.mxu3 %v2498_v42 }
 0x714   :  { %740 = vmatpush.msrb.mxu3 %v2496_v44 }
 0x781   :  { %v654_v29 = vpop.xlane.xlu1 %653 }
 0x782   :  { %v655_v30 = vmul.f32 %v654_v29, %v2887_v8 }
 0x784   :  { %v656_v31 = vsub.f32 %v3081_v27, %v655_v30 }
 0x786   :  { %v657_v32 = vmul.f32 %v656_v31, %v656_v31 }
 0x788   :  { %v658_v33 = vsel %vm70_vm0, %v657_v32, 0.0 }
 0x789   :  { %659 = vadd.xlane.f32.xlu0 %v658_v33 }
 0x7fc   :  { %v660_v45 = vpop.xlane.xlu0 %659 }
 0x7fd   :  { %v661_v46 = vmul.f32 %v660_v45, %v2887_v8 }
 0x7ff   :  { %v662_v47 = vadd.f32 1e-12, %v661_v46 }
 0x801   :  { %2709 = vrsqrt.f32 %v662_v47  ;;  %vm669_vm8 = vweird.f32 %v662_v47 }
 0x807   :  { %v2710_v48 = vpop.eup %2709 }
 0x808   :  { %v664_v49 = vmul.f32 %v2710_v48, %v662_v47  ;;  %vm670_vm11 = vweird.f32 %v2710_v48 }
 0x809   :  { %vm671_vm12 = vmor %vm669_vm8, %vm670_vm11 }
 0x80a   :  { %v665_v50 = vmul.f32 %v2710_v48, %v664_v49 }
 0x80c   :  { %v666_v51 = vmul.f32 0.5, %v665_v50 }
 0x80e   :  { %v667_v52 = vsub.f32 1.5, %v666_v51 }
 0x810   :  { %v668_v53 = vmul.f32 %v2710_v48, %v667_v52 }
 0x812   :  { %v672_v55 = vsel %vm671_vm12, %v2710_v48, %v668_v53 }
 0x813   :  { %v673_v56 = vmul.f32 %v672_v55, %v656_v31 }
 0x815   :  { %v677_v58 = vmul.f32 %v2663_v54, %v673_v56 }
 0x817   :  { %v681_v59 = vadd.f32 %v2664_v57, %v677_v58 }
 0x819   :  { %2508 = vmatmul.msk.f32.vlgmr.msrb.gmra.mxu2 %vm126_vm5, %v681_v59  ;;  %2509 = vmatmul.msk.f32.vlgmr.msrb.gmra.mxu3 %vm126_vm5, %v681_v59 }
 0x89c   :  { %v722_v63 = vpop.f32.mrf.mxu2  ;;  %v742_v1 = vpop.f32.mrf.mxu3 }
 0x89d   :  { %v723_v2 = vadd.f32 %v722_v63, %v698_v61  ;;  %v743_v3 = vadd.f32 %v742_v1, %v699_v62 }
 0x89f   :  { %745 = vst [vmem:[#allocation2] sm:$0x1f] %v723_v2 }
 0x8a0   :  { %746 = vst.msk [vmem:[#allocation2 + $0x8] sm:$0x1f] %vm171_vm6, %v743_v3 }
 0x8a6   :  { %v747_v4 = vld [vmem:[#allocation2] sm:$0x1f] }
 0x8a7   :  { %830 = vrot.lane.b32.xlu0 %v747_v4, %s3809_s23  ;;  %832 = vrot.lane.b32.xlu2 %v747_v4, %s3811_s22  ;;  %v959_v35 = vld [vmem:[#allocation2 + $0x8] sm:$0x1f]  ;;  %s3836_s23 = smov 64  }
 0x8af   :  { %962 = vrot.lane.b32.xlu2 %v747_v4, %s3825_s19 }
 0x8b7   :  { %960 = vrot.lane.b32.xlu2 %v747_v4, %s3826_s1 }
 0x8bf   :  { %749 = vrot.lane.b32.xlu2 %v747_v4, %s3827_s26 }
 0x901   :  { %v833_v5 = vpop.permute.xlu2 %832 }
 0x902   :  { %2516 = vmatpush.xpose.msk.msra.mxu3 %vm177_vm7, %v833_v5 }
 0x909   :  { %v963_v6 = vpop.permute.xlu2 %962 }
 0x90a   :  { %2524 = vmatpush.xpose.msk.msrb.mxu3 %vm177_vm7, %v963_v6 }
 0x911   :  { %v961_v7 = vpop.permute.xlu2 %960 }
 0x919   :  { %v831_v10 = vpop.permute.xlu0 %830  ;;  %v750_v11 = vpop.permute.xlu2 %749 }
 0x91a   :  { %2510 = vmatpush.xpose.msk.msrb.mxu0 %vm177_vm7, %v750_v11  ;;  %2517 = vmatmul.msk.f32.vlgmr.msra.gmra.mxu3 %vm177_vm7, %v831_v10 }
 0x91d   :  { %2511 = vmatmul.msk.f32.vlgmr.msrb.gmra.mxu0 %vm177_vm7, %v747_v4 }
 0x922   :  { %2525 = vmatmul.msk.f32.vlgmr.msrb.gmra.mxu3 %vm177_vm7, %v961_v7 }
 0x99a   :  { %v772_v12 = vpop.f32.mrf.mxu0 }
 0x99b   :  { %v775_v13 = vmul.f32 0.25, %v772_v12 }
 0x99d   :  { %v855_v14 = vpop.f32.mrf.mxu3  ;;  %v776_v15 = vsel %vm3828_vm13, %v775_v13, -inf }
 0x99e   :  { %v858_v16 = vmul.f32 0.25, %v855_v14  ;;  %777 = vmax.xlane.f32.xlu2 %v776_v15  ;;  %v2521_v14 = vld [vmem:[%s3781_s5 + $0x48] sm:$0xff]  ;;  %v2520_v15 = vld [vmem:[%s3781_s5 + $0x40] sm:$0xff] }
 0x9a0   :  { %v859_v0 = vsel %vm3829_vm14, %v858_v16, -inf }
 0x9a1   :  { %860 = vmax.xlane.f32.xlu0 %v859_v0  ;;  %v2528_v0 = vld [vmem:[%s3781_s5 + $0x50] sm:$0xff] }
 0x9a5   :  { %v985_v17 = vpop.f32.mrf.mxu3 }
 0x9a6   :  { %v988_v19 = vmul.f32 0.25, %v985_v17  ;;  %v2515_v17 = vld [vmem:[%s3781_s5 + $0x38] sm:$0xff] }
 0x9a7   :  { %953 = vmatpush.msra.mxu1 %v2515_v17  ;;  %v2546_v17 = vld [vmem:[%s3788_s11 + $0x80] sm:$0xff] }
 0x9a8   :  { %v989_v20 = vsel %vm3830_vm15, %v988_v19, -inf }
 0x9a9   :  { %990 = vmax.xlane.f32.xlu1 %v989_v20 }
 0x9b5   :  { %883 = vrot.lane.b32.xlu0 %v747_v4, %s3831_s28  ;;  %s3854_s28 = sld [smem:[#allocation7_spill]] }
 0xa11   :  { %v778_v21 = vpop.xlane.xlu2 %777 }
 0xa12   :  { %v779_v22 = vsub.f32 %v775_v13, %v778_v21 }
 0xa14   :  { %v780_v23 = vmul.f32 1.442695, %v779_v22  ;;  %v861_v24 = vpop.xlane.xlu0 %860 }
 0xa15   :  { %v862_v25 = vsub.f32 %v858_v16, %v861_v24  ;;  %v2529_v16 = vld [vmem:[%s3781_s5 + $0x58] sm:$0xff] }
 0xa16   :  { %2711 = vpow2.f32 %v780_v23 }
 0xa17   :  { %v863_v26 = vmul.f32 1.442695, %v862_v25 }
 0xa19   :  { %2713 = vpow2.f32 %v863_v26 }
 0xa1c   :  { %v3152_v28 = vpop.eup %2711  ;;  %v991_v29 = vpop.xlane.xlu1 %990 }
 0xa1d   :  { %v992_v30 = vsub.f32 %v988_v19, %v991_v29  ;;  %v782_v31 = vsel %vm3832_vm1, %v3152_v28, 0.0  ;;  %v2514_v19 = vld [vmem:[%s3781_s5 + $0x30] sm:$0xff]  ;;  %v2665_v29 = vld [vmem:[%s3782_s6 + $0x1] ss:$0 sm:$0xff] }
 0xa1e   :  { %783 = vadd.xlane.f32.xlu1 %v782_v31  ;;  %954 = vmatpush.msra.mxu1 %v2514_v19 }
 0xa1f   :  { %v993_v32 = vmul.f32 1.442695, %v992_v30  ;;  %v2714_v33 = vpop.eup %2713 }
 0xa20   :  { %v865_v34 = vsel %vm3833_vm3, %v2714_v33, 0.0 }
 0xa21   :  { %2715 = vpow2.f32 %v993_v32 }
 0xa26   :  { %866 = vadd.xlane.f32.xlu1 %v865_v34 }
 0xa27   :  { %v884_v9 = vpop.permute.xlu0 %883  ;;  %v2716_v36 = vpop.eup %2715 }
 0xa28   :  { %2518 = vmatpush.msk.msra.mxu0 %vm234_vm9, %v884_v9  ;;  %v995_v37 = vsel %vm3834_vm4, %v2716_v36, 0.0 }
 0xa2a   :  { %2526 = vmatpush.msk.msrb.mxu0 %vm234_vm9, %v959_v35 }
 0xa2e   :  { %996 = vadd.xlane.f32.xlu1 %v995_v37 }
 0xa47   :  { %800 = vrot.lane.b32.xlu1 %v747_v4, %s3835_s21 }
 0xa91   :  { %v784_v38 = vpop.xlane.xlu1 %783 }
 0xa92   :  { %2717 = vrcp.f32 %v784_v38  ;;  %v796_v1 = vand.u32 2147483648, %v784_v38  ;;  %vm790_vm4 = vweird.f32 %v784_v38  ;;  %v794_v3 = vand.u32 2147483647, %v784_v38 }
 0xa94   :  { %v797_v10 = vor.u32 1.1754944e-38, %v796_v1  ;;  %v2668_v1 = vld [vmem:[%s3785_s10 + $0x1] ss:$0 sm:$0xff] }
 0xa98   :  { %v2718_v40 = vpop.eup %2717 }
 0xa99   :  { %v867_v39 = vpop.xlane.xlu1 %866  ;;  %v786_v44 = vmul.f32 %v2718_v40, %v784_v38  ;;  %vm791_vm15 = vweird.f32 %v2718_v40  ;;  %v2539_v38 = vld [vmem:[%s3786_s9 + $0x58] sm:$0xff] }
 0xa9a   :  { %2719 = vrcp.f32 %v867_v39  ;;  %v879_v46 = vand.u32 2147483648, %v867_v39  ;;  %v877_v48 = vand.u32 2147483647, %v867_v39  ;;  %vm873_vm8 = vweird.f32 %v867_v39  ;;  %1132 = vmatpush.msrb.mxu1 %v2539_v38 }
 0xa9b   :  { %v787_v49 = vsub.f32 1.0, %v786_v44 }
 0xa9c   :  { %v880_v52 = vor.u32 1.1754944e-38, %v879_v46  ;;  %vm878_vm13 = vcmp.eq.f32.partialorder %v877_v48, 8.507059e+37 }
 0xa9d   :  { %v788_v56 = vmul.f32 %v2718_v40, %v787_v49 }
 0xa9f   :  { %v789_v62 = vadd.f32 %v2718_v40, %v788_v56 }
 0xaa0   :  { %v2720_v41 = vpop.eup %2719 }
 0xaa1   :  { %v869_v42 = vmul.f32 %v2720_v41, %v867_v39  ;;  %v997_v43 = vpop.xlane.xlu1 %996  ;;  %vm874_vm11 = vweird.f32 %v2720_v41  ;;  %v2538_v39 = vld [vmem:[%s3786_s9 + $0x50] sm:$0xff] }
 0xaa2   :  { %2721 = vrcp.f32 %v997_v43  ;;  %vm875_vm12 = vmor %vm873_vm8, %vm874_vm11  ;;  %v1009_v59 = vand.u32 2147483648, %v997_v43  ;;  %v1007_v61 = vand.u32 2147483647, %v997_v43  ;;  %vm1003_vm1 = vweird.f32 %v997_v43  ;;  %1133 = vmatpush.msrb.mxu1 %v2538_v39  ;;  %v1323_v39 = vld [vmem:[%s3779_s3 + $0x30] sm:$0xff] }
 0xaa3   :  { %v870_v45 = vsub.f32 1.0, %v869_v42  ;;  %vm792_vm8 = vmor %vm790_vm4, %vm791_vm15  ;;  %v2535_v42 = vld [vmem:[%s3786_s9 + $0x38] sm:$0xff] }
 0xaa4   :  { %v1010_v2 = vor.u32 1.1754944e-38, %v1009_v59  ;;  %vm1008_vm11 = vcmp.eq.f32.partialorder %v1007_v61, 8.507059e+37  ;;  %v793_v6 = vsel %vm792_vm8, %v2718_v40, %v789_v62  ;;  %v2537_v40 = vld [vmem:[%s3786_s9 + $0x48] sm:$0xff]  ;;  %v2667_v61 = vld [vmem:[%s3784_s8 + $0x1] ss:$0 sm:$0xff] }
 0xaa5   :  { %v871_v47 = vmul.f32 %v2720_v41, %v870_v45  ;;  %1134 = vmatpush.msrb.mxu1 %v2537_v40 }
 0xaa7   :  { %v872_v50 = vadd.f32 %v2720_v41, %v871_v47 }
 0xaa8   :  { %v2722_v51 = vpop.eup %2721 }
 0xaa9   :  { %v876_v53 = vsel %vm875_vm12, %v2720_v41, %v872_v50  ;;  %v999_v54 = vmul.f32 %v2722_v51, %v997_v43  ;;  %vm1004_vm14 = vweird.f32 %v2722_v51  ;;  %vm795_vm12 = vcmp.eq.f32.partialorder %v794_v3, 8.507059e+37  ;;  %v2536_v41 = vld [vmem:[%s3786_s9 + $0x40] sm:$0xff]  ;;  %v2534_v43 = vld [vmem:[%s3786_s9 + $0x30] sm:$0xff] }
 0xaaa   :  { %v881_v55 = vsel %vm878_vm13, %v880_v52, %v876_v53  ;;  %vm1005_vm3 = vmor %vm1003_vm1, %vm1004_vm14  ;;  %v798_v11 = vsel %vm795_vm12, %v797_v10, %v793_v6  ;;  %1135 = vmatpush.msrb.mxu1 %v2536_v41  ;;  %v2552_v6 = vld [vmem:[%s3788_s11 + $0xb0] sm:$0xff]  ;;  %v2551_v10 = vld [vmem:[%s3788_s11 + $0xa8] sm:$0xff] }
 0xaab   :  { %v1000_v57 = vsub.f32 1.0, %v999_v54  ;;  %v882_v58 = vmul.f32 %v2714_v33, %v881_v55  ;;  %v799_v13 = vmul.f32 %v3152_v28, %v798_v11  ;;  %v3198_v33 = vld [vmem:[%s3822_s29 + $0x8] sm:$0x1f]  ;;  %s3842_s29 = smov 16  }
 0xaac   :  { %v1287_v34 = vsel %vm70_vm0, %v3198_v33, 0.0  ;;  %1136 = vmatpush.msrb.mxu1 %v2535_v42 }
 0xaad   :  { %v1001_v60 = vmul.f32 %v2722_v51, %v1000_v57  ;;  %2519 = vmatmul.msk.f32.vlgmr.msra.gmra.mxu0 %vm230_vm2, %v882_v58  ;;  %1288 = vadd.xlane.f32.xlu0 %v1287_v34  ;;  %v2666_v58 = vld [vmem:[%s3783_s7 + $0x1] ss:$0 sm:$0xff] }
 0xaae   :  { %1137 = vmatpush.msrb.mxu1 %v2534_v43  ;;  %v1324_v43 = vld [vmem:[%s3779_s3 + $0x38] sm:$0xff] }
 0xaaf   :  { %v1002_v63 = vadd.f32 %v2722_v51, %v1001_v60 }
 0xab1   :  { %v1006_v4 = vsel %vm1005_vm3, %v2722_v51, %v1002_v63 }
 0xab2   :  { %v1011_v5 = vsel %vm1008_vm11, %v1010_v2, %v1006_v4  ;;  %v2553_v4 = vld [vmem:[%s3788_s11 + $0xb8] sm:$0xff] }
 0xab3   :  { %v1012_v7 = vmul.f32 %v2716_v36, %v1011_v5  ;;  %1202 = vmatpush.msra.mxu3 %v2553_v4 }
 0xab5   :  { %2527 = vmatmul.msk.f32.vlgmr.msrb.gmra.mxu0 %vm230_vm2, %v1012_v7  ;;  %1203 = vmatpush.msra.mxu3 %v2552_v6  ;;  %v2670_v6 = vld [vmem:[%s3824_s0] ss:$0 sm:$0xff] }
 0xab7   :  { %1204 = vmatpush.msra.mxu3 %v2551_v10 }
 0xab9   :  { %v801_v12 = vpop.permute.xlu1 %800 }
 0xaba   :  { %2512 = vmatpush.msk.msra.mxu2 %vm234_vm9, %v801_v12  ;;  %v2550_v12 = vld [vmem:[%s3788_s11 + $0xa0] sm:$0xff] }
 0xabb   :  { %2513 = vmatmul.msk.f32.vlgmr.msra.gmra.mxu2 %vm230_vm2, %v799_v13  ;;  %1205 = vmatpush.msra.mxu3 %v2550_v12 }
 0xabc   :  { %930 = vmatpush.msrb.mxu2 %v2521_v14  ;;  %v2549_v14 = vld [vmem:[%s3788_s11 + $0x98] sm:$0xff] }
 0xabd   :  { %1206 = vmatpush.msra.mxu3 %v2549_v14 }
 0xabe   :  { %931 = vmatpush.msrb.mxu2 %v2520_v15  ;;  %v2548_v15 = vld [vmem:[%s3788_s11 + $0x90] sm:$0xff] }
 0xabf   :  { %1207 = vmatpush.msra.mxu3 %v2548_v15 }
 0xac0   :  { %1059 = vmatpush.msra.mxu2 %v2529_v16  ;;  %v2547_v16 = vld [vmem:[%s3788_s11 + $0x88] sm:$0xff] }
 0xac1   :  { %1208 = vmatpush.msra.mxu3 %v2547_v16 }
 0xac2   :  { %1060 = vmatpush.msra.mxu2 %v2528_v0 }
 0xac3   :  { %1209 = vmatpush.msra.mxu3 %v2546_v17 }
 0xb20   :  { %v1289_v44 = vpop.xlane.xlu0 %1288 }
 0xb21   :  { %v1290_v45 = vmul.f32 %v1289_v44, %v2887_v8 }
 0xb23   :  { %v3225_v47 = vsub.f32 %v3198_v33, %v1290_v45 }
 0xb25   :  { %v1292_v49 = vmul.f32 %v3225_v47, %v3225_v47 }
 0xb27   :  { %v1293_v51 = vsel %vm70_vm0, %v1292_v49, 0.0 }
 0xb2a   :  { %v907_v20 = vpop.f32.mrf.mxu0 }
 0xb2b   :  { %2522 = vmatmul.msk.f32.vlgmr.msrb.gmra.mxu2 %vm177_vm7, %v907_v20 }
 0xb32   :  { %v1036_v21 = vpop.f32.mrf.mxu0 }
 0xb33   :  { %2530 = vmatmul.msk.f32.vlgmr.msra.gmra.mxu2 %vm177_vm7, %v1036_v21 }
 0xb3e   :  { %v824_v22 = vpop.f32.mrf.mxu2 }
 0xb3f   :  { %2523 = vmatmul.msk.f32.vlgmr.msra.gmra.mxu1 %vm177_vm7, %v824_v22  ;;  %v2545_v22 = vld [vmem:[%s3788_s11 + $0x78] sm:$0xff] }
 0xb40   :  { %1210 = vmatpush.msra.mxu3 %v2545_v22 }
 0xbae   :  { %v933_v23 = vpop.f32.mrf.mxu2 }
 0xbb6   :  { %v1062_v26 = vpop.f32.mrf.mxu2 }
 0xbbc   :  { %v956_v24 = vpop.f32.mrf.mxu1 }
 0xbbd   :  { %v957_v25 = vadd.f32 %v956_v24, %v933_v23 }
 0xbbf   :  { %v1065_v28 = vadd.f32 %v1062_v26, %v957_v25  ;;  %v2544_v25 = vld [vmem:[%s3788_s11 + $0x70] sm:$0xff] }
 0xbc0   :  { %1211 = vmatpush.msra.mxu3 %v2544_v25 }
 0xbc1   :  { %v1066_v30 = vadd.f32 %v1065_v28, %v3081_v27 }
 0xbc3   :  { %v3191_v31 = vadd.f32 %v2665_v29, %v1066_v30  ;;  %v2543_v30 = vld [vmem:[%s3788_s11 + $0x68] sm:$0xff] }
 0xbc4   :  { %1212 = vmatpush.msra.mxu3 %v2543_v30 }
 0xbc5   :  { %v1077_v32 = vsel %vm70_vm0, %v3191_v31, 0.0 }
 0xbc6   :  { %1078 = vadd.xlane.f32.xlu2 %v1077_v32  ;;  %v2542_v32 = vld [vmem:[%s3788_s11 + $0x60] sm:$0xff] }
 0xbc7   :  { %1213 = vmatpush.msra.mxu3 %v2542_v32 }
 0xc39   :  { %v1079_v9 = vpop.xlane.xlu2 %1078 }
 0xc3a   :  { %v1080_v35 = vmul.f32 %v1079_v9, %v2887_v8  ;;  %v1327_v9 = vld [vmem:[%s3779_s3 + $0x50] sm:$0xff] }
 0xc3b   :  { %1348 = vmatpush.msrb.mxu2 %v1327_v9 }
 0xc3c   :  { %v1081_v27 = vsub.f32 %v3191_v31, %v1080_v35  ;;  %v1328_v35 = vld [vmem:[%s3779_s3 + $0x58] sm:$0xff] }
 0xc3d   :  { %1368 = vmatpush.msra.mxu1 %v1328_v35 }
 0xc3e   :  { %v1082_v36 = vmul.f32 %v1081_v27, %v1081_v27 }
 0xc40   :  { %v1083_v37 = vsel %vm70_vm0, %v1082_v36, 0.0 }
 0xc41   :  { %1084 = vadd.xlane.f32.xlu2 %v1083_v37  ;;  %v1326_v37 = vld [vmem:[%s3779_s3 + $0x48] sm:$0xff] }
 0xc42   :  { %1369 = vmatpush.msra.mxu1 %v1326_v37 }
 0xc44   :  { %1370 = vmatpush.msra.mxu1 %v1324_v43 }
 0xc49   :  { %1294 = vadd.xlane.f32.xlu2 %v1293_v51  ;;  %v1319_v51 = vld [vmem:[%s3779_s3 + $0x10] sm:$0xff] }
 0xcb4   :  { %v1085_v46 = vpop.xlane.xlu2 %1084 }
 0xcb5   :  { %v1086_v48 = vmul.f32 %v1085_v46, %v2887_v8  ;;  %v1321_v46 = vld [vmem:[%s3779_s3 + $0x20] sm:$0xff] }
 0xcb7   :  { %v1087_v50 = vadd.f32 1e-12, %v1086_v48  ;;  %v1322_v48 = vld [vmem:[%s3779_s3 + $0x28] sm:$0xff] }
 0xcb8   :  { %1371 = vmatpush.msra.mxu1 %v1322_v48 }
 0xcb9   :  { %2723 = vrsqrt.f32 %v1087_v50  ;;  %vm1094_vm14 = vweird.f32 %v1087_v50 }
 0xcbc   :  { %v1295_v0 = vpop.xlane.xlu2 %1294 }
 0xcbd   :  { %v1296_v20 = vmul.f32 %v1295_v0, %v2887_v8 }
 0xcbf   :  { %v2724_v52 = vpop.eup %2723  ;;  %v1297_v23 = vadd.f32 1e-12, %v1296_v20 }
 0xcc0   :  { %v1089_v53 = vmul.f32 %v2724_v52, %v1087_v50  ;;  %vm1095_vm13 = vweird.f32 %v2724_v52 }
 0xcc1   :  { %vm1096_vm15 = vmor %vm1094_vm14, %vm1095_vm13  ;;  %vm1304_vm8 = vweird.f32 %v1297_v23 }
 0xcc2   :  { %v1090_v54 = vmul.f32 %v2724_v52, %v1089_v53  ;;  %v1320_v53 = vld [vmem:[%s3779_s3 + $0x18] sm:$0xff] }
 0xcc3   :  { %1372 = vmatpush.msra.mxu1 %v1320_v53 }
 0xcc4   :  { %v1091_v55 = vmul.f32 0.5, %v1090_v54 }
 0xcc6   :  { %v1092_v56 = vsub.f32 1.5, %v1091_v55 }
 0xcc8   :  { %v1093_v57 = vmul.f32 %v2724_v52, %v1092_v56  ;;  %v1317_v56 = vld [vmem:[%s3779_s3] sm:$0xff] }
 0xcca   :  { %v1097_v59 = vsel %vm1096_vm15, %v2724_v52, %v1093_v57  ;;  %v1318_v57 = vld [vmem:[%s3779_s3 + $0x8] sm:$0xff] }
 0xccb   :  { %v1098_v60 = vmul.f32 %v1097_v59, %v1081_v27  ;;  %v1325_v27 = vld [vmem:[%s3779_s3 + $0x40] sm:$0xff]  ;;  %1373 = vmatpush.msra.mxu1 %v1318_v57 }
 0xccc   :  { %1349 = vmatpush.msrb.mxu2 %v1325_v27  ;;  %v2673_v57 = vld [vmem:[%s3792_s14] ss:$0 sm:$0xff] }
 0xccd   :  { %v1102_v62 = vmul.f32 %v2666_v58, %v1098_v60 }
 0xcce   :  { %1350 = vmatpush.msrb.mxu2 %v1323_v39  ;;  %v3380_v39 = vld [vmem:[%s3791_s15 + $0x18] sm:$0xff] }
 0xccf   :  { %v1106_v63 = vadd.f32 %v2667_v61, %v1102_v62 }
 0xcd0   :  { %1351 = vmatpush.msrb.mxu2 %v1321_v46 }
 0xcd1   :  { %2541 = vmatmul.msk.f32.vlgmr.msrb.gmra.mxu1 %vm126_vm5, %v1106_v63  ;;  %v2669_v63 = vld [vmem:[%s3823_s27] ss:$0 sm:$0xff] }
 0xcd2   :  { %1352 = vmatpush.msrb.mxu2 %v1319_v51 }
 0xcd4   :  { %1353 = vmatpush.msrb.mxu2 %v1317_v56 }
 0xd4e   :  { %v1139_v2 = vpop.f32.mrf.mxu1 }
 0xd4f   :  { %v3241_v3 = vadd.f32 %v2668_v1, %v1139_v2 }
 0xd51   :  { %v3247_v5 = vmul.f32 0.70710677, %v3241_v3  ;;  %v1142_v17 = vmul.f32 0.5, %v3241_v3  ;;  %v2671_v3 = vld [vmem:[%s3787_s12 + $0x1] ss:$0 sm:$0xff] }
 0xd53   :  { %v3253_v7 = vand.u32 2147483647, %v3247_v5  ;;  %vm1144_vm14 = vcmp.ge.f32.partialorder %v3247_v5, 0.0 }
 0xd55   :  { %v1147_v11 = vmul.f32 0.3275911, %v3253_v7  ;;  %v1173_v42 = vsub.f32 0.0, %v3253_v7 }
 0xd57   :  { %v1148_v13 = vadd.f32 1.0, %v1147_v11  ;;  %v1174_v52 = vmul.f32 %v1173_v42, %v3253_v7  ;;  %v3398_v42 = vld [vmem:[%s3791_s15] sm:$0xff] }
 0xd59   :  { %2725 = vrcp.f32 %v1148_v13  ;;  %v1160_v26 = vand.u32 2147483648, %v1148_v13  ;;  %v1158_v29 = vand.u32 2147483647, %v1148_v13  ;;  %vm1154_vm3 = vweird.f32 %v1148_v13 }
 0xd5a   :  { %2727 = vrsqrt.f32 %v1297_v23  ;;  %v1175_v60 = vmul.f32 1.442695, %v1174_v52 }
 0xd5b   :  { %v1161_v36 = vor.u32 1.1754944e-38, %v1160_v26  ;;  %vm1159_vm11 = vcmp.eq.f32.partialorder %v1158_v29, 8.507059e+37 }
 0xd5c   :  { %2729 = vpow2.f32 %v1175_v60 }
 0xd5f   :  { %v2726_v19 = vpop.eup %2725 }
 0xd60   :  { %v1150_v21 = vmul.f32 %v2726_v19, %v1148_v13  ;;  %vm1155_vm1 = vweird.f32 %v2726_v19  ;;  %v2728_v40 = vpop.eup %2727 }
 0xd61   :  { %vm1156_vm4 = vmor %vm1154_vm3, %vm1155_vm1  ;;  %v1299_v45 = vmul.f32 %v2728_v40, %v1297_v23  ;;  %vm1305_vm12 = vweird.f32 %v2728_v40 }
 0xd62   :  { %v1151_v24 = vsub.f32 1.0, %v1150_v21  ;;  %vm1306_vm13 = vmor %vm1304_vm8, %vm1305_vm12  ;;  %v2730_v14 = vpop.eup %2729  ;;  %v1329_v21 = vld [vmem:[%s3780_s4] sm:$0x3] }
 0xd63   :  { %v1300_v50 = vmul.f32 %v2728_v40, %v1299_v45  ;;  %v1332_v22 = vperm.slane %v1329_v21, 1  ;;  %v1331_v5 = vperm.slane %v1329_v21, 0 }
 0xd64   :  { %v1152_v28 = vmul.f32 %v2726_v19, %v1151_v24 }
 0xd65   :  { %v1301_v55 = vmul.f32 0.5, %v1300_v50 }
 0xd66   :  { %v1153_v34 = vadd.f32 %v2726_v19, %v1152_v28 }
 0xd67   :  { %v1302_v59 = vsub.f32 1.5, %v1301_v55 }
 0xd68   :  { %v1157_v38 = vsel %vm1156_vm4, %v2726_v19, %v1153_v34  ;;  %vm3839_vm4 = vcmask 36864  }
 0xd69   :  { %v1162_v41 = vsel %vm1159_vm11, %v1161_v36, %v1157_v38  ;;  %v1303_v62 = vmul.f32 %v2728_v40, %v1302_v59  ;;  %v3367_v38 = vld [vmem:[%s3791_s15 + $0x20] sm:$0xff]  ;;  %vm3840_vm11 = vmmov %vm3839_vm4 }
 0xd6a   :  { %v1164_v44 = vmul.f32 1.0614054, %v1162_v41  ;;  %vm3841_vm8 = vmmov %vm3839_vm4 }
 0xd6b   :  { %v1307_v2 = vsel %vm1306_vm13, %v2728_v40, %v1303_v62  ;;  %v3386_v40 = vld [vmem:[%s3791_s15 + $0x10] sm:$0xff]  ;;  %vm3843_vm12 = vmmov %vm3839_vm4 }
 0xd6c   :  { %v1165_v49 = vadd.f32 -1.4531521, %v1164_v44  ;;  %v1308_v4 = vmul.f32 %v1307_v2, %v3225_v47  ;;  %v1145_v47 = vsel %vm1144_vm14, 1.0, %v2784_v18  ;;  %vm3844_vm13 = vmmov %vm3839_vm4 }
 0xd6d   :  { %vm3845_vm14 = vmmov %vm3839_vm4 }
 0xd6e   :  { %v1166_v54 = vmul.f32 %v1165_v49, %v1162_v41  ;;  %v1312_v10 = vmul.f32 %v2669_v63, %v1308_v4 }
 0xd70   :  { %v1167_v58 = vadd.f32 1.4214138, %v1166_v54  ;;  %v1316_v12 = vadd.f32 %v2670_v6, %v1312_v10  ;;  %v2672_v54 = vld [vmem:[%s3790_s13] ss:$0 sm:$0xff] }
 0xd72   :  { %v1168_v61 = vmul.f32 %v1167_v58, %v1162_v41  ;;  %2558 = vmatmul.msk.f32.vlgmr.msrb.gmra.mxu2 %vm126_vm5, %v1316_v12  ;;  %2559 = vmatmul.msk.f32.vlgmr.msra.gmra.mxu1 %vm126_vm5, %v1316_v12 }
 0xd74   :  { %v1169_v1 = vadd.f32 -0.28449672, %v1168_v61 }
 0xd76   :  { %v1170_v7 = vmul.f32 %v1169_v1, %v1162_v41  ;;  %v2674_v1 = vld [vmem:[%s3793_s16] ss:$0 sm:$0xff] }
 0xd78   :  { %v1171_v11 = vadd.f32 0.2548296, %v1170_v7 }
 0xd7a   :  { %v1172_v13 = vmul.f32 %v1171_v11, %v1162_v41  ;;  %v3392_v41 = vld [vmem:[%s3791_s15 + $0x8] sm:$0xff] }
 0xd7c   :  { %v1177_v15 = vmul.f32 %v2730_v14, %v1172_v13 }
 0xd7e   :  { %v1178_v16 = vsub.f32 1.0, %v1177_v15 }
 0xd80   :  { %v1179_v0 = vmul.f32 %v1178_v16, %v1145_v47 }
 0xd82   :  { %v1180_v19 = vadd.f32 1.0, %v1179_v0 }
 0xd84   :  { %v1181_v20 = vmul.f32 %v1180_v19, %v1142_v17 }
 0xd86   :  { %2554 = vmatmul.msk.f32.vlgmr.msra.gmra.mxu3 %vm618_vm10, %v1181_v20 }
 0xdef   :  { %v1375_v23 = vpop.f32.mrf.mxu1 }
 0xdf0   :  { %v1376_v24 = vadd.f32 %v1375_v23, %v1332_v22 }
 0xdf2   :  { %1379 = vst.msk [vmem:[#allocation2 + $0x8] sm:$0x1f] %vm171_vm6, %v1376_v24 }
 0xdf5   :  { %v1355_v25 = vpop.f32.mrf.mxu2 }
 0xdf6   :  { %v1356_v26 = vadd.f32 %v1355_v25, %v1331_v5 }
 0xdf8   :  { %1378 = vst [vmem:[#allocation2] sm:$0x1f] %v1356_v26 }
 0xdff   :  { %v3345_v28 = vld [vmem:[#allocation2] sm:$0x1f] }
 0xe00   :  { %1464 = vrot.lane.b32.xlu0 %v3345_v28, %s3836_s23 }
 0xe09   :  { %v1215_v29 = vpop.f32.mrf.mxu3 }
 0xe0a   :  { %v1218_v30 = vadd.f32 %v1215_v29, %v3191_v31  ;;  %v3362_v31 = vld [vmem:[%s3791_s15 + $0x28] sm:$0xff]  ;;  %s3846_s15 = smov 32  }
 0xe0b   :  { %1272 = vmatpush.msra.mxu0 %v3362_v31 }
 0xe0c   :  { %v1224_v32 = vadd.f32 %v2671_v3, %v1218_v30 }
 0xe0d   :  { %1273 = vmatpush.msra.mxu0 %v3367_v38 }
 0xe0e   :  { %1225 = vst.msk [vmem:[%s3789_s17] sm:$0x1f] %vm70_vm0, %v1224_v32  ;;  %v1226_v34 = vsel %vm70_vm0, %v1224_v32, 0.0 }
 0xe0f   :  { %1227 = vadd.xlane.f32.xlu1 %v1226_v34  ;;  %1274 = vmatpush.msra.mxu0 %v3380_v39  ;;  %v1590_v34 = vld [vmem:[#allocation2 + $0x8] sm:$0x1f] }
 0xe11   :  { %1275 = vmatpush.msra.mxu0 %v3386_v40 }
 0xe13   :  { %1276 = vmatpush.msra.mxu0 %v3392_v41 }
 0xe15   :  { %1277 = vmatpush.msra.mxu0 %v3398_v42 }
 0xe28   :  { %1593 = vrot.lane.b32.xlu1 %v3345_v28, %s3825_s19 }
 0xe72   :  { %v1465_v60 = vpop.permute.xlu0 %1464 }
 0xe82   :  { %v1228_v9 = vpop.xlane.xlu1 %1227 }
 0xe83   :  { %v1229_v35 = vmul.f32 %v1228_v9, %v2887_v8 }
 0xe85   :  { %v1230_v27 = vsub.f32 %v1224_v32, %v1229_v35 }
 0xe87   :  { %v1231_v36 = vmul.f32 %v1230_v27, %v1230_v27 }
 0xe89   :  { %v1232_v37 = vsel %vm70_vm0, %v1231_v36, 0.0 }
 0xe8a   :  { %1233 = vadd.xlane.f32.xlu2 %v1232_v37 }
 0xe9a   :  { %v1594_v61 = vpop.permute.xlu1 %1593 }
 0xea2   :  { %1382 = vrot.lane.b32.xlu2 %v3345_v28, %s3827_s26 }
 0xeaa   :  { %1462 = vrot.lane.b32.xlu2 %v3345_v28, %s3837_s30 }
 0xeb2   :  { %1591 = vrot.lane.b32.xlu2 %v3345_v28, %s3826_s1 }
 0xefd   :  { %v1234_v43 = vpop.xlane.xlu2 %1233 }
 0xefe   :  { %v1235_v44 = vmul.f32 %v1234_v43, %v2887_v8 }
 0xf00   :  { %v1236_v45 = vadd.f32 1e-12, %v1235_v44 }
 0xf02   :  { %2731 = vrsqrt.f32 %v1236_v45  ;;  %vm1243_vm1 = vweird.f32 %v1236_v45 }
 0xf05   :  { %v1383_v46 = vpop.permute.xlu2 %1382 }
 0xf06   :  { %2560 = vmatpush.xpose.msk.msrb.mxu0 %vm177_vm7, %v1383_v46 }
 0xf08   :  { %v2732_v48 = vpop.eup %2731 }
 0xf09   :  { %v1238_v49 = vmul.f32 %v2732_v48, %v1236_v45  ;;  %vm1244_vm15 = vweird.f32 %v2732_v48 }
 0xf0a   :  { %vm1245_vm3 = vmor %vm1243_vm1, %vm1244_vm15 }
 0xf0b   :  { %v1239_v50 = vmul.f32 %v2732_v48, %v1238_v49 }
 0xf0d   :  { %v1240_v51 = vmul.f32 0.5, %v1239_v50  ;;  %v1463_v62 = vpop.permute.xlu2 %1462 }
 0xf0f   :  { %v1241_v52 = vsub.f32 1.5, %v1240_v51 }
 0xf11   :  { %v1242_v53 = vmul.f32 %v2732_v48, %v1241_v52 }
 0xf13   :  { %v1246_v55 = vsel %vm1245_vm3, %v2732_v48, %v1242_v53 }
 0xf14   :  { %v1247_v56 = vmul.f32 %v1246_v55, %v1230_v27 }
 0xf15   :  { %v1592_v63 = vpop.permute.xlu2 %1591 }
 0xf16   :  { %v1251_v58 = vmul.f32 %v2672_v54, %v1247_v56 }
 0xf18   :  { %v1255_v59 = vadd.f32 %v2673_v57, %v1251_v58 }
 0xf1a   :  { %2556 = vmatmul.msk.f32.vlgmr.msra.gmra.mxu0 %vm126_vm5, %v1255_v59 }
 0xf1b   :  { %2564 = vmatpush.xpose.msk.msra.mxu0 %vm177_vm7, %v1465_v60 }
 0xf22   :  { %2561 = vmatmul.msk.f32.vlgmr.msrb.gmra.mxu0 %vm177_vm7, %v3345_v28 }
 0xf23   :  { %2572 = vmatpush.xpose.msk.msrb.mxu0 %vm177_vm7, %v1594_v61 }
 0xf2a   :  { %2565 = vmatmul.msk.f32.vlgmr.msra.gmra.mxu0 %vm177_vm7, %v1463_v62 }
 0xf32   :  { %2573 = vmatmul.msk.f32.vlgmr.msrb.gmra.mxu0 %vm177_vm7, %v1592_v63 }
 0xf97   :  { %v1279_v2 = vpop.f32.mrf.mxu0 }
 0xf98   :  { %v1280_v4 = vadd.f32 %v2674_v1, %v1279_v2 }
 0xf9a   :  { %1282 = vst.msk [vmem:[%s3838_s2] sm:$0x1f] %vm70_vm0, %v1280_v4 }
 0xf9f   :  { %v1405_v6 = vpop.f32.mrf.mxu0 }
 0xfa0   :  { %v1408_v7 = vmul.f32 0.25, %v1405_v6 }
 0xfa2   :  { %v1409_v10 = vsel %vm3839_vm4, %v1408_v7, -inf }
 0xfa3   :  { %1410 = vmax.xlane.f32.xlu2 %v1409_v10 }
 0xfa7   :  { %v1487_v11 = vpop.f32.mrf.mxu0 }
 0xfa8   :  { %v1490_v12 = vmul.f32 0.25, %v1487_v11 }
 0xfaa   :  { %v1491_v13 = vsel %vm3840_vm11, %v1490_v12, -inf }
 0xfab   :  { %1492 = vmax.xlane.f32.xlu0 %v1491_v13 }
 0xfaf   :  { %v1616_v14 = vpop.f32.mrf.mxu0 }
 0xfb0   :  { %v1619_v15 = vmul.f32 0.25, %v1616_v14 }
 0xfb2   :  { %v1620_v16 = vsel %vm3841_vm8, %v1619_v15, -inf }
 0xfb3   :  { %1621 = vmax.xlane.f32.xlu1 %v1620_v16 }
 0xfcc   :  { %1515 = vrot.lane.b32.xlu1 %v3345_v28, %s3842_s29 }
0x1016   :  { %v1411_v47 = vpop.xlane.xlu2 %1410 }
0x1017   :  { %v1412_v0 = vsub.f32 %v1408_v7, %v1411_v47  ;;  %v2569_v7 = vld [vmem:[%s3781_s5 + $0x18] sm:$0xff]  ;;  %v2568_v47 = vld [vmem:[%s3781_s5 + $0x10] sm:$0xff] }
0x1019   :  { %v1413_v17 = vmul.f32 1.442695, %v1412_v0  ;;  %v1461_v0 = vld [vmem:[%s3781_s5 + $0x8] sm:$0xff] }
0x101a   :  { %1584 = vmatpush.msrb.mxu3 %v1461_v0  ;;  %v1811_v0 = vld [vmem:[%s3788_s11 + $0x20] sm:$0xff] }
0x101b   :  { %2733 = vpow2.f32 %v1413_v17  ;;  %v2577_v17 = vld [vmem:[%s3781_s5 + $0x28] sm:$0xff] }
0x101e   :  { %v1493_v19 = vpop.xlane.xlu0 %1492 }
0x101f   :  { %v1494_v20 = vsub.f32 %v1490_v12, %v1493_v19  ;;  %v1460_v19 = vld [vmem:[%s3781_s5] sm:$0xff] }
0x1020   :  { %1585 = vmatpush.msrb.mxu3 %v1460_v19 }
0x1021   :  { %v2734_v21 = vpop.eup %2733  ;;  %v1495_v22 = vmul.f32 1.442695, %v1494_v20  ;;  %v2576_v20 = vld [vmem:[%s3781_s5 + $0x20] sm:$0xff] }
0x1022   :  { %v1415_v23 = vsel %vm3843_vm12, %v2734_v21, 0.0 }
0x1023   :  { %2735 = vpow2.f32 %v1495_v22  ;;  %1416 = vadd.xlane.f32.xlu2 %v1415_v23 }
0x1026   :  { %v1622_v24 = vpop.xlane.xlu1 %1621 }
0x1027   :  { %v1623_v5 = vsub.f32 %v1619_v15, %v1622_v24 }
0x1029   :  { %v2736_v25 = vpop.eup %2735  ;;  %v1624_v26 = vmul.f32 1.442695, %v1623_v5 }
0x102a   :  { %v1497_v3 = vsel %vm3844_vm13, %v2736_v25, 0.0 }
0x102b   :  { %2737 = vpow2.f32 %v1624_v26  ;;  %1498 = vadd.xlane.f32.xlu0 %v1497_v3 }
0x1031   :  { %v3430_v29 = vpop.eup %2737 }
0x1032   :  { %v1626_v30 = vsel %vm3845_vm14, %v3430_v29, 0.0 }
0x1033   :  { %1627 = vadd.xlane.f32.xlu2 %v1626_v30 }
0x103e   :  { %v1516_v32 = vpop.permute.xlu1 %1515 }
0x103f   :  { %1433 = vrot.lane.b32.xlu0 %v3345_v28, %s3846_s15  ;;  %2566 = vmatpush.msk.msrb.mxu1 %vm234_vm9, %v1516_v32 }
0x1041   :  { %2574 = vmatpush.msk.msra.mxu1 %vm234_vm9, %v1590_v34 }
0x1096   :  { %v1417_v9 = vpop.xlane.xlu2 %1416 }
0x1097   :  { %2739 = vrcp.f32 %v1417_v9  ;;  %v1429_v28 = vand.u32 2147483648, %v1417_v9  ;;  %vm1423_vm1 = vweird.f32 %v1417_v9  ;;  %v1427_v50 = vand.u32 2147483647, %v1417_v9 }
0x1099   :  { %v1430_v55 = vor.u32 1.1754944e-38, %v1429_v28  ;;  %vm1428_vm8 = vcmp.eq.f32.partialorder %v1427_v50, 8.507059e+37 }
0x109d   :  { %v2740_v35 = vpop.eup %2739 }
0x109e   :  { %v1419_v27 = vmul.f32 %v2740_v35, %v1417_v9  ;;  %v1499_v36 = vpop.xlane.xlu0 %1498  ;;  %vm1424_vm15 = vweird.f32 %v2740_v35 }
0x109f   :  { %2741 = vrcp.f32 %v1499_v36  ;;  %v1511_v51 = vand.u32 2147483648, %v1499_v36  ;;  %vm1425_vm3 = vmor %vm1423_vm1, %vm1424_vm15  ;;  %v1509_v53 = vand.u32 2147483647, %v1499_v36  ;;  %vm1505_vm11 = vweird.f32 %v1499_v36 }
0x10a0   :  { %v1420_v37 = vsub.f32 1.0, %v1419_v27 }
0x10a1   :  { %v1512_v58 = vor.u32 1.1754944e-38, %v1511_v51  ;;  %vm1510_vm13 = vcmp.eq.f32.partialorder %v1509_v53, 8.507059e+37 }
0x10a2   :  { %v1421_v43 = vmul.f32 %v2740_v35, %v1420_v37 }
0x10a4   :  { %v1422_v48 = vadd.f32 %v2740_v35, %v1421_v43  ;;  %v1739_v43 = vld [vmem:[%s3786_s9 + $0x28] sm:$0xff] }
0x10a5   :  { %v2742_v44 = vpop.eup %2741  ;;  %1757 = vmatpush.msra.mxu3 %v1739_v43 }
0x10a6   :  { %v1501_v45 = vmul.f32 %v2742_v44, %v1499_v36  ;;  %v1628_v46 = vpop.xlane.xlu2 %1627  ;;  %vm1506_vm4 = vweird.f32 %v2742_v44  ;;  %v1426_v54 = vsel %vm1425_vm3, %v2740_v35, %v1422_v48  ;;  %v1734_v48 = vld [vmem:[%s3786_s9] sm:$0xff] }
0x10a7   :  { %2743 = vrcp.f32 %v1628_v46  ;;  %vm1507_vm12 = vmor %vm1505_vm11, %vm1506_vm4  ;;  %v1431_v59 = vsel %vm1428_vm8, %v1430_v55, %v1426_v54  ;;  %v1640_v2 = vand.u32 2147483648, %v1628_v46  ;;  %v1638_v11 = vand.u32 2147483647, %v1628_v46 }
0x10a8   :  { %v1502_v49 = vsub.f32 1.0, %v1501_v45  ;;  %v1432_v6 = vmul.f32 %v2734_v21, %v1431_v59  ;;  %vm1634_vm15 = vweird.f32 %v1628_v46  ;;  %v1736_v45 = vld [vmem:[%s3786_s9 + $0x10] sm:$0xff] }
0x10a9   :  { %v1641_v13 = vor.u32 1.1754944e-38, %v1640_v2  ;;  %vm1639_vm3 = vcmp.eq.f32.partialorder %v1638_v11, 8.507059e+37  ;;  %v1816_v11 = vld [vmem:[%s3788_s11 + $0x48] sm:$0xff] }
0x10aa   :  { %v1503_v52 = vmul.f32 %v2742_v44, %v1502_v49 }
0x10ac   :  { %v1504_v56 = vadd.f32 %v2742_v44, %v1503_v52 }
0x10ad   :  { %v2744_v57 = vpop.eup %2743 }
0x10ae   :  { %v1508_v60 = vsel %vm1507_vm12, %v2742_v44, %v1504_v56  ;;  %v1630_v61 = vmul.f32 %v2744_v57, %v1628_v46  ;;  %vm1635_vm14 = vweird.f32 %v2744_v57  ;;  %v1737_v44 = vld [vmem:[%s3786_s9 + $0x18] sm:$0xff]  ;;  %v1735_v46 = vld [vmem:[%s3786_s9 + $0x8] sm:$0xff] }
0x10af   :  { %v1513_v62 = vsel %vm1510_vm13, %v1512_v58, %v1508_v60  ;;  %vm1636_vm1 = vmor %vm1634_vm15, %vm1635_vm14  ;;  %v2677_v60 = vld [vmem:[%s3784_s8] ss:$0 sm:$0xff] }
0x10b0   :  { %v1631_v63 = vsub.f32 1.0, %v1630_v61  ;;  %v1514_v1 = vmul.f32 %v2736_v25, %v1513_v62 }
0x10b1   :  { %v1434_v4 = vpop.permute.xlu0 %1433 }
0x10b2   :  { %v1632_v10 = vmul.f32 %v2744_v57, %v1631_v63  ;;  %2562 = vmatpush.msk.msra.mxu2 %vm234_vm9, %v1434_v4  ;;  %2567 = vmatmul.msk.f32.vlgmr.msrb.gmra.mxu1 %vm230_vm2, %v1514_v1  ;;  %v2678_v63 = vld [vmem:[%s3785_s10] ss:$0 sm:$0xff]  ;;  %v1818_v4 = vld [vmem:[%s3788_s11 + $0x58] sm:$0xff] }
0x10b3   :  { %2563 = vmatmul.msk.f32.vlgmr.msra.gmra.mxu2 %vm230_vm2, %v1432_v6  ;;  %1826 = vmatpush.msra.mxu0 %v1818_v4 }
0x10b4   :  { %v1633_v12 = vadd.f32 %v2744_v57, %v1632_v10  ;;  %1561 = vmatpush.msrb.mxu2 %v2569_v7  ;;  %v1817_v7 = vld [vmem:[%s3788_s11 + $0x50] sm:$0xff] }
0x10b5   :  { %1827 = vmatpush.msra.mxu0 %v1817_v7  ;;  %v2591_v7 = vld [vmem:[%s3779_s3 + $0xa0] sm:$0xff] }
0x10b6   :  { %v1637_v14 = vsel %vm1636_vm1, %v2744_v57, %v1633_v12  ;;  %1562 = vmatpush.msrb.mxu2 %v2568_v47  ;;  %v2676_v57 = vld [vmem:[%s3783_s7] ss:$0 sm:$0xff]  ;;  %v1812_v47 = vld [vmem:[%s3788_s11 + $0x28] sm:$0xff] }
0x10b7   :  { %v1642_v15 = vsel %vm1639_vm3, %v1641_v13, %v1637_v14  ;;  %1828 = vmatpush.msra.mxu0 %v1816_v11  ;;  %v1815_v13 = vld [vmem:[%s3788_s11 + $0x40] sm:$0xff]  ;;  %v2589_v11 = vld [vmem:[%s3779_s3 + $0x90] sm:$0xff] }
0x10b8   :  { %v1643_v16 = vmul.f32 %v3430_v29, %v1642_v15  ;;  %1689 = vmatpush.msra.mxu2 %v2577_v17  ;;  %v2675_v29 = vld [vmem:[%s3782_s6] ss:$0 sm:$0xff]  ;;  %v1814_v15 = vld [vmem:[%s3788_s11 + $0x38] sm:$0xff] }
0x10b9   :  { %1829 = vmatpush.msra.mxu0 %v1815_v13  ;;  %v2587_v13 = vld [vmem:[%s3779_s3 + $0x80] sm:$0xff] }
0x10ba   :  { %2575 = vmatmul.msk.f32.vlgmr.msra.gmra.mxu1 %vm230_vm2, %v1643_v16  ;;  %1690 = vmatpush.msra.mxu2 %v2576_v20  ;;  %v1813_v16 = vld [vmem:[%s3788_s11 + $0x30] sm:$0xff]  ;;  %v1810_v20 = vld [vmem:[%s3788_s11 + $0x18] sm:$0xff] }
0x10bb   :  { %1830 = vmatpush.msra.mxu0 %v1814_v15  ;;  %v2585_v15 = vld [vmem:[%s3779_s3 + $0x70] sm:$0xff] }
0x10bd   :  { %1831 = vmatpush.msra.mxu0 %v1813_v16  ;;  %v2586_v16 = vld [vmem:[%s3779_s3 + $0x78] sm:$0xff] }
0x10bf   :  { %1832 = vmatpush.msra.mxu0 %v1812_v47  ;;  %v2583_v47 = vld [vmem:[%s3779_s3 + $0x60] sm:$0xff] }
0x10c1   :  { %1833 = vmatpush.msra.mxu0 %v1811_v0  ;;  %v2584_v0 = vld [vmem:[%s3779_s3 + $0x68] sm:$0xff] }
0x10c3   :  { %1834 = vmatpush.msra.mxu0 %v1810_v20 }
0x112f   :  { %v1539_v21 = vpop.f32.mrf.mxu1 }
0x1130   :  { %2570 = vmatmul.msk.f32.vlgmr.msrb.gmra.mxu2 %vm177_vm7, %v1539_v21 }
0x1136   :  { %v1457_v22 = vpop.f32.mrf.mxu2 }
0x1137   :  { %2571 = vmatmul.msk.f32.vlgmr.msrb.gmra.mxu3 %vm177_vm7, %v1457_v22  ;;  %v1667_v23 = vpop.f32.mrf.mxu1  ;;  %v1809_v22 = vld [vmem:[%s3788_s11 + $0x10] sm:$0xff] }
0x1138   :  { %2578 = vmatmul.msk.f32.vlgmr.msra.gmra.mxu2 %vm177_vm7, %v1667_v23  ;;  %1835 = vmatpush.msra.mxu0 %v1809_v22 }
0x11b3   :  { %v1564_v24 = vpop.f32.mrf.mxu2 }
0x11ba   :  { %v1587_v5 = vpop.f32.mrf.mxu3 }
0x11bb   :  { %v1588_v25 = vadd.f32 %v1587_v5, %v1564_v24  ;;  %v1692_v26 = vpop.f32.mrf.mxu2 }
0x11bd   :  { %v1695_v3 = vadd.f32 %v1692_v26, %v1588_v25  ;;  %v1808_v25 = vld [vmem:[%s3788_s11 + $0x8] sm:$0xff]  ;;  %v1807_v26 = vld [vmem:[%s3788_s11] sm:$0xff] }
0x11be   :  { %1836 = vmatpush.msra.mxu0 %v1808_v25 }
0x11bf   :  { %v1696_v30 = vadd.f32 %v3198_v33, %v1695_v3  ;;  %v1738_v33 = vld [vmem:[%s3786_s9 + $0x20] sm:$0xff] }
0x11c0   :  { %1758 = vmatpush.msra.mxu3 %v1738_v33  ;;  %1837 = vmatpush.msra.mxu0 %v1807_v26  ;;  %v2680_v26 = vld [vmem:[%s3823_s27 + $0x1] ss:$0 sm:$0xff] }
0x11c1   :  { %v3468_v32 = vadd.f32 %v2675_v29, %v1696_v30 }
0x11c2   :  { %1759 = vmatpush.msra.mxu3 %v1737_v44 }
0x11c3   :  { %v1704_v34 = vsel %vm70_vm0, %v3468_v32, 0.0 }
0x11c4   :  { %1705 = vadd.xlane.f32.xlu2 %v1704_v34  ;;  %1760 = vmatpush.msra.mxu3 %v1736_v45 }
0x11c6   :  { %1761 = vmatpush.msra.mxu3 %v1735_v46 }
0x11c8   :  { %1762 = vmatpush.msra.mxu3 %v1734_v48 }
0x1237   :  { %v1706_v9 = vpop.xlane.xlu2 %1705 }
0x1238   :  { %v1707_v35 = vmul.f32 %v1706_v9, %v2887_v8 }
0x123a   :  { %v1708_v27 = vsub.f32 %v3468_v32, %v1707_v35 }
0x123c   :  { %v1709_v36 = vmul.f32 %v1708_v27, %v1708_v27 }
0x123e   :  { %v1710_v37 = vsel %vm70_vm0, %v1709_v36, 0.0 }
0x123f   :  { %1711 = vadd.xlane.f32.xlu2 %v1710_v37 }
0x12b2   :  { %v1712_v28 = vpop.xlane.xlu2 %1711 }
0x12b3   :  { %v1713_v49 = vmul.f32 %v1712_v28, %v2887_v8 }
0x12b5   :  { %v1714_v50 = vadd.f32 1e-12, %v1713_v49 }
0x12b7   :  { %2745 = vrsqrt.f32 %v1714_v50  ;;  %vm1721_vm11 = vweird.f32 %v1714_v50 }
0x12bd   :  { %v2746_v51 = vpop.eup %2745 }
0x12be   :  { %v1716_v52 = vmul.f32 %v2746_v51, %v1714_v50  ;;  %vm1722_vm4 = vweird.f32 %v2746_v51 }
0x12bf   :  { %vm1723_vm8 = vmor %vm1721_vm11, %vm1722_vm4 }
0x12c0   :  { %v1717_v53 = vmul.f32 %v2746_v51, %v1716_v52 }
0x12c2   :  { %v1718_v54 = vmul.f32 0.5, %v1717_v53 }
0x12c4   :  { %v1719_v55 = vsub.f32 1.5, %v1718_v54 }
0x12c6   :  { %v1720_v56 = vmul.f32 %v2746_v51, %v1719_v55 }
0x12c8   :  { %v1724_v58 = vsel %vm1723_vm8, %v2746_v51, %v1720_v56 }
0x12c9   :  { %v1725_v59 = vmul.f32 %v1724_v58, %v1708_v27 }
0x12cb   :  { %v1729_v61 = vmul.f32 %v2676_v57, %v1725_v59  ;;  %v2679_v57 = vld [vmem:[%s3787_s12] ss:$0 sm:$0xff] }
0x12cd   :  { %v1733_v62 = vadd.f32 %v2677_v60, %v1729_v61 }
0x12cf   :  { %2579 = vmatmul.msk.f32.vlgmr.msra.gmra.mxu3 %vm126_vm5, %v1733_v62 }
0x1352   :  { %v1764_v1 = vpop.f32.mrf.mxu3 }
0x1353   :  { %v3504_v2 = vadd.f32 %v2678_v63, %v1764_v1 }
0x1355   :  { %v1768_v6 = vmul.f32 0.70710677, %v3504_v2  ;;  %v1767_v54 = vmul.f32 0.5, %v3504_v2 }
0x1357   :  { %v1771_v10 = vand.u32 2147483647, %v1768_v6  ;;  %vm1769_vm1 = vcmp.ge.f32.partialorder %v1768_v6, 0.0  ;;  %v2593_v6 = vld [vmem:[%s3779_s3 + $0xb0] sm:$0xff] }
0x1358   :  { %v1770_v52 = vsel %vm1769_vm1, 1.0, %v2784_v18  ;;  %1911 = vmatpush.msrb.mxu1 %v2593_v6 }
0x1359   :  { %v1772_v12 = vmul.f32 0.3275911, %v1771_v10  ;;  %v1798_v9 = vsub.f32 0.0, %v1771_v10 }
0x135a   :  { %1912 = vmatpush.msrb.mxu1 %v2591_v7 }
0x135b   :  { %v1773_v14 = vadd.f32 1.0, %v1772_v12  ;;  %v1799_v36 = vmul.f32 %v1798_v9, %v1771_v10  ;;  %v2592_v10 = vld [vmem:[%s3779_s3 + $0xa8] sm:$0xff]  ;;  %v2590_v12 = vld [vmem:[%s3779_s3 + $0x98] sm:$0xff] }
0x135c   :  { %1913 = vmatpush.msrb.mxu1 %v2589_v11 }
0x135d   :  { %2747 = vrcp.f32 %v1773_v14  ;;  %v1785_v23 = vand.u32 2147483648, %v1773_v14  ;;  %v1783_v5 = vand.u32 2147483647, %v1773_v14  ;;  %vm1779_vm13 = vweird.f32 %v1773_v14 }
0x135e   :  { %v1800_v33 = vmul.f32 1.442695, %v1799_v36  ;;  %1914 = vmatpush.msrb.mxu1 %v2587_v13 }
0x135f   :  { %v1786_v29 = vor.u32 1.1754944e-38, %v1785_v23  ;;  %vm1784_vm15 = vcmp.eq.f32.partialorder %v1783_v5, 8.507059e+37 }
0x1360   :  { %2749 = vpow2.f32 %v1800_v33  ;;  %1915 = vmatpush.msrb.mxu1 %v2585_v15 }
0x1362   :  { %1916 = vmatpush.msrb.mxu1 %v2583_v47 }
0x1363   :  { %v2748_v17 = vpop.eup %2747 }
0x1364   :  { %v1775_v19 = vmul.f32 %v2748_v17, %v1773_v14  ;;  %vm1780_vm12 = vweird.f32 %v2748_v17  ;;  %v2588_v14 = vld [vmem:[%s3779_s3 + $0x88] sm:$0xff] }
0x1365   :  { %vm1781_vm14 = vmor %vm1779_vm13, %vm1780_vm12 }
0x1366   :  { %v1776_v21 = vsub.f32 1.0, %v1775_v19  ;;  %v2750_v49 = vpop.eup %2749 }
0x1368   :  { %v1777_v24 = vmul.f32 %v2748_v17, %v1776_v21 }
0x136a   :  { %v1778_v3 = vadd.f32 %v2748_v17, %v1777_v24 }
0x136c   :  { %v1782_v30 = vsel %vm1781_vm14, %v2748_v17, %v1778_v3 }
0x136d   :  { %v1787_v34 = vsel %vm1784_vm15, %v1786_v29, %v1782_v30  ;;  %v2681_v30 = vld [vmem:[%s3824_s0 + $0x1] ss:$0 sm:$0xff] }
0x136e   :  { %v1789_v35 = vmul.f32 1.0614054, %v1787_v34 }
0x1370   :  { %v1790_v27 = vadd.f32 -1.4531521, %v1789_v35  ;;  %v2595_v35 = vld [vmem:[%s3780_s4 + $0x2] sm:$0x3] }
0x1372   :  { %v1791_v37 = vmul.f32 %v1790_v27, %v1787_v34  ;;  %v1894_v27 = vperm.slane %v2595_v35, 0 }
0x1374   :  { %v1792_v43 = vadd.f32 1.4214138, %v1791_v37 }
0x1376   :  { %v1793_v44 = vmul.f32 %v1792_v43, %v1787_v34  ;;  %v1895_v43 = vperm.slane %v2595_v35, 1 }
0x1378   :  { %v1794_v45 = vadd.f32 -0.28449672, %v1793_v44 }
0x137a   :  { %v1795_v46 = vmul.f32 %v1794_v45, %v1787_v34 }
0x137c   :  { %v1796_v48 = vadd.f32 0.2548296, %v1795_v46 }
0x137e   :  { %v1797_v28 = vmul.f32 %v1796_v48, %v1787_v34 }
0x1380   :  { %v1802_v50 = vmul.f32 %v2750_v49, %v1797_v28 }
0x1382   :  { %v1803_v51 = vsub.f32 1.0, %v1802_v50 }
0x1384   :  { %v1804_v53 = vmul.f32 %v1803_v51, %v1770_v52 }
0x1386   :  { %v1805_v55 = vadd.f32 1.0, %v1804_v53 }
0x1388   :  { %v1806_v56 = vmul.f32 %v1805_v55, %v1767_v54 }
0x138a   :  { %2580 = vmatmul.msk.f32.vlgmr.msra.gmra.mxu0 %vm618_vm10, %v1806_v56 }
0x1407   :  { %v1839_v58 = vpop.f32.mrf.mxu0 }
0x1408   :  { %v1842_v59 = vadd.f32 %v1839_v58, %v3468_v32  ;;  %v2594_v32 = vld [vmem:[%s3779_s3 + $0xb8] sm:$0xff] }
0x1409   :  { %1931 = vmatpush.msrb.mxu2 %v2594_v32 }
0x140a   :  { %v3550_v60 = vadd.f32 %v2679_v57, %v1842_v59 }
0x140b   :  { %1932 = vmatpush.msrb.mxu2 %v2592_v10 }
0x140c   :  { %v1850_v61 = vsel %vm70_vm0, %v3550_v60, 0.0 }
0x140d   :  { %1851 = vadd.xlane.f32.xlu2 %v1850_v61  ;;  %1933 = vmatpush.msrb.mxu2 %v2590_v12 }
0x140f   :  { %1934 = vmatpush.msrb.mxu2 %v2588_v14 }
0x1411   :  { %1935 = vmatpush.msrb.mxu2 %v2586_v16 }
0x1413   :  { %1936 = vmatpush.msrb.mxu2 %v2584_v0  ;;  %v2609_v0 = vld [vmem:[%s3781_s5 + $0x48] sm:$0xff] }
0x1480   :  { %v1852_v62 = vpop.xlane.xlu2 %1851 }
0x1481   :  { %v1853_v63 = vmul.f32 %v1852_v62, %v2887_v8 }
0x1483   :  { %v1854_v1 = vsub.f32 %v3550_v60, %v1853_v63 }
0x1485   :  { %v1855_v2 = vmul.f32 %v1854_v1, %v1854_v1 }
0x1487   :  { %v1856_v4 = vsel %vm70_vm0, %v1855_v2, 0.0 }
0x1488   :  { %1857 = vadd.xlane.f32.xlu0 %v1856_v4 }
0x14fb   :  { %v1858_v17 = vpop.xlane.xlu0 %1857 }
0x14fc   :  { %v1859_v19 = vmul.f32 %v1858_v17, %v2887_v8 }
0x14fe   :  { %v1860_v20 = vadd.f32 1e-12, %v1859_v19 }
0x1500   :  { %2751 = vrsqrt.f32 %v1860_v20  ;;  %vm1867_vm4 = vweird.f32 %v1860_v20 }
0x1506   :  { %v2752_v21 = vpop.eup %2751 }
0x1507   :  { %v1862_v22 = vmul.f32 %v2752_v21, %v1860_v20  ;;  %vm1868_vm3 = vweird.f32 %v2752_v21  ;;  %v2608_v20 = vld [vmem:[%s3781_s5 + $0x40] sm:$0xff] }
0x1508   :  { %vm1869_vm11 = vmor %vm1867_vm4, %vm1868_vm3 }
0x1509   :  { %v1863_v23 = vmul.f32 %v2752_v21, %v1862_v22 }
0x150b   :  { %v1864_v24 = vmul.f32 0.5, %v1863_v23 }
0x150d   :  { %v1865_v5 = vsub.f32 1.5, %v1864_v24 }
0x150f   :  { %v1866_v25 = vmul.f32 %v2752_v21, %v1865_v5 }
0x1511   :  { %v1870_v3 = vsel %vm1869_vm11, %v2752_v21, %v1866_v25 }
0x1512   :  { %v1871_v29 = vmul.f32 %v1870_v3, %v1854_v1 }
0x1514   :  { %v1875_v34 = vmul.f32 %v2680_v26, %v1871_v29 }
0x1516   :  { %v1879_v9 = vadd.f32 %v2681_v30, %v1875_v34 }
0x1518   :  { %2596 = vmatmul.msk.f32.vlgmr.msrb.gmra.mxu1 %vm126_vm5, %v1879_v9  ;;  %2597 = vmatmul.msk.f32.vlgmr.msrb.gmra.mxu2 %vm126_vm5, %v1879_v9 }
0x1595   :  { %v1918_v36 = vpop.f32.mrf.mxu1 }
0x1596   :  { %v1919_v37 = vadd.f32 %v1918_v36, %v1894_v27  ;;  %v2603_v27 = vld [vmem:[%s3781_s5 + $0x38] sm:$0xff]  ;;  %v2602_v36 = vld [vmem:[%s3781_s5 + $0x30] sm:$0xff] }
0x1598   :  { %1941 = vst [vmem:[#allocation2] sm:$0x1f] %v1919_v37 }
0x159b   :  { %v1938_v33 = vpop.f32.mrf.mxu2 }
0x159c   :  { %v1939_v44 = vadd.f32 %v1938_v33, %v1895_v43 }
0x159e   :  { %1942 = vst.msk [vmem:[#allocation2 + $0x8] sm:$0x1f] %vm171_vm6, %v1939_v44  ;;  %vm3847_vm6 = vcmask 36864  }
0x159f   :  { %v3606_v45 = vld [vmem:[#allocation2] sm:$0x1f]  ;;  %vm3848_vm8 = vmmov %vm3847_vm6 }
0x15a0   :  { %1945 = vrot.lane.b32.xlu0 %v3606_v45, %s3827_s26  ;;  %2025 = vrot.lane.b32.xlu1 %v3606_v45, %s3837_s30  ;;  %vm3849_vm12 = vmmov %vm3847_vm6 }
0x15a1   :  { %2027 = vrot.lane.b32.xlu2 %v3606_v45, %s3836_s23  ;;  %vm3850_vm3 = vmmov %vm3847_vm6 }
0x15a5   :  { %v2153_v46 = vld [vmem:[#allocation2 + $0x8] sm:$0x1f] }
0x15a6   :  { %2614 = vmatpush.msk.msrb.mxu0 %vm234_vm9, %v2153_v46 }
0x15a8   :  { %2450 = vmatpush.msra.mxu0 %v3362_v31  ;;  %2156 = vrot.lane.b32.xlu0 %v3606_v45, %s3825_s19 }
0x15aa   :  { %2451 = vmatpush.msra.mxu0 %v3367_v38 }
0x15ac   :  { %2452 = vmatpush.msra.mxu0 %v3380_v39 }
0x15ae   :  { %2453 = vmatpush.msra.mxu0 %v3386_v40 }
0x15b0   :  { %2454 = vmatpush.msra.mxu0 %v3392_v41  ;;  %2154 = vrot.lane.b32.xlu0 %v3606_v45, %s3826_s1 }
0x15b2   :  { %2455 = vmatpush.msra.mxu0 %v3398_v42 }
0x15fb   :  { %v2028_v48 = vpop.permute.xlu2 %2027 }
0x15fc   :  { %2604 = vmatpush.xpose.msk.msra.mxu2 %vm177_vm7, %v2028_v48  ;;  %v2617_v48 = vld [vmem:[%s3781_s5 + $0x58] sm:$0xff] }
0x1600   :  { %2147 = vmatpush.msrb.mxu2 %v2603_v27 }
0x1602   :  { %2148 = vmatpush.msrb.mxu2 %v2602_v36  ;;  %v2640_v36 = vld [vmem:[%s3788_s11 + $0xb0] sm:$0xff] }
0x1612   :  { %v1946_v31 = vpop.permute.xlu0 %1945  ;;  %v2026_v28 = vpop.permute.xlu1 %2025 }
0x1613   :  { %2598 = vmatpush.xpose.msk.msrb.mxu3 %vm177_vm7, %v1946_v31  ;;  %2605 = vmatmul.msk.f32.vlgmr.msra.gmra.mxu2 %vm177_vm7, %v2026_v28 }
0x1616   :  { %2599 = vmatmul.msk.f32.vlgmr.msrb.gmra.mxu3 %vm177_vm7, %v3606_v45 }
0x161a   :  { %v2157_v56 = vpop.permute.xlu0 %2156 }
0x1622   :  { %v2155_v15 = vpop.permute.xlu0 %2154 }
0x1696   :  { %v2050_v38 = vpop.f32.mrf.mxu2 }
0x1697   :  { %v2053_v39 = vmul.f32 0.25, %v2050_v38 }
0x1699   :  { %v2054_v40 = vsel %vm3847_vm6, %v2053_v39, -inf  ;;  %v1968_v52 = vpop.f32.mrf.mxu3 }
0x169a   :  { %2055 = vmax.xlane.f32.xlu1 %v2054_v40  ;;  %v1971_v53 = vmul.f32 0.25, %v1968_v52 }
0x169c   :  { %v1972_v54 = vsel %vm3849_vm12, %v1971_v53, -inf  ;;  %vm3852_vm12 = vmmov %vm3850_vm3 }
0x16b3   :  { %2078 = vrot.lane.b32.xlu1 %v3606_v45, %s3842_s29 }
0x170d   :  { %v2056_v41 = vpop.xlane.xlu1 %2055 }
0x170e   :  { %v2057_v42 = vsub.f32 %v2053_v39, %v2056_v41 }
0x1710   :  { %v2058_v49 = vmul.f32 1.442695, %v2057_v42 }
0x1712   :  { %2753 = vpow2.f32 %v2058_v49 }
0x1718   :  { %v2754_v50 = vpop.eup %2753 }
0x1719   :  { %v2060_v51 = vsel %vm3848_vm8, %v2754_v50, 0.0 }
0x171a   :  { %2061 = vadd.xlane.f32.xlu2 %v2060_v51 }
0x1722   :  { %1973 = vmax.xlane.f32.xlu2 %v1972_v54  ;;  %v2616_v54 = vld [vmem:[%s3781_s5 + $0x50] sm:$0xff] }
0x1725   :  { %v2079_v55 = vpop.permute.xlu1 %2078 }
0x1726   :  { %2606 = vmatpush.msk.msra.mxu3 %vm234_vm9, %v2079_v55 }
0x1728   :  { %2612 = vmatpush.xpose.msk.msrb.mxu3 %vm177_vm7, %v2157_v56 }
0x178d   :  { %v2062_v57 = vpop.xlane.xlu2 %2061 }
0x178e   :  { %2755 = vrcp.f32 %v2062_v57  ;;  %v2074_v1 = vand.u32 2147483648, %v2062_v57  ;;  %v2072_v6 = vand.u32 2147483647, %v2062_v57  ;;  %vm2068_vm14 = vweird.f32 %v2062_v57 }
0x1790   :  { %v2075_v7 = vor.u32 1.1754944e-38, %v2074_v1  ;;  %vm2073_vm1 = vcmp.eq.f32.partialorder %v2072_v6, 8.507059e+37 }
0x1794   :  { %v2756_v58 = vpop.eup %2755 }
0x1795   :  { %v2064_v59 = vmul.f32 %v2756_v58, %v2062_v57  ;;  %v1974_v61 = vpop.xlane.xlu2 %1973  ;;  %vm2069_vm13 = vweird.f32 %v2756_v58 }
0x1796   :  { %v1975_v62 = vsub.f32 %v1971_v53, %v1974_v61  ;;  %vm2070_vm15 = vmor %vm2068_vm14, %vm2069_vm13 }
0x1797   :  { %v2065_v63 = vsub.f32 1.0, %v2064_v59 }
0x1798   :  { %v1976_v2 = vmul.f32 1.442695, %v1975_v62  ;;  %v2682_v62 = vld [vmem:[%s3782_s6 + $0x1] ss:$0 sm:$0xff] }
0x1799   :  { %v2066_v4 = vmul.f32 %v2756_v58, %v2065_v63 }
0x179a   :  { %2757 = vpow2.f32 %v1976_v2 }
0x179b   :  { %v2067_v32 = vadd.f32 %v2756_v58, %v2066_v4 }
0x179d   :  { %v2071_v10 = vsel %vm2070_vm15, %v2756_v58, %v2067_v32 }
0x179e   :  { %v2076_v11 = vsel %vm2073_vm1, %v2075_v7, %v2071_v10 }
0x179f   :  { %v2077_v12 = vmul.f32 %v2754_v50, %v2076_v11  ;;  %v2627_v11 = vld [vmem:[%s3786_s9 + $0x58] sm:$0xff] }
0x17a0   :  { %v2758_v13 = vpop.eup %2757  ;;  %2320 = vmatpush.msra.mxu2 %v2627_v11 }
0x17a1   :  { %2607 = vmatmul.msk.f32.vlgmr.msra.gmra.mxu3 %vm230_vm2, %v2077_v12  ;;  %v1978_v14 = vsel %vm3850_vm3, %v2758_v13, 0.0  ;;  %v2625_v12 = vld [vmem:[%s3786_s9 + $0x48] sm:$0xff] }
0x17a2   :  { %1979 = vadd.xlane.f32.xlu2 %v1978_v14  ;;  %v2623_v14 = vld [vmem:[%s3786_s9 + $0x38] sm:$0xff] }
0x17a9   :  { %2613 = vmatmul.msk.f32.vlgmr.msrb.gmra.mxu3 %vm177_vm7, %v2155_v15  ;;  %v2622_v15 = vld [vmem:[%s3786_s9 + $0x30] sm:$0xff] }
0x17ba   :  { %1996 = vrot.lane.b32.xlu2 %v3606_v45, %s3846_s15  ;;  %s3853_s15 = sld [smem:[#allocation6_spill]] }
0x1815   :  { %v1980_v16 = vpop.xlane.xlu2 %1979 }
0x1816   :  { %2759 = vrcp.f32 %v1980_v16  ;;  %v1992_v22 = vand.u32 2147483648, %v1980_v16  ;;  %v1990_v24 = vand.u32 2147483647, %v1980_v16  ;;  %vm1986_vm11 = vweird.f32 %v1980_v16 }
0x1818   :  { %v1993_v25 = vor.u32 1.1754944e-38, %v1992_v22  ;;  %vm1991_vm8 = vcmp.eq.f32.partialorder %v1990_v24, 8.507059e+37  ;;  %v2683_v24 = vld [vmem:[%s3783_s7 + $0x1] ss:$0 sm:$0xff] }
0x181c   :  { %v2760_v47 = vpop.eup %2759 }
0x181d   :  { %v1982_v17 = vmul.f32 %v2760_v47, %v1980_v16  ;;  %v1997_v19 = vpop.permute.xlu2 %1996  ;;  %vm1987_vm4 = vweird.f32 %v2760_v47 }
0x181e   :  { %2600 = vmatpush.msk.msra.mxu1 %vm234_vm9, %v1997_v19  ;;  %vm1988_vm6 = vmor %vm1986_vm11, %vm1987_vm4 }
0x181f   :  { %v1983_v21 = vsub.f32 1.0, %v1982_v17  ;;  %vm3851_vm9 = vmmov %vm3850_vm3 }
0x1820   :  { %2124 = vmatpush.msrb.mxu1 %v2609_v0 }
0x1821   :  { %v1984_v23 = vmul.f32 %v2760_v47, %v1983_v21 }
0x1822   :  { %2125 = vmatpush.msrb.mxu1 %v2608_v20 }
0x1823   :  { %v1985_v5 = vadd.f32 %v2760_v47, %v1984_v23 }
0x1824   :  { %v2102_v26 = vpop.f32.mrf.mxu3 }
0x1825   :  { %v1989_v3 = vsel %vm1988_vm6, %v2760_v47, %v1985_v5 }
0x1826   :  { %v1994_v29 = vsel %vm1991_vm8, %v1993_v25, %v1989_v3 }
0x1827   :  { %v1995_v30 = vmul.f32 %v2758_v13, %v1994_v29  ;;  %v2624_v13 = vld [vmem:[%s3786_s9 + $0x40] sm:$0xff] }
0x1829   :  { %2601 = vmatmul.msk.f32.vlgmr.msra.gmra.mxu1 %vm230_vm2, %v1995_v30  ;;  %v2685_v30 = vld [vmem:[%s3785_s10 + $0x1] ss:$0 sm:$0xff] }
0x182a   :  { %2252 = vmatpush.msra.mxu1 %v2617_v48  ;;  %v2636_v48 = vld [vmem:[%s3788_s11 + $0x90] sm:$0xff] }
0x182c   :  { %v2179_v34 = vpop.f32.mrf.mxu3  ;;  %2253 = vmatpush.msra.mxu1 %v2616_v54 }
0x182d   :  { %v2182_v9 = vmul.f32 0.25, %v2179_v34 }
0x182f   :  { %v2183_v35 = vsel %vm3851_vm9, %v2182_v9, -inf }
0x1830   :  { %2184 = vmax.xlane.f32.xlu0 %v2183_v35  ;;  %v2641_v35 = vld [vmem:[%s3788_s11 + $0xb8] sm:$0xff] }
0x1831   :  { %2610 = vmatmul.msk.f32.vlgmr.msrb.gmra.mxu1 %vm177_vm7, %v2102_v26  ;;  %v2684_v26 = vld [vmem:[%s3784_s8 + $0x1] ss:$0 sm:$0xff]  ;;  %2389 = vmatpush.msra.mxu3 %v2641_v35 }
0x1833   :  { %2390 = vmatpush.msra.mxu3 %v2640_v36 }
0x18a3   :  { %v2185_v37 = vpop.xlane.xlu0 %2184 }
0x18a4   :  { %v2186_v43 = vsub.f32 %v2182_v9, %v2185_v37 }
0x18a6   :  { %v2187_v33 = vmul.f32 1.442695, %v2186_v43  ;;  %v2020_v44 = vpop.f32.mrf.mxu1  ;;  %v2639_v43 = vld [vmem:[%s3788_s11 + $0xa8] sm:$0xff] }
0x18a7   :  { %2611 = vmatmul.msk.f32.vlgmr.msrb.gmra.mxu2 %vm177_vm7, %v2020_v44  ;;  %2391 = vmatpush.msra.mxu3 %v2639_v43  ;;  %v2638_v44 = vld [vmem:[%s3788_s11 + $0xa0] sm:$0xff] }
0x18a8   :  { %2761 = vpow2.f32 %v2187_v33  ;;  %v2773_v43 = vld [vmem:[%s3790_s13] ss:$0 sm:$0xff] }
0x18a9   :  { %2392 = vmatpush.msra.mxu3 %v2638_v44 }
0x18ae   :  { %v2762_v45 = vpop.eup %2761  ;;  %v2127_v56 = vpop.f32.mrf.mxu1 }
0x18af   :  { %v2189_v46 = vsel %vm3852_vm12, %v2762_v45, 0.0 }
0x18b0   :  { %2190 = vadd.xlane.f32.xlu1 %v2189_v46  ;;  %v2637_v46 = vld [vmem:[%s3788_s11 + $0x98] sm:$0xff] }
0x18b1   :  { %2393 = vmatpush.msra.mxu3 %v2637_v46  ;;  %v2775_v46 = vld [vmem:[%s3854_s28] ss:$0 sm:$0xff] }
0x18b3   :  { %2394 = vmatpush.msra.mxu3 %v2636_v48 }
0x1923   :  { %v2191_v31 = vpop.xlane.xlu1 %2190 }
0x1924   :  { %2763 = vrcp.f32 %v2191_v31  ;;  %v2203_v40 = vand.u32 2147483648, %v2191_v31  ;;  %v2201_v42 = vand.u32 2147483647, %v2191_v31  ;;  %vm2197_vm14 = vweird.f32 %v2191_v31 }
0x1926   :  { %v2204_v50 = vor.u32 1.1754944e-38, %v2203_v40  ;;  %vm2202_vm1 = vcmp.eq.f32.partialorder %v2201_v42, 8.507059e+37  ;;  %v2633_v40 = vld [vmem:[%s3788_s11 + $0x78] sm:$0xff]  ;;  %v2632_v42 = vld [vmem:[%s3788_s11 + $0x70] sm:$0xff] }
0x192a   :  { %v2764_v28 = vpop.eup %2763  ;;  %v2150_v57 = vpop.f32.mrf.mxu2 }
0x192b   :  { %v2193_v38 = vmul.f32 %v2764_v28, %v2191_v31  ;;  %vm2198_vm13 = vweird.f32 %v2764_v28  ;;  %v2151_v58 = vadd.f32 %v2150_v57, %v2127_v56  ;;  %v2635_v31 = vld [vmem:[%s3788_s11 + $0x88] sm:$0xff] }
0x192c   :  { %vm2199_vm15 = vmor %vm2197_vm14, %vm2198_vm13  ;;  %2395 = vmatpush.msra.mxu3 %v2635_v31 }
0x192d   :  { %v2194_v39 = vsub.f32 1.0, %v2193_v38 }
0x192f   :  { %v2195_v41 = vmul.f32 %v2764_v28, %v2194_v39 }
0x1931   :  { %v2196_v49 = vadd.f32 %v2764_v28, %v2195_v41 }
0x1933   :  { %v2200_v51 = vsel %vm2199_vm15, %v2764_v28, %v2196_v49  ;;  %v2634_v28 = vld [vmem:[%s3788_s11 + $0x80] sm:$0xff] }
0x1934   :  { %v2205_v52 = vsel %vm2202_vm1, %v2204_v50, %v2200_v51  ;;  %2396 = vmatpush.msra.mxu3 %v2634_v28 }
0x1935   :  { %v2206_v53 = vmul.f32 %v2762_v45, %v2205_v52  ;;  %v2631_v52 = vld [vmem:[%s3788_s11 + $0x68] sm:$0xff] }
0x1936   :  { %2397 = vmatpush.msra.mxu3 %v2633_v40 }
0x1937   :  { %2615 = vmatmul.msk.f32.vlgmr.msrb.gmra.mxu0 %vm230_vm2, %v2206_v53  ;;  %v2630_v53 = vld [vmem:[%s3788_s11 + $0x60] sm:$0xff] }
0x1938   :  { %2398 = vmatpush.msra.mxu3 %v2632_v42 }
0x193a   :  { %2399 = vmatpush.msra.mxu3 %v2631_v52 }
0x193c   :  { %2400 = vmatpush.msra.mxu3 %v2630_v53 }
0x19b4   :  { %v2230_v55 = vpop.f32.mrf.mxu0 }
0x19b5   :  { %2618 = vmatmul.msk.f32.vlgmr.msra.gmra.mxu1 %vm177_vm7, %v2230_v55 }
0x1a32   :  { %v2255_v59 = vpop.f32.mrf.mxu1 }
0x1a33   :  { %v2258_v61 = vadd.f32 %v2255_v59, %v2151_v58 }
0x1a35   :  { %v2259_v63 = vadd.f32 %v2258_v61, %v3550_v60  ;;  %v2626_v60 = vld [vmem:[%s3786_s9 + $0x50] sm:$0xff] }
0x1a36   :  { %2321 = vmatpush.msra.mxu2 %v2626_v60 }
0x1a37   :  { %v3672_v1 = vadd.f32 %v2682_v62, %v2259_v63 }
0x1a38   :  { %2322 = vmatpush.msra.mxu2 %v2625_v12 }
0x1a39   :  { %v2267_v2 = vsel %vm70_vm0, %v3672_v1, 0.0 }
0x1a3a   :  { %2268 = vadd.xlane.f32.xlu2 %v2267_v2  ;;  %2323 = vmatpush.msra.mxu2 %v2624_v13 }
0x1a3c   :  { %2324 = vmatpush.msra.mxu2 %v2623_v14 }
0x1a3e   :  { %2325 = vmatpush.msra.mxu2 %v2622_v15 }
0x1aad   :  { %v2269_v4 = vpop.xlane.xlu2 %2268 }
0x1aae   :  { %v2270_v6 = vmul.f32 %v2269_v4, %v2887_v8 }
0x1ab0   :  { %v2271_v32 = vsub.f32 %v3672_v1, %v2270_v6 }
0x1ab2   :  { %v2272_v7 = vmul.f32 %v2271_v32, %v2271_v32 }
0x1ab4   :  { %v2273_v10 = vsel %vm70_vm0, %v2272_v7, 0.0 }
0x1ab5   :  { %2274 = vadd.xlane.f32.xlu0 %v2273_v10 }
0x1b28   :  { %v2275_v16 = vpop.xlane.xlu0 %2274 }
0x1b29   :  { %v2276_v47 = vmul.f32 %v2275_v16, %v2887_v8 }
0x1b2b   :  { %v2277_v0 = vadd.f32 1e-12, %v2276_v47 }
0x1b2d   :  { %2765 = vrsqrt.f32 %v2277_v0  ;;  %vm2284_vm2 = vweird.f32 %v2277_v0 }
0x1b33   :  { %v2766_v17 = vpop.eup %2765 }
0x1b34   :  { %v2279_v19 = vmul.f32 %v2766_v17, %v2277_v0  ;;  %vm2285_vm7 = vweird.f32 %v2766_v17 }
0x1b35   :  { %vm2286_vm3 = vmor %vm2284_vm2, %vm2285_vm7 }
0x1b36   :  { %v2280_v20 = vmul.f32 %v2766_v17, %v2279_v19 }
0x1b38   :  { %v2281_v21 = vmul.f32 0.5, %v2280_v20 }
0x1b3a   :  { %v2282_v22 = vsub.f32 1.5, %v2281_v21 }
0x1b3c   :  { %v2283_v23 = vmul.f32 %v2766_v17, %v2282_v22 }
0x1b3e   :  { %v2287_v5 = vsel %vm2286_vm3, %v2766_v17, %v2283_v23  ;;  %v2686_v17 = vld [vmem:[%s3787_s12 + $0x1] ss:$0 sm:$0xff] }
0x1b3f   :  { %v2288_v25 = vmul.f32 %v2287_v5, %v2271_v32 }
0x1b41   :  { %v2292_v3 = vmul.f32 %v2683_v24, %v2288_v25 }
0x1b43   :  { %v2296_v29 = vadd.f32 %v2684_v26, %v2292_v3 }
0x1b45   :  { %2629 = vmatmul.msk.f32.vlgmr.msra.gmra.mxu2 %vm126_vm5, %v2296_v29 }
0x1bc8   :  { %v2327_v34 = vpop.f32.mrf.mxu2 }
0x1bc9   :  { %v3708_v9 = vadd.f32 %v2685_v30, %v2327_v34 }
0x1bcb   :  { %v2331_v27 = vmul.f32 0.70710677, %v3708_v9  ;;  %v2330_v16 = vmul.f32 0.5, %v3708_v9 }
0x1bcd   :  { %v2334_v37 = vand.u32 2147483647, %v2331_v27  ;;  %vm2332_vm9 = vcmp.ge.f32.partialorder %v2331_v27, 0.0 }
0x1bce   :  { %v2333_v14 = vsel %vm2332_vm9, 1.0, %v2784_v18 }
0x1bcf   :  { %v2335_v33 = vmul.f32 0.3275911, %v2334_v37  ;;  %v2361_v58 = vsub.f32 0.0, %v2334_v37 }
0x1bd1   :  { %v2336_v45 = vadd.f32 1.0, %v2335_v33  ;;  %v2362_v62 = vmul.f32 %v2361_v58, %v2334_v37 }
0x1bd3   :  { %2767 = vrcp.f32 %v2336_v45  ;;  %v2348_v49 = vand.u32 2147483648, %v2336_v45  ;;  %v2346_v51 = vand.u32 2147483647, %v2336_v45  ;;  %vm2342_vm11 = vweird.f32 %v2336_v45 }
0x1bd4   :  { %v2363_v4 = vmul.f32 1.442695, %v2362_v62 }
0x1bd5   :  { %v2349_v55 = vor.u32 1.1754944e-38, %v2348_v49  ;;  %vm2347_vm8 = vcmp.eq.f32.partialorder %v2346_v51, 8.507059e+37 }
0x1bd6   :  { %2769 = vpow2.f32 %v2363_v4 }
0x1bd9   :  { %v2768_v38 = vpop.eup %2767 }
0x1bda   :  { %v2338_v39 = vmul.f32 %v2768_v38, %v2336_v45  ;;  %vm2343_vm4 = vweird.f32 %v2768_v38 }
0x1bdb   :  { %vm2344_vm6 = vmor %vm2342_vm11, %vm2343_vm4 }
0x1bdc   :  { %v2339_v41 = vsub.f32 1.0, %v2338_v39  ;;  %v2770_v60 = vpop.eup %2769 }
0x1bde   :  { %v2340_v50 = vmul.f32 %v2768_v38, %v2339_v41 }
0x1be0   :  { %v2341_v54 = vadd.f32 %v2768_v38, %v2340_v50 }
0x1be2   :  { %v2345_v56 = vsel %vm2344_vm6, %v2768_v38, %v2341_v54 }
0x1be3   :  { %v2350_v57 = vsel %vm2347_vm8, %v2349_v55, %v2345_v56 }
0x1be4   :  { %v2352_v59 = vmul.f32 1.0614054, %v2350_v57 }
0x1be6   :  { %v2353_v61 = vadd.f32 -1.4531521, %v2352_v59 }
0x1be8   :  { %v2354_v63 = vmul.f32 %v2353_v61, %v2350_v57 }
0x1bea   :  { %v2355_v2 = vadd.f32 1.4214138, %v2354_v63 }
0x1bec   :  { %v2356_v6 = vmul.f32 %v2355_v2, %v2350_v57 }
0x1bee   :  { %v2357_v32 = vadd.f32 -0.28449672, %v2356_v6 }
0x1bf0   :  { %v2358_v7 = vmul.f32 %v2357_v32, %v2350_v57 }
0x1bf2   :  { %v2359_v10 = vadd.f32 0.2548296, %v2358_v7 }
0x1bf4   :  { %v2360_v11 = vmul.f32 %v2359_v10, %v2350_v57 }
0x1bf6   :  { %v2365_v12 = vmul.f32 %v2770_v60, %v2360_v11 }
0x1bf8   :  { %v2366_v13 = vsub.f32 1.0, %v2365_v12 }
0x1bfa   :  { %v2367_v15 = vmul.f32 %v2366_v13, %v2333_v14 }
0x1bfc   :  { %v2368_v47 = vadd.f32 1.0, %v2367_v15 }
0x1bfe   :  { %v2369_v0 = vmul.f32 %v2368_v47, %v2330_v16 }
0x1c00   :  { %2642 = vmatmul.msk.f32.vlgmr.msra.gmra.mxu3 %vm618_vm10, %v2369_v0 }
0x1c83   :  { %v2402_v19 = vpop.f32.mrf.mxu3 }
0x1c84   :  { %v2405_v20 = vadd.f32 %v2402_v19, %v3672_v1 }
0x1c86   :  { %v2410_v21 = vadd.f32 %v2686_v17, %v2405_v20 }
0x1c88   :  { %2644 = vst.msk [vmem:[%s3789_s17 + $0x8] sm:$0x1f] %vm70_vm0, %v2410_v21  ;;  %v2413_v18 = vsel %vm70_vm0, %v2410_v21, 0.0 }
0x1c89   :  { %2414 = vadd.xlane.f32.xlu1 %v2413_v18 }
0x1cfc   :  { %v2415_v22 = vpop.xlane.xlu1 %2414 }
0x1cfd   :  { %v2416_v23 = vmul.f32 %v2415_v22, %v2887_v8 }
0x1cff   :  { %v2417_v24 = vsub.f32 %v2410_v21, %v2416_v23 }
0x1d01   :  { %v2418_v5 = vmul.f32 %v2417_v24, %v2417_v24 }
0x1d03   :  { %v2419_v25 = vsel %vm70_vm0, %v2418_v5, 0.0 }
0x1d04   :  { %2420 = vadd.xlane.f32.xlu0 %v2419_v25 }
0x1d77   :  { %v2421_v26 = vpop.xlane.xlu0 %2420 }
0x1d78   :  { %v2422_v1 = vmul.f32 %v2421_v26, %v2887_v8  ;;  %v2774_v8 = vld [vmem:[%s3853_s15] ss:$0 sm:$0xff] }
0x1d7a   :  { %v2423_v3 = vadd.f32 1e-12, %v2422_v1 }
0x1d7c   :  { %2771 = vrsqrt.f32 %v2423_v3  ;;  %vm2430_vm12 = vweird.f32 %v2423_v3 }
0x1d82   :  { %v2772_v29 = vpop.eup %2771 }
0x1d83   :  { %v2425_v30 = vmul.f32 %v2772_v29, %v2423_v3  ;;  %vm2431_vm10 = vweird.f32 %v2772_v29 }
0x1d84   :  { %vm2432_vm13 = vmor %vm2430_vm12, %vm2431_vm10 }
0x1d85   :  { %v2426_v34 = vmul.f32 %v2772_v29, %v2425_v30 }
0x1d87   :  { %v2427_v9 = vmul.f32 0.5, %v2426_v34 }
0x1d89   :  { %v2428_v35 = vsub.f32 1.5, %v2427_v9 }
0x1d8b   :  { %v2429_v27 = vmul.f32 %v2772_v29, %v2428_v35 }
0x1d8d   :  { %v2433_v36 = vsel %vm2432_vm13, %v2772_v29, %v2429_v27 }
0x1d8e   :  { %v2434_v37 = vmul.f32 %v2433_v36, %v2417_v24 }
0x1d90   :  { %v2435_v33 = vmul.f32 %v2773_v43, %v2434_v37 }
0x1d92   :  { %v2436_v44 = vadd.f32 %v2774_v8, %v2435_v33 }
0x1d94   :  { %2645 = vmatmul.msk.f32.vlgmr.msra.gmra.mxu0 %vm126_vm5, %v2436_v44 }
0x1e11   :  { %v2457_v45 = vpop.f32.mrf.mxu0 }
0x1e12   :  { %v2458_v48 = vadd.f32 %v2775_v46, %v2457_v45 }
0x1e14   :  { %2646 = vst.msk [vmem:[%s3855_s25 + $0x8] sm:$0x1f] %vm70_vm0, %v2458_v48 }

// kernel: mae_vit_forward.5
= control target key start
LH: loop header
LB: loop body
LE: loop exit
PB: predicated region body
PF: predicated region fallthrough
CT: control target
= control target key end

     0   :  { %s4318_s0 = inlined_call_operand.vmem [shape: f32[2,17,48], index: 0, kind: input, shape index: {}]   ;;  %s4319_s1 = inlined_call_operand.vmem [shape: f32[1,1,48], index: 1, kind: input, shape index: {}]   ;;  %s4320_s2 = inlined_call_operand.vmem [shape: f32[1,1,48], index: 2, kind: input, shape index: {}]   ;;  %s4321_s3 = inlined_call_operand.vmem [shape: f32[1,48,144], index: 3, kind: input, shape index: {}]   ;;  %s4322_s4 = inlined_call_operand.vmem [shape: f32[1,1,144], index: 4, kind: input, shape index: {}]   ;;  %s4323_s5 = inlined_call_operand.vmem [shape: f32[3,16,48], index: 5, kind: input, shape index: {}]   ;;  %s4324_s6 = inlined_call_operand.vmem [shape: f32[1,1,48], index: 6, kind: input, shape index: {}]   ;;  %s4325_s7 = inlined_call_operand.vmem [shape: f32[1,1,48], index: 7, kind: input, shape index: {}]   ;;  %s4326_s8 = inlined_call_operand.vmem [shape: f32[1,1,48], index: 8, kind: input, shape index: {}]   ;;  %s4327_s9 = inlined_call_operand.vmem [shape: f32[1,48,96], index: 9, kind: input, shape index: {}]   ;;  %s4328_s10 = inlined_call_operand.vmem [shape: f32[1,1,96], index: 10, kind: input, shape index: {}]   ;;  %s4329_s11 = inlined_call_operand.vmem [shape: f32[1,96,48], index: 11, kind: input, shape index: {}]   ;;  %s4330_s12 = inlined_call_operand.vmem [shape: f32[1,1,48], index: 12, kind: input, shape index: {}]   ;;  %s4331_s13 = inlined_call_operand.vmem [shape: f32[1,48], index: 13, kind: input, shape index: {}]   ;;  %s4332_s14 = inlined_call_operand.vmem [shape: f32[1,48], index: 14, kind: input, shape index: {}]   ;;  %s4333_s15 = inlined_call_operand.vmem [shape: f32[48,48], index: 15, kind: input, shape index: {}]   ;;  %s4334_s16 = inlined_call_operand.vmem [shape: f32[1,48], index: 16, kind: input, shape index: {}]   ;;  %s4335_s17 = inlined_call_operand.vmem [shape: f32[2,17,48], index: 17, kind: input, shape index: {}]   ;;  %s4336_s18 = inlined_call_operand.vmem [shape: f32[2,17,1], index: 18, kind: input, shape index: {}]   ;;  %s4337_s19 = inlined_call_operand.hbm [shape: f32[1,1], index: 19, kind: output, shape index: {}]  }
   0x1   :  { %4348 = sst [smem:[#allocation6_spill]] %s4318_s0 }
   0x2   :  { %4349 = sst [smem:[#allocation7_spill]] %s4319_s1 }
   0x3   :  { %4350 = sst [smem:[#allocation8_spill]] %s4320_s2 }
   0x4   :  { %4351 = sst [smem:[#allocation9_spill]] %s4321_s3 }
   0x5   :  { %s4352_s20 = sld [smem:[#allocation6_spill]]  ;;  %vm77_vm0 = vcmask 392192   ;;  %vm84_vm1 = vcmask 385024  }
   0xb   :  { %v72_v0 = vld [vmem:[%s4352_s20] sm:$0xff]  ;;  %v74_v1 = vld [vmem:[%s4352_s20 + $0x10] sm:$0x1]  ;;  %v73_v4 = vld [vmem:[%s4352_s20 + $0x8] sm:$0xff] }
   0xc   :  { %v78_v2 = vsel %vm77_vm0, %v72_v0, 0.0  ;;  %v85_v3 = vsel %vm84_vm1, %v74_v1, 0.0  ;;  %v81_v5 = vsel %vm77_vm0, %v73_v4, 0.0 }
   0xd   :  { %79 = vadd.xlane.f32.xlu0 %v78_v2  ;;  %86 = vadd.xlane.f32.xlu1 %v85_v3 }
   0xe   :  { %24 = vsyncpa [#allocation4], 0  ;;  %v3018_v6 = vmov 48.0   ;;  %s4353_s25 = sld [smem:[#allocation9_spill]]  ;;  %vm244_vm12 = vcmask 130048   ;;  %s3019_s29 = smov 80  }
   0xf   :  { %2848 = vrcp.f32 %v3018_v6  ;;  %s4354_s23 = sld [smem:[#allocation7_spill]]  ;;  %vm249_vm13 = vcmask 122880   ;;  %vm304_vm14 = vcmask 138240   ;;  %vm311_vm15 = vcmask 131072   ;;  %s3020_s0 = smov 64  }
  0x10   :  { %s4355_s26 = sld [smem:[#allocation8_spill]]  ;;  %s4342_s30 = smov 32  }
  0x11   :  { %s3022_s21 = smov 112   ;;  %s3023_s1 = smov 48  }
  0x12   :  { %s4346_s22 = smov 96   ;;  %s4344_s28 = smov 16  }
  0x14   :  { %v3163_v28 = vld [vmem:[%s4353_s25 + $0x50] sm:$0xff]  ;;  %v175_v29 = vld [vmem:[%s4353_s25 + $0x58] sm:$0xff]  ;;  %v3172_v30 = vld [vmem:[%s4353_s25 + $0x40] sm:$0xff] }
  0x15   :  { %82 = vadd.xlane.f32.xlu0 %v81_v5  ;;  %v2849_v7 = vpop.eup %2848  ;;  %201 = vmatpush.msra.mxu0 %v3163_v28  ;;  %v173_v31 = vld [vmem:[%s4353_s25 + $0x48] sm:$0xff]  ;;  %v3181_v32 = vld [vmem:[%s4353_s25 + $0x30] sm:$0xff]  ;;  %v171_v33 = vld [vmem:[%s4353_s25 + $0x38] sm:$0xff] }
  0x16   :  { %v89_v8 = vmul.f32 48.0, %v2849_v7  ;;  %vm93_vm2 = vweird.f32 %v2849_v7  ;;  %227 = vmatpush.msra.mxu1 %v175_v29  ;;  %v3190_v34 = vld [vmem:[%s4353_s25 + $0x20] sm:$0xff]  ;;  %v169_v35 = vld [vmem:[%s4353_s25 + $0x28] sm:$0xff]  ;;  %v3199_v36 = vld [vmem:[%s4353_s25 + $0x10] sm:$0xff] }
  0x17   :  { %202 = vmatpush.msra.mxu0 %v3172_v30  ;;  %v167_v37 = vld [vmem:[%s4353_s25 + $0x18] sm:$0xff]  ;;  %v3208_v38 = vld [vmem:[%s4353_s25] sm:$0xff]  ;;  %v165_v39 = vld [vmem:[%s4353_s25 + $0x8] sm:$0xff] }
  0x18   :  { %v90_v9 = vsub.f32 1.0, %v89_v8  ;;  %228 = vmatpush.msra.mxu1 %v173_v31  ;;  %v2831_v57 = vld [vmem:[%s4354_s23] ss:$0 sm:$0xff] }
  0x19   :  { %203 = vmatpush.msra.mxu0 %v3181_v32  ;;  %v2832_v61 = vld [vmem:[%s4355_s26] ss:$0 sm:$0xff] }
  0x1a   :  { %v91_v10 = vmul.f32 %v2849_v7, %v90_v9  ;;  %229 = vmatpush.msra.mxu1 %v171_v33 }
  0x1b   :  { %204 = vmatpush.msra.mxu0 %v3190_v34 }
  0x1c   :  { %v92_v11 = vadd.f32 %v2849_v7, %v91_v10  ;;  %230 = vmatpush.msra.mxu1 %v169_v35 }
  0x1d   :  { %205 = vmatpush.msra.mxu0 %v3199_v36 }
  0x1e   :  { %v3140_v12 = vsel %vm93_vm2, %v2849_v7, %v92_v11  ;;  %231 = vmatpush.msra.mxu1 %v167_v37  ;;  %vm395_vm2 = vcmask 1040384  }
  0x1f   :  { %206 = vmatpush.msra.mxu0 %v3208_v38 }
  0x20   :  { %232 = vmatpush.msra.mxu1 %v165_v39 }
  0x80   :  { %v80_v13 = vpop.xlane.xlu0 %79  ;;  %v87_v17 = vpop.xlane.xlu1 %86 }
  0x81   :  { %v95_v14 = vmul.f32 %v3140_v12, %v80_v13  ;;  %v97_v21 = vmul.f32 %v3140_v12, %v87_v17 }
  0x83   :  { %v3143_v15 = vsub.f32 %v72_v0, %v95_v14  ;;  %v3152_v23 = vsub.f32 %v74_v1, %v97_v21 }
  0x85   :  { %v101_v16 = vmul.f32 %v3143_v15, %v3143_v15  ;;  %v103_v26 = vmul.f32 %v3152_v23, %v3152_v23 }
  0x87   :  { %v104_v18 = vsel %vm77_vm0, %v101_v16, 0.0  ;;  %v110_v27 = vsel %vm84_vm1, %v103_v26, 0.0 }
  0x88   :  { %105 = vadd.xlane.f32.xlu1 %v104_v18  ;;  %v83_v19 = vpop.xlane.xlu0 %82  ;;  %v176_v18 = vld [vmem:[%s4322_s4] sm:$0x3] }
  0x89   :  { %v96_v20 = vmul.f32 %v3140_v12, %v83_v19  ;;  %v178_v19 = vperm.slane %v176_v18, 0 }
  0x8b   :  { %v3150_v22 = vsub.f32 %v73_v4, %v96_v20  ;;  %v179_v20 = vperm.slane %v176_v18, 1 }
  0x8d   :  { %v102_v24 = vmul.f32 %v3150_v22, %v3150_v22 }
  0x8f   :  { %v107_v25 = vsel %vm77_vm0, %v102_v24, 0.0 }
  0x90   :  { %108 = vadd.xlane.f32.xlu2 %v107_v25 }
  0x98   :  { %111 = vadd.xlane.f32.xlu2 %v110_v27 }
  0xfb   :  { %v106_v40 = vpop.xlane.xlu1 %105 }
  0xfc   :  { %v113_v41 = vmul.f32 %v106_v40, %v3140_v12 }
  0xfe   :  { %v116_v42 = vadd.f32 1e-12, %v113_v41 }
 0x100   :  { %2850 = vrsqrt.f32 %v116_v42  ;;  %vm125_vm4 = vweird.f32 %v116_v42 }
 0x103   :  { %v109_v43 = vpop.xlane.xlu2 %108 }
 0x104   :  { %v114_v44 = vmul.f32 %v109_v43, %v3140_v12 }
 0x106   :  { %v2851_v45 = vpop.eup %2850  ;;  %v117_v46 = vadd.f32 1e-12, %v114_v44 }
 0x107   :  { %v120_v47 = vmul.f32 %v2851_v45, %v116_v42  ;;  %vm126_vm3 = vweird.f32 %v2851_v45 }
 0x108   :  { %2852 = vrsqrt.f32 %v117_v46  ;;  %vm127_vm5 = vmor %vm125_vm4, %vm126_vm3  ;;  %vm135_vm7 = vweird.f32 %v117_v46 }
 0x109   :  { %v121_v48 = vmul.f32 %v2851_v45, %v120_v47 }
 0x10b   :  { %v122_v49 = vmul.f32 0.5, %v121_v48  ;;  %v112_v50 = vpop.xlane.xlu2 %111 }
 0x10c   :  { %v115_v51 = vmul.f32 %v112_v50, %v3140_v12 }
 0x10d   :  { %v123_v52 = vsub.f32 1.5, %v122_v49 }
 0x10e   :  { %v2853_v53 = vpop.eup %2852  ;;  %v118_v54 = vadd.f32 1e-12, %v115_v51 }
 0x10f   :  { %v124_v55 = vmul.f32 %v2851_v45, %v123_v52  ;;  %v130_v56 = vmul.f32 %v2853_v53, %v117_v46  ;;  %vm136_vm6 = vweird.f32 %v2853_v53 }
 0x110   :  { %2854 = vrsqrt.f32 %v118_v54  ;;  %vm137_vm8 = vmor %vm135_vm7, %vm136_vm6  ;;  %vm145_vm10 = vweird.f32 %v118_v54 }
 0x111   :  { %v128_v58 = vsel %vm127_vm5, %v2851_v45, %v124_v55  ;;  %v131_v59 = vmul.f32 %v2853_v53, %v130_v56 }
 0x112   :  { %v149_v60 = vmul.f32 %v128_v58, %v3143_v15 }
 0x113   :  { %v132_v62 = vmul.f32 0.5, %v131_v59 }
 0x114   :  { %v155_v63 = vmul.f32 %v2831_v57, %v149_v60 }
 0x115   :  { %v133_v0 = vsub.f32 1.5, %v132_v62 }
 0x116   :  { %v2855_v1 = vpop.eup %2854  ;;  %v161_v2 = vadd.f32 %v2832_v61, %v155_v63 }
 0x117   :  { %v134_v3 = vmul.f32 %v2853_v53, %v133_v0  ;;  %v140_v4 = vmul.f32 %v2855_v1, %v118_v54  ;;  %vm146_vm9 = vweird.f32 %v2855_v1 }
 0x118   :  { %2666 = vmatmul.msk.f32.vlgmr.msra.gmra.mxu0 %vm77_vm0, %v161_v2  ;;  %2669 = vmatmul.msk.f32.vlgmr.msra.gmra.mxu1 %vm77_vm0, %v161_v2  ;;  %vm147_vm11 = vmor %vm145_vm10, %vm146_vm9 }
 0x119   :  { %v138_v5 = vsel %vm137_vm8, %v2853_v53, %v134_v3  ;;  %v141_v6 = vmul.f32 %v2855_v1, %v140_v4 }
 0x11a   :  { %v150_v7 = vmul.f32 %v138_v5, %v3150_v22 }
 0x11b   :  { %v142_v8 = vmul.f32 0.5, %v141_v6 }
 0x11c   :  { %v156_v9 = vmul.f32 %v2831_v57, %v150_v7 }
 0x11d   :  { %v143_v10 = vsub.f32 1.5, %v142_v8 }
 0x11e   :  { %v162_v11 = vadd.f32 %v2832_v61, %v156_v9 }
 0x11f   :  { %v144_v13 = vmul.f32 %v2855_v1, %v143_v10 }
 0x120   :  { %2667 = vmatmul.msk.f32.gmra.mxu0 %vm77_vm0, %v162_v11  ;;  %2670 = vmatmul.msk.f32.gmra.mxu1 %vm77_vm0, %v162_v11 }
 0x121   :  { %v148_v14 = vsel %vm147_vm11, %v2855_v1, %v144_v13 }
 0x122   :  { %v151_v15 = vmul.f32 %v148_v14, %v3152_v23 }
 0x124   :  { %v157_v16 = vmul.f32 %v2831_v57, %v151_v15 }
 0x126   :  { %v163_v17 = vadd.f32 %v2832_v61, %v157_v16 }
 0x128   :  { %2668 = vmatmul.msk.f32.gmra.mxu0 %vm77_vm0, %v163_v17  ;;  %2671 = vmatmul.msk.f32.gmra.mxu1 %vm77_vm0, %v163_v17 }
 0x195   :  { %v208_v21 = vpop.f32.mrf.mxu0  ;;  %v234_v22 = vpop.f32.mrf.mxu1 }
 0x196   :  { %v3235_v24 = vadd.f32 %v208_v21, %v178_v19  ;;  %v235_v25 = vadd.f32 %v234_v22, %v179_v20 }
 0x198   :  { %245 = vst.msk [vmem:[#allocation2 + $0x8] sm:$0xff] %vm244_vm12, %v235_v25  ;;  %257 = vrot.lane.b32.xlu2 %v3235_v24, %s3019_s29 }
 0x19d   :  { %v211_v23 = vpop.f32.mrf.mxu0  ;;  %v237_v26 = vpop.f32.mrf.mxu1 }
 0x19e   :  { %v212_v27 = vadd.f32 %v211_v23, %v178_v19  ;;  %v238_v29 = vadd.f32 %v237_v26, %v179_v20 }
 0x1a0   :  { %247 = vst.msk [vmem:[#allocation2 + $0x18] sm:$0xff] %vm244_vm12, %v238_v29  ;;  %259 = vrot.lane.b32.xlu1 %v212_v27, %s3019_s29  ;;  %v3261_v52 = vpack.i.bf16 %v3235_v24, %v212_v27 }
 0x1a5   :  { %v214_v31 = vpop.f32.mrf.mxu0  ;;  %v240_v33 = vpop.f32.mrf.mxu1 }
 0x1a6   :  { %v215_v35 = vadd.f32 %v214_v31, %v178_v19  ;;  %v241_v37 = vadd.f32 %v240_v33, %v179_v20 }
 0x1a8   :  { %248 = vst [vmem:[#allocation2 + $0x20] sm:$0x1] %v215_v35 }
 0x1a9   :  { %250 = vst.msk [vmem:[#allocation2 + $0x28] sm:$0x1] %vm249_vm13, %v241_v37 }
 0x1af   :  { %v3243_v39 = vld [vmem:[#allocation2 + $0x20] sm:$0x1] }
 0x1b0   :  { %261 = vrot.lane.b32.xlu0 %v3243_v39, %s3019_s29 }
 0x1f2   :  { %v258_v42 = vpop.permute.xlu2 %257 }
 0x212   :  { %v260_v41 = vpop.permute.xlu1 %259 }
 0x222   :  { %v262_v40 = vpop.permute.xlu0 %261 }
 0x223   :  { %2672 = vmatpush.xpose.msk.msra.mxu2 %vm244_vm12, %v262_v40 }
 0x227   :  { %2673 = vmatpush.xpose.msk.msra.mxu2 %vm244_vm12, %v260_v41 }
 0x22b   :  { %2674 = vmatpush.xpose.msk.msra.mxu2 %vm244_vm12, %v258_v42 }
 0x22e   :  { %2675 = vmatmul.msk.f32.vlgmr.msra.gmra.mxu2 %vm244_vm12, %v3235_v24 }
 0x236   :  { %2676 = vmatmul.msk.f32.gmra.mxu2 %vm244_vm12, %v212_v27 }
 0x23e   :  { %2677 = vmatmul.msk.f32.gmra.mxu2 %vm244_vm12, %v3243_v39 }
 0x2b1   :  { %v292_v43 = vpop.f32.mrf.mxu2 }
 0x2b2   :  { %v301_v44 = vmul.f32 0.25, %v292_v43 }
 0x2b4   :  { %v305_v45 = vsel %vm304_vm14, %v301_v44, -inf }
 0x2b5   :  { %306 = vmax.xlane.f32.xlu0 %v305_v45 }
 0x2b9   :  { %v295_v46 = vpop.f32.mrf.mxu2 }
 0x2ba   :  { %v302_v47 = vmul.f32 0.25, %v295_v46 }
 0x2bc   :  { %v308_v48 = vsel %vm304_vm14, %v302_v47, -inf }
 0x2bd   :  { %309 = vmax.xlane.f32.xlu2 %v308_v48 }
 0x2c1   :  { %v298_v49 = vpop.f32.mrf.mxu2 }
 0x2c2   :  { %v303_v50 = vmul.f32 0.25, %v298_v49 }
 0x2c4   :  { %v312_v51 = vsel %vm311_vm15, %v303_v50, -inf }
 0x2c5   :  { %313 = vmax.xlane.f32.xlu1 %v312_v51 }
 0x2c9   :  { %436 = vrot.lane.b32.xlu0 %v3243_v39, %s3020_s0 }
 0x2d5   :  { %2812 = vrot.lane.b32.xlu2 %v3261_v52, %s4342_s30 }
 0x2de   :  { %382 = vrot.lane.b32.xlu1 %v3243_v39, %s4342_s30 }
 0x2e6   :  { %434 = vrot.lane.b32.xlu1 %v212_v27, %s3020_s0 }
 0x2ee   :  { %428 = vrot.lane.b32.xlu1 %v212_v27, %s3022_s21 }
 0x2f6   :  { %680 = vrot.lane.b32.xlu1 %v212_v27, %s3023_s1 }
 0x2fe   :  { %674 = vrot.lane.b32.xlu1 %v212_v27, %s4346_s22 }
 0x328   :  { %v307_v53 = vpop.xlane.xlu0 %306 }
 0x329   :  { %v315_v54 = vsub.f32 %v301_v44, %v307_v53 }
 0x32b   :  { %v318_v55 = vmul.f32 1.442695, %v315_v54 }
 0x32d   :  { %2856 = vpow2.f32 %v318_v55 }
 0x330   :  { %v310_v56 = vpop.xlane.xlu2 %309 }
 0x331   :  { %v316_v57 = vsub.f32 %v302_v47, %v310_v56 }
 0x333   :  { %v2857_v58 = vpop.eup %2856  ;;  %v320_v59 = vmul.f32 1.442695, %v316_v57 }
 0x334   :  { %v324_v60 = vsel %vm304_vm14, %v2857_v58, 0.0 }
 0x335   :  { %2858 = vpow2.f32 %v320_v59  ;;  %325 = vadd.xlane.f32.xlu0 %v324_v60 }
 0x338   :  { %v314_v61 = vpop.xlane.xlu1 %313  ;;  %v2813_v4 = vpop.permute.xlu2 %2812 }
 0x339   :  { %v317_v62 = vsub.f32 %v303_v50, %v314_v61  ;;  %v2814_v6 = vunpack.i.l.bf16 %v2813_v4  ;;  %v2815_v7 = vunpack.i.h.bf16 %v2813_v4  ;;  %v425_v61 = vld [vmem:[%s4323_s5 + $0x8] sm:$0xff] }
 0x33a   :  { %657 = vmatpush.msrb.mxu2 %v425_v61 }
 0x33b   :  { %v3272_v63 = vpop.eup %2858  ;;  %v322_v0 = vmul.f32 1.442695, %v317_v62  ;;  %v437_v8 = vpop.permute.xlu0 %436 }
 0x33c   :  { %v327_v1 = vsel %vm304_vm14, %v3272_v63, 0.0 }
 0x33d   :  { %2860 = vpow2.f32 %v322_v0  ;;  %328 = vadd.xlane.f32.xlu2 %v327_v1 }
 0x343   :  { %v3276_v2 = vpop.eup %2860 }
 0x344   :  { %v330_v3 = vsel %vm311_vm15, %v3276_v2, 0.0 }
 0x345   :  { %331 = vadd.xlane.f32.xlu0 %v330_v3 }
 0x350   :  { %v383_v5 = vpop.permute.xlu1 %382 }
 0x351   :  { %2678 = vmatpush.msk.msra.mxu3 %vm395_vm2, %v383_v5 }
 0x353   :  { %412 = vmatpush.msra.mxu3 %v2814_v6 }
 0x355   :  { %432 = vrot.lane.b32.xlu2 %v3235_v24, %s3020_s0  ;;  %413 = vmatpush.msra.mxu3 %v2815_v7 }
 0x357   :  { %2682 = vmatpush.xpose.msk.msrb.mxu3 %vm244_vm12, %v437_v8 }
 0x358   :  { %v435_v9 = vpop.permute.xlu1 %434 }
 0x359   :  { %426 = vrot.lane.b32.xlu0 %v3235_v24, %s3022_s21 }
 0x35b   :  { %2683 = vmatpush.xpose.msk.msrb.mxu3 %vm244_vm12, %v435_v9 }
 0x35d   :  { %682 = vrot.lane.b32.xlu2 %v3243_v39, %s3023_s1 }
 0x360   :  { %v429_v27 = vpop.permute.xlu1 %428 }
 0x361   :  { %430 = vrot.lane.b32.xlu0 %v3243_v39, %s3022_s21 }
 0x365   :  { %678 = vrot.lane.b32.xlu2 %v3235_v24, %s3023_s1 }
 0x368   :  { %v681_v50 = vpop.permute.xlu1 %680 }
 0x369   :  { %672 = vrot.lane.b32.xlu0 %v3235_v24, %s4346_s22 }
 0x36d   :  { %676 = vrot.lane.b32.xlu2 %v3243_v39, %s4346_s22  ;;  %s4357_s22 = smov 16  }
 0x370   :  { %v675_v0 = vpop.permute.xlu1 %674 }
 0x3a8   :  { %v326_v10 = vpop.xlane.xlu0 %325 }
 0x3a9   :  { %2862 = vrcp.f32 %v326_v10  ;;  %v344_v16 = vand.u32 2147483648, %v326_v10  ;;  %v342_v18 = vand.u32 2147483647, %v326_v10  ;;  %vm338_vm4 = vweird.f32 %v326_v10 }
 0x3ab   :  { %v345_v21 = vor.u32 1.1754944e-38, %v344_v16  ;;  %vm343_vm6 = vcmp.eq.f32.partialorder %v342_v18, 8.507059e+37 }
 0x3af   :  { %v2863_v11 = vpop.eup %2862 }
 0x3b0   :  { %v334_v13 = vmul.f32 %v2863_v11, %v326_v10  ;;  %v329_v14 = vpop.xlane.xlu2 %328  ;;  %vm339_vm3 = vweird.f32 %v2863_v11 }
 0x3b1   :  { %2864 = vrcp.f32 %v329_v14  ;;  %vm340_vm5 = vmor %vm338_vm4, %vm339_vm3  ;;  %v359_v33 = vand.u32 2147483648, %v329_v14  ;;  %v357_v37 = vand.u32 2147483647, %v329_v14  ;;  %vm353_vm8 = vweird.f32 %v329_v14 }
 0x3b2   :  { %v335_v15 = vsub.f32 1.0, %v334_v13 }
 0x3b3   :  { %v360_v42 = vor.u32 1.1754944e-38, %v359_v33  ;;  %vm358_vm10 = vcmp.eq.f32.partialorder %v357_v37, 8.507059e+37 }
 0x3b4   :  { %v336_v17 = vmul.f32 %v2863_v11, %v335_v15 }
 0x3b6   :  { %v337_v19 = vadd.f32 %v2863_v11, %v336_v17 }
 0x3b7   :  { %v2865_v20 = vpop.eup %2864 }
 0x3b8   :  { %v349_v22 = vmul.f32 %v2865_v20, %v329_v14  ;;  %v433_v24 = vpop.permute.xlu2 %432  ;;  %v332_v25 = vpop.xlane.xlu0 %331  ;;  %v341_v23 = vsel %vm340_vm5, %v2863_v11, %v337_v19  ;;  %vm354_vm7 = vweird.f32 %v2865_v20 }
 0x3b9   :  { %2866 = vrcp.f32 %v332_v25  ;;  %2684 = vmatpush.xpose.msk.msrb.mxu3 %vm244_vm12, %v433_v24  ;;  %v346_v26 = vsel %vm343_vm6, %v345_v21, %v341_v23  ;;  %vm355_vm9 = vmor %vm353_vm8, %vm354_vm7  ;;  %v374_v49 = vand.u32 2147483648, %v332_v25  ;;  %v372_v53 = vand.u32 2147483647, %v332_v25 }
 0x3ba   :  { %v350_v29 = vsub.f32 1.0, %v349_v22  ;;  %v347_v31 = vmul.f32 %v2857_v58, %v346_v26  ;;  %vm368_vm3 = vweird.f32 %v332_v25 }
 0x3bb   :  { %v375_v55 = vor.u32 1.1754944e-38, %v374_v49  ;;  %vm373_vm5 = vcmp.eq.f32.partialorder %v372_v53, 8.507059e+37 }
 0x3bc   :  { %v351_v35 = vmul.f32 %v2865_v20, %v350_v29  ;;  %2679 = vmatmul.msk.f32.vlgmr.msra.gmra.mxu3 %vm304_vm14, %v347_v31 }
 0x3be   :  { %v352_v40 = vadd.f32 %v2865_v20, %v351_v35 }
 0x3bf   :  { %v2867_v41 = vpop.eup %2866 }
 0x3c0   :  { %v364_v43 = vmul.f32 %v2867_v41, %v332_v25  ;;  %v683_v44 = vpop.permute.xlu2 %682  ;;  %v356_v45 = vsel %vm355_vm9, %v2865_v20, %v352_v40  ;;  %vm369_vm11 = vweird.f32 %v2867_v41 }
 0x3c1   :  { %2700 = vmatpush.xpose.msk.msra.mxu3 %vm244_vm12, %v683_v44  ;;  %v361_v46 = vsel %vm358_vm10, %v360_v42, %v356_v45  ;;  %vm370_vm4 = vmor %vm368_vm3, %vm369_vm11 }
 0x3c2   :  { %v365_v47 = vsub.f32 1.0, %v364_v43  ;;  %v362_v48 = vmul.f32 %v3272_v63, %v361_v46 }
 0x3c4   :  { %v366_v51 = vmul.f32 %v2867_v41, %v365_v47  ;;  %2680 = vmatmul.msk.f32.gmra.mxu3 %vm304_vm14, %v362_v48 }
 0x3c5   :  { %2701 = vmatpush.xpose.msk.msra.mxu3 %vm244_vm12, %v681_v50 }
 0x3c6   :  { %v367_v54 = vadd.f32 %v2867_v41, %v366_v51 }
 0x3c8   :  { %v679_v56 = vpop.permute.xlu2 %678  ;;  %v371_v57 = vsel %vm370_vm4, %v2867_v41, %v367_v54 }
 0x3c9   :  { %2702 = vmatpush.xpose.msk.msra.mxu3 %vm244_vm12, %v679_v56  ;;  %v376_v58 = vsel %vm373_vm5, %v375_v55, %v371_v57 }
 0x3ca   :  { %v377_v59 = vmul.f32 %v3276_v2, %v376_v58  ;;  %v424_v2 = vld [vmem:[%s4323_s5] sm:$0xff] }
 0x3cb   :  { %v427_v60 = vpop.permute.xlu0 %426  ;;  %658 = vmatpush.msrb.mxu2 %v424_v2 }
 0x3cc   :  { %2681 = vmatmul.msk.f32.gmra.mxu3 %vm304_vm14, %v377_v59 }
 0x3d0   :  { %v677_v1 = vpop.permute.xlu2 %676 }
 0x3d3   :  { %v431_v62 = vpop.permute.xlu0 %430 }
 0x3d4   :  { %2685 = vmatmul.msk.f32.vlgmr.msrb.gmra.mxu3 %vm244_vm12, %v427_v60 }
 0x3db   :  { %v673_v63 = vpop.permute.xlu0 %672 }
 0x3dc   :  { %2686 = vmatmul.msk.f32.gmra.mxu3 %vm244_vm12, %v429_v27 }
 0x3e4   :  { %2687 = vmatmul.msk.f32.gmra.mxu3 %vm244_vm12, %v431_v62 }
 0x3ec   :  { %2703 = vmatmul.msk.f32.vlgmr.msra.gmra.mxu3 %vm244_vm12, %v673_v63 }
 0x3f4   :  { %2704 = vmatmul.msk.f32.gmra.mxu3 %vm244_vm12, %v675_v0 }
 0x3fc   :  { %2705 = vmatmul.msk.f32.gmra.mxu3 %vm244_vm12, %v677_v1 }
 0x43f   :  { %v415_v3 = vpop.f32.mrf.mxu3 }
 0x440   :  { %2697 = vmatmul.msk.f32.vlgmr.msrb.gmra.mxu2 %vm244_vm12, %v415_v3 }
 0x447   :  { %v418_v4 = vpop.f32.mrf.mxu3 }
 0x448   :  { %2698 = vmatmul.msk.f32.gmra.mxu2 %vm244_vm12, %v418_v4 }
 0x44f   :  { %v421_v5 = vpop.f32.mrf.mxu3 }
 0x450   :  { %2699 = vmatmul.msk.f32.gmra.mxu2 %vm244_vm12, %v421_v5 }
 0x457   :  { %v467_v6 = vpop.f32.mrf.mxu3 }
 0x458   :  { %v476_v7 = vmul.f32 0.25, %v467_v6 }
 0x45a   :  { %v479_v8 = vsel %vm304_vm14, %v476_v7, -inf }
 0x45b   :  { %480 = vmax.xlane.f32.xlu0 %v479_v8 }
 0x45f   :  { %v470_v9 = vpop.f32.mrf.mxu3 }
 0x460   :  { %v477_v10 = vmul.f32 0.25, %v470_v9 }
 0x462   :  { %v482_v11 = vsel %vm304_vm14, %v477_v10, -inf }
 0x463   :  { %483 = vmax.xlane.f32.xlu1 %v482_v11 }
 0x467   :  { %v473_v13 = vpop.f32.mrf.mxu3 }
 0x468   :  { %v478_v14 = vmul.f32 0.25, %v473_v13 }
 0x46a   :  { %v485_v15 = vsel %vm311_vm15, %v478_v14, -inf }
 0x46b   :  { %486 = vmax.xlane.f32.xlu2 %v485_v15 }
 0x46f   :  { %v713_v16 = vpop.f32.mrf.mxu3 }
 0x470   :  { %v722_v17 = vmul.f32 0.25, %v713_v16 }
 0x472   :  { %v725_v18 = vsel %vm304_vm14, %v722_v17, -inf }
 0x473   :  { %726 = vmax.xlane.f32.xlu0 %v725_v18 }
 0x477   :  { %v716_v19 = vpop.f32.mrf.mxu3 }
 0x478   :  { %v723_v20 = vmul.f32 0.25, %v716_v19 }
 0x47a   :  { %v728_v21 = vsel %vm304_vm14, %v723_v20, -inf }
 0x47b   :  { %729 = vmax.xlane.f32.xlu1 %v728_v21 }
 0x47f   :  { %v719_v22 = vpop.f32.mrf.mxu3 }
 0x480   :  { %v724_v24 = vmul.f32 0.25, %v719_v22 }
 0x482   :  { %v731_v25 = vsel %vm311_vm15, %v724_v24, -inf }
 0x483   :  { %732 = vmax.xlane.f32.xlu2 %v731_v25 }
 0x49b   :  { %555 = vrot.lane.b32.xlu2 %v3243_v39, %s4344_s28 }
 0x4ce   :  { %v481_v23 = vpop.xlane.xlu0 %480 }
 0x4cf   :  { %v488_v26 = vsub.f32 %v476_v7, %v481_v23 }
 0x4d1   :  { %v491_v27 = vmul.f32 1.442695, %v488_v26 }
 0x4d3   :  { %2868 = vpow2.f32 %v491_v27 }
 0x4d6   :  { %v484_v29 = vpop.xlane.xlu1 %483 }
 0x4d7   :  { %v489_v31 = vsub.f32 %v477_v10, %v484_v29 }
 0x4d9   :  { %v3329_v33 = vpop.eup %2868  ;;  %v493_v35 = vmul.f32 1.442695, %v489_v31 }
 0x4da   :  { %v497_v37 = vsel %vm304_vm14, %v3329_v33, 0.0 }
 0x4db   :  { %2870 = vpow2.f32 %v493_v35  ;;  %498 = vadd.xlane.f32.xlu0 %v497_v37  ;;  %v671_v37 = vld [vmem:[#allocation2 + $0x28] sm:$0x1] }
 0x4de   :  { %v487_v40 = vpop.xlane.xlu2 %486 }
 0x4df   :  { %v490_v41 = vsub.f32 %v478_v14, %v487_v40 }
 0x4e1   :  { %v3333_v42 = vpop.eup %2870  ;;  %v495_v43 = vmul.f32 1.442695, %v490_v41  ;;  %v3379_v41 = vld [vmem:[%s4352_s20 + $0x18] sm:$0xff] }
 0x4e2   :  { %v500_v39 = vsel %vm304_vm14, %v3333_v42, 0.0 }
 0x4e3   :  { %2872 = vpow2.f32 %v495_v43  ;;  %501 = vadd.xlane.f32.xlu1 %v500_v39  ;;  %v1370_v43 = vsel %vm77_vm0, %v3379_v41, 0.0  ;;  %v670_v39 = vld [vmem:[#allocation2 + $0x18] sm:$0xff] }
 0x4e6   :  { %v727_v44 = vpop.xlane.xlu0 %726 }
 0x4e7   :  { %v734_v45 = vsub.f32 %v722_v17, %v727_v44 }
 0x4e9   :  { %v3337_v46 = vpop.eup %2872  ;;  %v737_v47 = vmul.f32 1.442695, %v734_v45 }
 0x4ea   :  { %v503_v48 = vsel %vm311_vm15, %v3337_v46, 0.0 }
 0x4eb   :  { %2874 = vpow2.f32 %v737_v47  ;;  %504 = vadd.xlane.f32.xlu0 %v503_v48  ;;  %v669_v48 = vld [vmem:[#allocation2 + $0x8] sm:$0xff] }
 0x4ee   :  { %v730_v49 = vpop.xlane.xlu1 %729 }
 0x4ef   :  { %v735_v50 = vsub.f32 %v723_v20, %v730_v49 }
 0x4f1   :  { %v3341_v51 = vpop.eup %2874  ;;  %v739_v53 = vmul.f32 1.442695, %v735_v50 }
 0x4f2   :  { %v743_v54 = vsel %vm304_vm14, %v3341_v51, 0.0 }
 0x4f3   :  { %2876 = vpow2.f32 %v739_v53  ;;  %744 = vadd.xlane.f32.xlu0 %v743_v54 }
 0x4f6   :  { %v733_v55 = vpop.xlane.xlu2 %732 }
 0x4f7   :  { %v736_v56 = vsub.f32 %v724_v24, %v733_v55 }
 0x4f9   :  { %v3345_v57 = vpop.eup %2876  ;;  %v741_v58 = vmul.f32 1.442695, %v736_v56 }
 0x4fa   :  { %v746_v59 = vsel %vm304_vm14, %v3345_v57, 0.0 }
 0x4fb   :  { %2878 = vpow2.f32 %v741_v58  ;;  %747 = vadd.xlane.f32.xlu0 %v746_v59 }
 0x4fc   :  { %2817 = vrot.lane.b32.xlu1 %v3261_v52, %s4344_s28 }
 0x4fe   :  { %v556_v60 = vpop.permute.xlu2 %555 }
 0x4ff   :  { %2688 = vmatpush.msk.msrb.mxu0 %vm395_vm2, %v556_v60  ;;  %v3400_v60 = vld [vmem:[%s4352_s20 + $0x28] sm:$0x1] }
 0x501   :  { %v3352_v61 = vpop.eup %2878 }
 0x502   :  { %v749_v62 = vsel %vm311_vm15, %v3352_v61, 0.0 }
 0x503   :  { %750 = vadd.xlane.f32.xlu2 %v749_v62  ;;  %1371 = vadd.xlane.f32.xlu0 %v1370_v43 }
 0x54e   :  { %v499_v63 = vpop.xlane.xlu0 %498 }
 0x54f   :  { %2880 = vrcp.f32 %v499_v63  ;;  %v517_v11 = vand.u32 2147483648, %v499_v63  ;;  %vm511_vm7 = vweird.f32 %v499_v63  ;;  %v515_v13 = vand.u32 2147483647, %v499_v63 }
 0x551   :  { %v518_v17 = vor.u32 1.1754944e-38, %v517_v11  ;;  %vm516_vm9 = vcmp.eq.f32.partialorder %v515_v13, 8.507059e+37 }
 0x555   :  { %v2881_v1 = vpop.eup %2880 }
 0x556   :  { %v502_v0 = vpop.xlane.xlu1 %501  ;;  %v507_v2 = vmul.f32 %v2881_v1, %v499_v63  ;;  %vm512_vm6 = vweird.f32 %v2881_v1  ;;  %v1376_v63 = vsel %vm84_vm1, %v3400_v60, 0.0 }
 0x557   :  { %2882 = vrcp.f32 %v502_v0  ;;  %vm513_vm8 = vmor %vm511_vm7, %vm512_vm6  ;;  %v532_v23 = vand.u32 2147483648, %v502_v0  ;;  %vm526_vm11 = vweird.f32 %v502_v0  ;;  %v530_v29 = vand.u32 2147483647, %v502_v0  ;;  %1377 = vadd.xlane.f32.xlu0 %v1376_v63 }
 0x558   :  { %v508_v4 = vsub.f32 1.0, %v507_v2 }
 0x559   :  { %vm531_vm4 = vcmp.eq.f32.partialorder %v530_v29, 8.507059e+37  ;;  %v2710_v29 = vld [vmem:[%s4323_s5 + $0x20] sm:$0xff] }
 0x55a   :  { %v509_v52 = vmul.f32 %v2881_v1, %v508_v4 }
 0x55c   :  { %v510_v8 = vadd.f32 %v2881_v1, %v509_v52 }
 0x55d   :  { %v2883_v5 = vpop.eup %2882 }
 0x55e   :  { %v3356_v3 = vpop.xlane.xlu0 %504  ;;  %v522_v6 = vmul.f32 %v2883_v5, %v502_v0  ;;  %v514_v16 = vsel %vm513_vm8, %v2881_v1, %v510_v8  ;;  %vm527_vm10 = vweird.f32 %v2883_v5 }
 0x55f   :  { %2884 = vrcp.f32 %v3356_v3  ;;  %v519_v20 = vsel %vm516_vm9, %v518_v17, %v514_v16  ;;  %vm528_vm3 = vmor %vm526_vm11, %vm527_vm10  ;;  %v547_v53 = vand.u32 2147483648, %v3356_v3  ;;  %vm541_vm6 = vweird.f32 %v3356_v3 }
 0x560   :  { %v523_v9 = vsub.f32 1.0, %v522_v6  ;;  %v520_v27 = vmul.f32 %v3329_v33, %v519_v20  ;;  %v533_v33 = vor.u32 1.1754944e-38, %v532_v23  ;;  %v545_v55 = vand.u32 2147483647, %v3356_v3 }
 0x561   :  { %v548_v62 = vor.u32 1.1754944e-38, %v547_v53 }
 0x562   :  { %v524_v14 = vmul.f32 %v2883_v5, %v523_v9  ;;  %vm546_vm8 = vcmp.eq.f32.partialorder %v545_v55, 8.507059e+37 }
 0x564   :  { %v525_v24 = vadd.f32 %v2883_v5, %v524_v14 }
 0x565   :  { %v3361_v10 = vpop.eup %2884 }
 0x566   :  { %v3359_v7 = vpop.xlane.xlu0 %744  ;;  %v537_v15 = vmul.f32 %v3361_v10, %v3356_v3  ;;  %v529_v40 = vsel %vm528_vm3, %v2883_v5, %v525_v24  ;;  %vm542_vm5 = vweird.f32 %v3361_v10 }
 0x567   :  { %2886 = vrcp.f32 %v3359_v7  ;;  %v534_v44 = vsel %vm531_vm4, %v533_v33, %v529_v40  ;;  %vm543_vm7 = vmor %vm541_vm6, %vm542_vm5  ;;  %v763_v4 = vand.u32 2147483648, %v3359_v7  ;;  %vm757_vm10 = vweird.f32 %v3359_v7 }
 0x568   :  { %v538_v21 = vsub.f32 1.0, %v537_v15  ;;  %v535_v54 = vmul.f32 %v3333_v42, %v534_v44  ;;  %v2693_v42 = vld [vmem:[%s4323_s5 + $0x18] sm:$0xff]  ;;  %v761_v5 = vand.u32 2147483647, %v3359_v7 }
 0x569   :  { %622 = vmatpush.msrb.mxu1 %v2693_v42 }
 0x56a   :  { %v539_v31 = vmul.f32 %v3361_v10, %v538_v21  ;;  %vm762_vm3 = vcmp.eq.f32.partialorder %v761_v5, 8.507059e+37 }
 0x56c   :  { %v540_v49 = vadd.f32 %v3361_v10, %v539_v31 }
 0x56d   :  { %v3368_v25 = vpop.eup %2886 }
 0x56e   :  { %v2818_v18 = vpop.permute.xlu1 %2817  ;;  %v3366_v22 = vpop.xlane.xlu0 %747  ;;  %v753_v35 = vmul.f32 %v3368_v25, %v3359_v7  ;;  %v544_v59 = vsel %vm543_vm7, %v3361_v10, %v540_v49  ;;  %vm758_vm9 = vweird.f32 %v3368_v25  ;;  %v764_v10 = vor.u32 1.1754944e-38, %v763_v4 }
 0x56f   :  { %v2819_v19 = vunpack.i.l.bf16 %v2818_v18  ;;  %v2820_v26 = vunpack.i.h.bf16 %v2818_v18  ;;  %2888 = vrcp.f32 %v3366_v22  ;;  %v549_v0 = vsel %vm546_vm8, %v548_v62, %v544_v59  ;;  %vm759_vm11 = vmor %vm757_vm10, %vm758_vm9  ;;  %v3470_v62 = vld [vmem:[%s4354_s23] ss:$0 sm:$0xff]  ;;  %v660_v4 = vpop.f32.mrf.mxu2 }
 0x570   :  { %v754_v45 = vsub.f32 1.0, %v753_v35  ;;  %v550_v52 = vmul.f32 %v3337_v46, %v549_v0  ;;  %v778_v15 = vand.u32 2147483648, %v3366_v22  ;;  %vm772_vm5 = vweird.f32 %v3366_v22 }
 0x571   :  { %584 = vmatpush.msrb.mxu0 %v2819_v19  ;;  %v776_v7 = vand.u32 2147483647, %v3366_v22 }
 0x572   :  { %v755_v56 = vmul.f32 %v3368_v25, %v754_v45  ;;  %v779_v18 = vor.u32 1.1754944e-38, %v778_v15 }
 0x573   :  { %585 = vmatpush.msrb.mxu0 %v2820_v26  ;;  %vm777_vm7 = vcmp.eq.f32.partialorder %v776_v7, 8.507059e+37 }
 0x574   :  { %2689 = vmatmul.msk.f32.vlgmr.msrb.gmra.mxu0 %vm304_vm14, %v520_v27  ;;  %v756_v1 = vadd.f32 %v3368_v25, %v755_v56  ;;  %v2692_v27 = vld [vmem:[%s4323_s5 + $0x10] sm:$0xff] }
 0x575   :  { %2706 = vmatpush.msk.msra.mxu0 %vm395_vm2, %v671_v37  ;;  %v2889_v50 = vpop.eup %2888  ;;  %623 = vmatpush.msrb.mxu1 %v2692_v27 }
 0x576   :  { %v3384_v47 = vpop.xlane.xlu2 %750  ;;  %v768_v58 = vmul.f32 %v2889_v50, %v3366_v22  ;;  %v760_v6 = vsel %vm759_vm11, %v3368_v25, %v756_v1  ;;  %vm773_vm4 = vweird.f32 %v2889_v50  ;;  %v1372_v31 = vpop.xlane.xlu0 %1371 }
 0x577   :  { %823 = vmatpush.msra.mxu0 %v670_v39  ;;  %2890 = vrcp.f32 %v3384_v47  ;;  %v765_v11 = vsel %vm762_vm3, %v764_v10, %v760_v6  ;;  %vm774_vm6 = vmor %vm772_vm5, %vm773_vm4  ;;  %v793_v21 = vand.u32 2147483648, %v3384_v47  ;;  %vm787_vm9 = vweird.f32 %v3384_v47  ;;  %v2984_v10 = vld [vmem:[%s4352_s20] sm:$0xff] }
 0x578   :  { %v769_v2 = vsub.f32 1.0, %v768_v58  ;;  %v766_v46 = vmul.f32 %v3341_v51, %v765_v11  ;;  %v791_v51 = vand.u32 2147483647, %v3384_v47 }
 0x579   :  { %824 = vmatpush.msra.mxu0 %v669_v48  ;;  %v794_v25 = vor.u32 1.1754944e-38, %v793_v21 }
 0x57a   :  { %v770_v8 = vmul.f32 %v2889_v50, %v769_v2  ;;  %vm792_vm11 = vcmp.eq.f32.partialorder %v791_v51, 8.507059e+37 }
 0x57c   :  { %2690 = vmatmul.msk.f32.gmra.mxu0 %vm304_vm14, %v535_v54  ;;  %v771_v14 = vadd.f32 %v2889_v50, %v770_v8 }
 0x57d   :  { %v2891_v3 = vpop.eup %2890 }
 0x57e   :  { %v783_v9 = vmul.f32 %v2891_v3, %v3384_v47  ;;  %v775_v17 = vsel %vm774_vm6, %v2889_v50, %v771_v14  ;;  %vm788_vm8 = vweird.f32 %v2891_v3 }
 0x57f   :  { %v780_v19 = vsel %vm777_vm7, %v779_v18, %v775_v17  ;;  %vm789_vm10 = vmor %vm787_vm9, %vm788_vm8  ;;  %v2985_v17 = vld [vmem:[%s4352_s20 + $0x8] sm:$0xff] }
 0x580   :  { %v784_v13 = vsub.f32 1.0, %v783_v9  ;;  %v781_v24 = vmul.f32 %v3345_v57, %v780_v19  ;;  %v2711_v57 = vld [vmem:[%s4323_s5 + $0x28] sm:$0xff]  ;;  %v2833_v9 = vld [vmem:[%s4324_s6] ss:$0 sm:$0xff] }
 0x581   :  { %861 = vmatpush.msra.mxu1 %v2711_v57 }
 0x582   :  { %v785_v16 = vmul.f32 %v2891_v3, %v784_v13  ;;  %v663_v13 = vpop.f32.mrf.mxu2 }
 0x583   :  { %862 = vmatpush.msra.mxu1 %v2710_v29 }
 0x584   :  { %2691 = vmatmul.msk.f32.gmra.mxu0 %vm304_vm14, %v550_v52  ;;  %v786_v20 = vadd.f32 %v2891_v3, %v785_v16 }
 0x586   :  { %v790_v22 = vsel %vm789_vm10, %v2891_v3, %v786_v20  ;;  %v3476_v3 = vld [vmem:[%s4355_s26] ss:$0 sm:$0xff] }
 0x587   :  { %v795_v23 = vsel %vm792_vm11, %v794_v25, %v790_v22 }
 0x588   :  { %v796_v26 = vmul.f32 %v3352_v61, %v795_v23  ;;  %v1379_v61 = vmul.f32 %v1372_v31, %v3140_v12 }
 0x58a   :  { %v1382_v35 = vsub.f32 %v3379_v41, %v1379_v61  ;;  %v3449_v41 = vld [vmem:[%s4352_s20 + $0x20] sm:$0xff]  ;;  %v666_v20 = vpop.f32.mrf.mxu2 }
 0x58c   :  { %2707 = vmatmul.msk.f32.vlgmr.msra.gmra.mxu0 %vm304_vm14, %v766_v46  ;;  %v1385_v37 = vmul.f32 %v1382_v35, %v1382_v35 }
 0x58e   :  { %v1388_v33 = vsel %vm77_vm0, %v1385_v37, 0.0  ;;  %v3513_v37 = vld [vmem:[%s4322_s4] sm:$0x3] }
 0x58f   :  { %1389 = vadd.xlane.f32.xlu2 %v1388_v33 }
 0x594   :  { %2708 = vmatmul.msk.f32.gmra.mxu0 %vm304_vm14, %v781_v24 }
 0x59c   :  { %2709 = vmatmul.msk.f32.gmra.mxu0 %vm304_vm14, %v796_v26  ;;  %v2986_v26 = vld [vmem:[%s4352_s20 + $0x10] sm:$0x1] }
 0x5ca   :  { %v1378_v39 = vpop.xlane.xlu0 %1377 }
 0x5cb   :  { %v1381_v44 = vmul.f32 %v1378_v39, %v3140_v12 }
 0x5f1   :  { %v587_v40 = vpop.f32.mrf.mxu0 }
 0x5f2   :  { %2694 = vmatmul.msk.f32.vlgmr.msrb.gmra.mxu1 %vm244_vm12, %v587_v40  ;;  %v3516_v40 = vperm.slane %v3513_v37, 0 }
 0x5f3   :  { %1485 = vmatpush.msrb.mxu1 %v3163_v28  ;;  %v1373_v28 = vsel %vm77_vm0, %v3449_v41, 0.0 }
 0x5f4   :  { %1374 = vadd.xlane.f32.xlu1 %v1373_v28 }
 0x5f5   :  { %1486 = vmatpush.msrb.mxu1 %v3172_v30  ;;  %v3456_v30 = vsub.f32 %v3400_v60, %v1381_v44 }
 0x5f7   :  { %1487 = vmatpush.msrb.mxu1 %v3181_v32  ;;  %v1387_v32 = vmul.f32 %v3456_v30, %v3456_v30 }
 0x5f9   :  { %v590_v43 = vpop.f32.mrf.mxu0  ;;  %1488 = vmatpush.msrb.mxu1 %v3190_v34  ;;  %v1394_v45 = vsel %vm84_vm1, %v1387_v32, 0.0 }
 0x5fa   :  { %2695 = vmatmul.msk.f32.gmra.mxu1 %vm244_vm12, %v590_v43  ;;  %1395 = vadd.xlane.f32.xlu2 %v1394_v45 }
 0x5fb   :  { %1489 = vmatpush.msrb.mxu1 %v3199_v36 }
 0x5fd   :  { %1490 = vmatpush.msrb.mxu1 %v3208_v38 }
 0x601   :  { %v593_v34 = vpop.f32.mrf.mxu0 }
 0x602   :  { %2696 = vmatmul.msk.f32.gmra.mxu1 %vm244_vm12, %v593_v34  ;;  %v1390_v49 = vpop.xlane.xlu2 %1389 }
 0x603   :  { %v1397_v38 = vmul.f32 %v1390_v49, %v3140_v12 }
 0x605   :  { %v1400_v50 = vadd.f32 1e-12, %v1397_v38 }
 0x607   :  { %2892 = vrsqrt.f32 %v1400_v50  ;;  %vm1409_vm3 = vweird.f32 %v1400_v50 }
 0x609   :  { %v826_v47 = vpop.f32.mrf.mxu0 }
 0x60a   :  { %2712 = vmatmul.msk.f32.vlgmr.msra.gmra.mxu1 %vm244_vm12, %v826_v47 }
 0x60d   :  { %v2893_v54 = vpop.eup %2892 }
 0x60e   :  { %v1404_v55 = vmul.f32 %v2893_v54, %v1400_v50  ;;  %vm1410_vm4 = vweird.f32 %v2893_v54 }
 0x60f   :  { %vm1411_vm5 = vmor %vm1409_vm3, %vm1410_vm4 }
 0x610   :  { %v1405_v56 = vmul.f32 %v2893_v54, %v1404_v55 }
 0x611   :  { %v829_v48 = vpop.f32.mrf.mxu0 }
 0x612   :  { %2713 = vmatmul.msk.f32.gmra.mxu1 %vm244_vm12, %v829_v48  ;;  %v1406_v58 = vmul.f32 0.5, %v1405_v56 }
 0x614   :  { %v1407_v60 = vsub.f32 1.5, %v1406_v58 }
 0x616   :  { %v1408_v42 = vmul.f32 %v2893_v54, %v1407_v60 }
 0x618   :  { %v1412_v63 = vsel %vm1411_vm5, %v2893_v54, %v1408_v42 }
 0x619   :  { %v832_v36 = vpop.f32.mrf.mxu0  ;;  %v1433_v0 = vmul.f32 %v1412_v63, %v1382_v35 }
 0x61a   :  { %2714 = vmatmul.msk.f32.gmra.mxu1 %vm244_vm12, %v832_v36 }
 0x61b   :  { %v1439_v2 = vmul.f32 %v3470_v62, %v1433_v0 }
 0x61d   :  { %v3479_v5 = vadd.f32 %v3476_v3, %v1439_v2 }
 0x622   :  { %2727 = vmatmul.msk.f32.vlgmr.msrb.gmra.mxu1 %vm77_vm0, %v3479_v5 }
 0x667   :  { %v1375_v21 = vpop.xlane.xlu1 %1374 }
 0x668   :  { %v1380_v23 = vmul.f32 %v1375_v21, %v3140_v12 }
 0x66a   :  { %v1383_v29 = vsub.f32 %v3449_v41, %v1380_v23 }
 0x66c   :  { %v1386_v61 = vmul.f32 %v1383_v29, %v1383_v29 }
 0x66d   :  { %v1396_v34 = vpop.xlane.xlu2 %1395 }
 0x66e   :  { %v1391_v35 = vsel %vm77_vm0, %v1386_v61, 0.0  ;;  %v1399_v48 = vmul.f32 %v1396_v34, %v3140_v12  ;;  %v1451_v34 = vld [vmem:[%s4353_s25 + $0x18] sm:$0xff] }
 0x66f   :  { %v625_v53 = vpop.f32.mrf.mxu1 }
 0x670   :  { %v661_v52 = vadd.f32 %v660_v4, %v625_v53  ;;  %v1402_v38 = vadd.f32 1e-12, %v1399_v48 }
 0x672   :  { %2894 = vrsqrt.f32 %v1402_v38  ;;  %vm1429_vm6 = vweird.f32 %v1402_v38 }
 0x677   :  { %v628_v59 = vpop.f32.mrf.mxu1 }
 0x678   :  { %v664_v15 = vadd.f32 %v663_v13, %v628_v59  ;;  %v2895_v60 = vpop.eup %2894 }
 0x679   :  { %v1424_v0 = vmul.f32 %v2895_v60, %v1402_v38  ;;  %vm1430_vm7 = vweird.f32 %v2895_v60 }
 0x67a   :  { %vm1431_vm9 = vmor %vm1429_vm6, %vm1430_vm7 }
 0x67f   :  { %v631_v1 = vpop.f32.mrf.mxu1 }
 0x680   :  { %v667_v24 = vadd.f32 %v666_v20, %v631_v1  ;;  %v1425_v1 = vmul.f32 %v2895_v60, %v1424_v0 }
 0x682   :  { %v1426_v4 = vmul.f32 0.5, %v1425_v1 }
 0x687   :  { %v864_v6 = vpop.f32.mrf.mxu1 }
 0x688   :  { %v873_v8 = vadd.f32 %v864_v6, %v661_v52 }
 0x68a   :  { %v876_v11 = vadd.f32 %v2984_v10, %v873_v8  ;;  %v1427_v8 = vsub.f32 1.5, %v1426_v4 }
 0x68c   :  { %v3489_v14 = vadd.f32 %v2833_v9, %v876_v11  ;;  %v1428_v11 = vmul.f32 %v2895_v60, %v1427_v8 }
 0x68e   :  { %v888_v46 = vsel %vm77_vm0, %v3489_v14, 0.0 }
 0x68f   :  { %889 = vadd.xlane.f32.xlu0 %v888_v46  ;;  %v867_v7 = vpop.f32.mrf.mxu1 }
 0x690   :  { %v874_v16 = vadd.f32 %v867_v7, %v664_v15  ;;  %v1432_v7 = vsel %vm1431_vm9, %v2895_v60, %v1428_v11 }
 0x692   :  { %v877_v18 = vadd.f32 %v2985_v17, %v874_v16 }
 0x694   :  { %v3496_v19 = vadd.f32 %v2833_v9, %v877_v18  ;;  %v1435_v18 = vmul.f32 %v1432_v7, %v3456_v30  ;;  %v970_v30 = vld [vmem:[%s4327_s9 + $0x20] sm:$0xff] }
 0x696   :  { %v891_v51 = vsel %vm77_vm0, %v3496_v19, 0.0  ;;  %v1441_v20 = vmul.f32 %v3470_v62, %v1435_v18 }
 0x697   :  { %892 = vadd.xlane.f32.xlu0 %v891_v51  ;;  %v870_v22 = vpop.f32.mrf.mxu1  ;;  %v967_v51 = vld [vmem:[%s4327_s9 + $0x8] sm:$0xff] }
 0x698   :  { %v875_v25 = vadd.f32 %v870_v22, %v667_v24  ;;  %v3555_v21 = vadd.f32 %v3476_v3, %v1441_v20  ;;  %v971_v24 = vld [vmem:[%s4327_s9 + $0x28] sm:$0xff]  ;;  %v966_v22 = vld [vmem:[%s4327_s9] sm:$0xff] }
 0x699   :  { %995 = vmatpush.msra.mxu2 %v971_v24 }
 0x69a   :  { %v878_v27 = vadd.f32 %v2986_v26, %v875_v25 }
 0x69b   :  { %996 = vmatpush.msra.mxu2 %v970_v30 }
 0x69c   :  { %v3504_v57 = vadd.f32 %v2833_v9, %v878_v27 }
 0x69e   :  { %v894_v31 = vsel %vm84_vm1, %v3504_v57, 0.0 }
 0x69f   :  { %895 = vadd.xlane.f32.xlu0 %v894_v31  ;;  %v1492_v33 = vpop.f32.mrf.mxu1  ;;  %v1457_v31 = vld [vmem:[%s4353_s25 + $0x48] sm:$0xff] }
 0x6a0   :  { %v3519_v43 = vadd.f32 %v1492_v33, %v3516_v40 }
 0x6a7   :  { %1392 = vadd.xlane.f32.xlu0 %v1391_v35 }
 0x702   :  { %v890_v39 = vpop.xlane.xlu0 %889 }
 0x703   :  { %v897_v41 = vmul.f32 %v890_v39, %v3140_v12 }
 0x705   :  { %v3523_v44 = vsub.f32 %v3489_v14, %v897_v41  ;;  %v1455_v41 = vld [vmem:[%s4353_s25 + $0x38] sm:$0xff] }
 0x707   :  { %v903_v28 = vmul.f32 %v3523_v44, %v3523_v44 }
 0x709   :  { %v906_v32 = vsel %vm77_vm0, %v903_v28, 0.0  ;;  %v1453_v28 = vld [vmem:[%s4353_s25 + $0x28] sm:$0xff] }
 0x70a   :  { %907 = vadd.xlane.f32.xlu1 %v906_v32  ;;  %v893_v45 = vpop.xlane.xlu0 %892 }
 0x70b   :  { %v898_v47 = vmul.f32 %v893_v45, %v3140_v12 }
 0x70d   :  { %v3531_v36 = vsub.f32 %v3496_v19, %v898_v47 }
 0x70f   :  { %v904_v49 = vmul.f32 %v3531_v36, %v3531_v36 }
 0x711   :  { %v909_v50 = vsel %vm77_vm0, %v904_v49, 0.0  ;;  %v1449_v49 = vld [vmem:[%s4353_s25 + $0x8] sm:$0xff] }
 0x712   :  { %910 = vadd.xlane.f32.xlu0 %v909_v50  ;;  %v896_v53 = vpop.xlane.xlu0 %895 }
 0x713   :  { %v899_v54 = vmul.f32 %v896_v53, %v3140_v12 }
 0x715   :  { %v3538_v55 = vsub.f32 %v3504_v57, %v899_v54 }
 0x717   :  { %v905_v56 = vmul.f32 %v3538_v55, %v3538_v55 }
 0x719   :  { %v912_v58 = vsel %vm84_vm1, %v905_v56, 0.0 }
 0x71a   :  { %913 = vadd.xlane.f32.xlu1 %v912_v58  ;;  %v1393_v59 = vpop.xlane.xlu0 %1392  ;;  %v2836_v58 = vld [vmem:[%s4325_s7] ss:$0 sm:$0xff] }
 0x71b   :  { %v1398_v42 = vmul.f32 %v1393_v59, %v3140_v12 }
 0x71d   :  { %v1401_v63 = vadd.f32 1e-12, %v1398_v42 }
 0x71f   :  { %2896 = vrsqrt.f32 %v1401_v63  ;;  %vm1419_vm10 = vweird.f32 %v1401_v63 }
 0x725   :  { %v2897_v2 = vpop.eup %2896 }
 0x726   :  { %v1414_v52 = vmul.f32 %v2897_v2, %v1401_v63  ;;  %vm1420_vm8 = vweird.f32 %v2897_v2  ;;  %v2837_v63 = vld [vmem:[%s4326_s8] ss:$0 sm:$0xff] }
 0x727   :  { %vm1421_vm11 = vmor %vm1419_vm10, %vm1420_vm8 }
 0x728   :  { %v1415_v6 = vmul.f32 %v2897_v2, %v1414_v52 }
 0x72a   :  { %v1416_v9 = vmul.f32 0.5, %v1415_v6 }
 0x72c   :  { %v1417_v10 = vsub.f32 1.5, %v1416_v9 }
 0x72e   :  { %v1418_v13 = vmul.f32 %v2897_v2, %v1417_v10 }
 0x730   :  { %v1422_v15 = vsel %vm1421_vm11, %v2897_v2, %v1418_v13 }
 0x731   :  { %v1434_v46 = vmul.f32 %v1422_v15, %v1383_v29  ;;  %v1459_v29 = vld [vmem:[%s4353_s25 + $0x58] sm:$0xff] }
 0x733   :  { %1711 = vrot.lane.b32.xlu1 %v3519_v43, %s3020_s0  ;;  %v1440_v16 = vmul.f32 %v3470_v62, %v1434_v46  ;;  %v969_v62 = vld [vmem:[%s4327_s9 + $0x18] sm:$0xff] }
 0x734   :  { %997 = vmatpush.msra.mxu2 %v969_v62 }
 0x735   :  { %v3548_v17 = vadd.f32 %v3476_v3, %v1440_v16  ;;  %v968_v3 = vld [vmem:[%s4327_s9 + $0x10] sm:$0xff] }
 0x736   :  { %998 = vmatpush.msra.mxu2 %v968_v3  ;;  %v1139_v3 = vld [vmem:[%s4329_s11 + $0x40] sm:$0xff] }
 0x737   :  { %2728 = vmatmul.msk.f32.gmra.mxu1 %vm77_vm0, %v3548_v17 }
 0x738   :  { %999 = vmatpush.msra.mxu2 %v967_v51  ;;  %v1138_v51 = vld [vmem:[%s4329_s11 + $0x38] sm:$0xff] }
 0x73a   :  { %1000 = vmatpush.msra.mxu2 %v966_v22  ;;  %v1137_v22 = vld [vmem:[%s4329_s11 + $0x30] sm:$0xff] }
 0x73c   :  { %1511 = vmatpush.msrb.mxu2 %v1459_v29  ;;  %v1132_v29 = vld [vmem:[%s4329_s11 + $0x8] sm:$0xff] }
 0x73e   :  { %1512 = vmatpush.msrb.mxu2 %v1457_v31  ;;  %v1131_v31 = vld [vmem:[%s4329_s11] sm:$0xff] }
 0x73f   :  { %2729 = vmatmul.msk.f32.gmra.mxu1 %vm77_vm0, %v3555_v21 }
 0x740   :  { %1513 = vmatpush.msrb.mxu2 %v1455_v41 }
 0x742   :  { %1514 = vmatpush.msrb.mxu2 %v1453_v28 }
 0x744   :  { %1515 = vmatpush.msrb.mxu2 %v1451_v34 }
 0x746   :  { %1516 = vmatpush.msrb.mxu2 %v1449_v49 }
 0x77d   :  { %v908_v25 = vpop.xlane.xlu1 %907 }
 0x77e   :  { %v915_v23 = vmul.f32 %v908_v25, %v3140_v12  ;;  %v1136_v25 = vld [vmem:[%s4329_s11 + $0x28] sm:$0xff] }
 0x780   :  { %v918_v26 = vadd.f32 1e-12, %v915_v23  ;;  %v1135_v23 = vld [vmem:[%s4329_s11 + $0x20] sm:$0xff] }
 0x782   :  { %2898 = vrsqrt.f32 %v918_v26  ;;  %vm927_vm4 = vweird.f32 %v918_v26 }
 0x785   :  { %v911_v27 = vpop.xlane.xlu0 %910 }
 0x786   :  { %v916_v61 = vmul.f32 %v911_v27, %v3140_v12  ;;  %v1133_v27 = vld [vmem:[%s4329_s11 + $0x10] sm:$0xff] }
 0x788   :  { %v2899_v35 = vpop.eup %2898  ;;  %v919_v33 = vadd.f32 1e-12, %v916_v61  ;;  %v2838_v61 = vld [vmem:[%s4328_s10] ss:$0 sm:$0xff] }
 0x789   :  { %v922_v39 = vmul.f32 %v2899_v35, %v918_v26  ;;  %vm928_vm3 = vweird.f32 %v2899_v35  ;;  %v1134_v26 = vld [vmem:[%s4329_s11 + $0x18] sm:$0xff] }
 0x78a   :  { %2900 = vrsqrt.f32 %v919_v33  ;;  %vm929_vm5 = vmor %vm927_vm4, %vm928_vm3  ;;  %vm937_vm7 = vweird.f32 %v919_v33 }
 0x78b   :  { %v923_v32 = vmul.f32 %v2899_v35, %v922_v39 }
 0x78d   :  { %v924_v45 = vmul.f32 0.5, %v923_v32  ;;  %v914_v47 = vpop.xlane.xlu1 %913 }
 0x78e   :  { %v917_v48 = vmul.f32 %v914_v47, %v3140_v12 }
 0x78f   :  { %v925_v38 = vsub.f32 1.5, %v924_v45 }
 0x790   :  { %v2901_v50 = vpop.eup %2900  ;;  %v920_v53 = vadd.f32 1e-12, %v917_v48 }
 0x791   :  { %v926_v54 = vmul.f32 %v2899_v35, %v925_v38  ;;  %v932_v56 = vmul.f32 %v2901_v50, %v919_v33  ;;  %vm938_vm6 = vweird.f32 %v2901_v50 }
 0x792   :  { %2902 = vrsqrt.f32 %v920_v53  ;;  %vm939_vm8 = vmor %vm937_vm7, %vm938_vm6  ;;  %vm947_vm10 = vweird.f32 %v920_v53 }
 0x793   :  { %v930_v59 = vsel %vm929_vm5, %v2899_v35, %v926_v54  ;;  %v933_v60 = vmul.f32 %v2901_v50, %v932_v56 }
 0x794   :  { %v951_v42 = vmul.f32 %v930_v59, %v3523_v44 }
 0x795   :  { %v934_v0 = vmul.f32 0.5, %v933_v60 }
 0x796   :  { %v957_v1 = vmul.f32 %v2836_v58, %v951_v42 }
 0x797   :  { %v935_v2 = vsub.f32 1.5, %v934_v0 }
 0x798   :  { %v2903_v4 = vpop.eup %2902  ;;  %v963_v52 = vadd.f32 %v2837_v63, %v957_v1 }
 0x799   :  { %v936_v6 = vmul.f32 %v2901_v50, %v935_v2  ;;  %v942_v8 = vmul.f32 %v2903_v4, %v920_v53  ;;  %vm948_vm9 = vweird.f32 %v2903_v4 }
 0x79a   :  { %2715 = vmatmul.msk.f32.vlgmr.msra.gmra.mxu2 %vm77_vm0, %v963_v52  ;;  %vm949_vm11 = vmor %vm947_vm10, %vm948_vm9 }
 0x79b   :  { %v940_v9 = vsel %vm939_vm8, %v2901_v50, %v936_v6  ;;  %v943_v10 = vmul.f32 %v2903_v4, %v942_v8  ;;  %v3717_v6 = vperm.slane %v3513_v37, 1 }
 0x79c   :  { %v952_v44 = vmul.f32 %v940_v9, %v3531_v36 }
 0x79d   :  { %v944_v11 = vmul.f32 0.5, %v943_v10 }
 0x79e   :  { %v958_v13 = vmul.f32 %v2836_v58, %v952_v44 }
 0x79f   :  { %v945_v15 = vsub.f32 1.5, %v944_v11 }
 0x7a0   :  { %v964_v46 = vadd.f32 %v2837_v63, %v958_v13 }
 0x7a1   :  { %v946_v7 = vmul.f32 %v2903_v4, %v945_v15 }
 0x7a2   :  { %2716 = vmatmul.msk.f32.gmra.mxu2 %vm77_vm0, %v964_v46 }
 0x7a3   :  { %v950_v16 = vsel %vm949_vm11, %v2903_v4, %v946_v7 }
 0x7a4   :  { %v953_v18 = vmul.f32 %v950_v16, %v3538_v55 }
 0x7a5   :  { %v1712_v53 = vpop.permute.xlu1 %1711 }
 0x7a6   :  { %v959_v20 = vmul.f32 %v2836_v58, %v953_v18 }
 0x7a8   :  { %v965_v24 = vadd.f32 %v2837_v63, %v959_v20 }
 0x7aa   :  { %2717 = vmatmul.msk.f32.gmra.mxu2 %vm77_vm0, %v965_v24 }
 0x7b2   :  { %2730 = vmatmul.msk.f32.vlgmr.msrb.gmra.mxu2 %vm77_vm0, %v3479_v5 }
 0x7b4   :  { %v1495_v36 = vpop.f32.mrf.mxu1 }
 0x7b5   :  { %v3613_v30 = vadd.f32 %v1495_v36, %v3516_v40 }
 0x7b7   :  { %1713 = vrot.lane.b32.xlu0 %v3613_v30, %s3020_s0 }
 0x7ba   :  { %2731 = vmatmul.msk.f32.gmra.mxu2 %vm77_vm0, %v3548_v17  ;;  %v1142_v17 = vld [vmem:[%s4329_s11 + $0x58] sm:$0xff] }
 0x7bb   :  { %1157 = vmatpush.msrb.mxu3 %v1142_v17 }
 0x7bc   :  { %v1498_v62 = vpop.f32.mrf.mxu1 }
 0x7bd   :  { %v1499_v55 = vadd.f32 %v1498_v62, %v3516_v40  ;;  %v1141_v40 = vld [vmem:[%s4329_s11 + $0x50] sm:$0xff] }
 0x7be   :  { %1158 = vmatpush.msrb.mxu3 %v1141_v40 }
 0x7bf   :  { %1531 = vst [vmem:[#allocation2 + $0x20] sm:$0x1] %v1499_v55  ;;  %1705 = vrot.lane.b32.xlu0 %v3519_v43, %s3022_s21 }
 0x7c2   :  { %2732 = vmatmul.msk.f32.gmra.mxu2 %vm77_vm0, %v3555_v21  ;;  %v1140_v21 = vld [vmem:[%s4329_s11 + $0x48] sm:$0xff] }
 0x7c3   :  { %1159 = vmatpush.msrb.mxu3 %v1140_v21 }
 0x7c5   :  { %1160 = vmatpush.msrb.mxu3 %v1139_v3 }
 0x7c6   :  { %v3624_v5 = vld [vmem:[#allocation2 + $0x20] sm:$0x1] }
 0x7c7   :  { %1709 = vrot.lane.b32.xlu1 %v3624_v5, %s3022_s21  ;;  %1715 = vrot.lane.b32.xlu2 %v3624_v5, %s3020_s0  ;;  %s4356_s0 = smov 96  }
 0x7c8   :  { %1960 = vrot.lane.b32.xlu0 %v3624_v5, %s3023_s1  ;;  %1161 = vmatpush.msrb.mxu3 %v1138_v51 }
 0x7ca   :  { %1162 = vmatpush.msrb.mxu3 %v1137_v22 }
 0x7cc   :  { %1163 = vmatpush.msrb.mxu3 %v1136_v25 }
 0x7ce   :  { %1164 = vmatpush.msrb.mxu3 %v1135_v23 }
 0x7cf   :  { %1541 = vrot.lane.b32.xlu1 %v3613_v30, %s3019_s29  ;;  %1707 = vrot.lane.b32.xlu2 %v3613_v30, %s3022_s21  ;;  %s3027_s21 = smov [#allocation3]  }
 0x7d0   :  { %1958 = vrot.lane.b32.xlu0 %v3613_v30, %s3023_s1  ;;  %1165 = vmatpush.msrb.mxu3 %v1134_v26  ;;  %s2655_s30 = sshll.u32 %s3027_s21, 4  ;;  %s2656_s30 = int_to_ptr.vmem [resolvable:$true] %s2655_s30 }
 0x7d2   :  { %1166 = vmatpush.msrb.mxu3 %v1133_v27 }
 0x7d4   :  { %1167 = vmatpush.msrb.mxu3 %v1132_v29 }
 0x7d6   :  { %1168 = vmatpush.msrb.mxu3 %v1131_v31 }
 0x7d7   :  { %1539 = vrot.lane.b32.xlu1 %v3519_v43, %s3019_s29  ;;  %1543 = vrot.lane.b32.xlu2 %v3624_v5, %s3019_s29  ;;  %s2657_s29 = sshll.u32 %s4337_s19, 4  ;;  %s2658_s29 = int_to_ptr.hbm [resolvable:$true] %s2657_s29 }
 0x7d8   :  { %1950 = vrot.lane.b32.xlu0 %v3519_v43, %s4356_s0 }
 0x7df   :  { %1956 = vrot.lane.b32.xlu2 %v3519_v43, %s3023_s1 }
 0x7e0   :  { %1954 = vrot.lane.b32.xlu0 %v3624_v5, %s4356_s0 }
 0x7e7   :  { %1952 = vrot.lane.b32.xlu2 %v3613_v30, %s4356_s0 }
 0x81d   :  { %v1002_v35 = vpop.f32.mrf.mxu2 }
 0x81e   :  { %v3689_v33 = vadd.f32 %v2838_v61, %v1002_v35 }
 0x820   :  { %v3692_v39 = vmul.f32 0.70710677, %v3689_v33 }
 0x821   :  { %v1716_v41 = vpop.permute.xlu2 %1715 }
 0x822   :  { %v1023_v28 = vand.u32 2147483647, %v3692_v39  ;;  %2743 = vmatpush.xpose.msk.msra.mxu1 %vm244_vm12, %v1716_v41 }
 0x824   :  { %v1026_v32 = vmul.f32 0.3275911, %v1023_v28  ;;  %v1104_v18 = vsub.f32 0.0, %v1023_v28 }
 0x825   :  { %v1005_v34 = vpop.f32.mrf.mxu2 }
 0x826   :  { %v1029_v45 = vadd.f32 1.0, %v1026_v32  ;;  %v3696_v47 = vadd.f32 %v2838_v61, %v1005_v34  ;;  %v1107_v21 = vmul.f32 %v1104_v18, %v1023_v28 }
 0x828   :  { %2904 = vrcp.f32 %v1029_v45  ;;  %v3699_v48 = vmul.f32 0.70710677, %v3696_v47  ;;  %v1043_v4 = vand.u32 2147483648, %v1029_v45  ;;  %v1041_v9 = vand.u32 2147483647, %v1029_v45 }
 0x829   :  { %v1708_v49 = vpop.permute.xlu2 %1707  ;;  %v1714_v38 = vpop.permute.xlu0 %1713  ;;  %vm1037_vm4 = vweird.f32 %v1029_v45  ;;  %v1110_v35 = vmul.f32 1.442695, %v1107_v21 }
 0x82a   :  { %2744 = vmatpush.xpose.msk.msra.mxu1 %vm244_vm12, %v1714_v38  ;;  %v3703_v50 = vand.u32 2147483647, %v3699_v48  ;;  %v1044_v13 = vor.u32 1.1754944e-38, %v1043_v4  ;;  %vm1042_vm6 = vcmp.eq.f32.partialorder %v1041_v9, 8.507059e+37 }
 0x82c   :  { %v1027_v54 = vmul.f32 0.3275911, %v3703_v50  ;;  %v1105_v32 = vsub.f32 0.0, %v3703_v50 }
 0x82d   :  { %v1008_v56 = vpop.f32.mrf.mxu2 }
 0x82e   :  { %v2905_v58 = vpop.eup %2904  ;;  %v3706_v59 = vadd.f32 %v2838_v61, %v1008_v56  ;;  %2745 = vmatpush.xpose.msk.msra.mxu1 %vm244_vm12, %v1712_v53  ;;  %v1030_v42 = vadd.f32 1.0, %v1027_v54 }
 0x82f   :  { %v1033_v60 = vmul.f32 %v2905_v58, %v1029_v45  ;;  %vm1038_vm3 = vweird.f32 %v2905_v58 }
 0x830   :  { %v3710_v63 = vmul.f32 0.70710677, %v3706_v59  ;;  %2906 = vrcp.f32 %v1030_v42  ;;  %vm1039_vm5 = vmor %vm1037_vm4, %vm1038_vm3  ;;  %v1058_v40 = vand.u32 2147483648, %v1030_v42  ;;  %v1056_v51 = vand.u32 2147483647, %v1030_v42 }
 0x831   :  { %v1034_v0 = vsub.f32 1.0, %v1033_v60  ;;  %v1544_v1 = vpop.permute.xlu2 %1543  ;;  %v1706_v2 = vpop.permute.xlu0 %1705  ;;  %vm1052_vm8 = vweird.f32 %v1030_v42 }
 0x832   :  { %v3713_v52 = vand.u32 2147483647, %v3710_v63  ;;  %2733 = vmatpush.xpose.msk.msra.mxu3 %vm244_vm12, %v1544_v1  ;;  %2746 = vmatmul.msk.f32.vlgmr.msra.gmra.mxu1 %vm244_vm12, %v1706_v2  ;;  %v1059_v61 = vor.u32 1.1754944e-38, %v1058_v40  ;;  %vm1057_vm10 = vcmp.eq.f32.partialorder %v1056_v51, 8.507059e+37  ;;  %v1108_v1 = vmul.f32 %v1105_v32, %v3703_v50 }
 0x833   :  { %v1035_v8 = vmul.f32 %v2905_v58, %v1034_v0 }
 0x834   :  { %v1028_v10 = vmul.f32 0.3275911, %v3713_v52 }
 0x835   :  { %v1036_v44 = vadd.f32 %v2905_v58, %v1035_v8  ;;  %v1518_v11 = vpop.f32.mrf.mxu2 }
 0x836   :  { %v3721_v15 = vadd.f32 1.0, %v1028_v10  ;;  %v1519_v46 = vadd.f32 %v1518_v11, %v3717_v6  ;;  %v2907_v7 = vpop.eup %2906 }
 0x837   :  { %v1040_v16 = vsel %vm1039_vm5, %v2905_v58, %v1036_v44  ;;  %v1048_v20 = vmul.f32 %v2907_v7, %v1030_v42  ;;  %vm1053_vm7 = vweird.f32 %v2907_v7 }
 0x838   :  { %v3724_v37 = vsel %vm1042_vm6, %v1044_v13, %v1040_v16  ;;  %2908 = vrcp.f32 %v3721_v15  ;;  %1528 = vst.msk [vmem:[#allocation2 + $0x8] sm:$0xff] %vm244_vm12, %v1519_v46  ;;  %vm1054_vm9 = vmor %vm1052_vm8, %vm1053_vm7  ;;  %v1073_v38 = vand.u32 2147483648, %v3721_v15  ;;  %v1071_v60 = vand.u32 2147483647, %v3721_v15 }
 0x839   :  { %v1077_v24 = vmul.f32 1.0614054, %v3724_v37  ;;  %v1710_v36 = vpop.permute.xlu1 %1709  ;;  %v1049_v62 = vsub.f32 1.0, %v1048_v20  ;;  %2910 = vpow2.f32 %v1110_v35  ;;  %vm1067_vm3 = vweird.f32 %v3721_v15  ;;  %v1957_v8 = vpop.permute.xlu2 %1956 }
 0x83a   :  { %v1961_v55 = vpop.permute.xlu0 %1960  ;;  %2747 = vmatmul.msk.f32.gmra.mxu1 %vm244_vm12, %v1708_v49  ;;  %v1074_v44 = vor.u32 1.1754944e-38, %v1073_v38  ;;  %vm1072_vm5 = vcmp.eq.f32.partialorder %v1071_v60, 8.507059e+37  ;;  %v1106_v46 = vsub.f32 0.0, %v3713_v52  ;;  %v1112_v16 = vmul.f32 1.442695, %v1108_v1 }
 0x83b   :  { %v1080_v17 = vadd.f32 -1.4531521, %v1077_v24  ;;  %2761 = vmatpush.xpose.msk.msrb.mxu1 %vm244_vm12, %v1961_v55  ;;  %v1050_v3 = vmul.f32 %v2907_v7, %v1049_v62  ;;  %vm1017_vm6 = vcmp.ge.f32.partialorder %v3692_v39, 0.0  ;;  %v1011_v39 = vmul.f32 0.5, %v3689_v33 }
 0x83c   :  { %2912 = vpow2.f32 %v1112_v16  ;;  %vm1018_vm7 = vcmp.ge.f32.partialorder %v3699_v48, 0.0  ;;  %vm1019_vm8 = vcmp.ge.f32.partialorder %v3710_v63, 0.0 }
 0x83d   :  { %v1083_v22 = vmul.f32 %v1080_v17, %v3724_v37  ;;  %v1521_v25 = vpop.f32.mrf.mxu2  ;;  %v1051_v27 = vadd.f32 %v2907_v7, %v1050_v3  ;;  %v1109_v17 = vmul.f32 %v1106_v46, %v3713_v52  ;;  %v3026_v3 = vmov -1.0  }
 0x83e   :  { %v2909_v23 = vpop.eup %2908  ;;  %v1522_v26 = vadd.f32 %v1521_v25, %v3717_v6  ;;  %v1020_v51 = vsel %vm1017_vm6, 1.0, %v3026_v3  ;;  %v1021_v33 = vsel %vm1018_vm7, 1.0, %v3026_v3  ;;  %v1022_v1 = vsel %vm1019_vm8, 1.0, %v3026_v3 }
 0x83f   :  { %v1086_v29 = vadd.f32 1.4214138, %v1083_v22  ;;  %v1063_v31 = vmul.f32 %v2909_v23, %v3721_v15  ;;  %v1055_v41 = vsel %vm1054_vm9, %v2907_v7, %v1051_v27  ;;  %vm1068_vm11 = vweird.f32 %v2909_v23 }
 0x840   :  { %1530 = vst.msk [vmem:[#allocation2 + $0x18] sm:$0xff] %vm244_vm12, %v1522_v26  ;;  %v1060_v49 = vsel %vm1057_vm10, %v1059_v61, %v1055_v41  ;;  %vm1069_vm4 = vmor %vm1067_vm3, %vm1068_vm11  ;;  %v1114_v26 = vmul.f32 1.442695, %v1109_v17 }
 0x841   :  { %v1089_v28 = vmul.f32 %v1086_v29, %v3724_v37  ;;  %v1064_v34 = vsub.f32 1.0, %v1063_v31  ;;  %v1542_v45 = vpop.permute.xlu1 %1541  ;;  %v1078_v54 = vmul.f32 1.0614054, %v1060_v49  ;;  %v1953_v61 = vpop.permute.xlu2 %1952 }
 0x842   :  { %2734 = vmatpush.xpose.msk.msra.mxu3 %vm244_vm12, %v1542_v45  ;;  %v1959_v53 = vpop.permute.xlu0 %1958  ;;  %2748 = vmatmul.msk.f32.gmra.mxu1 %vm244_vm12, %v1710_v36  ;;  %2914 = vpow2.f32 %v1114_v26 }
 0x843   :  { %v1092_v56 = vadd.f32 -0.28449672, %v1089_v28  ;;  %v1065_v58 = vmul.f32 %v2909_v23, %v1064_v34  ;;  %2762 = vmatpush.xpose.msk.msrb.mxu1 %vm244_vm12, %v1959_v53  ;;  %v1081_v42 = vadd.f32 -1.4531521, %v1078_v54 }
 0x845   :  { %v1095_v0 = vmul.f32 %v1092_v56, %v3724_v37  ;;  %v1524_v2 = vpop.f32.mrf.mxu2  ;;  %v1066_v4 = vadd.f32 %v2909_v23, %v1065_v58  ;;  %v1084_v10 = vmul.f32 %v1081_v42, %v1060_v49 }
 0x846   :  { %v1525_v9 = vadd.f32 %v1524_v2, %v3717_v6  ;;  %v2911_v6 = vpop.eup %2910 }
 0x847   :  { %v1098_v11 = vadd.f32 0.2548296, %v1095_v0  ;;  %2763 = vmatpush.xpose.msk.msrb.mxu1 %vm244_vm12, %v1957_v8  ;;  %v1070_v13 = vsel %vm1069_vm4, %v2909_v23, %v1066_v4  ;;  %v1087_v50 = vadd.f32 1.4214138, %v1084_v10  ;;  %v2913_v52 = vpop.eup %2912  ;;  %v1013_v4 = vmul.f32 0.5, %v3706_v59 }
 0x848   :  { %1532 = vst.msk [vmem:[#allocation2 + $0x28] sm:$0x1] %vm249_vm13, %v1525_v9  ;;  %v1075_v7 = vsel %vm1072_vm5, %v1074_v44, %v1070_v13  ;;  %vm1143_vm13 = vcmask 785408   ;;  %v2915_v56 = vpop.eup %2914 }
 0x849   :  { %v1101_v15 = vmul.f32 %v1098_v11, %v3724_v37  ;;  %v1540_v18 = vpop.permute.xlu1 %1539  ;;  %v1079_v20 = vmul.f32 1.0614054, %v1075_v7  ;;  %v1090_v36 = vmul.f32 %v1087_v50, %v1060_v49 }
 0x84a   :  { %2735 = vmatpush.xpose.msk.msra.mxu3 %vm244_vm12, %v1540_v18  ;;  %v1951_v24 = vpop.permute.xlu0 %1950 }
 0x84b   :  { %v1116_v62 = vmul.f32 %v2911_v6, %v1101_v15  ;;  %2764 = vmatmul.msk.f32.vlgmr.msrb.gmra.mxu1 %vm244_vm12, %v1951_v24  ;;  %v1082_v55 = vadd.f32 -1.4531521, %v1079_v20  ;;  %v1093_v40 = vadd.f32 -0.28449672, %v1090_v36  ;;  %v2839_v24 = vld [vmem:[%s4330_s12] ss:$0 sm:$0xff] }
 0x84d   :  { %v1119_v21 = vsub.f32 1.0, %v1116_v62  ;;  %v1085_v37 = vmul.f32 %v1082_v55, %v1075_v7  ;;  %v1096_v22 = vmul.f32 %v1093_v40, %v1060_v49 }
 0x84f   :  { %v1122_v25 = vmul.f32 %v1119_v21, %v1020_v51  ;;  %v1088_v23 = vadd.f32 1.4214138, %v1085_v37  ;;  %v1099_v27 = vadd.f32 0.2548296, %v1096_v22 }
 0x851   :  { %v1125_v29 = vadd.f32 1.0, %v1122_v25  ;;  %v1091_v31 = vmul.f32 %v1088_v23, %v1075_v7  ;;  %v1102_v35 = vmul.f32 %v1099_v27, %v1060_v49  ;;  %v1012_v49 = vmul.f32 0.5, %v3696_v47 }
 0x852   :  { %v1955_v58 = vpop.permute.xlu0 %1954 }
 0x853   :  { %v1128_v41 = vmul.f32 %v1125_v29, %v1011_v39  ;;  %2765 = vmatmul.msk.f32.gmra.mxu1 %vm244_vm12, %v1953_v61  ;;  %v1094_v28 = vadd.f32 -0.28449672, %v1091_v31  ;;  %v1117_v32 = vmul.f32 %v2913_v52, %v1102_v35 }
 0x855   :  { %2718 = vmatmul.msk.f32.vlgmr.msrb.gmra.mxu3 %vm1143_vm13, %v1128_v41  ;;  %v1097_v34 = vmul.f32 %v1094_v28, %v1075_v7  ;;  %v1120_v45 = vsub.f32 1.0, %v1117_v32 }
 0x857   :  { %v1100_v38 = vadd.f32 0.2548296, %v1097_v34  ;;  %v1123_v53 = vmul.f32 %v1120_v45, %v1021_v33 }
 0x859   :  { %v1103_v54 = vmul.f32 %v1100_v38, %v1075_v7  ;;  %v1126_v60 = vadd.f32 1.0, %v1123_v53 }
 0x85b   :  { %2766 = vmatmul.msk.f32.gmra.mxu1 %vm244_vm12, %v1955_v58  ;;  %v1118_v48 = vmul.f32 %v2915_v56, %v1103_v54  ;;  %v1129_v42 = vmul.f32 %v1126_v60, %v1012_v49 }
 0x85d   :  { %v1121_v0 = vsub.f32 1.0, %v1118_v48  ;;  %2719 = vmatmul.msk.f32.gmra.mxu3 %vm1143_vm13, %v1129_v42 }
 0x85f   :  { %v1124_v2 = vmul.f32 %v1121_v0, %v1022_v1 }
 0x861   :  { %v1127_v8 = vadd.f32 1.0, %v1124_v2 }
 0x863   :  { %v1130_v9 = vmul.f32 %v1127_v8, %v1013_v4 }
 0x865   :  { %2720 = vmatmul.msk.f32.gmra.mxu3 %vm1143_vm13, %v1130_v9 }
 0x86d   :  { %2736 = vmatmul.msk.f32.vlgmr.msra.gmra.mxu3 %vm244_vm12, %v3519_v43 }
 0x875   :  { %2737 = vmatmul.msk.f32.gmra.mxu3 %vm244_vm12, %v3613_v30 }
 0x87d   :  { %2738 = vmatmul.msk.f32.gmra.mxu3 %vm244_vm12, %v3624_v5 }
 0x8af   :  { %v1746_v47 = vpop.f32.mrf.mxu1 }
 0x8b0   :  { %v1755_v63 = vmul.f32 0.25, %v1746_v47 }
 0x8b2   :  { %v1758_v10 = vsel %vm304_vm14, %v1755_v63, -inf }
 0x8b3   :  { %1759 = vmax.xlane.f32.xlu1 %v1758_v10 }
 0x8b7   :  { %v1749_v44 = vpop.f32.mrf.mxu1 }
 0x8b8   :  { %v1756_v59 = vmul.f32 0.25, %v1749_v44 }
 0x8ba   :  { %v1761_v11 = vsel %vm304_vm14, %v1756_v59, -inf }
 0x8bb   :  { %1762 = vmax.xlane.f32.xlu0 %v1761_v11 }
 0x8bf   :  { %v1752_v13 = vpop.f32.mrf.mxu1 }
 0x8c0   :  { %v3775_v46 = vmul.f32 0.25, %v1752_v13 }
 0x8c2   :  { %v1764_v50 = vsel %vm311_vm15, %v3775_v46, -inf }
 0x8c3   :  { %1765 = vmax.xlane.f32.xlu2 %v1764_v50 }
 0x8c8   :  { %v1991_v7 = vpop.f32.mrf.mxu1 }
 0x8c9   :  { %v2000_v15 = vmul.f32 0.25, %v1991_v7 }
 0x8cb   :  { %v2003_v16 = vsel %vm304_vm14, %v2000_v15, -inf }
 0x8cc   :  { %2004 = vmax.xlane.f32.xlu1 %v2003_v16 }
 0x8d0   :  { %v1994_v18 = vpop.f32.mrf.mxu1 }
 0x8d1   :  { %v2001_v20 = vmul.f32 0.25, %v1994_v18 }
 0x8d3   :  { %v2006_v6 = vsel %vm304_vm14, %v2001_v20, -inf }
 0x8d4   :  { %2007 = vmax.xlane.f32.xlu2 %v2006_v6 }
 0x8d8   :  { %v1170_v36 = vpop.f32.mrf.mxu3  ;;  %v1997_v62 = vpop.f32.mrf.mxu1 }
 0x8d9   :  { %v1179_v55 = vadd.f32 %v1170_v36, %v3489_v14  ;;  %v2002_v17 = vmul.f32 0.25, %v1997_v62  ;;  %v3846_v36 = vpack.i.bf16 %v3519_v43, %v3613_v30 }
 0x8db   :  { %v3785_v40 = vadd.f32 %v2839_v24, %v1179_v55  ;;  %v2009_v21 = vsel %vm311_vm15, %v2002_v17, -inf }
 0x8dc   :  { %2010 = vmax.xlane.f32.xlu1 %v2009_v21 }
 0x8dd   :  { %v1189_v37 = vsel %vm77_vm0, %v3785_v40, 0.0 }
 0x8de   :  { %1190 = vadd.xlane.f32.xlu2 %v1189_v37 }
 0x8e0   :  { %v1173_v51 = vpop.f32.mrf.mxu3 }
 0x8e1   :  { %v1180_v22 = vadd.f32 %v1173_v51, %v3496_v19 }
 0x8e3   :  { %v3791_v25 = vadd.f32 %v2839_v24, %v1180_v22 }
 0x8e5   :  { %v1192_v45 = vsel %vm77_vm0, %v3791_v25, 0.0 }
 0x8e8   :  { %v1176_v23 = vpop.f32.mrf.mxu3 }
 0x8e9   :  { %v1181_v26 = vadd.f32 %v1176_v23, %v3504_v57 }
 0x8eb   :  { %v3794_v27 = vadd.f32 %v2839_v24, %v1181_v26 }
 0x8ed   :  { %v1195_v49 = vsel %vm84_vm1, %v3794_v27, 0.0 }
 0x8f0   :  { %v1574_v14 = vpop.f32.mrf.mxu3 }
 0x8f1   :  { %v3812_v58 = vmul.f32 0.25, %v1574_v14 }
 0x8f3   :  { %v1586_v2 = vsel %vm304_vm14, %v3812_v58, -inf }
 0x8f8   :  { %v1577_v39 = vpop.f32.mrf.mxu3 }
 0x8f9   :  { %v3796_v29 = vmul.f32 0.25, %v1577_v39 }
 0x8fb   :  { %v1589_v31 = vsel %vm304_vm14, %v3796_v29, -inf }
 0x8fc   :  { %1590 = vmax.xlane.f32.xlu2 %v1589_v31 }
 0x900   :  { %v1580_v4 = vpop.f32.mrf.mxu3 }
 0x901   :  { %v3821_v47 = vmul.f32 0.25, %v1580_v4 }
 0x926   :  { %v1760_v61 = vpop.xlane.xlu1 %1759 }
 0x927   :  { %v1767_v35 = vsub.f32 %v1755_v63, %v1760_v61 }
 0x929   :  { %v1770_v52 = vmul.f32 1.442695, %v1767_v35 }
 0x92b   :  { %2916 = vpow2.f32 %v1770_v52  ;;  %v3879_v52 = vld [vmem:[%s4333_s15 + $0x28] sm:$0xff] }
 0x92c   :  { %1289 = vmatpush.msrb.mxu0 %v3879_v52 }
 0x92e   :  { %v1763_v19 = vpop.xlane.xlu0 %1762 }
 0x92f   :  { %v1768_v41 = vsub.f32 %v1756_v59, %v1763_v19 }
 0x931   :  { %v3800_v28 = vpop.eup %2916  ;;  %v1772_v32 = vmul.f32 1.442695, %v1768_v41  ;;  %v3891_v41 = vld [vmem:[%s4333_s15 + $0x18] sm:$0xff] }
 0x932   :  { %v1776_v57 = vsel %vm304_vm14, %v3800_v28, 0.0 }
 0x933   :  { %2918 = vpow2.f32 %v1772_v32  ;;  %1777 = vadd.xlane.f32.xlu1 %v1776_v57  ;;  %v3897_v32 = vld [vmem:[%s4333_s15 + $0x10] sm:$0xff]  ;;  %v3903_v57 = vld [vmem:[%s4333_s15 + $0x8] sm:$0xff] }
 0x936   :  { %v1766_v38 = vpop.xlane.xlu2 %1765 }
 0x937   :  { %v1769_v42 = vsub.f32 %v3775_v46, %v1766_v38  ;;  %v1592_v46 = vsel %vm311_vm15, %v3821_v47, -inf }
 0x939   :  { %v3804_v34 = vpop.eup %2918  ;;  %v1774_v9 = vmul.f32 1.442695, %v1769_v42 }
 0x93a   :  { %v1779_v33 = vsel %vm304_vm14, %v3804_v34, 0.0 }
 0x93b   :  { %1193 = vadd.xlane.f32.xlu1 %v1192_v45  ;;  %1780 = vadd.xlane.f32.xlu0 %v1779_v33  ;;  %v3909_v45 = vld [vmem:[%s4333_s15] sm:$0xff] }
 0x93f   :  { %v2005_v53 = vpop.xlane.xlu1 %2004 }
 0x940   :  { %v2012_v54 = vsub.f32 %v2000_v15, %v2005_v53 }
 0x942   :  { %v2015_v56 = vmul.f32 1.442695, %v2012_v54 }
 0x943   :  { %1196 = vadd.xlane.f32.xlu0 %v1195_v49 }
 0x944   :  { %2920 = vpow2.f32 %v2015_v56 }
 0x947   :  { %v2008_v60 = vpop.xlane.xlu2 %2007 }
 0x948   :  { %v2013_v48 = vsub.f32 %v2001_v20, %v2008_v60 }
 0x94a   :  { %v3815_v0 = vpop.eup %2920  ;;  %v2017_v1 = vmul.f32 1.442695, %v2013_v48 }
 0x94b   :  { %v2021_v8 = vsel %vm304_vm14, %v3815_v0, 0.0  ;;  %1587 = vmax.xlane.f32.xlu0 %v1586_v2 }
 0x94c   :  { %2922 = vpow2.f32 %v2017_v1  ;;  %2022 = vadd.xlane.f32.xlu1 %v2021_v8 }
 0x94d   :  { %2924 = vpow2.f32 %v1774_v9 }
 0x94f   :  { %v2011_v63 = vpop.xlane.xlu1 %2010 }
 0x950   :  { %v2014_v10 = vsub.f32 %v2002_v17, %v2011_v63 }
 0x951   :  { %v1191_v44 = vpop.xlane.xlu2 %1190 }
 0x952   :  { %v3823_v59 = vpop.eup %2922  ;;  %v1198_v11 = vmul.f32 %v1191_v44, %v3140_v12  ;;  %v2019_v13 = vmul.f32 1.442695, %v2014_v10 }
 0x953   :  { %v2024_v50 = vsel %vm304_vm14, %v3823_v59, 0.0  ;;  %1593 = vmax.xlane.f32.xlu0 %v1592_v46  ;;  %v3835_v16 = vpop.eup %2924 }
 0x954   :  { %v3831_v7 = vsub.f32 %v3785_v40, %v1198_v11  ;;  %2926 = vpow2.f32 %v2019_v13  ;;  %2025 = vadd.xlane.f32.xlu1 %v2024_v50  ;;  %v1782_v6 = vsel %vm311_vm15, %v3835_v16, 0.0 }
 0x956   :  { %v1204_v15 = vmul.f32 %v3831_v7, %v3831_v7 }
 0x958   :  { %v1207_v18 = vsel %vm77_vm0, %v1204_v15, 0.0 }
 0x959   :  { %1208 = vadd.xlane.f32.xlu2 %v1207_v18 }
 0x95a   :  { %v3838_v20 = vpop.eup %2926 }
 0x95b   :  { %v2027_v24 = vsel %vm311_vm15, %v3838_v20, 0.0  ;;  %1783 = vadd.xlane.f32.xlu0 %v1782_v6 }
 0x95c   :  { %2028 = vadd.xlane.f32.xlu1 %v2027_v24 }
 0x96f   :  { %2822 = vrot.lane.b32.xlu0 %v3846_v36, %s4357_s22  ;;  %v1591_v62 = vpop.xlane.xlu2 %1590 }
 0x970   :  { %v1596_v55 = vsub.f32 %v3796_v29, %v1591_v62 }
 0x971   :  { %1834 = vrot.lane.b32.xlu2 %v3624_v5, %s4357_s22 }
 0x972   :  { %v1600_v17 = vmul.f32 1.442695, %v1596_v55 }
 0x974   :  { %2928 = vpow2.f32 %v1600_v17 }
 0x97a   :  { %v3853_v40 = vpop.eup %2928 }
 0x97b   :  { %v1607_v21 = vsel %vm304_vm14, %v3853_v40, 0.0 }
 0x999   :  { %1608 = vadd.xlane.f32.xlu0 %v1607_v21 }
 0x9a6   :  { %v3857_v37 = vpop.xlane.xlu1 %1777 }
 0x9a7   :  { %v1796_v50 = vand.u32 2147483648, %v3857_v37  ;;  %vm1790_vm10 = vweird.f32 %v3857_v37  ;;  %v1794_v18 = vand.u32 2147483647, %v3857_v37 }
 0x9a9   :  { %v1797_v17 = vor.u32 1.1754944e-38, %v1796_v50  ;;  %vm1795_vm5 = vcmp.eq.f32.partialorder %v1794_v18, 8.507059e+37 }
 0x9ae   :  { %v1194_v43 = vpop.xlane.xlu1 %1193  ;;  %v3859_v30 = vpop.xlane.xlu0 %1780 }
 0x9af   :  { %v1199_v51 = vmul.f32 %v1194_v43, %v3140_v12  ;;  %v3954_v43 = vld [vmem:[%s4331_s13] ss:$0 sm:$0xff]  ;;  %vm1805_vm8 = vweird.f32 %v3859_v30 }
 0x9b1   :  { %v3863_v22 = vsub.f32 %v3791_v25, %v1199_v51 }
 0x9b3   :  { %v1205_v23 = vmul.f32 %v3863_v22, %v3863_v22 }
 0x9b5   :  { %v1210_v26 = vsel %vm77_vm0, %v1205_v23, 0.0 }
 0x9b6   :  { %1211 = vadd.xlane.f32.xlu1 %v1210_v26  ;;  %v1197_v14 = vpop.xlane.xlu0 %1196 }
 0x9b7   :  { %v1200_v39 = vmul.f32 %v1197_v14, %v3140_v12 }
 0x9b9   :  { %v3870_v29 = vsub.f32 %v3794_v27, %v1200_v39  ;;  %v3885_v27 = vld [vmem:[%s4333_s15 + $0x20] sm:$0xff]  ;;  %s4358_s15 = smov 32  }
 0x9ba   :  { %1290 = vmatpush.msrb.mxu0 %v3885_v27 }
 0x9bb   :  { %v1206_v31 = vmul.f32 %v3870_v29, %v3870_v29 }
 0x9bc   :  { %1291 = vmatpush.msrb.mxu0 %v3891_v41 }
 0x9bd   :  { %v1213_v61 = vsel %vm84_vm1, %v1206_v31, 0.0 }
 0x9be   :  { %1214 = vadd.xlane.f32.xlu1 %v1213_v61  ;;  %v1588_v25 = vpop.xlane.xlu0 %1587  ;;  %1292 = vmatpush.msrb.mxu0 %v3897_v32  ;;  %v3962_v61 = vld [vmem:[%s4332_s14] ss:$0 sm:$0xff] }
 0x9bf   :  { %v1595_v35 = vsub.f32 %v3812_v58, %v1588_v25  ;;  %v3930_v63 = vpop.xlane.xlu1 %2022 }
 0x9c0   :  { %1293 = vmatpush.msrb.mxu0 %v3903_v57 }
 0x9c1   :  { %v1598_v19 = vmul.f32 1.442695, %v1595_v35 }
 0x9c2   :  { %1294 = vmatpush.msrb.mxu0 %v3909_v45 }
 0x9c3   :  { %2930 = vpow2.f32 %v1598_v19  ;;  %v1811_v19 = vand.u32 2147483648, %v3859_v30 }
 0x9c4   :  { %2932 = vrcp.f32 %v3857_v37 }
 0x9c5   :  { %2934 = vrcp.f32 %v3859_v30 }
 0x9c6   :  { %v3913_v38 = vpop.xlane.xlu0 %1593 }
 0x9c7   :  { %v1597_v18 = vsub.f32 %v3821_v47, %v3913_v38  ;;  %v2041_v47 = vand.u32 2147483648, %v3930_v63  ;;  %v2039_v38 = vand.u32 2147483647, %v3930_v63 }
 0x9c9   :  { %v3911_v33 = vpop.eup %2930 }
 0x9ca   :  { %v1604_v53 = vsel %vm304_vm14, %v3911_v33, 0.0  ;;  %v2933_v54 = vpop.eup %2932 }
 0x9cb   :  { %1605 = vadd.xlane.f32.xlu2 %v1604_v53  ;;  %v1786_v58 = vmul.f32 %v2933_v54, %v3857_v37  ;;  %v3924_v1 = vpop.eup %2934  ;;  %vm1791_vm9 = vweird.f32 %v2933_v54  ;;  %v3949_v37 = vpop.xlane.xlu1 %2025 }
 0x9cc   :  { %v1209_v56 = vpop.xlane.xlu2 %1208  ;;  %v1801_v9 = vmul.f32 %v3924_v1, %v3859_v30  ;;  %vm3939_vm11 = vmor %vm1790_vm10, %vm1791_vm9  ;;  %vm1806_vm7 = vweird.f32 %v3924_v1 }
 0x9cd   :  { %v1216_v49 = vmul.f32 %v1209_v56, %v3140_v12  ;;  %v1787_v48 = vsub.f32 1.0, %v1786_v58  ;;  %vm1807_vm9 = vmor %vm1805_vm8, %vm1806_vm7  ;;  %vm2035_vm7 = vweird.f32 %v3930_v63 }
 0x9ce   :  { %v3922_v42 = vpop.xlane.xlu0 %1783  ;;  %v1802_v13 = vsub.f32 1.0, %v1801_v9  ;;  %v1947_v9 = vld [vmem:[#allocation2 + $0x8] sm:$0xff] }
 0x9cf   :  { %v1219_v60 = vadd.f32 1e-12, %v1216_v49  ;;  %v1788_v8 = vmul.f32 %v2933_v54, %v1787_v48 }
 0x9d0   :  { %v1803_v62 = vmul.f32 %v3924_v1, %v1802_v13  ;;  %v1824_v13 = vand.u32 2147483647, %v3922_v42 }
 0x9d1   :  { %2936 = vrsqrt.f32 %v1219_v60  ;;  %v1789_v11 = vadd.f32 %v2933_v54, %v1788_v8  ;;  %vm1228_vm4 = vweird.f32 %v1219_v60 }
 0x9d2   :  { %2938 = vrcp.f32 %v3922_v42  ;;  %v1804_v25 = vadd.f32 %v3924_v1, %v1803_v62 }
 0x9d3   :  { %2940 = vrcp.f32 %v3930_v63  ;;  %v1793_v24 = vsel %vm3939_vm11, %v2933_v54, %v1789_v11  ;;  %v1809_v54 = vand.u32 2147483647, %v3859_v30  ;;  %v3982_v8 = vpop.xlane.xlu1 %2028 }
 0x9d4   :  { %v1835_v2 = vpop.permute.xlu2 %1834  ;;  %v1798_v23 = vsel %vm1795_vm5, %v1797_v17, %v1793_v24  ;;  %2942 = vrcp.f32 %v3949_v37  ;;  %v1808_v48 = vsel %vm1807_vm9, %v3924_v1, %v1804_v25  ;;  %v1826_v1 = vand.u32 2147483648, %v3922_v42 }
 0x9d5   :  { %2749 = vmatpush.msk.msra.mxu2 %vm395_vm2, %v1835_v2  ;;  %v1812_v2 = vor.u32 1.1754944e-38, %v1811_v19  ;;  %vm1810_vm10 = vcmp.eq.f32.partialorder %v1809_v54, 8.507059e+37  ;;  %2944 = vrcp.f32 %v3982_v8  ;;  %vm1825_vm5 = vcmp.eq.f32.partialorder %v1824_v13, 8.507059e+37 }
 0x9d6   :  { %v1602_v24 = vmul.f32 1.442695, %v1597_v18  ;;  %v2042_v17 = vor.u32 1.1754944e-38, %v2041_v47  ;;  %vm2040_vm9 = vcmp.eq.f32.partialorder %v2039_v38, 8.507059e+37 }
 0x9d7   :  { %v2937_v4 = vpop.eup %2936  ;;  %1662 = vrot.lane.b32.xlu1 %v3624_v5, %s4358_s15  ;;  %v1813_v30 = vsel %vm1810_vm10, %v1812_v2, %v1808_v48 }
 0x9d8   :  { %v1223_v10 = vmul.f32 %v2937_v4, %v1219_v60  ;;  %v3934_v46 = vpop.eup %2938  ;;  %vm1229_vm3 = vweird.f32 %v2937_v4  ;;  %v1949_v60 = vld [vmem:[#allocation2 + $0x28] sm:$0x1]  ;;  %v1814_v11 = vmul.f32 %v3804_v34, %v1813_v30  ;;  %2946 = vpow2.f32 %v1602_v24 }
 0x9d9   :  { %v1816_v55 = vmul.f32 %v3934_v46, %v3922_v42  ;;  %vm1230_vm6 = vmor %vm1228_vm4, %vm1229_vm3  ;;  %v3966_v35 = vpop.eup %2940  ;;  %vm1821_vm11 = vweird.f32 %v3934_v46  ;;  %vm1820_vm3 = vweird.f32 %v3922_v42 }
 0x9da   :  { %v1224_v44 = vmul.f32 %v2937_v4, %v1223_v10  ;;  %v2031_v56 = vmul.f32 %v3966_v35, %v3930_v63  ;;  %vm1822_vm4 = vmor %vm1820_vm3, %vm1821_vm11  ;;  %vm2050_vm11 = vweird.f32 %v3949_v37 }
 0x9db   :  { %v1817_v31 = vsub.f32 1.0, %v1816_v55 }
 0x9dc   :  { %v1225_v15 = vmul.f32 0.5, %v1224_v44  ;;  %v2943_v44 = vpop.eup %2942 }
 0x9dd   :  { %v1818_v49 = vmul.f32 %v3934_v46, %v1817_v31  ;;  %v2945_v62 = vpop.eup %2944  ;;  %vm2051_vm10 = vweird.f32 %v2943_v44 }
 0x9de   :  { %v1226_v5 = vsub.f32 1.5, %v1225_v15  ;;  %v2046_v15 = vmul.f32 %v2943_v44, %v3949_v37  ;;  %v2061_v55 = vmul.f32 %v2945_v62, %v3982_v8  ;;  %vm2052_vm3 = vmor %vm2050_vm11, %vm2051_vm10 }
 0x9df   :  { %v1819_v10 = vadd.f32 %v3934_v46, %v1818_v49 }
 0x9e0   :  { %v1227_v21 = vmul.f32 %v2937_v4, %v1226_v5  ;;  %v1827_v5 = vor.u32 1.1754944e-38, %v1826_v1  ;;  %v2047_v42 = vsub.f32 1.0, %v2046_v15 }
 0x9e1   :  { %v2823_v51 = vpop.permute.xlu0 %2822  ;;  %v1823_v6 = vsel %vm1822_vm4, %v3934_v46, %v1819_v10 }
 0x9e2   :  { %v1231_v26 = vsel %vm1230_vm6, %v2937_v4, %v1227_v21  ;;  %v2824_v14 = vunpack.i.l.bf16 %v2823_v51  ;;  %v2825_v53 = vunpack.i.h.bf16 %v2823_v51  ;;  %v2032_v4 = vsub.f32 1.0, %v2031_v56  ;;  %v4013_v51 = vpop.eup %2946 }
 0x9e3   :  { %v1252_v39 = vmul.f32 %v1231_v26, %v3831_v7  ;;  %2827 = vrot.lane.b32.xlu2 %v3846_v36, %s4358_s15  ;;  %v1799_v36 = vmul.f32 %v3800_v28, %v1798_v23  ;;  %v1948_v28 = vld [vmem:[#allocation2 + $0x18] sm:$0xff]  ;;  %v1828_v34 = vsel %vm1825_vm5, %v1827_v5, %v1823_v6  ;;  %vm2036_vm6 = vweird.f32 %v3966_v35 }
 0x9e4   :  { %1863 = vmatpush.msra.mxu2 %v2824_v14  ;;  %v2033_v50 = vmul.f32 %v3966_v35, %v2032_v4  ;;  %vm2037_vm8 = vmor %vm2035_vm7, %vm2036_vm6  ;;  %v2048_v46 = vmul.f32 %v2943_v44, %v2047_v42  ;;  %v2062_v21 = vsub.f32 1.0, %v2061_v55  ;;  %v2054_v23 = vand.u32 2147483647, %v3949_v37 }
 0x9e5   :  { %v1258_v7 = vmul.f32 %v3954_v43, %v1252_v39  ;;  %v1610_v39 = vsel %vm311_vm15, %v4013_v51, 0.0  ;;  %vm2066_vm5 = vweird.f32 %v2945_v62  ;;  %vm2065_vm6 = vweird.f32 %v3982_v8 }
 0x9e6   :  { %1864 = vmatpush.msra.mxu2 %v2825_v53  ;;  %v2049_v63 = vadd.f32 %v2943_v44, %v2048_v46  ;;  %v2063_v26 = vmul.f32 %v2945_v62, %v2062_v21  ;;  %vm2055_vm4 = vcmp.eq.f32.partialorder %v2054_v23, 8.507059e+37  ;;  %vm2067_vm7 = vmor %vm2065_vm6, %vm2066_vm5  ;;  %v2754_v46 = vld [vmem:[%s4323_s5 + $0x18] sm:$0xff]  ;;  %v2753_v21 = vld [vmem:[%s4323_s5 + $0x10] sm:$0xff] }
 0x9e7   :  { %v1264_v58 = vadd.f32 %v3962_v61, %v1258_v7  ;;  %2750 = vmatmul.msk.f32.vlgmr.msra.gmra.mxu2 %vm304_vm14, %v1799_v36  ;;  %1900 = vmatpush.msrb.mxu3 %v2754_v46 }
 0x9e8   :  { %2767 = vmatpush.msk.msrb.mxu2 %vm395_vm2, %v1949_v60  ;;  %v2064_v25 = vadd.f32 %v2945_v62, %v2063_v26 }
 0x9e9   :  { %2721 = vmatmul.msk.f32.vlgmr.msrb.gmra.mxu0 %vm77_vm0, %v1264_v58  ;;  %1901 = vmatpush.msrb.mxu3 %v2753_v21  ;;  %v2988_v21 = vld [vmem:[%s4352_s20 + $0x20] sm:$0xff] }
 0x9ea   :  { %2101 = vmatpush.msrb.mxu2 %v1948_v28  ;;  %v2068_v19 = vsel %vm2067_vm7, %v2945_v62, %v2064_v25 }
 0x9ec   :  { %2102 = vmatpush.msrb.mxu2 %v1947_v9 }
 0x9ee   :  { %2556 = vmatpush.msra.mxu2 %v3879_v52  ;;  %v2034_v52 = vadd.f32 %v3966_v35, %v2033_v50 }
 0x9ef   :  { %2751 = vmatmul.msk.f32.gmra.mxu2 %vm304_vm14, %v1814_v11 }
 0x9f0   :  { %2557 = vmatpush.msra.mxu2 %v3885_v27  ;;  %v1829_v27 = vmul.f32 %v3835_v16, %v1828_v34  ;;  %v2056_v16 = vand.u32 2147483648, %v3949_v37  ;;  %v2069_v37 = vand.u32 2147483647, %v3982_v8 }
 0x9f2   :  { %2558 = vmatpush.msra.mxu2 %v3891_v41  ;;  %v2038_v41 = vsel %vm2037_vm8, %v3966_v35, %v2034_v52  ;;  %v2057_v14 = vor.u32 1.1754944e-38, %v2056_v16  ;;  %v2071_v35 = vand.u32 2147483648, %v3982_v8  ;;  %vm2070_vm8 = vcmp.eq.f32.partialorder %v2069_v37, 8.507059e+37 }
 0x9f4   :  { %2559 = vmatpush.msra.mxu2 %v3897_v32  ;;  %v2043_v32 = vsel %vm2040_vm9, %v2042_v17, %v2038_v41  ;;  %v2072_v53 = vor.u32 1.1754944e-38, %v2071_v35 }
 0x9f6   :  { %2560 = vmatpush.msra.mxu2 %v3903_v57  ;;  %v2044_v57 = vmul.f32 %v3815_v0, %v2043_v32  ;;  %v2073_v7 = vsel %vm2070_vm8, %v2072_v53, %v2068_v19  ;;  %v2772_v53 = vld [vmem:[%s4323_s5 + $0x28] sm:$0xff] }
 0x9f7   :  { %2752 = vmatmul.msk.f32.gmra.mxu2 %vm304_vm14, %v1829_v27  ;;  %v2074_v36 = vmul.f32 %v3838_v20, %v2073_v7  ;;  %2138 = vmatpush.msra.mxu3 %v2772_v53 }
 0x9f8   :  { %2561 = vmatpush.msra.mxu2 %v3909_v45  ;;  %v2053_v45 = vsel %vm2052_vm3, %v2943_v44, %v2049_v63 }
 0x9f9   :  { %v2058_v31 = vsel %vm2055_vm4, %v2057_v14, %v2053_v45 }
 0x9fa   :  { %v2059_v0 = vmul.f32 %v3823_v59, %v2058_v31 }
 0x9ff   :  { %2768 = vmatmul.msk.f32.vlgmr.msrb.gmra.mxu2 %vm304_vm14, %v2044_v57 }
 0xa01   :  { %1611 = vadd.xlane.f32.xlu1 %v1610_v39 }
 0xa07   :  { %2769 = vmatmul.msk.f32.gmra.mxu2 %vm304_vm14, %v2059_v0 }
 0xa0c   :  { %v4030_v30 = vpop.xlane.xlu0 %1608 }
 0xa0d   :  { %v1639_v31 = vand.u32 2147483648, %v4030_v30 }
 0xa0f   :  { %2770 = vmatmul.msk.f32.gmra.mxu2 %vm304_vm14, %v2074_v36  ;;  %v1640_v0 = vor.u32 1.1754944e-38, %v1639_v31 }
 0xa29   :  { %v1212_v54 = vpop.xlane.xlu1 %1211 }
 0xa2a   :  { %v1217_v56 = vmul.f32 %v1212_v54, %v3140_v12 }
 0xa2c   :  { %v1220_v49 = vadd.f32 1e-12, %v1217_v56 }
 0xa2e   :  { %2948 = vrsqrt.f32 %v1220_v49  ;;  %vm1238_vm9 = vweird.f32 %v1220_v49 }
 0xa31   :  { %v1215_v58 = vpop.xlane.xlu1 %1214 }
 0xa32   :  { %v1218_v59 = vmul.f32 %v1215_v58, %v3140_v12 }
 0xa34   :  { %v2949_v60 = vpop.eup %2948  ;;  %v1221_v48 = vadd.f32 1e-12, %v1218_v59 }
 0xa35   :  { %v1233_v2 = vmul.f32 %v2949_v60, %v1220_v49  ;;  %vm1239_vm15 = vweird.f32 %v2949_v60 }
 0xa36   :  { %2950 = vrsqrt.f32 %v1221_v48  ;;  %vm1240_vm10 = vmor %vm1238_vm9, %vm1239_vm15  ;;  %vm1248_vm3 = vweird.f32 %v1221_v48  ;;  %vm1633_vm15 = vweird.f32 %v4030_v30 }
 0xa37   :  { %v1234_v28 = vmul.f32 %v2949_v60, %v1233_v2  ;;  %2952 = vrcp.f32 %v4030_v30 }
 0xa39   :  { %v1235_v4 = vmul.f32 0.5, %v1234_v28 }
 0xa3b   :  { %v1236_v8 = vsub.f32 1.5, %v1235_v4 }
 0xa3c   :  { %v2951_v20 = vpop.eup %2950 }
 0xa3d   :  { %v1237_v9 = vmul.f32 %v2949_v60, %v1236_v8  ;;  %v1243_v10 = vmul.f32 %v2951_v20, %v1221_v48  ;;  %v2953_v15 = vpop.eup %2952  ;;  %vm1249_vm11 = vweird.f32 %v2951_v20 }
 0xa3e   :  { %v1606_v44 = vpop.xlane.xlu2 %1605  ;;  %v1629_v52 = vmul.f32 %v2953_v15, %v4030_v30  ;;  %vm1250_vm4 = vmor %vm1248_vm3, %vm1249_vm11  ;;  %vm1634_vm8 = vweird.f32 %v2953_v15 }
 0xa3f   :  { %v1241_v1 = vsel %vm1240_vm10, %v2949_v60, %v1237_v9  ;;  %v1244_v11 = vmul.f32 %v2951_v20, %v1243_v10  ;;  %2954 = vrcp.f32 %v1606_v44  ;;  %v1624_v63 = vand.u32 2147483648, %v1606_v44  ;;  %vm1635_vm9 = vmor %vm1633_vm15, %vm1634_vm8 }
 0xa40   :  { %v1253_v13 = vmul.f32 %v1241_v1, %v3863_v22  ;;  %v1630_v27 = vsub.f32 1.0, %v1629_v52  ;;  %vm1618_vm6 = vweird.f32 %v1606_v44  ;;  %v1622_v16 = vand.u32 2147483647, %v1606_v44  ;;  %v1703_v1 = vld [vmem:[%s4323_s5] sm:$0xff] }
 0xa41   :  { %v1245_v50 = vmul.f32 0.5, %v1244_v11 }
 0xa42   :  { %v1259_v18 = vmul.f32 %v3954_v43, %v1253_v13  ;;  %v1631_v26 = vmul.f32 %v2953_v15, %v1630_v27 }
 0xa43   :  { %v1246_v6 = vsub.f32 1.5, %v1245_v50 }
 0xa44   :  { %v1265_v5 = vadd.f32 %v3962_v61, %v1259_v18  ;;  %v1632_v39 = vadd.f32 %v2953_v15, %v1631_v26 }
 0xa45   :  { %v2955_v34 = vpop.eup %2954  ;;  %v1247_v42 = vmul.f32 %v2951_v20, %v1246_v6 }
 0xa46   :  { %v1614_v24 = vmul.f32 %v2955_v34, %v1606_v44  ;;  %2722 = vmatmul.msk.f32.gmra.mxu0 %vm77_vm0, %v1265_v5  ;;  %v2828_v47 = vpop.permute.xlu2 %2827  ;;  %vm1619_vm5 = vweird.f32 %v2955_v34  ;;  %v1636_v35 = vsel %vm1635_vm9, %v2953_v15, %v1632_v39  ;;  %v1704_v44 = vld [vmem:[%s4323_s5 + $0x8] sm:$0xff] }
 0xa47   :  { %v1251_v62 = vsel %vm1250_vm4, %v2951_v20, %v1247_v42  ;;  %v2829_v17 = vunpack.i.l.bf16 %v2828_v47  ;;  %vm1620_vm7 = vmor %vm1618_vm6, %vm1619_vm5  ;;  %v2830_v23 = vunpack.i.h.bf16 %v2828_v47  ;;  %v2843_v47 = vld [vmem:[%s4324_s6] ss:$0 sm:$0xff] }
 0xa48   :  { %v1615_v22 = vsub.f32 1.0, %v1614_v24  ;;  %v1254_v38 = vmul.f32 %v1251_v62, %v3870_v29 }
 0xa49   :  { %v1663_v41 = vpop.permute.xlu1 %1662 }
 0xa4a   :  { %v1616_v55 = vmul.f32 %v2955_v34, %v1615_v22  ;;  %2739 = vmatpush.msk.msra.mxu0 %vm395_vm2, %v1663_v41  ;;  %v1260_v32 = vmul.f32 %v3954_v43, %v1254_v38  ;;  %v1625_v43 = vor.u32 1.1754944e-38, %v1624_v63  ;;  %vm1623_vm2 = vcmp.eq.f32.partialorder %v1622_v16, 8.507059e+37  ;;  %v2987_v22 = vld [vmem:[%s4352_s20 + $0x18] sm:$0xff] }
 0xa4c   :  { %v1617_v29 = vadd.f32 %v2955_v34, %v1616_v55  ;;  %1691 = vmatpush.msra.mxu0 %v2829_v17  ;;  %v1266_v57 = vadd.f32 %v3962_v61, %v1260_v32  ;;  %v1637_v61 = vand.u32 2147483647, %v4030_v30 }
 0xa4e   :  { %v1621_v45 = vsel %vm1620_vm7, %v2955_v34, %v1617_v29  ;;  %2723 = vmatmul.msk.f32.gmra.mxu0 %vm77_vm0, %v1266_v57  ;;  %vm1638_vm10 = vcmp.eq.f32.partialorder %v1637_v61, 8.507059e+37 }
 0xa4f   :  { %1692 = vmatpush.msra.mxu0 %v2830_v23  ;;  %v1626_v14 = vsel %vm1623_vm2, %v1625_v43, %v1621_v45  ;;  %v1641_v37 = vsel %vm1638_vm10, %v1640_v0, %v1636_v35  ;;  %v2989_v43 = vld [vmem:[%s4352_s20 + $0x28] sm:$0x1] }
 0xa50   :  { %v1627_v25 = vmul.f32 %v3911_v33, %v1626_v14  ;;  %v1642_v19 = vmul.f32 %v3853_v40, %v1641_v37  ;;  %v2771_v33 = vld [vmem:[%s4323_s5 + $0x20] sm:$0xff] }
 0xa51   :  { %2139 = vmatpush.msra.mxu3 %v2771_v33  ;;  %1935 = vmatpush.msrb.mxu0 %v1704_v44 }
 0xa53   :  { %1936 = vmatpush.msrb.mxu0 %v1703_v1 }
 0xa56   :  { %2740 = vmatmul.msk.f32.vlgmr.msra.gmra.mxu0 %vm304_vm14, %v1627_v25 }
 0xa5e   :  { %2741 = vmatmul.msk.f32.gmra.mxu0 %vm304_vm14, %v1642_v19 }
 0xa66   :  { %v4076_v11 = vpop.f32.mrf.mxu0 }
 0xa6a   :  { %v1866_v7 = vpop.f32.mrf.mxu2 }
 0xa6b   :  { %2755 = vmatmul.msk.f32.vlgmr.msrb.gmra.mxu3 %vm244_vm12, %v1866_v7 }
 0xa72   :  { %v1869_v36 = vpop.f32.mrf.mxu2 }
 0xa73   :  { %2756 = vmatmul.msk.f32.gmra.mxu3 %vm244_vm12, %v1869_v36 }
 0xa74   :  { %v1612_v54 = vpop.xlane.xlu1 %1611 }
 0xa75   :  { %2956 = vrcp.f32 %v1612_v54  ;;  %v1654_v59 = vand.u32 2147483648, %v1612_v54  ;;  %v1652_v48 = vand.u32 2147483647, %v1612_v54  ;;  %vm1648_vm3 = vweird.f32 %v1612_v54 }
 0xa77   :  { %v1655_v30 = vor.u32 1.1754944e-38, %v1654_v59  ;;  %vm1653_vm5 = vcmp.eq.f32.partialorder %v1652_v48, 8.507059e+37  ;;  %v2248_v59 = vld [vmem:[%s4327_s9 + $0x28] sm:$0xff]  ;;  %v2246_v48 = vld [vmem:[%s4327_s9 + $0x18] sm:$0xff] }
 0xa78   :  { %2272 = vmatpush.msra.mxu0 %v2248_v59 }
 0xa7a   :  { %v1872_v40 = vpop.f32.mrf.mxu2 }
 0xa7b   :  { %v2957_v56 = vpop.eup %2956  ;;  %2757 = vmatmul.msk.f32.gmra.mxu3 %vm244_vm12, %v1872_v40 }
 0xa7c   :  { %v1644_v49 = vmul.f32 %v2957_v56, %v1612_v54  ;;  %vm1649_vm11 = vweird.f32 %v2957_v56 }
 0xa7d   :  { %vm1650_vm4 = vmor %vm1648_vm3, %vm1649_vm11 }
 0xa7e   :  { %v1645_v58 = vsub.f32 1.0, %v1644_v49 }
 0xa80   :  { %v1646_v60 = vmul.f32 %v2957_v56, %v1645_v58 }
 0xa82   :  { %v2104_v2 = vpop.f32.mrf.mxu2  ;;  %v1647_v28 = vadd.f32 %v2957_v56, %v1646_v60  ;;  %v2247_v60 = vld [vmem:[%s4327_s9 + $0x20] sm:$0xff] }
 0xa83   :  { %2773 = vmatmul.msk.f32.vlgmr.msra.gmra.mxu3 %vm244_vm12, %v2104_v2  ;;  %2273 = vmatpush.msra.mxu0 %v2247_v60  ;;  %v2245_v2 = vld [vmem:[%s4327_s9 + $0x10] sm:$0xff] }
 0xa84   :  { %v1651_v4 = vsel %vm1650_vm4, %v2957_v56, %v1647_v28  ;;  %v2244_v28 = vld [vmem:[%s4327_s9 + $0x8] sm:$0xff] }
 0xa85   :  { %v1656_v8 = vsel %vm1653_vm5, %v1655_v30, %v1651_v4  ;;  %2274 = vmatpush.msra.mxu0 %v2246_v48  ;;  %v2243_v30 = vld [vmem:[%s4327_s9] sm:$0xff]  ;;  %v2417_v48 = vld [vmem:[%s4329_s11 + $0x48] sm:$0xff] }
 0xa86   :  { %v1657_v20 = vmul.f32 %v4013_v51, %v1656_v8 }
 0xa87   :  { %2275 = vmatpush.msra.mxu0 %v2245_v2  ;;  %v2416_v2 = vld [vmem:[%s4329_s11 + $0x40] sm:$0xff] }
 0xa88   :  { %2742 = vmatmul.msk.f32.gmra.mxu0 %vm304_vm14, %v1657_v20 }
 0xa89   :  { %2276 = vmatpush.msra.mxu0 %v2244_v28 }
 0xa8a   :  { %v2107_v9 = vpop.f32.mrf.mxu2 }
 0xa8b   :  { %2774 = vmatmul.msk.f32.gmra.mxu3 %vm244_vm12, %v2107_v9  ;;  %2277 = vmatpush.msra.mxu0 %v2243_v30  ;;  %v2415_v30 = vld [vmem:[%s4329_s11 + $0x38] sm:$0xff] }
 0xa92   :  { %v2110_v10 = vpop.f32.mrf.mxu2 }
 0xa93   :  { %2775 = vmatmul.msk.f32.gmra.mxu3 %vm244_vm12, %v2110_v10 }
 0xac3   :  { %v4078_v51 = vpop.f32.mrf.mxu0 }
 0xacb   :  { %v4080_v13 = vpop.f32.mrf.mxu0 }
 0xad3   :  { %v1694_v50 = vpop.f32.mrf.mxu0 }
 0xad4   :  { %2758 = vmatmul.msk.f32.vlgmr.msrb.gmra.mxu0 %vm244_vm12, %v1694_v50 }
 0xadb   :  { %v1697_v15 = vpop.f32.mrf.mxu0 }
 0xadc   :  { %2759 = vmatmul.msk.f32.gmra.mxu0 %vm244_vm12, %v1697_v15 }
 0xaee   :  { %v1903_v6 = vpop.f32.mrf.mxu3 }
 0xaf6   :  { %v1906_v5 = vpop.f32.mrf.mxu3 }
 0xafe   :  { %v1909_v34 = vpop.f32.mrf.mxu3 }
 0xb05   :  { %v1700_v18 = vpop.f32.mrf.mxu0 }
 0xb06   :  { %2760 = vmatmul.msk.f32.gmra.mxu0 %vm244_vm12, %v1700_v18  ;;  %v2141_v52 = vpop.f32.mrf.mxu3 }
 0xb0e   :  { %v2144_v17 = vpop.f32.mrf.mxu3 }
 0xb16   :  { %v2147_v26 = vpop.f32.mrf.mxu3 }
 0xb51   :  { %v1938_v42 = vpop.f32.mrf.mxu0 }
 0xb52   :  { %v1939_v24 = vadd.f32 %v1938_v42, %v1903_v6  ;;  %v2844_v42 = vld [vmem:[%s4325_s7] ss:$0 sm:$0xff] }
 0xb54   :  { %v2150_v62 = vadd.f32 %v2141_v52, %v1939_v24 }
 0xb56   :  { %v2153_v38 = vadd.f32 %v2987_v22, %v2150_v62  ;;  %v2845_v22 = vld [vmem:[%s4326_s8] ss:$0 sm:$0xff] }
 0xb58   :  { %v4091_v27 = vadd.f32 %v2843_v47, %v2153_v38 }
 0xb59   :  { %v1941_v41 = vpop.f32.mrf.mxu0 }
 0xb5a   :  { %v1942_v46 = vadd.f32 %v1941_v41, %v1906_v5  ;;  %v2165_v55 = vsel %vm77_vm0, %v4091_v27, 0.0 }
 0xb5b   :  { %2166 = vadd.xlane.f32.xlu0 %v2165_v55 }
 0xb5c   :  { %v2151_v32 = vadd.f32 %v2144_v17, %v1942_v46 }
 0xb5e   :  { %v2154_v63 = vadd.f32 %v2988_v21, %v2151_v32 }
 0xb60   :  { %v4098_v29 = vadd.f32 %v2843_v47, %v2154_v63 }
 0xb62   :  { %v2168_v16 = vsel %vm77_vm0, %v4098_v29, 0.0 }
 0xb63   :  { %2169 = vadd.xlane.f32.xlu0 %v2168_v16 }
 0xb83   :  { %v1944_v57 = vpop.f32.mrf.mxu0 }
 0xb84   :  { %v1945_v23 = vadd.f32 %v1944_v57, %v1909_v34 }
 0xb86   :  { %v2152_v45 = vadd.f32 %v2147_v26, %v1945_v23 }
 0xb88   :  { %v2155_v14 = vadd.f32 %v2989_v43, %v2152_v45 }
 0xb8a   :  { %v4105_v39 = vadd.f32 %v2843_v47, %v2155_v14 }
 0xb8c   :  { %v2171_v31 = vsel %vm84_vm1, %v4105_v39, 0.0 }
 0xb8d   :  { %2172 = vadd.xlane.f32.xlu2 %v2171_v31 }
 0xbce   :  { %v2167_v25 = vpop.xlane.xlu0 %2166 }
 0xbcf   :  { %v2174_v61 = vmul.f32 %v2167_v25, %v3140_v12 }
 0xbd1   :  { %v2177_v35 = vsub.f32 %v4091_v27, %v2174_v61 }
 0xbd3   :  { %v2180_v0 = vmul.f32 %v2177_v35, %v2177_v35 }
 0xbd5   :  { %v2183_v37 = vsel %vm77_vm0, %v2180_v0, 0.0 }
 0xbd6   :  { %2184 = vadd.xlane.f32.xlu0 %v2183_v37  ;;  %v2170_v19 = vpop.xlane.xlu0 %2169 }
 0xbd7   :  { %v2175_v53 = vmul.f32 %v2170_v19, %v3140_v12 }
 0xbd9   :  { %v2178_v33 = vsub.f32 %v4098_v29, %v2175_v53  ;;  %v4156_v53 = vld [vmem:[%s4328_s10] ss:$0 sm:$0xff] }
 0xbdb   :  { %v2181_v7 = vmul.f32 %v2178_v33, %v2178_v33 }
 0xbdd   :  { %v2186_v36 = vsel %vm77_vm0, %v2181_v7, 0.0 }
 0xbde   :  { %2187 = vadd.xlane.f32.xlu0 %v2186_v36 }
 0xc00   :  { %v2173_v54 = vpop.xlane.xlu2 %2172 }
 0xc01   :  { %v2176_v40 = vmul.f32 %v2173_v54, %v3140_v12 }
 0xc03   :  { %v4117_v56 = vsub.f32 %v4105_v39, %v2176_v40  ;;  %v2419_v40 = vld [vmem:[%s4329_s11 + $0x58] sm:$0xff] }
 0xc04   :  { %2433 = vmatpush.msra.mxu1 %v2419_v40 }
 0xc05   :  { %v2182_v49 = vmul.f32 %v4117_v56, %v4117_v56 }
 0xc07   :  { %v2189_v58 = vsel %vm84_vm1, %v2182_v49, 0.0  ;;  %v2418_v49 = vld [vmem:[%s4329_s11 + $0x50] sm:$0xff] }
 0xc08   :  { %2190 = vadd.xlane.f32.xlu1 %v2189_v58  ;;  %2434 = vmatpush.msra.mxu1 %v2418_v49 }
 0xc0a   :  { %2435 = vmatpush.msra.mxu1 %v2417_v48 }
 0xc0c   :  { %2436 = vmatpush.msra.mxu1 %v2416_v2 }
 0xc0e   :  { %2437 = vmatpush.msra.mxu1 %v2415_v30 }
 0xc49   :  { %v2185_v4 = vpop.xlane.xlu0 %2184 }
 0xc4a   :  { %v2192_v8 = vmul.f32 %v2185_v4, %v3140_v12 }
 0xc4c   :  { %v2195_v20 = vadd.f32 1e-12, %v2192_v8  ;;  %v2414_v8 = vld [vmem:[%s4329_s11 + $0x30] sm:$0xff] }
 0xc4d   :  { %2438 = vmatpush.msra.mxu1 %v2414_v8 }
 0xc4e   :  { %2958 = vrsqrt.f32 %v2195_v20  ;;  %vm2204_vm14 = vweird.f32 %v2195_v20 }
 0xc51   :  { %v2188_v9 = vpop.xlane.xlu0 %2187 }
 0xc52   :  { %v2193_v10 = vmul.f32 %v2188_v9, %v3140_v12 }
 0xc54   :  { %v2959_v44 = vpop.eup %2958  ;;  %v2196_v1 = vadd.f32 1e-12, %v2193_v10  ;;  %v2413_v10 = vld [vmem:[%s4329_s11 + $0x28] sm:$0xff] }
 0xc55   :  { %v2199_v50 = vmul.f32 %v2959_v44, %v2195_v20  ;;  %vm2205_vm12 = vweird.f32 %v2959_v44  ;;  %2439 = vmatpush.msra.mxu1 %v2413_v10 }
 0xc56   :  { %2960 = vrsqrt.f32 %v2196_v1  ;;  %vm2206_vm6 = vmor %vm2204_vm14, %vm2205_vm12  ;;  %vm2214_vm2 = vweird.f32 %v2196_v1 }
 0xc57   :  { %v2200_v15 = vmul.f32 %v2959_v44, %v2199_v50  ;;  %v2412_v50 = vld [vmem:[%s4329_s11 + $0x20] sm:$0xff] }
 0xc58   :  { %2440 = vmatpush.msra.mxu1 %v2412_v50 }
 0xc59   :  { %v2201_v18 = vmul.f32 0.5, %v2200_v15 }
 0xc5b   :  { %v2202_v6 = vsub.f32 1.5, %v2201_v18 }
 0xc5c   :  { %v2961_v5 = vpop.eup %2960 }
 0xc5d   :  { %v2203_v34 = vmul.f32 %v2959_v44, %v2202_v6  ;;  %v2209_v52 = vmul.f32 %v2961_v5, %v2196_v1  ;;  %vm2215_vm7 = vweird.f32 %v2961_v5  ;;  %v2411_v6 = vld [vmem:[%s4329_s11 + $0x18] sm:$0xff] }
 0xc5e   :  { %vm2216_vm8 = vmor %vm2214_vm2, %vm2215_vm7  ;;  %2441 = vmatpush.msra.mxu1 %v2411_v6 }
 0xc5f   :  { %v2207_v24 = vsel %vm2206_vm6, %v2959_v44, %v2203_v34  ;;  %v2210_v62 = vmul.f32 %v2961_v5, %v2209_v52  ;;  %v2410_v52 = vld [vmem:[%s4329_s11 + $0x10] sm:$0xff] }
 0xc60   :  { %v2228_v47 = vmul.f32 %v2207_v24, %v2177_v35  ;;  %2442 = vmatpush.msra.mxu1 %v2410_v52 }
 0xc61   :  { %v2211_v38 = vmul.f32 0.5, %v2210_v62  ;;  %v2409_v62 = vld [vmem:[%s4329_s11 + $0x8] sm:$0xff] }
 0xc62   :  { %v2234_v41 = vmul.f32 %v2844_v42, %v2228_v47  ;;  %2443 = vmatpush.msra.mxu1 %v2409_v62 }
 0xc63   :  { %v2212_v46 = vsub.f32 1.5, %v2211_v38 }
 0xc64   :  { %v2240_v55 = vadd.f32 %v2845_v22, %v2234_v41 }
 0xc65   :  { %v2213_v17 = vmul.f32 %v2961_v5, %v2212_v46 }
 0xc66   :  { %2776 = vmatmul.msk.f32.vlgmr.msra.gmra.mxu0 %vm77_vm0, %v2240_v55  ;;  %v2408_v55 = vld [vmem:[%s4329_s11] sm:$0xff] }
 0xc67   :  { %v2217_v32 = vsel %vm2216_vm8, %v2961_v5, %v2213_v17  ;;  %2444 = vmatpush.msra.mxu1 %v2408_v55 }
 0xc68   :  { %v2229_v21 = vmul.f32 %v2217_v32, %v2178_v33 }
 0xc6a   :  { %v2235_v63 = vmul.f32 %v2844_v42, %v2229_v21 }
 0xc6c   :  { %v2241_v16 = vadd.f32 %v2845_v22, %v2235_v63 }
 0xc6e   :  { %2777 = vmatmul.msk.f32.gmra.mxu0 %vm77_vm0, %v2241_v16 }
 0xc7b   :  { %v2191_v57 = vpop.xlane.xlu1 %2190 }
 0xc7c   :  { %v2194_v23 = vmul.f32 %v2191_v57, %v3140_v12 }
 0xc7e   :  { %v2197_v26 = vadd.f32 1e-12, %v2194_v23 }
 0xc80   :  { %2962 = vrsqrt.f32 %v2197_v26  ;;  %vm2224_vm9 = vweird.f32 %v2197_v26 }
 0xc86   :  { %v2963_v45 = vpop.eup %2962 }
 0xc87   :  { %v2219_v43 = vmul.f32 %v2963_v45, %v2197_v26  ;;  %vm2225_vm15 = vweird.f32 %v2963_v45 }
 0xc88   :  { %vm2226_vm10 = vmor %vm2224_vm9, %vm2225_vm15 }
 0xc89   :  { %v2220_v14 = vmul.f32 %v2963_v45, %v2219_v43 }
 0xc8b   :  { %v2221_v31 = vmul.f32 0.5, %v2220_v14 }
 0xc8d   :  { %v2222_v25 = vsub.f32 1.5, %v2221_v31 }
 0xc8f   :  { %v2223_v61 = vmul.f32 %v2963_v45, %v2222_v25 }
 0xc91   :  { %v2227_v35 = vsel %vm2226_vm10, %v2963_v45, %v2223_v61 }
 0xc92   :  { %v2230_v0 = vmul.f32 %v2227_v35, %v4117_v56 }
 0xc94   :  { %v2236_v37 = vmul.f32 %v2844_v42, %v2230_v0 }
 0xc96   :  { %v2242_v19 = vadd.f32 %v2845_v22, %v2236_v37 }
 0xc98   :  { %2778 = vmatmul.msk.f32.gmra.mxu0 %vm77_vm0, %v2242_v19 }
 0xce3   :  { %v2279_v33 = vpop.f32.mrf.mxu0 }
 0xce4   :  { %v4159_v7 = vadd.f32 %v4156_v53, %v2279_v33 }
 0xce6   :  { %v4162_v36 = vmul.f32 0.70710677, %v4159_v7 }
 0xce8   :  { %v2300_v54 = vand.u32 2147483647, %v4162_v36  ;;  %vm2294_vm2 = vcmp.ge.f32.partialorder %v4162_v36, 0.0 }
 0xce9   :  { %v2297_v10 = vsel %vm2294_vm2, 1.0, %v3026_v3 }
 0xcea   :  { %v2303_v56 = vmul.f32 0.3275911, %v2300_v54  ;;  %v2381_v41 = vsub.f32 0.0, %v2300_v54 }
 0xceb   :  { %v2282_v58 = vpop.f32.mrf.mxu0 }
 0xcec   :  { %v2306_v59 = vadd.f32 1.0, %v2303_v56  ;;  %v4172_v60 = vadd.f32 %v4156_v53, %v2282_v58  ;;  %v2384_v16 = vmul.f32 %v2381_v41, %v2300_v54 }
 0xcee   :  { %2964 = vrcp.f32 %v2306_v59  ;;  %v4181_v28 = vmul.f32 0.70710677, %v4172_v60  ;;  %v2320_v18 = vand.u32 2147483648, %v2306_v59  ;;  %v2318_v34 = vand.u32 2147483647, %v2306_v59 }
 0xcef   :  { %vm2314_vm3 = vweird.f32 %v2306_v59  ;;  %v2387_v31 = vmul.f32 1.442695, %v2384_v16 }
 0xcf0   :  { %v2301_v4 = vand.u32 2147483647, %v4181_v28  ;;  %v2321_v24 = vor.u32 1.1754944e-38, %v2320_v18  ;;  %vm2319_vm5 = vcmp.eq.f32.partialorder %v2318_v34, 8.507059e+37  ;;  %v2288_v18 = vmul.f32 0.5, %v4159_v7 }
 0xcf1   :  { %vm2295_vm8 = vcmp.ge.f32.partialorder %v4181_v28, 0.0  ;;  %v2289_v7 = vmul.f32 0.5, %v4172_v60 }
 0xcf2   :  { %v2304_v20 = vmul.f32 0.3275911, %v2301_v4  ;;  %v2382_v35 = vsub.f32 0.0, %v2301_v4 }
 0xcf4   :  { %v2965_v9 = vpop.eup %2964  ;;  %v2307_v1 = vadd.f32 1.0, %v2304_v20  ;;  %v2385_v40 = vmul.f32 %v2382_v35, %v2301_v4 }
 0xcf5   :  { %v2310_v44 = vmul.f32 %v2965_v9, %v2306_v59  ;;  %vm2315_vm11 = vweird.f32 %v2965_v9 }
 0xcf6   :  { %2966 = vrcp.f32 %v2307_v1  ;;  %vm2316_vm4 = vmor %vm2314_vm3, %vm2315_vm11  ;;  %v2335_v63 = vand.u32 2147483648, %v2307_v1  ;;  %v2333_v23 = vand.u32 2147483647, %v2307_v1  ;;  %vm2329_vm14 = vweird.f32 %v2307_v1 }
 0xcf7   :  { %v2311_v15 = vsub.f32 1.0, %v2310_v44  ;;  %2968 = vpow2.f32 %v2387_v31  ;;  %v2389_v48 = vmul.f32 1.442695, %v2385_v40 }
 0xcf8   :  { %v2336_v14 = vor.u32 1.1754944e-38, %v2335_v63  ;;  %vm2334_vm7 = vcmp.eq.f32.partialorder %v2333_v23, 8.507059e+37 }
 0xcf9   :  { %v2312_v5 = vmul.f32 %v2965_v9, %v2311_v15  ;;  %2970 = vpow2.f32 %v2389_v48 }
 0xcfb   :  { %v2313_v42 = vadd.f32 %v2965_v9, %v2312_v5 }
 0xcfc   :  { %v2967_v47 = vpop.eup %2966 }
 0xcfd   :  { %v2317_v22 = vsel %vm2316_vm4, %v2965_v9, %v2313_v42  ;;  %v2325_v46 = vmul.f32 %v2967_v47, %v2307_v1  ;;  %vm2330_vm12 = vweird.f32 %v2967_v47  ;;  %v2969_v2 = vpop.eup %2968 }
 0xcfe   :  { %v2322_v38 = vsel %vm2319_vm5, %v2321_v24, %v2317_v22  ;;  %vm2331_vm6 = vmor %vm2329_vm14, %vm2330_vm12  ;;  %v2298_v22 = vsel %vm2295_vm8, 1.0, %v3026_v3 }
 0xcff   :  { %v2354_v17 = vmul.f32 1.0614054, %v2322_v38  ;;  %v2326_v32 = vsub.f32 1.0, %v2325_v46  ;;  %v2971_v52 = vpop.eup %2970 }
 0xd01   :  { %v2357_v21 = vadd.f32 -1.4531521, %v2354_v17  ;;  %v2327_v57 = vmul.f32 %v2967_v47, %v2326_v32 }
 0xd03   :  { %v2360_v26 = vmul.f32 %v2357_v21, %v2322_v38  ;;  %v2328_v45 = vadd.f32 %v2967_v47, %v2327_v57 }
 0xd05   :  { %v2363_v43 = vadd.f32 1.4214138, %v2360_v26  ;;  %v2332_v25 = vsel %vm2331_vm6, %v2967_v47, %v2328_v45 }
 0xd06   :  { %v2337_v0 = vsel %vm2334_vm7, %v2336_v14, %v2332_v25 }
 0xd07   :  { %v2366_v61 = vmul.f32 %v2363_v43, %v2322_v38  ;;  %v2355_v37 = vmul.f32 1.0614054, %v2337_v0 }
 0xd09   :  { %v2369_v19 = vadd.f32 -0.28449672, %v2366_v61  ;;  %v2358_v33 = vadd.f32 -1.4531521, %v2355_v37 }
 0xd0b   :  { %v2372_v54 = vmul.f32 %v2369_v19, %v2322_v38  ;;  %v2361_v56 = vmul.f32 %v2358_v33, %v2337_v0 }
 0xd0d   :  { %v2375_v49 = vadd.f32 0.2548296, %v2372_v54  ;;  %v2364_v58 = vadd.f32 1.4214138, %v2361_v56 }
 0xd0f   :  { %v2378_v59 = vmul.f32 %v2375_v49, %v2322_v38  ;;  %v2367_v30 = vmul.f32 %v2364_v58, %v2337_v0 }
 0xd11   :  { %v2393_v8 = vmul.f32 %v2969_v2, %v2378_v59  ;;  %v2370_v20 = vadd.f32 -0.28449672, %v2367_v30  ;;  %v2847_v30 = vld [vmem:[%s4330_s12] ss:$0 sm:$0xff] }
 0xd13   :  { %v2396_v9 = vsub.f32 1.0, %v2393_v8  ;;  %v2373_v44 = vmul.f32 %v2370_v20, %v2337_v0 }
 0xd15   :  { %v2399_v1 = vmul.f32 %v2396_v9, %v2297_v10  ;;  %v2285_v50 = vpop.f32.mrf.mxu0  ;;  %v2376_v15 = vadd.f32 0.2548296, %v2373_v44 }
 0xd16   :  { %v2286_v4 = vadd.f32 %v4156_v53, %v2285_v50 }
 0xd17   :  { %v2402_v6 = vadd.f32 1.0, %v2399_v1  ;;  %v2379_v34 = vmul.f32 %v2376_v15, %v2337_v0 }
 0xd18   :  { %v2293_v5 = vmul.f32 0.70710677, %v2286_v4  ;;  %v2290_v59 = vmul.f32 0.5, %v2286_v4 }
 0xd19   :  { %v2405_v42 = vmul.f32 %v2402_v6, %v2288_v18  ;;  %v2394_v24 = vmul.f32 %v2971_v52, %v2379_v34 }
 0xd1a   :  { %v2302_v36 = vand.u32 2147483647, %v2293_v5  ;;  %vm2296_vm3 = vcmp.ge.f32.partialorder %v2293_v5, 0.0 }
 0xd1b   :  { %2779 = vmatmul.msk.f32.vlgmr.msra.gmra.mxu1 %vm1143_vm13, %v2405_v42  ;;  %v2397_v47 = vsub.f32 1.0, %v2394_v24  ;;  %v2299_v49 = vsel %vm2296_vm3, 1.0, %v3026_v3 }
 0xd1c   :  { %v2305_v62 = vmul.f32 0.3275911, %v2302_v36  ;;  %v2383_v26 = vsub.f32 0.0, %v2302_v36 }
 0xd1d   :  { %v2400_v53 = vmul.f32 %v2397_v47, %v2298_v22 }
 0xd1e   :  { %v2308_v38 = vadd.f32 1.0, %v2305_v62  ;;  %v2386_v14 = vmul.f32 %v2383_v26, %v2302_v36 }
 0xd1f   :  { %v2403_v41 = vadd.f32 1.0, %v2400_v53 }
 0xd20   :  { %2972 = vrcp.f32 %v2308_v38  ;;  %v2350_v32 = vand.u32 2147483648, %v2308_v38  ;;  %v2348_v63 = vand.u32 2147483647, %v2308_v38  ;;  %vm2344_vm9 = vweird.f32 %v2308_v38 }
 0xd21   :  { %v2406_v46 = vmul.f32 %v2403_v41, %v2289_v7  ;;  %v2391_v61 = vmul.f32 1.442695, %v2386_v14 }
 0xd22   :  { %v2351_v57 = vor.u32 1.1754944e-38, %v2350_v32  ;;  %vm2349_vm11 = vcmp.eq.f32.partialorder %v2348_v63, 8.507059e+37 }
 0xd23   :  { %2780 = vmatmul.msk.f32.gmra.mxu1 %vm1143_vm13, %v2406_v46  ;;  %2974 = vpow2.f32 %v2391_v61 }
 0xd26   :  { %v2973_v55 = vpop.eup %2972 }
 0xd27   :  { %v2340_v17 = vmul.f32 %v2973_v55, %v2308_v38  ;;  %vm2345_vm15 = vweird.f32 %v2973_v55 }
 0xd28   :  { %vm2346_vm10 = vmor %vm2344_vm9, %vm2345_vm15  ;;  %vm1332_vm15 = vcmask 7168   ;;  %vm1336_vm9 = vcmask 0  }
 0xd29   :  { %v2341_v28 = vsub.f32 1.0, %v2340_v17  ;;  %v2975_v54 = vpop.eup %2974 }
 0xd2b   :  { %v2342_v21 = vmul.f32 %v2973_v55, %v2341_v28 }
 0xd2d   :  { %v2343_v16 = vadd.f32 %v2973_v55, %v2342_v21 }
 0xd2f   :  { %v2347_v23 = vsel %vm2346_vm10, %v2973_v55, %v2343_v16 }
 0xd30   :  { %v2352_v45 = vsel %vm2349_vm11, %v2351_v57, %v2347_v23 }
 0xd31   :  { %v2356_v60 = vmul.f32 1.0614054, %v2352_v45 }
 0xd33   :  { %v2359_v43 = vadd.f32 -1.4531521, %v2356_v60 }
 0xd35   :  { %v2362_v31 = vmul.f32 %v2359_v43, %v2352_v45 }
 0xd37   :  { %v2365_v25 = vadd.f32 1.4214138, %v2362_v31 }
 0xd39   :  { %v2368_v35 = vmul.f32 %v2365_v25, %v2352_v45 }
 0xd3b   :  { %v2371_v0 = vadd.f32 -0.28449672, %v2368_v35 }
 0xd3d   :  { %v2374_v37 = vmul.f32 %v2371_v0, %v2352_v45 }
 0xd3f   :  { %v2377_v19 = vadd.f32 0.2548296, %v2374_v37 }
 0xd41   :  { %v2380_v33 = vmul.f32 %v2377_v19, %v2352_v45 }
 0xd43   :  { %v2395_v40 = vmul.f32 %v2975_v54, %v2380_v33 }
 0xd45   :  { %v2398_v56 = vsub.f32 1.0, %v2395_v40 }
 0xd47   :  { %v2401_v58 = vmul.f32 %v2398_v56, %v2299_v49 }
 0xd49   :  { %v2404_v48 = vadd.f32 1.0, %v2401_v58 }
 0xd4b   :  { %v2407_v2 = vmul.f32 %v2404_v48, %v2290_v59  ;;  %v2990_v48 = vld [vmem:[%s4331_s13] ss:$0 sm:$0xff] }
 0xd4d   :  { %2781 = vmatmul.msk.f32.gmra.mxu1 %vm1143_vm13, %v2407_v2 }
 0xd98   :  { %v2446_v8 = vpop.f32.mrf.mxu1 }
 0xd99   :  { %v2455_v20 = vadd.f32 %v2446_v8, %v4091_v27  ;;  %v4231_v27 = vld [vmem:[%s4334_s16] ss:$0 sm:$0xff] }
 0xd9a   :  { %v1300_v38 = vadd.f32 %v4231_v27, %v4078_v51  ;;  %v1303_v17 = vadd.f32 %v4231_v27, %v4080_v13  ;;  %v1307_v51 = vld [vmem:[%s4335_s17 + $0x10] sm:$0x1]  ;;  %v2991_v8 = vld [vmem:[%s4332_s14] ss:$0 sm:$0xff] }
 0xd9b   :  { %v2462_v9 = vadd.f32 %v2847_v30, %v2455_v20 }
 0xd9c   :  { %v1310_v32 = vsub.f32 %v1303_v17, %v1307_v51  ;;  %v2786_v17 = vld [vmem:[%s4335_s17 + $0x20] sm:$0xff] }
 0xd9d   :  { %v2465_v10 = vsel %vm77_vm0, %v2462_v9, 0.0 }
 0xd9e   :  { %2466 = vadd.xlane.f32.xlu0 %v2465_v10  ;;  %v1313_v63 = vmul.f32 %v1310_v32, %v1310_v32  ;;  %v1327_v32 = vld [vmem:[%s4336_s18 + $0x8] sm:$0xff] }
 0xda0   :  { %v2449_v44 = vpop.f32.mrf.mxu1  ;;  %v1320_v16 = vsel %vm84_vm1, %v1313_v63, 0.0 }
 0xda1   :  { %v2456_v3 = vadd.f32 %v2449_v44, %v4098_v29  ;;  %v1297_v29 = vadd.f32 %v4231_v27, %v4076_v11  ;;  %v1306_v11 = vld [vmem:[%s4335_s17 + $0x8] sm:$0xff] }
 0xda2   :  { %v1309_v46 = vsub.f32 %v1300_v38, %v1306_v11 }
 0xda3   :  { %v2463_v1 = vadd.f32 %v2847_v30, %v2456_v3 }
 0xda4   :  { %v1312_v28 = vmul.f32 %v1309_v46, %v1309_v46 }
 0xda5   :  { %v2468_v50 = vsel %vm77_vm0, %v2463_v1, 0.0 }
 0xda6   :  { %2469 = vadd.xlane.f32.xlu1 %v2468_v50  ;;  %v1317_v21 = vsel %vm77_vm0, %v1312_v28, 0.0 }
 0xdca   :  { %v2452_v4 = vpop.f32.mrf.mxu1 }
 0xdcb   :  { %v2457_v15 = vadd.f32 %v2452_v4, %v4105_v39  ;;  %v1305_v39 = vld [vmem:[%s4335_s17] sm:$0xff] }
 0xdcc   :  { %v1308_v36 = vsub.f32 %v1297_v29, %v1305_v39 }
 0xdcd   :  { %v2464_v18 = vadd.f32 %v2847_v30, %v2457_v15 }
 0xdce   :  { %v1311_v22 = vmul.f32 %v1308_v36, %v1308_v36 }
 0xdcf   :  { %v2471_v6 = vsel %vm84_vm1, %v2464_v18, 0.0 }
 0xdd0   :  { %2472 = vadd.xlane.f32.xlu0 %v2471_v6  ;;  %v1314_v41 = vsel %vm77_vm0, %v1311_v22, 0.0 }
 0xe11   :  { %v2467_v5 = vpop.xlane.xlu0 %2466 }
 0xe12   :  { %v2474_v34 = vmul.f32 %v2467_v5, %v3140_v12 }
 0xe14   :  { %v2477_v52 = vsub.f32 %v2462_v9, %v2474_v34 }
 0xe16   :  { %v2480_v42 = vmul.f32 %v2477_v52, %v2477_v52 }
 0xe18   :  { %v2483_v24 = vsel %vm77_vm0, %v2480_v42, 0.0 }
 0xe19   :  { %2484 = vadd.xlane.f32.xlu1 %v2483_v24  ;;  %v2470_v62 = vpop.xlane.xlu1 %2469 }
 0xe1a   :  { %v2475_v47 = vmul.f32 %v2470_v62, %v3140_v12 }
 0xe1c   :  { %v2478_v53 = vsub.f32 %v2463_v1, %v2475_v47 }
 0xe1e   :  { %v2481_v7 = vmul.f32 %v2478_v53, %v2478_v53 }
 0xe20   :  { %v2486_v55 = vsel %vm77_vm0, %v2481_v7, 0.0 }
 0xe21   :  { %1315 = vadd.xlane.f32.xlu1 %v1314_v41  ;;  %2487 = vadd.xlane.f32.xlu0 %v2486_v55 }
 0xe29   :  { %1318 = vadd.xlane.f32.xlu0 %v1317_v21 }
 0xe31   :  { %1321 = vadd.xlane.f32.xlu0 %v1320_v16 }
 0xe43   :  { %v2473_v57 = vpop.xlane.xlu0 %2472 }
 0xe44   :  { %v2476_v23 = vmul.f32 %v2473_v57, %v3140_v12  ;;  %v1326_v57 = vld [vmem:[%s4336_s18] sm:$0xff] }
 0xe46   :  { %v2479_v26 = vsub.f32 %v2464_v18, %v2476_v23  ;;  %v1328_v23 = vld [vmem:[%s4336_s18 + $0x10] sm:$0x1] }
 0xe48   :  { %v2482_v45 = vmul.f32 %v2479_v26, %v2479_v26 }
 0xe4a   :  { %v2489_v13 = vsel %vm84_vm1, %v2482_v45, 0.0 }
 0xe4b   :  { %2490 = vadd.xlane.f32.xlu2 %v2489_v13 }
 0xe8c   :  { %v2485_v60 = vpop.xlane.xlu1 %2484 }
 0xe8d   :  { %v2492_v43 = vmul.f32 %v2485_v60, %v3140_v12 }
 0xe8f   :  { %v2495_v14 = vadd.f32 1e-12, %v2492_v43 }
 0xe91   :  { %2976 = vrsqrt.f32 %v2495_v14  ;;  %vm2504_vm4 = vweird.f32 %v2495_v14 }
 0xe94   :  { %v2488_v31 = vpop.xlane.xlu0 %2487  ;;  %v1316_v41 = vpop.xlane.xlu1 %1315 }
 0xe95   :  { %v2493_v61 = vmul.f32 %v2488_v31, %v3140_v12  ;;  %v1323_v21 = vmul.f32 0.020833334, %v1316_v41 }
 0xe97   :  { %v2977_v25 = vpop.eup %2976  ;;  %v2496_v0 = vadd.f32 1e-12, %v2493_v61  ;;  %v1329_v13 = vmul.f32 %v1326_v57, %v1323_v21 }
 0xe98   :  { %v2499_v35 = vmul.f32 %v2977_v25, %v2495_v14  ;;  %vm2505_vm13 = vweird.f32 %v2977_v25 }
 0xe99   :  { %2978 = vrsqrt.f32 %v2496_v0  ;;  %vm2506_vm5 = vmor %vm2504_vm4, %vm2505_vm13  ;;  %vm2514_vm14 = vweird.f32 %v2496_v0  ;;  %v1333_v31 = vsel %vm1332_vm15, %v1329_v13, 0.0 }
 0xe9a   :  { %v2500_v37 = vmul.f32 %v2977_v25, %v2499_v35 }
 0xe9c   :  { %v2501_v19 = vmul.f32 0.5, %v2500_v37  ;;  %v1319_v47 = vpop.xlane.xlu0 %1318  ;;  %v2787_v37 = vld [vmem:[%s4335_s17 + $0x28] sm:$0x1] }
 0xe9d   :  { %v1324_v28 = vmul.f32 0.020833334, %v1319_v47 }
 0xe9e   :  { %v2502_v33 = vsub.f32 1.5, %v2501_v19 }
 0xe9f   :  { %v2979_v40 = vpop.eup %2978 }
 0xea0   :  { %v2503_v54 = vmul.f32 %v2977_v25, %v2502_v33  ;;  %v2509_v49 = vmul.f32 %v2979_v40, %v2496_v0  ;;  %vm2515_vm12 = vweird.f32 %v2979_v40 }
 0xea1   :  { %vm2516_vm6 = vmor %vm2514_vm14, %vm2515_vm12 }
 0xea2   :  { %v2507_v56 = vsel %vm2506_vm5, %v2977_v25, %v2503_v54  ;;  %v2510_v59 = vmul.f32 %v2979_v40, %v2509_v49 }
 0xea3   :  { %v2528_v58 = vmul.f32 %v2507_v56, %v2477_v52 }
 0xea4   :  { %v2511_v30 = vmul.f32 0.5, %v2510_v59  ;;  %v1322_v46 = vpop.xlane.xlu0 %1321  ;;  %v2789_v59 = vld [vmem:[%s4336_s18 + $0x20] sm:$0xff] }
 0xea5   :  { %v2531_v2 = vmul.f32 %v2990_v48, %v2528_v58  ;;  %v1325_v63 = vmul.f32 0.020833334, %v1322_v46  ;;  %v2788_v58 = vld [vmem:[%s4336_s18 + $0x18] sm:$0xff] }
 0xea6   :  { %v2512_v9 = vsub.f32 1.5, %v2511_v30  ;;  %v1350_v30 = vsel %vm1332_vm15, %v1327_v32, 0.0 }
 0xea7   :  { %v2534_v20 = vadd.f32 %v2991_v8, %v2531_v2  ;;  %v1331_v60 = vmul.f32 %v1328_v23, %v1325_v63  ;;  %v1349_v2 = vsel %vm1332_vm15, %v1326_v57, 0.0 }
 0xea8   :  { %v2513_v10 = vmul.f32 %v2979_v40, %v2512_v9 }
 0xea9   :  { %2782 = vmatmul.msk.f32.vlgmr.msra.gmra.mxu2 %vm77_vm0, %v2534_v20  ;;  %v1337_v25 = vsel %vm1336_vm9, %v1331_v60, 0.0  ;;  %v2617_v20 = vsel %vm1332_vm15, %v2789_v59, 0.0 }
 0xeaa   :  { %v2517_v44 = vsel %vm2516_vm6, %v2979_v40, %v2513_v10  ;;  %v1351_v10 = vadd.f32 %v1350_v30, %v1349_v2 }
 0xeab   :  { %v2529_v3 = vmul.f32 %v2517_v44, %v2478_v53  ;;  %v1352_v44 = vsel %vm1336_vm9, %v1328_v23, 0.0 }
 0xead   :  { %v2532_v1 = vmul.f32 %v2990_v48, %v2529_v3 }
 0xeaf   :  { %v2535_v50 = vadd.f32 %v2991_v8, %v2532_v1 }
 0xeb1   :  { %2783 = vmatmul.msk.f32.gmra.mxu2 %vm77_vm0, %v2535_v50 }
 0xebe   :  { %v2491_v4 = vpop.xlane.xlu2 %2490 }
 0xebf   :  { %v2494_v15 = vmul.f32 %v2491_v4, %v3140_v12  ;;  %v2785_v12 = vld [vmem:[%s4335_s17 + $0x18] sm:$0xff]  ;;  %v1353_v4 = vadd.f32 %v1352_v44, %v1351_v10 }
 0xec1   :  { %v2497_v18 = vadd.f32 1e-12, %v2494_v15  ;;  %1354 = vadd.xlane.f32.xlu0 %v1353_v4 }
 0xec3   :  { %2980 = vrsqrt.f32 %v2497_v18  ;;  %vm2524_vm2 = vweird.f32 %v2497_v18 }
 0xec9   :  { %v2981_v6 = vpop.eup %2980 }
 0xeca   :  { %v2519_v5 = vmul.f32 %v2981_v6, %v2497_v18  ;;  %vm2525_vm7 = vweird.f32 %v2981_v6 }
 0xecb   :  { %vm2526_vm8 = vmor %vm2524_vm2, %vm2525_vm7 }
 0xecc   :  { %v2520_v34 = vmul.f32 %v2981_v6, %v2519_v5 }
 0xece   :  { %v2521_v29 = vmul.f32 0.5, %v2520_v34 }
 0xed0   :  { %v2522_v52 = vsub.f32 1.5, %v2521_v29 }
 0xed2   :  { %v2523_v39 = vmul.f32 %v2981_v6, %v2522_v52 }
 0xed4   :  { %v2527_v42 = vsel %vm2526_vm8, %v2981_v6, %v2523_v39 }
 0xed5   :  { %v2530_v36 = vmul.f32 %v2527_v42, %v2479_v26  ;;  %v1330_v26 = vmul.f32 %v1327_v32, %v1324_v28 }
 0xed7   :  { %v2533_v24 = vmul.f32 %v2990_v48, %v2530_v36  ;;  %v1334_v14 = vsel %vm1332_vm15, %v1330_v26, 0.0 }
 0xed8   :  { %v1335_v61 = vadd.f32 %v1334_v14, %v1333_v31 }
 0xed9   :  { %v2536_v62 = vadd.f32 %v2991_v8, %v2533_v24  ;;  %v2616_v8 = vsel %vm1332_vm15, %v2788_v58, 0.0 }
 0xeda   :  { %v1338_v35 = vadd.f32 %v1337_v25, %v1335_v61  ;;  %v2618_v3 = vadd.f32 %v2617_v20, %v2616_v8 }
 0xedb   :  { %2784 = vmatmul.msk.f32.gmra.mxu2 %vm77_vm0, %v2536_v62 }
 0xf2c   :  { %v2563_v22 = vpop.f32.mrf.mxu2 }
 0xf2d   :  { %v2564_v38 = vadd.f32 %v4231_v27, %v2563_v22 }
 0xf2f   :  { %v2576_v53 = vsub.f32 %v2564_v38, %v2785_v12 }
 0xf31   :  { %v2579_v11 = vmul.f32 %v2576_v53, %v2576_v53 }
 0xf33   :  { %v2582_v7 = vsel %vm77_vm0, %v2579_v11, 0.0 }
 0xf34   :  { %2583 = vadd.xlane.f32.xlu2 %v2582_v7  ;;  %v2566_v55 = vpop.f32.mrf.mxu2  ;;  %v1355_v11 = vpop.xlane.xlu0 %1354 }
 0xf35   :  { %v2567_v51 = vadd.f32 %v4231_v27, %v2566_v55  ;;  %v1356_v7 = vrot.slane %v1355_v11, 4 }
 0xf37   :  { %v2577_v16 = vsub.f32 %v2567_v51, %v2786_v17  ;;  %v1357_v41 = vadd.f32 %v1356_v7, %v1355_v11 }
 0xf39   :  { %v2580_v45 = vmul.f32 %v2577_v16, %v2577_v16  ;;  %v1358_v46 = vrot.slane %v1357_v41, 2 }
 0xf3b   :  { %v2585_v43 = vsel %vm77_vm0, %v2580_v45, 0.0  ;;  %v1359_v55 = vadd.f32 %v1358_v46, %v1357_v41 }
 0xf3c   :  { %2586 = vadd.xlane.f32.xlu1 %v2585_v43 }
 0xf3d   :  { %v1360_v17 = vrot.slane %v1359_v55, 1 }
 0xf3f   :  { %v1361_v28 = vadd.f32 %v1360_v17, %v1359_v55 }
 0xf44   :  { %1339 = vadd.xlane.f32.xlu1 %v1338_v35 }
 0xf5e   :  { %v2569_v0 = vpop.f32.mrf.mxu2 }
 0xf5f   :  { %v2570_v19 = vadd.f32 %v4231_v27, %v2569_v0  ;;  %v2790_v27 = vld [vmem:[%s4336_s18 + $0x28] sm:$0x1] }
 0xf60   :  { %v2619_v1 = vsel %vm1336_vm9, %v2790_v27, 0.0 }
 0xf61   :  { %v2578_v33 = vsub.f32 %v2570_v19, %v2787_v37  ;;  %v2620_v15 = vadd.f32 %v2619_v1, %v2618_v3 }
 0xf63   :  { %v2581_v54 = vmul.f32 %v2578_v33, %v2578_v33  ;;  %2621 = vadd.xlane.f32.xlu1 %v2620_v15 }
 0xf65   :  { %v2588_v40 = vsel %vm84_vm1, %v2581_v54, 0.0 }
 0xf66   :  { %2589 = vadd.xlane.f32.xlu2 %v2588_v40 }
 0xfa7   :  { %v2584_v34 = vpop.xlane.xlu2 %2583 }
 0xfa8   :  { %v2591_v52 = vmul.f32 0.020833334, %v2584_v34 }
 0xfaa   :  { %v2598_v42 = vmul.f32 %v2788_v58, %v2591_v52 }
 0xfac   :  { %v2601_v22 = vsel %vm1332_vm15, %v2598_v42, 0.0 }
 0xfaf   :  { %v2587_v56 = vpop.xlane.xlu1 %2586 }
 0xfb0   :  { %v2592_v29 = vmul.f32 0.020833334, %v2587_v56 }
 0xfb2   :  { %v2599_v39 = vmul.f32 %v2789_v59, %v2592_v29 }
 0xfb4   :  { %v2602_v62 = vsel %vm1332_vm15, %v2599_v39, 0.0 }
 0xfb5   :  { %v2603_v12 = vadd.f32 %v2602_v62, %v2601_v22 }
 0xfb7   :  { %v1340_v49 = vpop.xlane.xlu1 %1339 }
 0xfb8   :  { %v1341_v48 = vrot.slane %v1340_v49, 4 }
 0xfba   :  { %v1342_v9 = vadd.f32 %v1341_v48, %v1340_v49 }
 0xfbc   :  { %v1343_v50 = vrot.slane %v1342_v9, 2 }
 0xfbe   :  { %v1344_v18 = vadd.f32 %v1343_v50, %v1342_v9 }
 0xfc0   :  { %v1345_v6 = vrot.slane %v1344_v18, 1 }
 0xfc2   :  { %v1346_v5 = vadd.f32 %v1345_v6, %v1344_v18 }
 0xfc4   :  { %2791 = vpush %v1346_v5 }
 0xfc5   :  { %2793 = vpush %v1361_v28 }
 0xfd6   :  { %v2622_v51 = vpop.xlane.xlu1 %2621 }
 0xfd7   :  { %v2623_v32 = vrot.slane %v2622_v51, 4 }
 0xfd9   :  { %v2590_v36 = vpop.xlane.xlu2 %2589  ;;  %v2624_v21 = vadd.f32 %v2623_v32, %v2622_v51 }
 0xfda   :  { %v2593_v24 = vmul.f32 0.020833334, %v2590_v36 }
 0xfdb   :  { %v2625_v16 = vrot.slane %v2624_v21, 2 }
 0xfdc   :  { %v2600_v47 = vmul.f32 %v2790_v27, %v2593_v24 }
 0xfdd   :  { %v2626_v26 = vadd.f32 %v2625_v16, %v2624_v21 }
 0xfde   :  { %v2604_v38 = vsel %vm1336_vm9, %v2600_v47, 0.0 }
 0xfdf   :  { %v2605_v53 = vadd.f32 %v2604_v38, %v2603_v12  ;;  %v2627_v60 = vrot.slane %v2626_v26, 1 }
 0xfe1   :  { %2606 = vadd.xlane.f32.xlu2 %v2605_v53  ;;  %v2628_v31 = vadd.f32 %v2627_v60, %v2626_v26 }
 0xff5   :  { %s2792_s18 = spop %2791 }
 0xff6   :  { %s2794_s6 = spop %2793 }
0x1054   :  { %v2607_v63 = vpop.xlane.xlu2 %2606 }
0x1055   :  { %v2608_v57 = vrot.slane %v2607_v63, 4 }
0x1057   :  { %v2609_v23 = vadd.f32 %v2608_v57, %v2607_v63 }
0x1059   :  { %v2610_v45 = vrot.slane %v2609_v23, 2 }
0x105b   :  { %v2611_v13 = vadd.f32 %v2610_v45, %v2609_v23 }
0x105d   :  { %v2612_v43 = vrot.slane %v2611_v13, 1 }
0x105f   :  { %v2613_v14 = vadd.f32 %v2612_v43, %v2611_v13 }
0x1061   :  { %2795 = vpush %v2613_v14 }
0x1062   :  { %2797 = vpush %v2628_v31 }
0x1092   :  { %s2796_s0 = spop %2795 }
0x1093   :  { %s2615_s10 = sadd.f32 %s2796_s0, %s2792_s18  ;;  %s2798_s16 = spop %2797 }
0x1094   :  { %s2630_s20 = sadd.f32 %s2798_s16, %s2794_s6 }
0x1096   :  { %v2631_v25 = vstv %s2630_s20 }
0x1097   :  { %2982 = vrcp.f32 %v2631_v25  ;;  %v2643_v37 = vand.u32 2147483648, %v2631_v25  ;;  %v2641_v33 = vand.u32 2147483647, %v2631_v25  ;;  %vm2637_vm1 = vweird.f32 %v2631_v25 }
0x1099   :  { %v2644_v40 = vor.u32 1.1754944e-38, %v2643_v37  ;;  %vm2642_vm11 = vcmp.eq.f32.partialorder %v2641_v33, 8.507059e+37 }
0x109d   :  { %v2983_v61 = vpop.eup %2982 }
0x109e   :  { %v2633_v35 = vmul.f32 %v2983_v61, %v2631_v25  ;;  %vm2638_vm0 = vweird.f32 %v2983_v61 }
0x109f   :  { %vm2639_vm10 = vmor %vm2637_vm1, %vm2638_vm0 }
0x10a0   :  { %v2634_v0 = vsub.f32 1.0, %v2633_v35 }
0x10a2   :  { %v2635_v19 = vmul.f32 %v2983_v61, %v2634_v0 }
0x10a4   :  { %v2636_v54 = vadd.f32 %v2983_v61, %v2635_v19 }
0x10a6   :  { %v2640_v56 = vsel %vm2639_vm10, %v2983_v61, %v2636_v54 }
0x10a7   :  { %v2645_v49 = vsel %vm2642_vm11, %v2644_v40, %v2640_v56 }
0x10a8   :  { %2799 = vpush %v2645_v49 }
0x10d9   :  { %s2800_s3 = spop %2799 }
0x10da   :  { %s2647_s13 = smul.f32 %s2800_s3, %s2615_s10 }
0x10dc   :  { %v2648_v58 = vstv %s2647_s13 }
0x10dd   :  { %2649 = vst.msk [vmem:[#allocation3] sm:$0x1] %vm1336_vm9, %v2648_v58 }
0x10de   :  { %2660 = dma.vmem_to_hbm [thread:$0]  %s2656_s30, 16, %s2658_s29, [#allocation4]  }
0x10df   :  { %3016 = dma.done.wait [#allocation4], 16  }
0x10e0   :  { %3017 = vsyncadd [#allocation4], 4294967280 }
0x10e1   :  { %2665 = vsyncpa [#allocation4], 1 }

</bundles_post_ra>
